<compile_context>
chip_gen: v5e
topology: v5e:2x2
jax: 0.10.0
libtpu: 0.0.40
codegen_flags: <defaults>
</compile_context>

<pallas_src>
import math

import jax
import jax.numpy as jnp
from jax.experimental import pallas as pl
from jax.experimental.pallas import tpu as pltpu

EMBED = 32          # Config.embed_size
HEADS = 4
HEAD_DIM = EMBED // HEADS
FF_DIM = 64
LN_EPS = 1e-5
NEG_INF = -1e30

# Fixed ordering of the stacked per-layer weight tensors passed to the kernel.
ENC_NAMES = ("qkv_w", "qkv_b", "o_w", "o_b", "ln1_g", "ln1_b",
             "w1", "b1", "w2", "b2", "ln2_g", "ln2_b")
DEC_NAMES = ("qkv_w", "qkv_b", "o_w", "o_b", "ln1_g", "ln1_b",
             "cq_w", "cq_b", "ckv_w", "ckv_b", "co_w", "co_b",
             "ln2_g", "ln2_b",
             "w1", "b1", "w2", "b2", "ln3_g", "ln3_b")


# --------------------------- in-kernel helpers ------------------------------
# These operate on loaded jnp values inside the single fused kernel.

def _layernorm(x, g, b):
    mean = jnp.mean(x, axis=-1, keepdims=True)
    xc = x - mean
    var = jnp.mean(xc * xc, axis=-1, keepdims=True)
    return xc * jax.lax.rsqrt(var + LN_EPS) * g + b


def _dense(x, w, b, relu=False):
    # x: f32 activations (M, K); w: bf16 weights (K, N); b: f32 bias (1, N).
    y = jnp.dot(x.astype(jnp.bfloat16), w,
                preferred_element_type=jnp.float32) + b
    if relu:
        y = jnp.maximum(y, 0.0)
    return y


def _mha(q, k, v, causal):
    # q: (B, Sq, E); k, v: (B, Skv, E); heads concatenated on the last dim.
    _, Sq, _ = q.shape
    Skv = k.shape[1]
    scale = 1.0 / math.sqrt(HEAD_DIM)
    if causal:
        row = jax.lax.broadcasted_iota(jnp.int32, (Sq, Skv), 0)
        col = jax.lax.broadcasted_iota(jnp.int32, (Sq, Skv), 1)
        mask = (col <= row)[None]                       # (1, Sq, Skv)
    outs = []
    for h in range(HEADS):                              # static unroll, H=4
        sl = slice(h * HEAD_DIM, (h + 1) * HEAD_DIM)
        qh = (q[:, :, sl] * scale).astype(jnp.bfloat16)
        kh = k[:, :, sl].astype(jnp.bfloat16)
        vh = v[:, :, sl].astype(jnp.bfloat16)
        s = jnp.einsum("bqd,bkd->bqk", qh, kh,
                       preferred_element_type=jnp.float32)
        if causal:
            s = jnp.where(mask, s, NEG_INF)
        m = jnp.max(s, axis=-1, keepdims=True)
        p = jnp.exp(s - m)
        p = p / jnp.sum(p, axis=-1, keepdims=True)
        outs.append(jnp.einsum("bqk,bkd->bqd", p.astype(jnp.bfloat16), vh,
                               preferred_element_type=jnp.float32))
    return jnp.concatenate(outs, axis=-1)               # (B, Sq, E)


def _encoder_layer(x, w):
    B, S, E = x.shape
    x2d = x.reshape(B * S, E)
    qkv = _dense(x2d, w["qkv_w"], w["qkv_b"]).reshape(B, S, 3 * E)
    attn = _mha(qkv[:, :, :E], qkv[:, :, E:2 * E], qkv[:, :, 2 * E:],
                causal=False)
    attn2d = _dense(attn.reshape(B * S, E), w["o_w"], w["o_b"])
    x2d = _layernorm(x2d + attn2d, w["ln1_g"], w["ln1_b"])
    h = _dense(x2d, w["w1"], w["b1"], relu=True)
    h = _dense(h, w["w2"], w["b2"])
    x2d = _layernorm(x2d + h, w["ln2_g"], w["ln2_b"])
    return x2d.reshape(B, S, E)


def _decoder_layer(x, enc_out, w):
    B, S, E = x.shape
    Skv = enc_out.shape[1]
    x2d = x.reshape(B * S, E)
    # causal self-attention
    qkv = _dense(x2d, w["qkv_w"], w["qkv_b"]).reshape(B, S, 3 * E)
    attn = _mha(qkv[:, :, :E], qkv[:, :, E:2 * E], qkv[:, :, 2 * E:],
                causal=True)
    attn2d = _dense(attn.reshape(B * S, E), w["o_w"], w["o_b"])
    x2d = _layernorm(x2d + attn2d, w["ln1_g"], w["ln1_b"])
    # cross-attention against encoder output
    q = _dense(x2d, w["cq_w"], w["cq_b"]).reshape(B, S, E)
    kv = _dense(enc_out.reshape(B * Skv, E),
                w["ckv_w"], w["ckv_b"]).reshape(B, Skv, 2 * E)
    cross = _mha(q, kv[:, :, :E], kv[:, :, E:], causal=False)
    cross2d = _dense(cross.reshape(B * S, E), w["co_w"], w["co_b"])
    x2d = _layernorm(x2d + cross2d, w["ln2_g"], w["ln2_b"])
    # feed-forward
    h = _dense(x2d, w["w1"], w["b1"], relu=True)
    h = _dense(h, w["w2"], w["b2"])
    x2d = _layernorm(x2d + h, w["ln3_g"], w["ln3_b"])
    return x2d.reshape(B, S, E)


# ------------------------------ fused kernel --------------------------------

def _fused_forward_kernel(*refs):
    x_enc_ref, x_dec_ref = refs[0], refs[1]
    i = 2
    enc_refs = dict(zip(ENC_NAMES, refs[i:i + len(ENC_NAMES)]))
    i += len(ENC_NAMES)
    dec_refs = dict(zip(DEC_NAMES, refs[i:i + len(DEC_NAMES)]))
    i += len(DEC_NAMES)
    head_w_ref, head_b_ref = refs[i], refs[i + 1]
    out_ref = refs[i + 2]

    x_enc = x_enc_ref[...]                               # (B, S, E) f32
    x_dec = x_dec_ref[...]
    n_layers = enc_refs["qkv_w"].shape[0]

    # Static unroll over layers; all weights already resident in VMEM.
    for l in range(n_layers):
        enc_w = {name: r[l] for name, r in enc_refs.items()}
        dec_w = {name: r[l] for name, r in dec_refs.items()}
        enc_out = _encoder_layer(x_enc, enc_w)
        dec_out = _decoder_layer(x_dec, enc_out, dec_w)
        x_enc, x_dec = enc_out, dec_out

    # Output head: 2-D GEMM, then reshape for the axis-0 softmax.
    B, S, E = x_dec.shape
    out_dim = head_w_ref.shape[1]
    logits = _dense(x_dec.reshape(B * S, E), head_w_ref[...], head_b_ref[...])
    logits = logits.reshape(B, S, out_dim)
    # nn.Softmax() with no dim: PyTorch legacy implicit dim is 0 for 3-D input.
    m = jnp.max(logits, axis=0, keepdims=True)
    e = jnp.exp(logits - m)
    out_ref[...] = (e / jnp.sum(e, axis=0, keepdims=True)).astype(out_ref.dtype)


def transformer_forward(params, x_input_ids, x_output_ids):
    # NB: reference forward uses embedding_decoder for BOTH streams.
    emb = params["embedding_decoder"]
    x_enc = jnp.take(emb, x_input_ids, axis=0)           # (B, S, E) f32
    x_dec = jnp.take(emb, x_output_ids, axis=0)

    enc_args = [params["enc"][n] for n in ENC_NAMES]
    dec_args = [params["dec"][n] for n in DEC_NAMES]

    B, s_dec, _ = x_dec.shape
    out_dim = params["out_w"].shape[1]
    return pl.pallas_call(
        _fused_forward_kernel,
        out_shape=jax.ShapeDtypeStruct((B, s_dec, out_dim), jnp.float32),
        compiler_params=pltpu.CompilerParams(
            vmem_limit_bytes=32 * 1024 * 1024),
    )(x_enc, x_dec, *enc_args, *dec_args, params["out_w"], params["out_b"])


# ------------------------------ parameter init ------------------------------

def init_params(key, n_layers, vocab_size, output_dim):
    keys = iter(jax.random.split(key, 64))
    L, E = n_layers, EMBED

    def wmat(shape):          # bf16 weight matrices (MXU-native operands)
        return (0.02 * jax.random.normal(next(keys), shape,
                                         jnp.float32)).astype(jnp.bfloat16)

    def bias(n):
        return jnp.zeros((L, 1, n), jnp.float32)

    def ones(n):
        return jnp.ones((L, 1, n), jnp.float32)

    enc = {
        "qkv_w": wmat((L, E, 3 * E)), "qkv_b": bias(3 * E),
        "o_w": wmat((L, E, E)), "o_b": bias(E),
        "ln1_g": ones(E), "ln1_b": bias(E),
        "w1": wmat((L, E, FF_DIM)), "b1": bias(FF_DIM),
        "w2": wmat((L, FF_DIM, E)), "b2": bias(E),
        "ln2_g": ones(E), "ln2_b": bias(E),
    }
    dec = {
        "qkv_w": wmat((L, E, 3 * E)), "qkv_b": bias(3 * E),
        "o_w": wmat((L, E, E)), "o_b": bias(E),
        "ln1_g": ones(E), "ln1_b": bias(E),
        "cq_w": wmat((L, E, E)), "cq_b": bias(E),
        "ckv_w": wmat((L, E, 2 * E)), "ckv_b": bias(2 * E),
        "co_w": wmat((L, E, E)), "co_b": bias(E),
        "ln2_g": ones(E), "ln2_b": bias(E),
        "w1": wmat((L, E, FF_DIM)), "b1": bias(FF_DIM),
        "w2": wmat((L, FF_DIM, E)), "b2": bias(E),
        "ln3_g": ones(E), "ln3_b": bias(E),
    }
    return {
        # embedding_encoder exists in __init__ but is unused by forward().
        "embedding_encoder": 0.02 * jax.random.normal(
            next(keys), (vocab_size, E), jnp.float32),
        "embedding_decoder": 0.02 * jax.random.normal(
            next(keys), (vocab_size, E), jnp.float32),
        "enc": enc,
        "dec": dec,
        "out_w": wmat((E, output_dim)),
        "out_b": jnp.zeros((1, output_dim), jnp.float32),
    }


# ----------------------------------- main -----------------------------------

if __name__ == "__main__":
    N_LAYERS, VOCAB, OUT_DIM = 2, 50, 16
    B, S_ENC, S_DEC = 2, 8, 8

    root = jax.random.PRNGKey(0)
    k_params, k_in, k_out = jax.random.split(root, 3)
    params = init_params(k_params, N_LAYERS, VOCAB, OUT_DIM)

    x_input = jax.random.randint(k_in, (B, S_ENC), 0, VOCAB, dtype=jnp.int32)
    x_output = jax.random.randint(k_out, (B, S_DEC), 0, VOCAB, dtype=jnp.int32)

    fwd = jax.jit(transformer_forward)
    y = fwd(params, x_input, x_output)
    jax.block_until_ready(y)
    assert y.shape == (B, S_DEC, OUT_DIM)
    assert bool(jnp.all(jnp.isfinite(y)))
    print("KERNEL_OK")
</pallas_src>

<mosaic_0001>
module attributes {stable_mosaic.version = 11 : i64} {
  func.func @_fused_forward_kernel(%arg0: memref<2x8x32xf32, #tpu.memory_space<vmem>>, %arg1: memref<2x8x32xf32, #tpu.memory_space<vmem>>, %arg2: memref<2x32x96xbf16, #tpu.memory_space<vmem>>, %arg3: memref<2x1x96xf32, #tpu.memory_space<vmem>>, %arg4: memref<2x32x32xbf16, #tpu.memory_space<vmem>>, %arg5: memref<2x1x32xf32, #tpu.memory_space<vmem>>, %arg6: memref<2x1x32xf32, #tpu.memory_space<vmem>>, %arg7: memref<2x1x32xf32, #tpu.memory_space<vmem>>, %arg8: memref<2x32x64xbf16, #tpu.memory_space<vmem>>, %arg9: memref<2x1x64xf32, #tpu.memory_space<vmem>>, %arg10: memref<2x64x32xbf16, #tpu.memory_space<vmem>>, %arg11: memref<2x1x32xf32, #tpu.memory_space<vmem>>, %arg12: memref<2x1x32xf32, #tpu.memory_space<vmem>>, %arg13: memref<2x1x32xf32, #tpu.memory_space<vmem>>, %arg14: memref<2x32x96xbf16, #tpu.memory_space<vmem>>, %arg15: memref<2x1x96xf32, #tpu.memory_space<vmem>>, %arg16: memref<2x32x32xbf16, #tpu.memory_space<vmem>>, %arg17: memref<2x1x32xf32, #tpu.memory_space<vmem>>, %arg18: memref<2x1x32xf32, #tpu.memory_space<vmem>>, %arg19: memref<2x1x32xf32, #tpu.memory_space<vmem>>, %arg20: memref<2x32x32xbf16, #tpu.memory_space<vmem>>, %arg21: memref<2x1x32xf32, #tpu.memory_space<vmem>>, %arg22: memref<2x32x64xbf16, #tpu.memory_space<vmem>>, %arg23: memref<2x1x64xf32, #tpu.memory_space<vmem>>, %arg24: memref<2x32x32xbf16, #tpu.memory_space<vmem>>, %arg25: memref<2x1x32xf32, #tpu.memory_space<vmem>>, %arg26: memref<2x1x32xf32, #tpu.memory_space<vmem>>, %arg27: memref<2x1x32xf32, #tpu.memory_space<vmem>>, %arg28: memref<2x32x64xbf16, #tpu.memory_space<vmem>>, %arg29: memref<2x1x64xf32, #tpu.memory_space<vmem>>, %arg30: memref<2x64x32xbf16, #tpu.memory_space<vmem>>, %arg31: memref<2x1x32xf32, #tpu.memory_space<vmem>>, %arg32: memref<2x1x32xf32, #tpu.memory_space<vmem>>, %arg33: memref<2x1x32xf32, #tpu.memory_space<vmem>>, %arg34: memref<32x16xbf16, #tpu.memory_space<vmem>>, %arg35: memref<1x16xf32, #tpu.memory_space<vmem>>, %arg36: memref<2x8x16xf32, #tpu.memory_space<vmem>>) attributes {dimension_semantics = [], scalar_prefetch = 0 : i64, scratch_operands = 0 : i64, tpu.core_type = #tpu.core_type<tc>} {
    %c0 = arith.constant 0 : index
    %c0_0 = arith.constant 0 : index
    %c0_1 = arith.constant 0 : index
    %0 = vector.load %arg0[%c0, %c0_0, %c0_1] : memref<2x8x32xf32, #tpu.memory_space<vmem>>, vector<2x8x32xf32>
    %c0_2 = arith.constant 0 : index
    %c0_3 = arith.constant 0 : index
    %c0_4 = arith.constant 0 : index
    %1 = vector.load %arg1[%c0_2, %c0_3, %c0_4] : memref<2x8x32xf32, #tpu.memory_space<vmem>>, vector<2x8x32xf32>
    %c0_5 = arith.constant 0 : index
    %c0_6 = arith.constant 0 : index
    %c0_7 = arith.constant 0 : index
    %2 = vector.load %arg2[%c0_5, %c0_6, %c0_7] : memref<2x32x96xbf16, #tpu.memory_space<vmem>>, vector<1x32x96xbf16>
    %3 = vector.shape_cast %2 : vector<1x32x96xbf16> to vector<32x96xbf16>
    %c0_8 = arith.constant 0 : index
    %c0_9 = arith.constant 0 : index
    %c0_10 = arith.constant 0 : index
    %4 = vector.load %arg3[%c0_8, %c0_9, %c0_10] : memref<2x1x96xf32, #tpu.memory_space<vmem>>, vector<1x1x96xf32>
    %5 = vector.shape_cast %4 : vector<1x1x96xf32> to vector<1x96xf32>
    %c0_11 = arith.constant 0 : index
    %c0_12 = arith.constant 0 : index
    %c0_13 = arith.constant 0 : index
    %6 = vector.load %arg4[%c0_11, %c0_12, %c0_13] : memref<2x32x32xbf16, #tpu.memory_space<vmem>>, vector<1x32x32xbf16>
    %7 = vector.shape_cast %6 : vector<1x32x32xbf16> to vector<32x32xbf16>
    %c0_14 = arith.constant 0 : index
    %c0_15 = arith.constant 0 : index
    %c0_16 = arith.constant 0 : index
    %8 = vector.load %arg5[%c0_14, %c0_15, %c0_16] : memref<2x1x32xf32, #tpu.memory_space<vmem>>, vector<1x1x32xf32>
    %9 = vector.shape_cast %8 : vector<1x1x32xf32> to vector<1x32xf32>
    %c0_17 = arith.constant 0 : index
    %c0_18 = arith.constant 0 : index
    %c0_19 = arith.constant 0 : index
    %10 = vector.load %arg6[%c0_17, %c0_18, %c0_19] : memref<2x1x32xf32, #tpu.memory_space<vmem>>, vector<1x1x32xf32>
    %11 = vector.shape_cast %10 : vector<1x1x32xf32> to vector<1x32xf32>
    %c0_20 = arith.constant 0 : index
    %c0_21 = arith.constant 0 : index
    %c0_22 = arith.constant 0 : index
    %12 = vector.load %arg7[%c0_20, %c0_21, %c0_22] : memref<2x1x32xf32, #tpu.memory_space<vmem>>, vector<1x1x32xf32>
    %13 = vector.shape_cast %12 : vector<1x1x32xf32> to vector<1x32xf32>
    %c0_23 = arith.constant 0 : index
    %c0_24 = arith.constant 0 : index
    %c0_25 = arith.constant 0 : index
    %14 = vector.load %arg8[%c0_23, %c0_24, %c0_25] : memref<2x32x64xbf16, #tpu.memory_space<vmem>>, vector<1x32x64xbf16>
    %15 = vector.shape_cast %14 : vector<1x32x64xbf16> to vector<32x64xbf16>
    %c0_26 = arith.constant 0 : index
    %c0_27 = arith.constant 0 : index
    %c0_28 = arith.constant 0 : index
    %16 = vector.load %arg9[%c0_26, %c0_27, %c0_28] : memref<2x1x64xf32, #tpu.memory_space<vmem>>, vector<1x1x64xf32>
    %17 = vector.shape_cast %16 : vector<1x1x64xf32> to vector<1x64xf32>
    %c0_29 = arith.constant 0 : index
    %c0_30 = arith.constant 0 : index
    %c0_31 = arith.constant 0 : index
    %18 = vector.load %arg10[%c0_29, %c0_30, %c0_31] : memref<2x64x32xbf16, #tpu.memory_space<vmem>>, vector<1x64x32xbf16>
    %19 = vector.shape_cast %18 : vector<1x64x32xbf16> to vector<64x32xbf16>
    %c0_32 = arith.constant 0 : index
    %c0_33 = arith.constant 0 : index
    %c0_34 = arith.constant 0 : index
    %20 = vector.load %arg11[%c0_32, %c0_33, %c0_34] : memref<2x1x32xf32, #tpu.memory_space<vmem>>, vector<1x1x32xf32>
    %21 = vector.shape_cast %20 : vector<1x1x32xf32> to vector<1x32xf32>
    %c0_35 = arith.constant 0 : index
    %c0_36 = arith.constant 0 : index
    %c0_37 = arith.constant 0 : index
    %22 = vector.load %arg12[%c0_35, %c0_36, %c0_37] : memref<2x1x32xf32, #tpu.memory_space<vmem>>, vector<1x1x32xf32>
    %23 = vector.shape_cast %22 : vector<1x1x32xf32> to vector<1x32xf32>
    %c0_38 = arith.constant 0 : index
    %c0_39 = arith.constant 0 : index
    %c0_40 = arith.constant 0 : index
    %24 = vector.load %arg13[%c0_38, %c0_39, %c0_40] : memref<2x1x32xf32, #tpu.memory_space<vmem>>, vector<1x1x32xf32>
    %25 = vector.shape_cast %24 : vector<1x1x32xf32> to vector<1x32xf32>
    %c0_41 = arith.constant 0 : index
    %c0_42 = arith.constant 0 : index
    %c0_43 = arith.constant 0 : index
    %26 = vector.load %arg14[%c0_41, %c0_42, %c0_43] : memref<2x32x96xbf16, #tpu.memory_space<vmem>>, vector<1x32x96xbf16>
    %27 = vector.shape_cast %26 : vector<1x32x96xbf16> to vector<32x96xbf16>
    %c0_44 = arith.constant 0 : index
    %c0_45 = arith.constant 0 : index
    %c0_46 = arith.constant 0 : index
    %28 = vector.load %arg15[%c0_44, %c0_45, %c0_46] : memref<2x1x96xf32, #tpu.memory_space<vmem>>, vector<1x1x96xf32>
    %29 = vector.shape_cast %28 : vector<1x1x96xf32> to vector<1x96xf32>
    %c0_47 = arith.constant 0 : index
    %c0_48 = arith.constant 0 : index
    %c0_49 = arith.constant 0 : index
    %30 = vector.load %arg16[%c0_47, %c0_48, %c0_49] : memref<2x32x32xbf16, #tpu.memory_space<vmem>>, vector<1x32x32xbf16>
    %31 = vector.shape_cast %30 : vector<1x32x32xbf16> to vector<32x32xbf16>
    %c0_50 = arith.constant 0 : index
    %c0_51 = arith.constant 0 : index
    %c0_52 = arith.constant 0 : index
    %32 = vector.load %arg17[%c0_50, %c0_51, %c0_52] : memref<2x1x32xf32, #tpu.memory_space<vmem>>, vector<1x1x32xf32>
    %33 = vector.shape_cast %32 : vector<1x1x32xf32> to vector<1x32xf32>
    %c0_53 = arith.constant 0 : index
    %c0_54 = arith.constant 0 : index
    %c0_55 = arith.constant 0 : index
    %34 = vector.load %arg18[%c0_53, %c0_54, %c0_55] : memref<2x1x32xf32, #tpu.memory_space<vmem>>, vector<1x1x32xf32>
    %35 = vector.shape_cast %34 : vector<1x1x32xf32> to vector<1x32xf32>
    %c0_56 = arith.constant 0 : index
    %c0_57 = arith.constant 0 : index
    %c0_58 = arith.constant 0 : index
    %36 = vector.load %arg19[%c0_56, %c0_57, %c0_58] : memref<2x1x32xf32, #tpu.memory_space<vmem>>, vector<1x1x32xf32>
    %37 = vector.shape_cast %36 : vector<1x1x32xf32> to vector<1x32xf32>
    %c0_59 = arith.constant 0 : index
    %c0_60 = arith.constant 0 : index
    %c0_61 = arith.constant 0 : index
    %38 = vector.load %arg20[%c0_59, %c0_60, %c0_61] : memref<2x32x32xbf16, #tpu.memory_space<vmem>>, vector<1x32x32xbf16>
    %39 = vector.shape_cast %38 : vector<1x32x32xbf16> to vector<32x32xbf16>
    %c0_62 = arith.constant 0 : index
    %c0_63 = arith.constant 0 : index
    %c0_64 = arith.constant 0 : index
    %40 = vector.load %arg21[%c0_62, %c0_63, %c0_64] : memref<2x1x32xf32, #tpu.memory_space<vmem>>, vector<1x1x32xf32>
    %41 = vector.shape_cast %40 : vector<1x1x32xf32> to vector<1x32xf32>
    %c0_65 = arith.constant 0 : index
    %c0_66 = arith.constant 0 : index
    %c0_67 = arith.constant 0 : index
    %42 = vector.load %arg22[%c0_65, %c0_66, %c0_67] : memref<2x32x64xbf16, #tpu.memory_space<vmem>>, vector<1x32x64xbf16>
    %43 = vector.shape_cast %42 : vector<1x32x64xbf16> to vector<32x64xbf16>
    %c0_68 = arith.constant 0 : index
    %c0_69 = arith.constant 0 : index
    %c0_70 = arith.constant 0 : index
    %44 = vector.load %arg23[%c0_68, %c0_69, %c0_70] : memref<2x1x64xf32, #tpu.memory_space<vmem>>, vector<1x1x64xf32>
    %45 = vector.shape_cast %44 : vector<1x1x64xf32> to vector<1x64xf32>
    %c0_71 = arith.constant 0 : index
    %c0_72 = arith.constant 0 : index
    %c0_73 = arith.constant 0 : index
    %46 = vector.load %arg24[%c0_71, %c0_72, %c0_73] : memref<2x32x32xbf16, #tpu.memory_space<vmem>>, vector<1x32x32xbf16>
    %47 = vector.shape_cast %46 : vector<1x32x32xbf16> to vector<32x32xbf16>
    %c0_74 = arith.constant 0 : index
    %c0_75 = arith.constant 0 : index
    %c0_76 = arith.constant 0 : index
    %48 = vector.load %arg25[%c0_74, %c0_75, %c0_76] : memref<2x1x32xf32, #tpu.memory_space<vmem>>, vector<1x1x32xf32>
    %49 = vector.shape_cast %48 : vector<1x1x32xf32> to vector<1x32xf32>
    %c0_77 = arith.constant 0 : index
    %c0_78 = arith.constant 0 : index
    %c0_79 = arith.constant 0 : index
    %50 = vector.load %arg26[%c0_77, %c0_78, %c0_79] : memref<2x1x32xf32, #tpu.memory_space<vmem>>, vector<1x1x32xf32>
    %51 = vector.shape_cast %50 : vector<1x1x32xf32> to vector<1x32xf32>
    %c0_80 = arith.constant 0 : index
    %c0_81 = arith.constant 0 : index
    %c0_82 = arith.constant 0 : index
    %52 = vector.load %arg27[%c0_80, %c0_81, %c0_82] : memref<2x1x32xf32, #tpu.memory_space<vmem>>, vector<1x1x32xf32>
    %53 = vector.shape_cast %52 : vector<1x1x32xf32> to vector<1x32xf32>
    %c0_83 = arith.constant 0 : index
    %c0_84 = arith.constant 0 : index
    %c0_85 = arith.constant 0 : index
    %54 = vector.load %arg28[%c0_83, %c0_84, %c0_85] : memref<2x32x64xbf16, #tpu.memory_space<vmem>>, vector<1x32x64xbf16>
    %55 = vector.shape_cast %54 : vector<1x32x64xbf16> to vector<32x64xbf16>
    %c0_86 = arith.constant 0 : index
    %c0_87 = arith.constant 0 : index
    %c0_88 = arith.constant 0 : index
    %56 = vector.load %arg29[%c0_86, %c0_87, %c0_88] : memref<2x1x64xf32, #tpu.memory_space<vmem>>, vector<1x1x64xf32>
    %57 = vector.shape_cast %56 : vector<1x1x64xf32> to vector<1x64xf32>
    %c0_89 = arith.constant 0 : index
    %c0_90 = arith.constant 0 : index
    %c0_91 = arith.constant 0 : index
    %58 = vector.load %arg30[%c0_89, %c0_90, %c0_91] : memref<2x64x32xbf16, #tpu.memory_space<vmem>>, vector<1x64x32xbf16>
    %59 = vector.shape_cast %58 : vector<1x64x32xbf16> to vector<64x32xbf16>
    %c0_92 = arith.constant 0 : index
    %c0_93 = arith.constant 0 : index
    %c0_94 = arith.constant 0 : index
    %60 = vector.load %arg31[%c0_92, %c0_93, %c0_94] : memref<2x1x32xf32, #tpu.memory_space<vmem>>, vector<1x1x32xf32>
    %61 = vector.shape_cast %60 : vector<1x1x32xf32> to vector<1x32xf32>
    %c0_95 = arith.constant 0 : index
    %c0_96 = arith.constant 0 : index
    %c0_97 = arith.constant 0 : index
    %62 = vector.load %arg32[%c0_95, %c0_96, %c0_97] : memref<2x1x32xf32, #tpu.memory_space<vmem>>, vector<1x1x32xf32>
    %63 = vector.shape_cast %62 : vector<1x1x32xf32> to vector<1x32xf32>
    %c0_98 = arith.constant 0 : index
    %c0_99 = arith.constant 0 : index
    %c0_100 = arith.constant 0 : index
    %64 = vector.load %arg33[%c0_98, %c0_99, %c0_100] : memref<2x1x32xf32, #tpu.memory_space<vmem>>, vector<1x1x32xf32>
    %65 = vector.shape_cast %64 : vector<1x1x32xf32> to vector<1x32xf32>
    %66 = vector.shape_cast %0 : vector<2x8x32xf32> to vector<16x32xf32>
    %67 = arith.truncf %66 : vector<16x32xf32> to vector<16x32xbf16>
    %cst = arith.constant dense<0.000000e+00> : vector<16x96xf32>
    %68 = tpu.matmul %67, %3, %cst {dimension_numbers = #tpu.dot_dimension_numbers<[1], [0], [0], [1], [0, 0, 1, 1], [], []>} : vector<16x32xbf16>, vector<32x96xbf16>, vector<16x96xf32> -> vector<16x96xf32>
    %69 = vector.broadcast %5 : vector<1x96xf32> to vector<16x96xf32>
    %70 = arith.addf %68, %69 : vector<16x96xf32>
    %71 = vector.shape_cast %70 : vector<16x96xf32> to vector<2x8x96xf32>
    %72 = vector.extract_strided_slice %71 {offsets = [0, 0, 0], sizes = [2, 8, 32], strides = [1, 1, 1]} : vector<2x8x96xf32> to vector<2x8x32xf32>
    %73 = vector.extract_strided_slice %71 {offsets = [0, 0, 32], sizes = [2, 8, 32], strides = [1, 1, 1]} : vector<2x8x96xf32> to vector<2x8x32xf32>
    %74 = vector.extract_strided_slice %71 {offsets = [0, 0, 64], sizes = [2, 8, 32], strides = [1, 1, 1]} : vector<2x8x96xf32> to vector<2x8x32xf32>
    %75 = vector.extract_strided_slice %72 {offsets = [0, 0, 0], sizes = [2, 8, 8], strides = [1, 1, 1]} : vector<2x8x32xf32> to vector<2x8x8xf32>
    %cst_101 = arith.constant 0.353553385 : f32
    %76 = vector.broadcast %cst_101 : f32 to vector<2x8x8xf32>
    %77 = arith.mulf %75, %76 : vector<2x8x8xf32>
    %78 = arith.truncf %77 : vector<2x8x8xf32> to vector<2x8x8xbf16>
    %79 = vector.extract_strided_slice %73 {offsets = [0, 0, 0], sizes = [2, 8, 8], strides = [1, 1, 1]} : vector<2x8x32xf32> to vector<2x8x8xf32>
    %80 = arith.truncf %79 : vector<2x8x8xf32> to vector<2x8x8xbf16>
    %81 = vector.extract_strided_slice %74 {offsets = [0, 0, 0], sizes = [2, 8, 8], strides = [1, 1, 1]} : vector<2x8x32xf32> to vector<2x8x8xf32>
    %82 = arith.truncf %81 : vector<2x8x8xf32> to vector<2x8x8xbf16>
    "tpu.trace_start"() <{level = 10 : i32, message = "bqd,bkd->bqk"}> : () -> ()
    %cst_102 = arith.constant dense<0.000000e+00> : vector<2x8x8xf32>
    %83 = tpu.matmul %78, %80, %cst_102 {dimension_numbers = #tpu.dot_dimension_numbers<[2], [2], [1], [1], [0, 0, 0, 1, 1, 1], [0], [0]>} : vector<2x8x8xbf16>, vector<2x8x8xbf16>, vector<2x8x8xf32> -> vector<2x8x8xf32>
    "tpu.trace_stop"() : () -> ()
    %cst_103 = arith.constant dense<0xFF800000> : vector<2x8xf32>
    %84 = vector.multi_reduction <maximumf>, %83, %cst_103 [2] : vector<2x8x8xf32> to vector<2x8xf32>
    %85 = vector.shape_cast %84 : vector<2x8xf32> to vector<2x8x1xf32>
    %86 = vector.broadcast %85 : vector<2x8x1xf32> to vector<2x8x8xf32>
    %87 = arith.subf %83, %86 : vector<2x8x8xf32>
    %88 = math.exp %87 : vector<2x8x8xf32>
    %cst_104 = arith.constant dense<0.000000e+00> : vector<2x8xf32>
    %89 = vector.multi_reduction <add>, %88, %cst_104 [2] : vector<2x8x8xf32> to vector<2x8xf32>
    %90 = vector.shape_cast %89 : vector<2x8xf32> to vector<2x8x1xf32>
    %91 = vector.broadcast %90 : vector<2x8x1xf32> to vector<2x8x8xf32>
    %92 = arith.divf %88, %91 : vector<2x8x8xf32>
    %93 = arith.truncf %92 : vector<2x8x8xf32> to vector<2x8x8xbf16>
    "tpu.trace_start"() <{level = 10 : i32, message = "bqk,bkd->bqd"}> : () -> ()
    %cst_105 = arith.constant dense<0.000000e+00> : vector<2x8x8xf32>
    %94 = tpu.matmul %93, %82, %cst_105 {dimension_numbers = #tpu.dot_dimension_numbers<[2], [1], [1], [2], [0, 0, 0, 1, 1, 2], [0], [0]>} : vector<2x8x8xbf16>, vector<2x8x8xbf16>, vector<2x8x8xf32> -> vector<2x8x8xf32>
    "tpu.trace_stop"() : () -> ()
    %95 = vector.extract_strided_slice %72 {offsets = [0, 0, 8], sizes = [2, 8, 8], strides = [1, 1, 1]} : vector<2x8x32xf32> to vector<2x8x8xf32>
    %cst_106 = arith.constant 0.353553385 : f32
    %96 = vector.broadcast %cst_106 : f32 to vector<2x8x8xf32>
    %97 = arith.mulf %95, %96 : vector<2x8x8xf32>
    %98 = arith.truncf %97 : vector<2x8x8xf32> to vector<2x8x8xbf16>
    %99 = vector.extract_strided_slice %73 {offsets = [0, 0, 8], sizes = [2, 8, 8], strides = [1, 1, 1]} : vector<2x8x32xf32> to vector<2x8x8xf32>
    %100 = arith.truncf %99 : vector<2x8x8xf32> to vector<2x8x8xbf16>
    %101 = vector.extract_strided_slice %74 {offsets = [0, 0, 8], sizes = [2, 8, 8], strides = [1, 1, 1]} : vector<2x8x32xf32> to vector<2x8x8xf32>
    %102 = arith.truncf %101 : vector<2x8x8xf32> to vector<2x8x8xbf16>
    "tpu.trace_start"() <{level = 10 : i32, message = "bqd,bkd->bqk"}> : () -> ()
    %cst_107 = arith.constant dense<0.000000e+00> : vector<2x8x8xf32>
    %103 = tpu.matmul %98, %100, %cst_107 {dimension_numbers = #tpu.dot_dimension_numbers<[2], [2], [1], [1], [0, 0, 0, 1, 1, 1], [0], [0]>} : vector<2x8x8xbf16>, vector<2x8x8xbf16>, vector<2x8x8xf32> -> vector<2x8x8xf32>
    "tpu.trace_stop"() : () -> ()
    %cst_108 = arith.constant dense<0xFF800000> : vector<2x8xf32>
    %104 = vector.multi_reduction <maximumf>, %103, %cst_108 [2] : vector<2x8x8xf32> to vector<2x8xf32>
    %105 = vector.shape_cast %104 : vector<2x8xf32> to vector<2x8x1xf32>
    %106 = vector.broadcast %105 : vector<2x8x1xf32> to vector<2x8x8xf32>
    %107 = arith.subf %103, %106 : vector<2x8x8xf32>
    %108 = math.exp %107 : vector<2x8x8xf32>
    %cst_109 = arith.constant dense<0.000000e+00> : vector<2x8xf32>
    %109 = vector.multi_reduction <add>, %108, %cst_109 [2] : vector<2x8x8xf32> to vector<2x8xf32>
    %110 = vector.shape_cast %109 : vector<2x8xf32> to vector<2x8x1xf32>
    %111 = vector.broadcast %110 : vector<2x8x1xf32> to vector<2x8x8xf32>
    %112 = arith.divf %108, %111 : vector<2x8x8xf32>
    %113 = arith.truncf %112 : vector<2x8x8xf32> to vector<2x8x8xbf16>
    "tpu.trace_start"() <{level = 10 : i32, message = "bqk,bkd->bqd"}> : () -> ()
    %cst_110 = arith.constant dense<0.000000e+00> : vector<2x8x8xf32>
    %114 = tpu.matmul %113, %102, %cst_110 {dimension_numbers = #tpu.dot_dimension_numbers<[2], [1], [1], [2], [0, 0, 0, 1, 1, 2], [0], [0]>} : vector<2x8x8xbf16>, vector<2x8x8xbf16>, vector<2x8x8xf32> -> vector<2x8x8xf32>
    "tpu.trace_stop"() : () -> ()
    %115 = vector.extract_strided_slice %72 {offsets = [0, 0, 16], sizes = [2, 8, 8], strides = [1, 1, 1]} : vector<2x8x32xf32> to vector<2x8x8xf32>
    %cst_111 = arith.constant 0.353553385 : f32
    %116 = vector.broadcast %cst_111 : f32 to vector<2x8x8xf32>
    %117 = arith.mulf %115, %116 : vector<2x8x8xf32>
    %118 = arith.truncf %117 : vector<2x8x8xf32> to vector<2x8x8xbf16>
    %119 = vector.extract_strided_slice %73 {offsets = [0, 0, 16], sizes = [2, 8, 8], strides = [1, 1, 1]} : vector<2x8x32xf32> to vector<2x8x8xf32>
    %120 = arith.truncf %119 : vector<2x8x8xf32> to vector<2x8x8xbf16>
    %121 = vector.extract_strided_slice %74 {offsets = [0, 0, 16], sizes = [2, 8, 8], strides = [1, 1, 1]} : vector<2x8x32xf32> to vector<2x8x8xf32>
    %122 = arith.truncf %121 : vector<2x8x8xf32> to vector<2x8x8xbf16>
    "tpu.trace_start"() <{level = 10 : i32, message = "bqd,bkd->bqk"}> : () -> ()
    %cst_112 = arith.constant dense<0.000000e+00> : vector<2x8x8xf32>
    %123 = tpu.matmul %118, %120, %cst_112 {dimension_numbers = #tpu.dot_dimension_numbers<[2], [2], [1], [1], [0, 0, 0, 1, 1, 1], [0], [0]>} : vector<2x8x8xbf16>, vector<2x8x8xbf16>, vector<2x8x8xf32> -> vector<2x8x8xf32>
    "tpu.trace_stop"() : () -> ()
    %cst_113 = arith.constant dense<0xFF800000> : vector<2x8xf32>
    %124 = vector.multi_reduction <maximumf>, %123, %cst_113 [2] : vector<2x8x8xf32> to vector<2x8xf32>
    %125 = vector.shape_cast %124 : vector<2x8xf32> to vector<2x8x1xf32>
    %126 = vector.broadcast %125 : vector<2x8x1xf32> to vector<2x8x8xf32>
    %127 = arith.subf %123, %126 : vector<2x8x8xf32>
    %128 = math.exp %127 : vector<2x8x8xf32>
    %cst_114 = arith.constant dense<0.000000e+00> : vector<2x8xf32>
    %129 = vector.multi_reduction <add>, %128, %cst_114 [2] : vector<2x8x8xf32> to vector<2x8xf32>
    %130 = vector.shape_cast %129 : vector<2x8xf32> to vector<2x8x1xf32>
    %131 = vector.broadcast %130 : vector<2x8x1xf32> to vector<2x8x8xf32>
    %132 = arith.divf %128, %131 : vector<2x8x8xf32>
    %133 = arith.truncf %132 : vector<2x8x8xf32> to vector<2x8x8xbf16>
    "tpu.trace_start"() <{level = 10 : i32, message = "bqk,bkd->bqd"}> : () -> ()
    %cst_115 = arith.constant dense<0.000000e+00> : vector<2x8x8xf32>
    %134 = tpu.matmul %133, %122, %cst_115 {dimension_numbers = #tpu.dot_dimension_numbers<[2], [1], [1], [2], [0, 0, 0, 1, 1, 2], [0], [0]>} : vector<2x8x8xbf16>, vector<2x8x8xbf16>, vector<2x8x8xf32> -> vector<2x8x8xf32>
    "tpu.trace_stop"() : () -> ()
    %135 = vector.extract_strided_slice %72 {offsets = [0, 0, 24], sizes = [2, 8, 8], strides = [1, 1, 1]} : vector<2x8x32xf32> to vector<2x8x8xf32>
    %cst_116 = arith.constant 0.353553385 : f32
    %136 = vector.broadcast %cst_116 : f32 to vector<2x8x8xf32>
    %137 = arith.mulf %135, %136 : vector<2x8x8xf32>
    %138 = arith.truncf %137 : vector<2x8x8xf32> to vector<2x8x8xbf16>
    %139 = vector.extract_strided_slice %73 {offsets = [0, 0, 24], sizes = [2, 8, 8], strides = [1, 1, 1]} : vector<2x8x32xf32> to vector<2x8x8xf32>
    %140 = arith.truncf %139 : vector<2x8x8xf32> to vector<2x8x8xbf16>
    %141 = vector.extract_strided_slice %74 {offsets = [0, 0, 24], sizes = [2, 8, 8], strides = [1, 1, 1]} : vector<2x8x32xf32> to vector<2x8x8xf32>
    %142 = arith.truncf %141 : vector<2x8x8xf32> to vector<2x8x8xbf16>
    "tpu.trace_start"() <{level = 10 : i32, message = "bqd,bkd->bqk"}> : () -> ()
    %cst_117 = arith.constant dense<0.000000e+00> : vector<2x8x8xf32>
    %143 = tpu.matmul %138, %140, %cst_117 {dimension_numbers = #tpu.dot_dimension_numbers<[2], [2], [1], [1], [0, 0, 0, 1, 1, 1], [0], [0]>} : vector<2x8x8xbf16>, vector<2x8x8xbf16>, vector<2x8x8xf32> -> vector<2x8x8xf32>
    "tpu.trace_stop"() : () -> ()
    %cst_118 = arith.constant dense<0xFF800000> : vector<2x8xf32>
    %144 = vector.multi_reduction <maximumf>, %143, %cst_118 [2] : vector<2x8x8xf32> to vector<2x8xf32>
    %145 = vector.shape_cast %144 : vector<2x8xf32> to vector<2x8x1xf32>
    %146 = vector.broadcast %145 : vector<2x8x1xf32> to vector<2x8x8xf32>
    %147 = arith.subf %143, %146 : vector<2x8x8xf32>
    %148 = math.exp %147 : vector<2x8x8xf32>
    %cst_119 = arith.constant dense<0.000000e+00> : vector<2x8xf32>
    %149 = vector.multi_reduction <add>, %148, %cst_119 [2] : vector<2x8x8xf32> to vector<2x8xf32>
    %150 = vector.shape_cast %149 : vector<2x8xf32> to vector<2x8x1xf32>
    %151 = vector.broadcast %150 : vector<2x8x1xf32> to vector<2x8x8xf32>
    %152 = arith.divf %148, %151 : vector<2x8x8xf32>
    %153 = arith.truncf %152 : vector<2x8x8xf32> to vector<2x8x8xbf16>
    "tpu.trace_start"() <{level = 10 : i32, message = "bqk,bkd->bqd"}> : () -> ()
    %cst_120 = arith.constant dense<0.000000e+00> : vector<2x8x8xf32>
    %154 = tpu.matmul %153, %142, %cst_120 {dimension_numbers = #tpu.dot_dimension_numbers<[2], [1], [1], [2], [0, 0, 0, 1, 1, 2], [0], [0]>} : vector<2x8x8xbf16>, vector<2x8x8xbf16>, vector<2x8x8xf32> -> vector<2x8x8xf32>
    "tpu.trace_stop"() : () -> ()
    %155 = tpu.concatenate %94, %114, %134, %154 in 2 : vector<2x8x8xf32>, vector<2x8x8xf32>, vector<2x8x8xf32>, vector<2x8x8xf32> -> vector<2x8x32xf32>
    %156 = vector.shape_cast %155 : vector<2x8x32xf32> to vector<16x32xf32>
    %157 = arith.truncf %156 : vector<16x32xf32> to vector<16x32xbf16>
    %cst_121 = arith.constant dense<0.000000e+00> : vector<16x32xf32>
    %158 = tpu.matmul %157, %7, %cst_121 {dimension_numbers = #tpu.dot_dimension_numbers<[1], [0], [0], [1], [0, 0, 1, 1], [], []>} : vector<16x32xbf16>, vector<32x32xbf16>, vector<16x32xf32> -> vector<16x32xf32>
    %159 = vector.broadcast %9 : vector<1x32xf32> to vector<16x32xf32>
    %160 = arith.addf %158, %159 : vector<16x32xf32>
    %161 = arith.addf %66, %160 : vector<16x32xf32>
    %cst_122 = arith.constant dense<0.000000e+00> : vector<16xf32>
    %162 = vector.multi_reduction <add>, %161, %cst_122 [1] : vector<16x32xf32> to vector<16xf32>
    %163 = vector.shape_cast %162 : vector<16xf32> to vector<16x1xf32>
    %cst_123 = arith.constant 3.200000e+01 : f32
    %164 = vector.broadcast %cst_123 : f32 to vector<16x1xf32>
    %165 = arith.divf %163, %164 : vector<16x1xf32>
    %166 = vector.broadcast %165 : vector<16x1xf32> to vector<16x32xf32>
    %167 = arith.subf %161, %166 : vector<16x32xf32>
    %168 = arith.mulf %167, %167 : vector<16x32xf32>
    %cst_124 = arith.constant dense<0.000000e+00> : vector<16xf32>
    %169 = vector.multi_reduction <add>, %168, %cst_124 [1] : vector<16x32xf32> to vector<16xf32>
    %170 = vector.shape_cast %169 : vector<16xf32> to vector<16x1xf32>
    %cst_125 = arith.constant 3.200000e+01 : f32
    %171 = vector.broadcast %cst_125 : f32 to vector<16x1xf32>
    %172 = arith.divf %170, %171 : vector<16x1xf32>
    %cst_126 = arith.constant 9.99999974E-6 : f32
    %173 = vector.broadcast %cst_126 : f32 to vector<16x1xf32>
    %174 = arith.addf %172, %173 : vector<16x1xf32>
    %175 = math.rsqrt %174 : vector<16x1xf32>
    %176 = vector.broadcast %175 : vector<16x1xf32> to vector<16x32xf32>
    %177 = arith.mulf %167, %176 : vector<16x32xf32>
    %178 = vector.broadcast %11 : vector<1x32xf32> to vector<16x32xf32>
    %179 = arith.mulf %177, %178 : vector<16x32xf32>
    %180 = vector.broadcast %13 : vector<1x32xf32> to vector<16x32xf32>
    %181 = arith.addf %179, %180 : vector<16x32xf32>
    %182 = arith.truncf %181 : vector<16x32xf32> to vector<16x32xbf16>
    %cst_127 = arith.constant dense<0.000000e+00> : vector<16x64xf32>
    %183 = tpu.matmul %182, %15, %cst_127 {dimension_numbers = #tpu.dot_dimension_numbers<[1], [0], [0], [1], [0, 0, 1, 1], [], []>} : vector<16x32xbf16>, vector<32x64xbf16>, vector<16x64xf32> -> vector<16x64xf32>
    %184 = vector.broadcast %17 : vector<1x64xf32> to vector<16x64xf32>
    %185 = arith.addf %183, %184 : vector<16x64xf32>
    %cst_128 = arith.constant 0.000000e+00 : f32
    %186 = vector.broadcast %cst_128 : f32 to vector<16x64xf32>
    %187 = arith.maximumf %185, %186 : vector<16x64xf32>
    %188 = arith.truncf %187 : vector<16x64xf32> to vector<16x64xbf16>
    %cst_129 = arith.constant dense<0.000000e+00> : vector<16x32xf32>
    %189 = tpu.matmul %188, %19, %cst_129 {dimension_numbers = #tpu.dot_dimension_numbers<[1], [0], [0], [1], [0, 0, 1, 1], [], []>} : vector<16x64xbf16>, vector<64x32xbf16>, vector<16x32xf32> -> vector<16x32xf32>
    %190 = vector.broadcast %21 : vector<1x32xf32> to vector<16x32xf32>
    %191 = arith.addf %189, %190 : vector<16x32xf32>
    %192 = arith.addf %181, %191 : vector<16x32xf32>
    %cst_130 = arith.constant dense<0.000000e+00> : vector<16xf32>
    %193 = vector.multi_reduction <add>, %192, %cst_130 [1] : vector<16x32xf32> to vector<16xf32>
    %194 = vector.shape_cast %193 : vector<16xf32> to vector<16x1xf32>
    %cst_131 = arith.constant 3.200000e+01 : f32
    %195 = vector.broadcast %cst_131 : f32 to vector<16x1xf32>
    %196 = arith.divf %194, %195 : vector<16x1xf32>
    %197 = vector.broadcast %196 : vector<16x1xf32> to vector<16x32xf32>
    %198 = arith.subf %192, %197 : vector<16x32xf32>
    %199 = arith.mulf %198, %198 : vector<16x32xf32>
    %cst_132 = arith.constant dense<0.000000e+00> : vector<16xf32>
    %200 = vector.multi_reduction <add>, %199, %cst_132 [1] : vector<16x32xf32> to vector<16xf32>
    %201 = vector.shape_cast %200 : vector<16xf32> to vector<16x1xf32>
    %cst_133 = arith.constant 3.200000e+01 : f32
    %202 = vector.broadcast %cst_133 : f32 to vector<16x1xf32>
    %203 = arith.divf %201, %202 : vector<16x1xf32>
    %cst_134 = arith.constant 9.99999974E-6 : f32
    %204 = vector.broadcast %cst_134 : f32 to vector<16x1xf32>
    %205 = arith.addf %203, %204 : vector<16x1xf32>
    %206 = math.rsqrt %205 : vector<16x1xf32>
    %207 = vector.broadcast %206 : vector<16x1xf32> to vector<16x32xf32>
    %208 = arith.mulf %198, %207 : vector<16x32xf32>
    %209 = vector.broadcast %23 : vector<1x32xf32> to vector<16x32xf32>
    %210 = arith.mulf %208, %209 : vector<16x32xf32>
    %211 = vector.broadcast %25 : vector<1x32xf32> to vector<16x32xf32>
    %212 = arith.addf %210, %211 : vector<16x32xf32>
    %213 = vector.shape_cast %212 : vector<16x32xf32> to vector<2x8x32xf32>
    %214 = vector.shape_cast %1 : vector<2x8x32xf32> to vector<16x32xf32>
    %215 = arith.truncf %214 : vector<16x32xf32> to vector<16x32xbf16>
    %cst_135 = arith.constant dense<0.000000e+00> : vector<16x96xf32>
    %216 = tpu.matmul %215, %27, %cst_135 {dimension_numbers = #tpu.dot_dimension_numbers<[1], [0], [0], [1], [0, 0, 1, 1], [], []>} : vector<16x32xbf16>, vector<32x96xbf16>, vector<16x96xf32> -> vector<16x96xf32>
    %217 = vector.broadcast %29 : vector<1x96xf32> to vector<16x96xf32>
    %218 = arith.addf %216, %217 : vector<16x96xf32>
    %219 = vector.shape_cast %218 : vector<16x96xf32> to vector<2x8x96xf32>
    %220 = vector.extract_strided_slice %219 {offsets = [0, 0, 0], sizes = [2, 8, 32], strides = [1, 1, 1]} : vector<2x8x96xf32> to vector<2x8x32xf32>
    %221 = vector.extract_strided_slice %219 {offsets = [0, 0, 32], sizes = [2, 8, 32], strides = [1, 1, 1]} : vector<2x8x96xf32> to vector<2x8x32xf32>
    %222 = vector.extract_strided_slice %219 {offsets = [0, 0, 64], sizes = [2, 8, 32], strides = [1, 1, 1]} : vector<2x8x96xf32> to vector<2x8x32xf32>
    %223 = tpu.iota {dimensions = array<i32: 0>} : vector<8x8xi32>
    %224 = tpu.iota {dimensions = array<i32: 1>} : vector<8x8xi32>
    %225 = arith.cmpi sle, %224, %223 : vector<8x8xi32>
    %226 = vector.shape_cast %225 : vector<8x8xi1> to vector<1x8x8xi1>
    %227 = vector.extract_strided_slice %220 {offsets = [0, 0, 0], sizes = [2, 8, 8], strides = [1, 1, 1]} : vector<2x8x32xf32> to vector<2x8x8xf32>
    %cst_136 = arith.constant 0.353553385 : f32
    %228 = vector.broadcast %cst_136 : f32 to vector<2x8x8xf32>
    %229 = arith.mulf %227, %228 : vector<2x8x8xf32>
    %230 = arith.truncf %229 : vector<2x8x8xf32> to vector<2x8x8xbf16>
    %231 = vector.extract_strided_slice %221 {offsets = [0, 0, 0], sizes = [2, 8, 8], strides = [1, 1, 1]} : vector<2x8x32xf32> to vector<2x8x8xf32>
    %232 = arith.truncf %231 : vector<2x8x8xf32> to vector<2x8x8xbf16>
    %233 = vector.extract_strided_slice %222 {offsets = [0, 0, 0], sizes = [2, 8, 8], strides = [1, 1, 1]} : vector<2x8x32xf32> to vector<2x8x8xf32>
    %234 = arith.truncf %233 : vector<2x8x8xf32> to vector<2x8x8xbf16>
    "tpu.trace_start"() <{level = 10 : i32, message = "bqd,bkd->bqk"}> : () -> ()
    %cst_137 = arith.constant dense<0.000000e+00> : vector<2x8x8xf32>
    %235 = tpu.matmul %230, %232, %cst_137 {dimension_numbers = #tpu.dot_dimension_numbers<[2], [2], [1], [1], [0, 0, 0, 1, 1, 1], [0], [0]>} : vector<2x8x8xbf16>, vector<2x8x8xbf16>, vector<2x8x8xf32> -> vector<2x8x8xf32>
    %cst_138 = arith.constant -1.000000e+30 : f32
    "tpu.trace_stop"() : () -> ()
    %236 = vector.shape_cast %226 : vector<1x8x8xi1> to vector<1x8x8xi1>
    %237 = vector.broadcast %236 : vector<1x8x8xi1> to vector<2x8x8xi1>
    %238 = vector.broadcast %cst_138 : f32 to vector<2x8x8xf32>
    %239 = arith.select %237, %235, %238 : vector<2x8x8xi1>, vector<2x8x8xf32>
    %cst_139 = arith.constant dense<0xFF800000> : vector<2x8xf32>
    %240 = vector.multi_reduction <maximumf>, %239, %cst_139 [2] : vector<2x8x8xf32> to vector<2x8xf32>
    %241 = vector.shape_cast %240 : vector<2x8xf32> to vector<2x8x1xf32>
    %242 = vector.broadcast %241 : vector<2x8x1xf32> to vector<2x8x8xf32>
    %243 = arith.subf %239, %242 : vector<2x8x8xf32>
    %244 = math.exp %243 : vector<2x8x8xf32>
    %cst_140 = arith.constant dense<0.000000e+00> : vector<2x8xf32>
    %245 = vector.multi_reduction <add>, %244, %cst_140 [2] : vector<2x8x8xf32> to vector<2x8xf32>
    %246 = vector.shape_cast %245 : vector<2x8xf32> to vector<2x8x1xf32>
    %247 = vector.broadcast %246 : vector<2x8x1xf32> to vector<2x8x8xf32>
    %248 = arith.divf %244, %247 : vector<2x8x8xf32>
    %249 = arith.truncf %248 : vector<2x8x8xf32> to vector<2x8x8xbf16>
    "tpu.trace_start"() <{level = 10 : i32, message = "bqk,bkd->bqd"}> : () -> ()
    %cst_141 = arith.constant dense<0.000000e+00> : vector<2x8x8xf32>
    %250 = tpu.matmul %249, %234, %cst_141 {dimension_numbers = #tpu.dot_dimension_numbers<[2], [1], [1], [2], [0, 0, 0, 1, 1, 2], [0], [0]>} : vector<2x8x8xbf16>, vector<2x8x8xbf16>, vector<2x8x8xf32> -> vector<2x8x8xf32>
    "tpu.trace_stop"() : () -> ()
    %251 = vector.extract_strided_slice %220 {offsets = [0, 0, 8], sizes = [2, 8, 8], strides = [1, 1, 1]} : vector<2x8x32xf32> to vector<2x8x8xf32>
    %cst_142 = arith.constant 0.353553385 : f32
    %252 = vector.broadcast %cst_142 : f32 to vector<2x8x8xf32>
    %253 = arith.mulf %251, %252 : vector<2x8x8xf32>
    %254 = arith.truncf %253 : vector<2x8x8xf32> to vector<2x8x8xbf16>
    %255 = vector.extract_strided_slice %221 {offsets = [0, 0, 8], sizes = [2, 8, 8], strides = [1, 1, 1]} : vector<2x8x32xf32> to vector<2x8x8xf32>
    %256 = arith.truncf %255 : vector<2x8x8xf32> to vector<2x8x8xbf16>
    %257 = vector.extract_strided_slice %222 {offsets = [0, 0, 8], sizes = [2, 8, 8], strides = [1, 1, 1]} : vector<2x8x32xf32> to vector<2x8x8xf32>
    %258 = arith.truncf %257 : vector<2x8x8xf32> to vector<2x8x8xbf16>
    "tpu.trace_start"() <{level = 10 : i32, message = "bqd,bkd->bqk"}> : () -> ()
    %cst_143 = arith.constant dense<0.000000e+00> : vector<2x8x8xf32>
    %259 = tpu.matmul %254, %256, %cst_143 {dimension_numbers = #tpu.dot_dimension_numbers<[2], [2], [1], [1], [0, 0, 0, 1, 1, 1], [0], [0]>} : vector<2x8x8xbf16>, vector<2x8x8xbf16>, vector<2x8x8xf32> -> vector<2x8x8xf32>
    %cst_144 = arith.constant -1.000000e+30 : f32
    "tpu.trace_stop"() : () -> ()
    %260 = vector.shape_cast %226 : vector<1x8x8xi1> to vector<1x8x8xi1>
    %261 = vector.broadcast %260 : vector<1x8x8xi1> to vector<2x8x8xi1>
    %262 = vector.broadcast %cst_144 : f32 to vector<2x8x8xf32>
    %263 = arith.select %261, %259, %262 : vector<2x8x8xi1>, vector<2x8x8xf32>
    %cst_145 = arith.constant dense<0xFF800000> : vector<2x8xf32>
    %264 = vector.multi_reduction <maximumf>, %263, %cst_145 [2] : vector<2x8x8xf32> to vector<2x8xf32>
    %265 = vector.shape_cast %264 : vector<2x8xf32> to vector<2x8x1xf32>
    %266 = vector.broadcast %265 : vector<2x8x1xf32> to vector<2x8x8xf32>
    %267 = arith.subf %263, %266 : vector<2x8x8xf32>
    %268 = math.exp %267 : vector<2x8x8xf32>
    %cst_146 = arith.constant dense<0.000000e+00> : vector<2x8xf32>
    %269 = vector.multi_reduction <add>, %268, %cst_146 [2] : vector<2x8x8xf32> to vector<2x8xf32>
    %270 = vector.shape_cast %269 : vector<2x8xf32> to vector<2x8x1xf32>
    %271 = vector.broadcast %270 : vector<2x8x1xf32> to vector<2x8x8xf32>
    %272 = arith.divf %268, %271 : vector<2x8x8xf32>
    %273 = arith.truncf %272 : vector<2x8x8xf32> to vector<2x8x8xbf16>
    "tpu.trace_start"() <{level = 10 : i32, message = "bqk,bkd->bqd"}> : () -> ()
    %cst_147 = arith.constant dense<0.000000e+00> : vector<2x8x8xf32>
    %274 = tpu.matmul %273, %258, %cst_147 {dimension_numbers = #tpu.dot_dimension_numbers<[2], [1], [1], [2], [0, 0, 0, 1, 1, 2], [0], [0]>} : vector<2x8x8xbf16>, vector<2x8x8xbf16>, vector<2x8x8xf32> -> vector<2x8x8xf32>
    "tpu.trace_stop"() : () -> ()
    %275 = vector.extract_strided_slice %220 {offsets = [0, 0, 16], sizes = [2, 8, 8], strides = [1, 1, 1]} : vector<2x8x32xf32> to vector<2x8x8xf32>
    %cst_148 = arith.constant 0.353553385 : f32
    %276 = vector.broadcast %cst_148 : f32 to vector<2x8x8xf32>
    %277 = arith.mulf %275, %276 : vector<2x8x8xf32>
    %278 = arith.truncf %277 : vector<2x8x8xf32> to vector<2x8x8xbf16>
    %279 = vector.extract_strided_slice %221 {offsets = [0, 0, 16], sizes = [2, 8, 8], strides = [1, 1, 1]} : vector<2x8x32xf32> to vector<2x8x8xf32>
    %280 = arith.truncf %279 : vector<2x8x8xf32> to vector<2x8x8xbf16>
    %281 = vector.extract_strided_slice %222 {offsets = [0, 0, 16], sizes = [2, 8, 8], strides = [1, 1, 1]} : vector<2x8x32xf32> to vector<2x8x8xf32>
    %282 = arith.truncf %281 : vector<2x8x8xf32> to vector<2x8x8xbf16>
    "tpu.trace_start"() <{level = 10 : i32, message = "bqd,bkd->bqk"}> : () -> ()
    %cst_149 = arith.constant dense<0.000000e+00> : vector<2x8x8xf32>
    %283 = tpu.matmul %278, %280, %cst_149 {dimension_numbers = #tpu.dot_dimension_numbers<[2], [2], [1], [1], [0, 0, 0, 1, 1, 1], [0], [0]>} : vector<2x8x8xbf16>, vector<2x8x8xbf16>, vector<2x8x8xf32> -> vector<2x8x8xf32>
    %cst_150 = arith.constant -1.000000e+30 : f32
    "tpu.trace_stop"() : () -> ()
    %284 = vector.shape_cast %226 : vector<1x8x8xi1> to vector<1x8x8xi1>
    %285 = vector.broadcast %284 : vector<1x8x8xi1> to vector<2x8x8xi1>
    %286 = vector.broadcast %cst_150 : f32 to vector<2x8x8xf32>
    %287 = arith.select %285, %283, %286 : vector<2x8x8xi1>, vector<2x8x8xf32>
    %cst_151 = arith.constant dense<0xFF800000> : vector<2x8xf32>
    %288 = vector.multi_reduction <maximumf>, %287, %cst_151 [2] : vector<2x8x8xf32> to vector<2x8xf32>
    %289 = vector.shape_cast %288 : vector<2x8xf32> to vector<2x8x1xf32>
    %290 = vector.broadcast %289 : vector<2x8x1xf32> to vector<2x8x8xf32>
    %291 = arith.subf %287, %290 : vector<2x8x8xf32>
    %292 = math.exp %291 : vector<2x8x8xf32>
    %cst_152 = arith.constant dense<0.000000e+00> : vector<2x8xf32>
    %293 = vector.multi_reduction <add>, %292, %cst_152 [2] : vector<2x8x8xf32> to vector<2x8xf32>
    %294 = vector.shape_cast %293 : vector<2x8xf32> to vector<2x8x1xf32>
    %295 = vector.broadcast %294 : vector<2x8x1xf32> to vector<2x8x8xf32>
    %296 = arith.divf %292, %295 : vector<2x8x8xf32>
    %297 = arith.truncf %296 : vector<2x8x8xf32> to vector<2x8x8xbf16>
    "tpu.trace_start"() <{level = 10 : i32, message = "bqk,bkd->bqd"}> : () -> ()
    %cst_153 = arith.constant dense<0.000000e+00> : vector<2x8x8xf32>
    %298 = tpu.matmul %297, %282, %cst_153 {dimension_numbers = #tpu.dot_dimension_numbers<[2], [1], [1], [2], [0, 0, 0, 1, 1, 2], [0], [0]>} : vector<2x8x8xbf16>, vector<2x8x8xbf16>, vector<2x8x8xf32> -> vector<2x8x8xf32>
    "tpu.trace_stop"() : () -> ()
    %299 = vector.extract_strided_slice %220 {offsets = [0, 0, 24], sizes = [2, 8, 8], strides = [1, 1, 1]} : vector<2x8x32xf32> to vector<2x8x8xf32>
    %cst_154 = arith.constant 0.353553385 : f32
    %300 = vector.broadcast %cst_154 : f32 to vector<2x8x8xf32>
    %301 = arith.mulf %299, %300 : vector<2x8x8xf32>
    %302 = arith.truncf %301 : vector<2x8x8xf32> to vector<2x8x8xbf16>
    %303 = vector.extract_strided_slice %221 {offsets = [0, 0, 24], sizes = [2, 8, 8], strides = [1, 1, 1]} : vector<2x8x32xf32> to vector<2x8x8xf32>
    %304 = arith.truncf %303 : vector<2x8x8xf32> to vector<2x8x8xbf16>
    %305 = vector.extract_strided_slice %222 {offsets = [0, 0, 24], sizes = [2, 8, 8], strides = [1, 1, 1]} : vector<2x8x32xf32> to vector<2x8x8xf32>
    %306 = arith.truncf %305 : vector<2x8x8xf32> to vector<2x8x8xbf16>
    "tpu.trace_start"() <{level = 10 : i32, message = "bqd,bkd->bqk"}> : () -> ()
    %cst_155 = arith.constant dense<0.000000e+00> : vector<2x8x8xf32>
    %307 = tpu.matmul %302, %304, %cst_155 {dimension_numbers = #tpu.dot_dimension_numbers<[2], [2], [1], [1], [0, 0, 0, 1, 1, 1], [0], [0]>} : vector<2x8x8xbf16>, vector<2x8x8xbf16>, vector<2x8x8xf32> -> vector<2x8x8xf32>
    %cst_156 = arith.constant -1.000000e+30 : f32
    "tpu.trace_stop"() : () -> ()
    %308 = vector.shape_cast %226 : vector<1x8x8xi1> to vector<1x8x8xi1>
    %309 = vector.broadcast %308 : vector<1x8x8xi1> to vector<2x8x8xi1>
    %310 = vector.broadcast %cst_156 : f32 to vector<2x8x8xf32>
    %311 = arith.select %309, %307, %310 : vector<2x8x8xi1>, vector<2x8x8xf32>
    %cst_157 = arith.constant dense<0xFF800000> : vector<2x8xf32>
    %312 = vector.multi_reduction <maximumf>, %311, %cst_157 [2] : vector<2x8x8xf32> to vector<2x8xf32>
    %313 = vector.shape_cast %312 : vector<2x8xf32> to vector<2x8x1xf32>
    %314 = vector.broadcast %313 : vector<2x8x1xf32> to vector<2x8x8xf32>
    %315 = arith.subf %311, %314 : vector<2x8x8xf32>
    %316 = math.exp %315 : vector<2x8x8xf32>
    %cst_158 = arith.constant dense<0.000000e+00> : vector<2x8xf32>
    %317 = vector.multi_reduction <add>, %316, %cst_158 [2] : vector<2x8x8xf32> to vector<2x8xf32>
    %318 = vector.shape_cast %317 : vector<2x8xf32> to vector<2x8x1xf32>
    %319 = vector.broadcast %318 : vector<2x8x1xf32> to vector<2x8x8xf32>
    %320 = arith.divf %316, %319 : vector<2x8x8xf32>
    %321 = arith.truncf %320 : vector<2x8x8xf32> to vector<2x8x8xbf16>
    "tpu.trace_start"() <{level = 10 : i32, message = "bqk,bkd->bqd"}> : () -> ()
    %cst_159 = arith.constant dense<0.000000e+00> : vector<2x8x8xf32>
    %322 = tpu.matmul %321, %306, %cst_159 {dimension_numbers = #tpu.dot_dimension_numbers<[2], [1], [1], [2], [0, 0, 0, 1, 1, 2], [0], [0]>} : vector<2x8x8xbf16>, vector<2x8x8xbf16>, vector<2x8x8xf32> -> vector<2x8x8xf32>
    "tpu.trace_stop"() : () -> ()
    %323 = tpu.concatenate %250, %274, %298, %322 in 2 : vector<2x8x8xf32>, vector<2x8x8xf32>, vector<2x8x8xf32>, vector<2x8x8xf32> -> vector<2x8x32xf32>
    %324 = vector.shape_cast %323 : vector<2x8x32xf32> to vector<16x32xf32>
    %325 = arith.truncf %324 : vector<16x32xf32> to vector<16x32xbf16>
    %cst_160 = arith.constant dense<0.000000e+00> : vector<16x32xf32>
    %326 = tpu.matmul %325, %31, %cst_160 {dimension_numbers = #tpu.dot_dimension_numbers<[1], [0], [0], [1], [0, 0, 1, 1], [], []>} : vector<16x32xbf16>, vector<32x32xbf16>, vector<16x32xf32> -> vector<16x32xf32>
    %327 = vector.broadcast %33 : vector<1x32xf32> to vector<16x32xf32>
    %328 = arith.addf %326, %327 : vector<16x32xf32>
    %329 = arith.addf %214, %328 : vector<16x32xf32>
    %cst_161 = arith.constant dense<0.000000e+00> : vector<16xf32>
    %330 = vector.multi_reduction <add>, %329, %cst_161 [1] : vector<16x32xf32> to vector<16xf32>
    %331 = vector.shape_cast %330 : vector<16xf32> to vector<16x1xf32>
    %cst_162 = arith.constant 3.200000e+01 : f32
    %332 = vector.broadcast %cst_162 : f32 to vector<16x1xf32>
    %333 = arith.divf %331, %332 : vector<16x1xf32>
    %334 = vector.broadcast %333 : vector<16x1xf32> to vector<16x32xf32>
    %335 = arith.subf %329, %334 : vector<16x32xf32>
    %336 = arith.mulf %335, %335 : vector<16x32xf32>
    %cst_163 = arith.constant dense<0.000000e+00> : vector<16xf32>
    %337 = vector.multi_reduction <add>, %336, %cst_163 [1] : vector<16x32xf32> to vector<16xf32>
    %338 = vector.shape_cast %337 : vector<16xf32> to vector<16x1xf32>
    %cst_164 = arith.constant 3.200000e+01 : f32
    %339 = vector.broadcast %cst_164 : f32 to vector<16x1xf32>
    %340 = arith.divf %338, %339 : vector<16x1xf32>
    %cst_165 = arith.constant 9.99999974E-6 : f32
    %341 = vector.broadcast %cst_165 : f32 to vector<16x1xf32>
    %342 = arith.addf %340, %341 : vector<16x1xf32>
    %343 = math.rsqrt %342 : vector<16x1xf32>
    %344 = vector.broadcast %343 : vector<16x1xf32> to vector<16x32xf32>
    %345 = arith.mulf %335, %344 : vector<16x32xf32>
    %346 = vector.broadcast %35 : vector<1x32xf32> to vector<16x32xf32>
    %347 = arith.mulf %345, %346 : vector<16x32xf32>
    %348 = vector.broadcast %37 : vector<1x32xf32> to vector<16x32xf32>
    %349 = arith.addf %347, %348 : vector<16x32xf32>
    %350 = arith.truncf %349 : vector<16x32xf32> to vector<16x32xbf16>
    %cst_166 = arith.constant dense<0.000000e+00> : vector<16x32xf32>
    %351 = tpu.matmul %350, %39, %cst_166 {dimension_numbers = #tpu.dot_dimension_numbers<[1], [0], [0], [1], [0, 0, 1, 1], [], []>} : vector<16x32xbf16>, vector<32x32xbf16>, vector<16x32xf32> -> vector<16x32xf32>
    %352 = vector.broadcast %41 : vector<1x32xf32> to vector<16x32xf32>
    %353 = arith.addf %351, %352 : vector<16x32xf32>
    %354 = vector.shape_cast %353 : vector<16x32xf32> to vector<2x8x32xf32>
    %355 = vector.shape_cast %213 : vector<2x8x32xf32> to vector<16x32xf32>
    %356 = arith.truncf %355 : vector<16x32xf32> to vector<16x32xbf16>
    %cst_167 = arith.constant dense<0.000000e+00> : vector<16x64xf32>
    %357 = tpu.matmul %356, %43, %cst_167 {dimension_numbers = #tpu.dot_dimension_numbers<[1], [0], [0], [1], [0, 0, 1, 1], [], []>} : vector<16x32xbf16>, vector<32x64xbf16>, vector<16x64xf32> -> vector<16x64xf32>
    %358 = vector.broadcast %45 : vector<1x64xf32> to vector<16x64xf32>
    %359 = arith.addf %357, %358 : vector<16x64xf32>
    %360 = vector.shape_cast %359 : vector<16x64xf32> to vector<2x8x64xf32>
    %361 = vector.extract_strided_slice %360 {offsets = [0, 0, 0], sizes = [2, 8, 32], strides = [1, 1, 1]} : vector<2x8x64xf32> to vector<2x8x32xf32>
    %362 = vector.extract_strided_slice %360 {offsets = [0, 0, 32], sizes = [2, 8, 32], strides = [1, 1, 1]} : vector<2x8x64xf32> to vector<2x8x32xf32>
    %363 = vector.extract_strided_slice %354 {offsets = [0, 0, 0], sizes = [2, 8, 8], strides = [1, 1, 1]} : vector<2x8x32xf32> to vector<2x8x8xf32>
    %cst_168 = arith.constant 0.353553385 : f32
    %364 = vector.broadcast %cst_168 : f32 to vector<2x8x8xf32>
    %365 = arith.mulf %363, %364 : vector<2x8x8xf32>
    %366 = arith.truncf %365 : vector<2x8x8xf32> to vector<2x8x8xbf16>
    %367 = vector.extract_strided_slice %361 {offsets = [0, 0, 0], sizes = [2, 8, 8], strides = [1, 1, 1]} : vector<2x8x32xf32> to vector<2x8x8xf32>
    %368 = arith.truncf %367 : vector<2x8x8xf32> to vector<2x8x8xbf16>
    %369 = vector.extract_strided_slice %362 {offsets = [0, 0, 0], sizes = [2, 8, 8], strides = [1, 1, 1]} : vector<2x8x32xf32> to vector<2x8x8xf32>
    %370 = arith.truncf %369 : vector<2x8x8xf32> to vector<2x8x8xbf16>
    "tpu.trace_start"() <{level = 10 : i32, message = "bqd,bkd->bqk"}> : () -> ()
    %cst_169 = arith.constant dense<0.000000e+00> : vector<2x8x8xf32>
    %371 = tpu.matmul %366, %368, %cst_169 {dimension_numbers = #tpu.dot_dimension_numbers<[2], [2], [1], [1], [0, 0, 0, 1, 1, 1], [0], [0]>} : vector<2x8x8xbf16>, vector<2x8x8xbf16>, vector<2x8x8xf32> -> vector<2x8x8xf32>
    "tpu.trace_stop"() : () -> ()
    %cst_170 = arith.constant dense<0xFF800000> : vector<2x8xf32>
    %372 = vector.multi_reduction <maximumf>, %371, %cst_170 [2] : vector<2x8x8xf32> to vector<2x8xf32>
    %373 = vector.shape_cast %372 : vector<2x8xf32> to vector<2x8x1xf32>
    %374 = vector.broadcast %373 : vector<2x8x1xf32> to vector<2x8x8xf32>
    %375 = arith.subf %371, %374 : vector<2x8x8xf32>
    %376 = math.exp %375 : vector<2x8x8xf32>
    %cst_171 = arith.constant dense<0.000000e+00> : vector<2x8xf32>
    %377 = vector.multi_reduction <add>, %376, %cst_171 [2] : vector<2x8x8xf32> to vector<2x8xf32>
    %378 = vector.shape_cast %377 : vector<2x8xf32> to vector<2x8x1xf32>
    %379 = vector.broadcast %378 : vector<2x8x1xf32> to vector<2x8x8xf32>
    %380 = arith.divf %376, %379 : vector<2x8x8xf32>
    %381 = arith.truncf %380 : vector<2x8x8xf32> to vector<2x8x8xbf16>
    "tpu.trace_start"() <{level = 10 : i32, message = "bqk,bkd->bqd"}> : () -> ()
    %cst_172 = arith.constant dense<0.000000e+00> : vector<2x8x8xf32>
    %382 = tpu.matmul %381, %370, %cst_172 {dimension_numbers = #tpu.dot_dimension_numbers<[2], [1], [1], [2], [0, 0, 0, 1, 1, 2], [0], [0]>} : vector<2x8x8xbf16>, vector<2x8x8xbf16>, vector<2x8x8xf32> -> vector<2x8x8xf32>
    "tpu.trace_stop"() : () -> ()
    %383 = vector.extract_strided_slice %354 {offsets = [0, 0, 8], sizes = [2, 8, 8], strides = [1, 1, 1]} : vector<2x8x32xf32> to vector<2x8x8xf32>
    %cst_173 = arith.constant 0.353553385 : f32
    %384 = vector.broadcast %cst_173 : f32 to vector<2x8x8xf32>
    %385 = arith.mulf %383, %384 : vector<2x8x8xf32>
    %386 = arith.truncf %385 : vector<2x8x8xf32> to vector<2x8x8xbf16>
    %387 = vector.extract_strided_slice %361 {offsets = [0, 0, 8], sizes = [2, 8, 8], strides = [1, 1, 1]} : vector<2x8x32xf32> to vector<2x8x8xf32>
    %388 = arith.truncf %387 : vector<2x8x8xf32> to vector<2x8x8xbf16>
    %389 = vector.extract_strided_slice %362 {offsets = [0, 0, 8], sizes = [2, 8, 8], strides = [1, 1, 1]} : vector<2x8x32xf32> to vector<2x8x8xf32>
    %390 = arith.truncf %389 : vector<2x8x8xf32> to vector<2x8x8xbf16>
    "tpu.trace_start"() <{level = 10 : i32, message = "bqd,bkd->bqk"}> : () -> ()
    %cst_174 = arith.constant dense<0.000000e+00> : vector<2x8x8xf32>
    %391 = tpu.matmul %386, %388, %cst_174 {dimension_numbers = #tpu.dot_dimension_numbers<[2], [2], [1], [1], [0, 0, 0, 1, 1, 1], [0], [0]>} : vector<2x8x8xbf16>, vector<2x8x8xbf16>, vector<2x8x8xf32> -> vector<2x8x8xf32>
    "tpu.trace_stop"() : () -> ()
    %cst_175 = arith.constant dense<0xFF800000> : vector<2x8xf32>
    %392 = vector.multi_reduction <maximumf>, %391, %cst_175 [2] : vector<2x8x8xf32> to vector<2x8xf32>
    %393 = vector.shape_cast %392 : vector<2x8xf32> to vector<2x8x1xf32>
    %394 = vector.broadcast %393 : vector<2x8x1xf32> to vector<2x8x8xf32>
    %395 = arith.subf %391, %394 : vector<2x8x8xf32>
    %396 = math.exp %395 : vector<2x8x8xf32>
    %cst_176 = arith.constant dense<0.000000e+00> : vector<2x8xf32>
    %397 = vector.multi_reduction <add>, %396, %cst_176 [2] : vector<2x8x8xf32> to vector<2x8xf32>
    %398 = vector.shape_cast %397 : vector<2x8xf32> to vector<2x8x1xf32>
    %399 = vector.broadcast %398 : vector<2x8x1xf32> to vector<2x8x8xf32>
    %400 = arith.divf %396, %399 : vector<2x8x8xf32>
    %401 = arith.truncf %400 : vector<2x8x8xf32> to vector<2x8x8xbf16>
    "tpu.trace_start"() <{level = 10 : i32, message = "bqk,bkd->bqd"}> : () -> ()
    %cst_177 = arith.constant dense<0.000000e+00> : vector<2x8x8xf32>
    %402 = tpu.matmul %401, %390, %cst_177 {dimension_numbers = #tpu.dot_dimension_numbers<[2], [1], [1], [2], [0, 0, 0, 1, 1, 2], [0], [0]>} : vector<2x8x8xbf16>, vector<2x8x8xbf16>, vector<2x8x8xf32> -> vector<2x8x8xf32>
    "tpu.trace_stop"() : () -> ()
    %403 = vector.extract_strided_slice %354 {offsets = [0, 0, 16], sizes = [2, 8, 8], strides = [1, 1, 1]} : vector<2x8x32xf32> to vector<2x8x8xf32>
    %cst_178 = arith.constant 0.353553385 : f32
    %404 = vector.broadcast %cst_178 : f32 to vector<2x8x8xf32>
    %405 = arith.mulf %403, %404 : vector<2x8x8xf32>
    %406 = arith.truncf %405 : vector<2x8x8xf32> to vector<2x8x8xbf16>
    %407 = vector.extract_strided_slice %361 {offsets = [0, 0, 16], sizes = [2, 8, 8], strides = [1, 1, 1]} : vector<2x8x32xf32> to vector<2x8x8xf32>
    %408 = arith.truncf %407 : vector<2x8x8xf32> to vector<2x8x8xbf16>
    %409 = vector.extract_strided_slice %362 {offsets = [0, 0, 16], sizes = [2, 8, 8], strides = [1, 1, 1]} : vector<2x8x32xf32> to vector<2x8x8xf32>
    %410 = arith.truncf %409 : vector<2x8x8xf32> to vector<2x8x8xbf16>
    "tpu.trace_start"() <{level = 10 : i32, message = "bqd,bkd->bqk"}> : () -> ()
    %cst_179 = arith.constant dense<0.000000e+00> : vector<2x8x8xf32>
    %411 = tpu.matmul %406, %408, %cst_179 {dimension_numbers = #tpu.dot_dimension_numbers<[2], [2], [1], [1], [0, 0, 0, 1, 1, 1], [0], [0]>} : vector<2x8x8xbf16>, vector<2x8x8xbf16>, vector<2x8x8xf32> -> vector<2x8x8xf32>
    "tpu.trace_stop"() : () -> ()
    %cst_180 = arith.constant dense<0xFF800000> : vector<2x8xf32>
    %412 = vector.multi_reduction <maximumf>, %411, %cst_180 [2] : vector<2x8x8xf32> to vector<2x8xf32>
    %413 = vector.shape_cast %412 : vector<2x8xf32> to vector<2x8x1xf32>
    %414 = vector.broadcast %413 : vector<2x8x1xf32> to vector<2x8x8xf32>
    %415 = arith.subf %411, %414 : vector<2x8x8xf32>
    %416 = math.exp %415 : vector<2x8x8xf32>
    %cst_181 = arith.constant dense<0.000000e+00> : vector<2x8xf32>
    %417 = vector.multi_reduction <add>, %416, %cst_181 [2] : vector<2x8x8xf32> to vector<2x8xf32>
    %418 = vector.shape_cast %417 : vector<2x8xf32> to vector<2x8x1xf32>
    %419 = vector.broadcast %418 : vector<2x8x1xf32> to vector<2x8x8xf32>
    %420 = arith.divf %416, %419 : vector<2x8x8xf32>
    %421 = arith.truncf %420 : vector<2x8x8xf32> to vector<2x8x8xbf16>
    "tpu.trace_start"() <{level = 10 : i32, message = "bqk,bkd->bqd"}> : () -> ()
    %cst_182 = arith.constant dense<0.000000e+00> : vector<2x8x8xf32>
    %422 = tpu.matmul %421, %410, %cst_182 {dimension_numbers = #tpu.dot_dimension_numbers<[2], [1], [1], [2], [0, 0, 0, 1, 1, 2], [0], [0]>} : vector<2x8x8xbf16>, vector<2x8x8xbf16>, vector<2x8x8xf32> -> vector<2x8x8xf32>
    "tpu.trace_stop"() : () -> ()
    %423 = vector.extract_strided_slice %354 {offsets = [0, 0, 24], sizes = [2, 8, 8], strides = [1, 1, 1]} : vector<2x8x32xf32> to vector<2x8x8xf32>
    %cst_183 = arith.constant 0.353553385 : f32
    %424 = vector.broadcast %cst_183 : f32 to vector<2x8x8xf32>
    %425 = arith.mulf %423, %424 : vector<2x8x8xf32>
    %426 = arith.truncf %425 : vector<2x8x8xf32> to vector<2x8x8xbf16>
    %427 = vector.extract_strided_slice %361 {offsets = [0, 0, 24], sizes = [2, 8, 8], strides = [1, 1, 1]} : vector<2x8x32xf32> to vector<2x8x8xf32>
    %428 = arith.truncf %427 : vector<2x8x8xf32> to vector<2x8x8xbf16>
    %429 = vector.extract_strided_slice %362 {offsets = [0, 0, 24], sizes = [2, 8, 8], strides = [1, 1, 1]} : vector<2x8x32xf32> to vector<2x8x8xf32>
    %430 = arith.truncf %429 : vector<2x8x8xf32> to vector<2x8x8xbf16>
    "tpu.trace_start"() <{level = 10 : i32, message = "bqd,bkd->bqk"}> : () -> ()
    %cst_184 = arith.constant dense<0.000000e+00> : vector<2x8x8xf32>
    %431 = tpu.matmul %426, %428, %cst_184 {dimension_numbers = #tpu.dot_dimension_numbers<[2], [2], [1], [1], [0, 0, 0, 1, 1, 1], [0], [0]>} : vector<2x8x8xbf16>, vector<2x8x8xbf16>, vector<2x8x8xf32> -> vector<2x8x8xf32>
    "tpu.trace_stop"() : () -> ()
    %cst_185 = arith.constant dense<0xFF800000> : vector<2x8xf32>
    %432 = vector.multi_reduction <maximumf>, %431, %cst_185 [2] : vector<2x8x8xf32> to vector<2x8xf32>
    %433 = vector.shape_cast %432 : vector<2x8xf32> to vector<2x8x1xf32>
    %434 = vector.broadcast %433 : vector<2x8x1xf32> to vector<2x8x8xf32>
    %435 = arith.subf %431, %434 : vector<2x8x8xf32>
    %436 = math.exp %435 : vector<2x8x8xf32>
    %cst_186 = arith.constant dense<0.000000e+00> : vector<2x8xf32>
    %437 = vector.multi_reduction <add>, %436, %cst_186 [2] : vector<2x8x8xf32> to vector<2x8xf32>
    %438 = vector.shape_cast %437 : vector<2x8xf32> to vector<2x8x1xf32>
    %439 = vector.broadcast %438 : vector<2x8x1xf32> to vector<2x8x8xf32>
    %440 = arith.divf %436, %439 : vector<2x8x8xf32>
    %441 = arith.truncf %440 : vector<2x8x8xf32> to vector<2x8x8xbf16>
    "tpu.trace_start"() <{level = 10 : i32, message = "bqk,bkd->bqd"}> : () -> ()
    %cst_187 = arith.constant dense<0.000000e+00> : vector<2x8x8xf32>
    %442 = tpu.matmul %441, %430, %cst_187 {dimension_numbers = #tpu.dot_dimension_numbers<[2], [1], [1], [2], [0, 0, 0, 1, 1, 2], [0], [0]>} : vector<2x8x8xbf16>, vector<2x8x8xbf16>, vector<2x8x8xf32> -> vector<2x8x8xf32>
    "tpu.trace_stop"() : () -> ()
    %443 = tpu.concatenate %382, %402, %422, %442 in 2 : vector<2x8x8xf32>, vector<2x8x8xf32>, vector<2x8x8xf32>, vector<2x8x8xf32> -> vector<2x8x32xf32>
    %444 = vector.shape_cast %443 : vector<2x8x32xf32> to vector<16x32xf32>
    %445 = arith.truncf %444 : vector<16x32xf32> to vector<16x32xbf16>
    %cst_188 = arith.constant dense<0.000000e+00> : vector<16x32xf32>
    %446 = tpu.matmul %445, %47, %cst_188 {dimension_numbers = #tpu.dot_dimension_numbers<[1], [0], [0], [1], [0, 0, 1, 1], [], []>} : vector<16x32xbf16>, vector<32x32xbf16>, vector<16x32xf32> -> vector<16x32xf32>
    %447 = vector.broadcast %49 : vector<1x32xf32> to vector<16x32xf32>
    %448 = arith.addf %446, %447 : vector<16x32xf32>
    %449 = arith.addf %349, %448 : vector<16x32xf32>
    %cst_189 = arith.constant dense<0.000000e+00> : vector<16xf32>
    %450 = vector.multi_reduction <add>, %449, %cst_189 [1] : vector<16x32xf32> to vector<16xf32>
    %451 = vector.shape_cast %450 : vector<16xf32> to vector<16x1xf32>
    %cst_190 = arith.constant 3.200000e+01 : f32
    %452 = vector.broadcast %cst_190 : f32 to vector<16x1xf32>
    %453 = arith.divf %451, %452 : vector<16x1xf32>
    %454 = vector.broadcast %453 : vector<16x1xf32> to vector<16x32xf32>
    %455 = arith.subf %449, %454 : vector<16x32xf32>
    %456 = arith.mulf %455, %455 : vector<16x32xf32>
    %cst_191 = arith.constant dense<0.000000e+00> : vector<16xf32>
    %457 = vector.multi_reduction <add>, %456, %cst_191 [1] : vector<16x32xf32> to vector<16xf32>
    %458 = vector.shape_cast %457 : vector<16xf32> to vector<16x1xf32>
    %cst_192 = arith.constant 3.200000e+01 : f32
    %459 = vector.broadcast %cst_192 : f32 to vector<16x1xf32>
    %460 = arith.divf %458, %459 : vector<16x1xf32>
    %cst_193 = arith.constant 9.99999974E-6 : f32
    %461 = vector.broadcast %cst_193 : f32 to vector<16x1xf32>
    %462 = arith.addf %460, %461 : vector<16x1xf32>
    %463 = math.rsqrt %462 : vector<16x1xf32>
    %464 = vector.broadcast %463 : vector<16x1xf32> to vector<16x32xf32>
    %465 = arith.mulf %455, %464 : vector<16x32xf32>
    %466 = vector.broadcast %51 : vector<1x32xf32> to vector<16x32xf32>
    %467 = arith.mulf %465, %466 : vector<16x32xf32>
    %468 = vector.broadcast %53 : vector<1x32xf32> to vector<16x32xf32>
    %469 = arith.addf %467, %468 : vector<16x32xf32>
    %470 = arith.truncf %469 : vector<16x32xf32> to vector<16x32xbf16>
    %cst_194 = arith.constant dense<0.000000e+00> : vector<16x64xf32>
    %471 = tpu.matmul %470, %55, %cst_194 {dimension_numbers = #tpu.dot_dimension_numbers<[1], [0], [0], [1], [0, 0, 1, 1], [], []>} : vector<16x32xbf16>, vector<32x64xbf16>, vector<16x64xf32> -> vector<16x64xf32>
    %472 = vector.broadcast %57 : vector<1x64xf32> to vector<16x64xf32>
    %473 = arith.addf %471, %472 : vector<16x64xf32>
    %cst_195 = arith.constant 0.000000e+00 : f32
    %474 = vector.broadcast %cst_195 : f32 to vector<16x64xf32>
    %475 = arith.maximumf %473, %474 : vector<16x64xf32>
    %476 = arith.truncf %475 : vector<16x64xf32> to vector<16x64xbf16>
    %cst_196 = arith.constant dense<0.000000e+00> : vector<16x32xf32>
    %477 = tpu.matmul %476, %59, %cst_196 {dimension_numbers = #tpu.dot_dimension_numbers<[1], [0], [0], [1], [0, 0, 1, 1], [], []>} : vector<16x64xbf16>, vector<64x32xbf16>, vector<16x32xf32> -> vector<16x32xf32>
    %478 = vector.broadcast %61 : vector<1x32xf32> to vector<16x32xf32>
    %479 = arith.addf %477, %478 : vector<16x32xf32>
    %480 = arith.addf %469, %479 : vector<16x32xf32>
    %cst_197 = arith.constant dense<0.000000e+00> : vector<16xf32>
    %481 = vector.multi_reduction <add>, %480, %cst_197 [1] : vector<16x32xf32> to vector<16xf32>
    %482 = vector.shape_cast %481 : vector<16xf32> to vector<16x1xf32>
    %cst_198 = arith.constant 3.200000e+01 : f32
    %483 = vector.broadcast %cst_198 : f32 to vector<16x1xf32>
    %484 = arith.divf %482, %483 : vector<16x1xf32>
    %485 = vector.broadcast %484 : vector<16x1xf32> to vector<16x32xf32>
    %486 = arith.subf %480, %485 : vector<16x32xf32>
    %487 = arith.mulf %486, %486 : vector<16x32xf32>
    %cst_199 = arith.constant dense<0.000000e+00> : vector<16xf32>
    %488 = vector.multi_reduction <add>, %487, %cst_199 [1] : vector<16x32xf32> to vector<16xf32>
    %489 = vector.shape_cast %488 : vector<16xf32> to vector<16x1xf32>
    %cst_200 = arith.constant 3.200000e+01 : f32
    %490 = vector.broadcast %cst_200 : f32 to vector<16x1xf32>
    %491 = arith.divf %489, %490 : vector<16x1xf32>
    %cst_201 = arith.constant 9.99999974E-6 : f32
    %492 = vector.broadcast %cst_201 : f32 to vector<16x1xf32>
    %493 = arith.addf %491, %492 : vector<16x1xf32>
    %494 = math.rsqrt %493 : vector<16x1xf32>
    %495 = vector.broadcast %494 : vector<16x1xf32> to vector<16x32xf32>
    %496 = arith.mulf %486, %495 : vector<16x32xf32>
    %497 = vector.broadcast %63 : vector<1x32xf32> to vector<16x32xf32>
    %498 = arith.mulf %496, %497 : vector<16x32xf32>
    %499 = vector.broadcast %65 : vector<1x32xf32> to vector<16x32xf32>
    %500 = arith.addf %498, %499 : vector<16x32xf32>
    %501 = vector.shape_cast %500 : vector<16x32xf32> to vector<2x8x32xf32>
    %c1 = arith.constant 1 : index
    %c0_202 = arith.constant 0 : index
    %c0_203 = arith.constant 0 : index
    %502 = vector.load %arg2[%c1, %c0_202, %c0_203] : memref<2x32x96xbf16, #tpu.memory_space<vmem>>, vector<1x32x96xbf16>
    %503 = vector.shape_cast %502 : vector<1x32x96xbf16> to vector<32x96xbf16>
    %c1_204 = arith.constant 1 : index
    %c0_205 = arith.constant 0 : index
    %c0_206 = arith.constant 0 : index
    %504 = vector.load %arg3[%c1_204, %c0_205, %c0_206] : memref<2x1x96xf32, #tpu.memory_space<vmem>>, vector<1x1x96xf32>
    %505 = vector.shape_cast %504 : vector<1x1x96xf32> to vector<1x96xf32>
    %c1_207 = arith.constant 1 : index
    %c0_208 = arith.constant 0 : index
    %c0_209 = arith.constant 0 : index
    %506 = vector.load %arg4[%c1_207, %c0_208, %c0_209] : memref<2x32x32xbf16, #tpu.memory_space<vmem>>, vector<1x32x32xbf16>
    %507 = vector.shape_cast %506 : vector<1x32x32xbf16> to vector<32x32xbf16>
    %c1_210 = arith.constant 1 : index
    %c0_211 = arith.constant 0 : index
    %c0_212 = arith.constant 0 : index
    %508 = vector.load %arg5[%c1_210, %c0_211, %c0_212] : memref<2x1x32xf32, #tpu.memory_space<vmem>>, vector<1x1x32xf32>
    %509 = vector.shape_cast %508 : vector<1x1x32xf32> to vector<1x32xf32>
    %c1_213 = arith.constant 1 : index
    %c0_214 = arith.constant 0 : index
    %c0_215 = arith.constant 0 : index
    %510 = vector.load %arg6[%c1_213, %c0_214, %c0_215] : memref<2x1x32xf32, #tpu.memory_space<vmem>>, vector<1x1x32xf32>
    %511 = vector.shape_cast %510 : vector<1x1x32xf32> to vector<1x32xf32>
    %c1_216 = arith.constant 1 : index
    %c0_217 = arith.constant 0 : index
    %c0_218 = arith.constant 0 : index
    %512 = vector.load %arg7[%c1_216, %c0_217, %c0_218] : memref<2x1x32xf32, #tpu.memory_space<vmem>>, vector<1x1x32xf32>
    %513 = vector.shape_cast %512 : vector<1x1x32xf32> to vector<1x32xf32>
    %c1_219 = arith.constant 1 : index
    %c0_220 = arith.constant 0 : index
    %c0_221 = arith.constant 0 : index
    %514 = vector.load %arg8[%c1_219, %c0_220, %c0_221] : memref<2x32x64xbf16, #tpu.memory_space<vmem>>, vector<1x32x64xbf16>
    %515 = vector.shape_cast %514 : vector<1x32x64xbf16> to vector<32x64xbf16>
    %c1_222 = arith.constant 1 : index
    %c0_223 = arith.constant 0 : index
    %c0_224 = arith.constant 0 : index
    %516 = vector.load %arg9[%c1_222, %c0_223, %c0_224] : memref<2x1x64xf32, #tpu.memory_space<vmem>>, vector<1x1x64xf32>
    %517 = vector.shape_cast %516 : vector<1x1x64xf32> to vector<1x64xf32>
    %c1_225 = arith.constant 1 : index
    %c0_226 = arith.constant 0 : index
    %c0_227 = arith.constant 0 : index
    %518 = vector.load %arg10[%c1_225, %c0_226, %c0_227] : memref<2x64x32xbf16, #tpu.memory_space<vmem>>, vector<1x64x32xbf16>
    %519 = vector.shape_cast %518 : vector<1x64x32xbf16> to vector<64x32xbf16>
    %c1_228 = arith.constant 1 : index
    %c0_229 = arith.constant 0 : index
    %c0_230 = arith.constant 0 : index
    %520 = vector.load %arg11[%c1_228, %c0_229, %c0_230] : memref<2x1x32xf32, #tpu.memory_space<vmem>>, vector<1x1x32xf32>
    %521 = vector.shape_cast %520 : vector<1x1x32xf32> to vector<1x32xf32>
    %c1_231 = arith.constant 1 : index
    %c0_232 = arith.constant 0 : index
    %c0_233 = arith.constant 0 : index
    %522 = vector.load %arg12[%c1_231, %c0_232, %c0_233] : memref<2x1x32xf32, #tpu.memory_space<vmem>>, vector<1x1x32xf32>
    %523 = vector.shape_cast %522 : vector<1x1x32xf32> to vector<1x32xf32>
    %c1_234 = arith.constant 1 : index
    %c0_235 = arith.constant 0 : index
    %c0_236 = arith.constant 0 : index
    %524 = vector.load %arg13[%c1_234, %c0_235, %c0_236] : memref<2x1x32xf32, #tpu.memory_space<vmem>>, vector<1x1x32xf32>
    %525 = vector.shape_cast %524 : vector<1x1x32xf32> to vector<1x32xf32>
    %c1_237 = arith.constant 1 : index
    %c0_238 = arith.constant 0 : index
    %c0_239 = arith.constant 0 : index
    %526 = vector.load %arg14[%c1_237, %c0_238, %c0_239] : memref<2x32x96xbf16, #tpu.memory_space<vmem>>, vector<1x32x96xbf16>
    %527 = vector.shape_cast %526 : vector<1x32x96xbf16> to vector<32x96xbf16>
    %c1_240 = arith.constant 1 : index
    %c0_241 = arith.constant 0 : index
    %c0_242 = arith.constant 0 : index
    %528 = vector.load %arg15[%c1_240, %c0_241, %c0_242] : memref<2x1x96xf32, #tpu.memory_space<vmem>>, vector<1x1x96xf32>
    %529 = vector.shape_cast %528 : vector<1x1x96xf32> to vector<1x96xf32>
    %c1_243 = arith.constant 1 : index
    %c0_244 = arith.constant 0 : index
    %c0_245 = arith.constant 0 : index
    %530 = vector.load %arg16[%c1_243, %c0_244, %c0_245] : memref<2x32x32xbf16, #tpu.memory_space<vmem>>, vector<1x32x32xbf16>
    %531 = vector.shape_cast %530 : vector<1x32x32xbf16> to vector<32x32xbf16>
    %c1_246 = arith.constant 1 : index
    %c0_247 = arith.constant 0 : index
    %c0_248 = arith.constant 0 : index
    %532 = vector.load %arg17[%c1_246, %c0_247, %c0_248] : memref<2x1x32xf32, #tpu.memory_space<vmem>>, vector<1x1x32xf32>
    %533 = vector.shape_cast %532 : vector<1x1x32xf32> to vector<1x32xf32>
    %c1_249 = arith.constant 1 : index
    %c0_250 = arith.constant 0 : index
    %c0_251 = arith.constant 0 : index
    %534 = vector.load %arg18[%c1_249, %c0_250, %c0_251] : memref<2x1x32xf32, #tpu.memory_space<vmem>>, vector<1x1x32xf32>
    %535 = vector.shape_cast %534 : vector<1x1x32xf32> to vector<1x32xf32>
    %c1_252 = arith.constant 1 : index
    %c0_253 = arith.constant 0 : index
    %c0_254 = arith.constant 0 : index
    %536 = vector.load %arg19[%c1_252, %c0_253, %c0_254] : memref<2x1x32xf32, #tpu.memory_space<vmem>>, vector<1x1x32xf32>
    %537 = vector.shape_cast %536 : vector<1x1x32xf32> to vector<1x32xf32>
    %c1_255 = arith.constant 1 : index
    %c0_256 = arith.constant 0 : index
    %c0_257 = arith.constant 0 : index
    %538 = vector.load %arg20[%c1_255, %c0_256, %c0_257] : memref<2x32x32xbf16, #tpu.memory_space<vmem>>, vector<1x32x32xbf16>
    %539 = vector.shape_cast %538 : vector<1x32x32xbf16> to vector<32x32xbf16>
    %c1_258 = arith.constant 1 : index
    %c0_259 = arith.constant 0 : index
    %c0_260 = arith.constant 0 : index
    %540 = vector.load %arg21[%c1_258, %c0_259, %c0_260] : memref<2x1x32xf32, #tpu.memory_space<vmem>>, vector<1x1x32xf32>
    %541 = vector.shape_cast %540 : vector<1x1x32xf32> to vector<1x32xf32>
    %c1_261 = arith.constant 1 : index
    %c0_262 = arith.constant 0 : index
    %c0_263 = arith.constant 0 : index
    %542 = vector.load %arg22[%c1_261, %c0_262, %c0_263] : memref<2x32x64xbf16, #tpu.memory_space<vmem>>, vector<1x32x64xbf16>
    %543 = vector.shape_cast %542 : vector<1x32x64xbf16> to vector<32x64xbf16>
    %c1_264 = arith.constant 1 : index
    %c0_265 = arith.constant 0 : index
    %c0_266 = arith.constant 0 : index
    %544 = vector.load %arg23[%c1_264, %c0_265, %c0_266] : memref<2x1x64xf32, #tpu.memory_space<vmem>>, vector<1x1x64xf32>
    %545 = vector.shape_cast %544 : vector<1x1x64xf32> to vector<1x64xf32>
    %c1_267 = arith.constant 1 : index
    %c0_268 = arith.constant 0 : index
    %c0_269 = arith.constant 0 : index
    %546 = vector.load %arg24[%c1_267, %c0_268, %c0_269] : memref<2x32x32xbf16, #tpu.memory_space<vmem>>, vector<1x32x32xbf16>
    %547 = vector.shape_cast %546 : vector<1x32x32xbf16> to vector<32x32xbf16>
    %c1_270 = arith.constant 1 : index
    %c0_271 = arith.constant 0 : index
    %c0_272 = arith.constant 0 : index
    %548 = vector.load %arg25[%c1_270, %c0_271, %c0_272] : memref<2x1x32xf32, #tpu.memory_space<vmem>>, vector<1x1x32xf32>
    %549 = vector.shape_cast %548 : vector<1x1x32xf32> to vector<1x32xf32>
    %c1_273 = arith.constant 1 : index
    %c0_274 = arith.constant 0 : index
    %c0_275 = arith.constant 0 : index
    %550 = vector.load %arg26[%c1_273, %c0_274, %c0_275] : memref<2x1x32xf32, #tpu.memory_space<vmem>>, vector<1x1x32xf32>
    %551 = vector.shape_cast %550 : vector<1x1x32xf32> to vector<1x32xf32>
    %c1_276 = arith.constant 1 : index
    %c0_277 = arith.constant 0 : index
    %c0_278 = arith.constant 0 : index
    %552 = vector.load %arg27[%c1_276, %c0_277, %c0_278] : memref<2x1x32xf32, #tpu.memory_space<vmem>>, vector<1x1x32xf32>
    %553 = vector.shape_cast %552 : vector<1x1x32xf32> to vector<1x32xf32>
    %c1_279 = arith.constant 1 : index
    %c0_280 = arith.constant 0 : index
    %c0_281 = arith.constant 0 : index
    %554 = vector.load %arg28[%c1_279, %c0_280, %c0_281] : memref<2x32x64xbf16, #tpu.memory_space<vmem>>, vector<1x32x64xbf16>
    %555 = vector.shape_cast %554 : vector<1x32x64xbf16> to vector<32x64xbf16>
    %c1_282 = arith.constant 1 : index
    %c0_283 = arith.constant 0 : index
    %c0_284 = arith.constant 0 : index
    %556 = vector.load %arg29[%c1_282, %c0_283, %c0_284] : memref<2x1x64xf32, #tpu.memory_space<vmem>>, vector<1x1x64xf32>
    %557 = vector.shape_cast %556 : vector<1x1x64xf32> to vector<1x64xf32>
    %c1_285 = arith.constant 1 : index
    %c0_286 = arith.constant 0 : index
    %c0_287 = arith.constant 0 : index
    %558 = vector.load %arg30[%c1_285, %c0_286, %c0_287] : memref<2x64x32xbf16, #tpu.memory_space<vmem>>, vector<1x64x32xbf16>
    %559 = vector.shape_cast %558 : vector<1x64x32xbf16> to vector<64x32xbf16>
    %c1_288 = arith.constant 1 : index
    %c0_289 = arith.constant 0 : index
    %c0_290 = arith.constant 0 : index
    %560 = vector.load %arg31[%c1_288, %c0_289, %c0_290] : memref<2x1x32xf32, #tpu.memory_space<vmem>>, vector<1x1x32xf32>
    %561 = vector.shape_cast %560 : vector<1x1x32xf32> to vector<1x32xf32>
    %c1_291 = arith.constant 1 : index
    %c0_292 = arith.constant 0 : index
    %c0_293 = arith.constant 0 : index
    %562 = vector.load %arg32[%c1_291, %c0_292, %c0_293] : memref<2x1x32xf32, #tpu.memory_space<vmem>>, vector<1x1x32xf32>
    %563 = vector.shape_cast %562 : vector<1x1x32xf32> to vector<1x32xf32>
    %c1_294 = arith.constant 1 : index
    %c0_295 = arith.constant 0 : index
    %c0_296 = arith.constant 0 : index
    %564 = vector.load %arg33[%c1_294, %c0_295, %c0_296] : memref<2x1x32xf32, #tpu.memory_space<vmem>>, vector<1x1x32xf32>
    %565 = vector.shape_cast %564 : vector<1x1x32xf32> to vector<1x32xf32>
    %566 = vector.shape_cast %213 : vector<2x8x32xf32> to vector<16x32xf32>
    %567 = arith.truncf %566 : vector<16x32xf32> to vector<16x32xbf16>
    %cst_297 = arith.constant dense<0.000000e+00> : vector<16x96xf32>
    %568 = tpu.matmul %567, %503, %cst_297 {dimension_numbers = #tpu.dot_dimension_numbers<[1], [0], [0], [1], [0, 0, 1, 1], [], []>} : vector<16x32xbf16>, vector<32x96xbf16>, vector<16x96xf32> -> vector<16x96xf32>
    %569 = vector.broadcast %505 : vector<1x96xf32> to vector<16x96xf32>
    %570 = arith.addf %568, %569 : vector<16x96xf32>
    %571 = vector.shape_cast %570 : vector<16x96xf32> to vector<2x8x96xf32>
    %572 = vector.extract_strided_slice %571 {offsets = [0, 0, 0], sizes = [2, 8, 32], strides = [1, 1, 1]} : vector<2x8x96xf32> to vector<2x8x32xf32>
    %573 = vector.extract_strided_slice %571 {offsets = [0, 0, 32], sizes = [2, 8, 32], strides = [1, 1, 1]} : vector<2x8x96xf32> to vector<2x8x32xf32>
    %574 = vector.extract_strided_slice %571 {offsets = [0, 0, 64], sizes = [2, 8, 32], strides = [1, 1, 1]} : vector<2x8x96xf32> to vector<2x8x32xf32>
    %575 = vector.extract_strided_slice %572 {offsets = [0, 0, 0], sizes = [2, 8, 8], strides = [1, 1, 1]} : vector<2x8x32xf32> to vector<2x8x8xf32>
    %cst_298 = arith.constant 0.353553385 : f32
    %576 = vector.broadcast %cst_298 : f32 to vector<2x8x8xf32>
    %577 = arith.mulf %575, %576 : vector<2x8x8xf32>
    %578 = arith.truncf %577 : vector<2x8x8xf32> to vector<2x8x8xbf16>
    %579 = vector.extract_strided_slice %573 {offsets = [0, 0, 0], sizes = [2, 8, 8], strides = [1, 1, 1]} : vector<2x8x32xf32> to vector<2x8x8xf32>
    %580 = arith.truncf %579 : vector<2x8x8xf32> to vector<2x8x8xbf16>
    %581 = vector.extract_strided_slice %574 {offsets = [0, 0, 0], sizes = [2, 8, 8], strides = [1, 1, 1]} : vector<2x8x32xf32> to vector<2x8x8xf32>
    %582 = arith.truncf %581 : vector<2x8x8xf32> to vector<2x8x8xbf16>
    "tpu.trace_start"() <{level = 10 : i32, message = "bqd,bkd->bqk"}> : () -> ()
    %cst_299 = arith.constant dense<0.000000e+00> : vector<2x8x8xf32>
    %583 = tpu.matmul %578, %580, %cst_299 {dimension_numbers = #tpu.dot_dimension_numbers<[2], [2], [1], [1], [0, 0, 0, 1, 1, 1], [0], [0]>} : vector<2x8x8xbf16>, vector<2x8x8xbf16>, vector<2x8x8xf32> -> vector<2x8x8xf32>
    "tpu.trace_stop"() : () -> ()
    %cst_300 = arith.constant dense<0xFF800000> : vector<2x8xf32>
    %584 = vector.multi_reduction <maximumf>, %583, %cst_300 [2] : vector<2x8x8xf32> to vector<2x8xf32>
    %585 = vector.shape_cast %584 : vector<2x8xf32> to vector<2x8x1xf32>
    %586 = vector.broadcast %585 : vector<2x8x1xf32> to vector<2x8x8xf32>
    %587 = arith.subf %583, %586 : vector<2x8x8xf32>
    %588 = math.exp %587 : vector<2x8x8xf32>
    %cst_301 = arith.constant dense<0.000000e+00> : vector<2x8xf32>
    %589 = vector.multi_reduction <add>, %588, %cst_301 [2] : vector<2x8x8xf32> to vector<2x8xf32>
    %590 = vector.shape_cast %589 : vector<2x8xf32> to vector<2x8x1xf32>
    %591 = vector.broadcast %590 : vector<2x8x1xf32> to vector<2x8x8xf32>
    %592 = arith.divf %588, %591 : vector<2x8x8xf32>
    %593 = arith.truncf %592 : vector<2x8x8xf32> to vector<2x8x8xbf16>
    "tpu.trace_start"() <{level = 10 : i32, message = "bqk,bkd->bqd"}> : () -> ()
    %cst_302 = arith.constant dense<0.000000e+00> : vector<2x8x8xf32>
    %594 = tpu.matmul %593, %582, %cst_302 {dimension_numbers = #tpu.dot_dimension_numbers<[2], [1], [1], [2], [0, 0, 0, 1, 1, 2], [0], [0]>} : vector<2x8x8xbf16>, vector<2x8x8xbf16>, vector<2x8x8xf32> -> vector<2x8x8xf32>
    "tpu.trace_stop"() : () -> ()
    %595 = vector.extract_strided_slice %572 {offsets = [0, 0, 8], sizes = [2, 8, 8], strides = [1, 1, 1]} : vector<2x8x32xf32> to vector<2x8x8xf32>
    %cst_303 = arith.constant 0.353553385 : f32
    %596 = vector.broadcast %cst_303 : f32 to vector<2x8x8xf32>
    %597 = arith.mulf %595, %596 : vector<2x8x8xf32>
    %598 = arith.truncf %597 : vector<2x8x8xf32> to vector<2x8x8xbf16>
    %599 = vector.extract_strided_slice %573 {offsets = [0, 0, 8], sizes = [2, 8, 8], strides = [1, 1, 1]} : vector<2x8x32xf32> to vector<2x8x8xf32>
    %600 = arith.truncf %599 : vector<2x8x8xf32> to vector<2x8x8xbf16>
    %601 = vector.extract_strided_slice %574 {offsets = [0, 0, 8], sizes = [2, 8, 8], strides = [1, 1, 1]} : vector<2x8x32xf32> to vector<2x8x8xf32>
    %602 = arith.truncf %601 : vector<2x8x8xf32> to vector<2x8x8xbf16>
    "tpu.trace_start"() <{level = 10 : i32, message = "bqd,bkd->bqk"}> : () -> ()
    %cst_304 = arith.constant dense<0.000000e+00> : vector<2x8x8xf32>
    %603 = tpu.matmul %598, %600, %cst_304 {dimension_numbers = #tpu.dot_dimension_numbers<[2], [2], [1], [1], [0, 0, 0, 1, 1, 1], [0], [0]>} : vector<2x8x8xbf16>, vector<2x8x8xbf16>, vector<2x8x8xf32> -> vector<2x8x8xf32>
    "tpu.trace_stop"() : () -> ()
    %cst_305 = arith.constant dense<0xFF800000> : vector<2x8xf32>
    %604 = vector.multi_reduction <maximumf>, %603, %cst_305 [2] : vector<2x8x8xf32> to vector<2x8xf32>
    %605 = vector.shape_cast %604 : vector<2x8xf32> to vector<2x8x1xf32>
    %606 = vector.broadcast %605 : vector<2x8x1xf32> to vector<2x8x8xf32>
    %607 = arith.subf %603, %606 : vector<2x8x8xf32>
    %608 = math.exp %607 : vector<2x8x8xf32>
    %cst_306 = arith.constant dense<0.000000e+00> : vector<2x8xf32>
    %609 = vector.multi_reduction <add>, %608, %cst_306 [2] : vector<2x8x8xf32> to vector<2x8xf32>
    %610 = vector.shape_cast %609 : vector<2x8xf32> to vector<2x8x1xf32>
    %611 = vector.broadcast %610 : vector<2x8x1xf32> to vector<2x8x8xf32>
    %612 = arith.divf %608, %611 : vector<2x8x8xf32>
    %613 = arith.truncf %612 : vector<2x8x8xf32> to vector<2x8x8xbf16>
    "tpu.trace_start"() <{level = 10 : i32, message = "bqk,bkd->bqd"}> : () -> ()
    %cst_307 = arith.constant dense<0.000000e+00> : vector<2x8x8xf32>
    %614 = tpu.matmul %613, %602, %cst_307 {dimension_numbers = #tpu.dot_dimension_numbers<[2], [1], [1], [2], [0, 0, 0, 1, 1, 2], [0], [0]>} : vector<2x8x8xbf16>, vector<2x8x8xbf16>, vector<2x8x8xf32> -> vector<2x8x8xf32>
    "tpu.trace_stop"() : () -> ()
    %615 = vector.extract_strided_slice %572 {offsets = [0, 0, 16], sizes = [2, 8, 8], strides = [1, 1, 1]} : vector<2x8x32xf32> to vector<2x8x8xf32>
    %cst_308 = arith.constant 0.353553385 : f32
    %616 = vector.broadcast %cst_308 : f32 to vector<2x8x8xf32>
    %617 = arith.mulf %615, %616 : vector<2x8x8xf32>
    %618 = arith.truncf %617 : vector<2x8x8xf32> to vector<2x8x8xbf16>
    %619 = vector.extract_strided_slice %573 {offsets = [0, 0, 16], sizes = [2, 8, 8], strides = [1, 1, 1]} : vector<2x8x32xf32> to vector<2x8x8xf32>
    %620 = arith.truncf %619 : vector<2x8x8xf32> to vector<2x8x8xbf16>
    %621 = vector.extract_strided_slice %574 {offsets = [0, 0, 16], sizes = [2, 8, 8], strides = [1, 1, 1]} : vector<2x8x32xf32> to vector<2x8x8xf32>
    %622 = arith.truncf %621 : vector<2x8x8xf32> to vector<2x8x8xbf16>
    "tpu.trace_start"() <{level = 10 : i32, message = "bqd,bkd->bqk"}> : () -> ()
    %cst_309 = arith.constant dense<0.000000e+00> : vector<2x8x8xf32>
    %623 = tpu.matmul %618, %620, %cst_309 {dimension_numbers = #tpu.dot_dimension_numbers<[2], [2], [1], [1], [0, 0, 0, 1, 1, 1], [0], [0]>} : vector<2x8x8xbf16>, vector<2x8x8xbf16>, vector<2x8x8xf32> -> vector<2x8x8xf32>
    "tpu.trace_stop"() : () -> ()
    %cst_310 = arith.constant dense<0xFF800000> : vector<2x8xf32>
    %624 = vector.multi_reduction <maximumf>, %623, %cst_310 [2] : vector<2x8x8xf32> to vector<2x8xf32>
    %625 = vector.shape_cast %624 : vector<2x8xf32> to vector<2x8x1xf32>
    %626 = vector.broadcast %625 : vector<2x8x1xf32> to vector<2x8x8xf32>
    %627 = arith.subf %623, %626 : vector<2x8x8xf32>
    %628 = math.exp %627 : vector<2x8x8xf32>
    %cst_311 = arith.constant dense<0.000000e+00> : vector<2x8xf32>
    %629 = vector.multi_reduction <add>, %628, %cst_311 [2] : vector<2x8x8xf32> to vector<2x8xf32>
    %630 = vector.shape_cast %629 : vector<2x8xf32> to vector<2x8x1xf32>
    %631 = vector.broadcast %630 : vector<2x8x1xf32> to vector<2x8x8xf32>
    %632 = arith.divf %628, %631 : vector<2x8x8xf32>
    %633 = arith.truncf %632 : vector<2x8x8xf32> to vector<2x8x8xbf16>
    "tpu.trace_start"() <{level = 10 : i32, message = "bqk,bkd->bqd"}> : () -> ()
    %cst_312 = arith.constant dense<0.000000e+00> : vector<2x8x8xf32>
    %634 = tpu.matmul %633, %622, %cst_312 {dimension_numbers = #tpu.dot_dimension_numbers<[2], [1], [1], [2], [0, 0, 0, 1, 1, 2], [0], [0]>} : vector<2x8x8xbf16>, vector<2x8x8xbf16>, vector<2x8x8xf32> -> vector<2x8x8xf32>
    "tpu.trace_stop"() : () -> ()
    %635 = vector.extract_strided_slice %572 {offsets = [0, 0, 24], sizes = [2, 8, 8], strides = [1, 1, 1]} : vector<2x8x32xf32> to vector<2x8x8xf32>
    %cst_313 = arith.constant 0.353553385 : f32
    %636 = vector.broadcast %cst_313 : f32 to vector<2x8x8xf32>
    %637 = arith.mulf %635, %636 : vector<2x8x8xf32>
    %638 = arith.truncf %637 : vector<2x8x8xf32> to vector<2x8x8xbf16>
    %639 = vector.extract_strided_slice %573 {offsets = [0, 0, 24], sizes = [2, 8, 8], strides = [1, 1, 1]} : vector<2x8x32xf32> to vector<2x8x8xf32>
    %640 = arith.truncf %639 : vector<2x8x8xf32> to vector<2x8x8xbf16>
    %641 = vector.extract_strided_slice %574 {offsets = [0, 0, 24], sizes = [2, 8, 8], strides = [1, 1, 1]} : vector<2x8x32xf32> to vector<2x8x8xf32>
    %642 = arith.truncf %641 : vector<2x8x8xf32> to vector<2x8x8xbf16>
    "tpu.trace_start"() <{level = 10 : i32, message = "bqd,bkd->bqk"}> : () -> ()
    %cst_314 = arith.constant dense<0.000000e+00> : vector<2x8x8xf32>
    %643 = tpu.matmul %638, %640, %cst_314 {dimension_numbers = #tpu.dot_dimension_numbers<[2], [2], [1], [1], [0, 0, 0, 1, 1, 1], [0], [0]>} : vector<2x8x8xbf16>, vector<2x8x8xbf16>, vector<2x8x8xf32> -> vector<2x8x8xf32>
    "tpu.trace_stop"() : () -> ()
    %cst_315 = arith.constant dense<0xFF800000> : vector<2x8xf32>
    %644 = vector.multi_reduction <maximumf>, %643, %cst_315 [2] : vector<2x8x8xf32> to vector<2x8xf32>
    %645 = vector.shape_cast %644 : vector<2x8xf32> to vector<2x8x1xf32>
    %646 = vector.broadcast %645 : vector<2x8x1xf32> to vector<2x8x8xf32>
    %647 = arith.subf %643, %646 : vector<2x8x8xf32>
    %648 = math.exp %647 : vector<2x8x8xf32>
    %cst_316 = arith.constant dense<0.000000e+00> : vector<2x8xf32>
    %649 = vector.multi_reduction <add>, %648, %cst_316 [2] : vector<2x8x8xf32> to vector<2x8xf32>
    %650 = vector.shape_cast %649 : vector<2x8xf32> to vector<2x8x1xf32>
    %651 = vector.broadcast %650 : vector<2x8x1xf32> to vector<2x8x8xf32>
    %652 = arith.divf %648, %651 : vector<2x8x8xf32>
    %653 = arith.truncf %652 : vector<2x8x8xf32> to vector<2x8x8xbf16>
    "tpu.trace_start"() <{level = 10 : i32, message = "bqk,bkd->bqd"}> : () -> ()
    %cst_317 = arith.constant dense<0.000000e+00> : vector<2x8x8xf32>
    %654 = tpu.matmul %653, %642, %cst_317 {dimension_numbers = #tpu.dot_dimension_numbers<[2], [1], [1], [2], [0, 0, 0, 1, 1, 2], [0], [0]>} : vector<2x8x8xbf16>, vector<2x8x8xbf16>, vector<2x8x8xf32> -> vector<2x8x8xf32>
    "tpu.trace_stop"() : () -> ()
    %655 = tpu.concatenate %594, %614, %634, %654 in 2 : vector<2x8x8xf32>, vector<2x8x8xf32>, vector<2x8x8xf32>, vector<2x8x8xf32> -> vector<2x8x32xf32>
    %656 = vector.shape_cast %655 : vector<2x8x32xf32> to vector<16x32xf32>
    %657 = arith.truncf %656 : vector<16x32xf32> to vector<16x32xbf16>
    %cst_318 = arith.constant dense<0.000000e+00> : vector<16x32xf32>
    %658 = tpu.matmul %657, %507, %cst_318 {dimension_numbers = #tpu.dot_dimension_numbers<[1], [0], [0], [1], [0, 0, 1, 1], [], []>} : vector<16x32xbf16>, vector<32x32xbf16>, vector<16x32xf32> -> vector<16x32xf32>
    %659 = vector.broadcast %509 : vector<1x32xf32> to vector<16x32xf32>
    %660 = arith.addf %658, %659 : vector<16x32xf32>
    %661 = arith.addf %566, %660 : vector<16x32xf32>
    %cst_319 = arith.constant dense<0.000000e+00> : vector<16xf32>
    %662 = vector.multi_reduction <add>, %661, %cst_319 [1] : vector<16x32xf32> to vector<16xf32>
    %663 = vector.shape_cast %662 : vector<16xf32> to vector<16x1xf32>
    %cst_320 = arith.constant 3.200000e+01 : f32
    %664 = vector.broadcast %cst_320 : f32 to vector<16x1xf32>
    %665 = arith.divf %663, %664 : vector<16x1xf32>
    %666 = vector.broadcast %665 : vector<16x1xf32> to vector<16x32xf32>
    %667 = arith.subf %661, %666 : vector<16x32xf32>
    %668 = arith.mulf %667, %667 : vector<16x32xf32>
    %cst_321 = arith.constant dense<0.000000e+00> : vector<16xf32>
    %669 = vector.multi_reduction <add>, %668, %cst_321 [1] : vector<16x32xf32> to vector<16xf32>
    %670 = vector.shape_cast %669 : vector<16xf32> to vector<16x1xf32>
    %cst_322 = arith.constant 3.200000e+01 : f32
    %671 = vector.broadcast %cst_322 : f32 to vector<16x1xf32>
    %672 = arith.divf %670, %671 : vector<16x1xf32>
    %cst_323 = arith.constant 9.99999974E-6 : f32
    %673 = vector.broadcast %cst_323 : f32 to vector<16x1xf32>
    %674 = arith.addf %672, %673 : vector<16x1xf32>
    %675 = math.rsqrt %674 : vector<16x1xf32>
    %676 = vector.broadcast %675 : vector<16x1xf32> to vector<16x32xf32>
    %677 = arith.mulf %667, %676 : vector<16x32xf32>
    %678 = vector.broadcast %511 : vector<1x32xf32> to vector<16x32xf32>
    %679 = arith.mulf %677, %678 : vector<16x32xf32>
    %680 = vector.broadcast %513 : vector<1x32xf32> to vector<16x32xf32>
    %681 = arith.addf %679, %680 : vector<16x32xf32>
    %682 = arith.truncf %681 : vector<16x32xf32> to vector<16x32xbf16>
    %cst_324 = arith.constant dense<0.000000e+00> : vector<16x64xf32>
    %683 = tpu.matmul %682, %515, %cst_324 {dimension_numbers = #tpu.dot_dimension_numbers<[1], [0], [0], [1], [0, 0, 1, 1], [], []>} : vector<16x32xbf16>, vector<32x64xbf16>, vector<16x64xf32> -> vector<16x64xf32>
    %684 = vector.broadcast %517 : vector<1x64xf32> to vector<16x64xf32>
    %685 = arith.addf %683, %684 : vector<16x64xf32>
    %cst_325 = arith.constant 0.000000e+00 : f32
    %686 = vector.broadcast %cst_325 : f32 to vector<16x64xf32>
    %687 = arith.maximumf %685, %686 : vector<16x64xf32>
    %688 = arith.truncf %687 : vector<16x64xf32> to vector<16x64xbf16>
    %cst_326 = arith.constant dense<0.000000e+00> : vector<16x32xf32>
    %689 = tpu.matmul %688, %519, %cst_326 {dimension_numbers = #tpu.dot_dimension_numbers<[1], [0], [0], [1], [0, 0, 1, 1], [], []>} : vector<16x64xbf16>, vector<64x32xbf16>, vector<16x32xf32> -> vector<16x32xf32>
    %690 = vector.broadcast %521 : vector<1x32xf32> to vector<16x32xf32>
    %691 = arith.addf %689, %690 : vector<16x32xf32>
    %692 = arith.addf %681, %691 : vector<16x32xf32>
    %cst_327 = arith.constant dense<0.000000e+00> : vector<16xf32>
    %693 = vector.multi_reduction <add>, %692, %cst_327 [1] : vector<16x32xf32> to vector<16xf32>
    %694 = vector.shape_cast %693 : vector<16xf32> to vector<16x1xf32>
    %cst_328 = arith.constant 3.200000e+01 : f32
    %695 = vector.broadcast %cst_328 : f32 to vector<16x1xf32>
    %696 = arith.divf %694, %695 : vector<16x1xf32>
    %697 = vector.broadcast %696 : vector<16x1xf32> to vector<16x32xf32>
    %698 = arith.subf %692, %697 : vector<16x32xf32>
    %699 = arith.mulf %698, %698 : vector<16x32xf32>
    %cst_329 = arith.constant dense<0.000000e+00> : vector<16xf32>
    %700 = vector.multi_reduction <add>, %699, %cst_329 [1] : vector<16x32xf32> to vector<16xf32>
    %701 = vector.shape_cast %700 : vector<16xf32> to vector<16x1xf32>
    %cst_330 = arith.constant 3.200000e+01 : f32
    %702 = vector.broadcast %cst_330 : f32 to vector<16x1xf32>
    %703 = arith.divf %701, %702 : vector<16x1xf32>
    %cst_331 = arith.constant 9.99999974E-6 : f32
    %704 = vector.broadcast %cst_331 : f32 to vector<16x1xf32>
    %705 = arith.addf %703, %704 : vector<16x1xf32>
    %706 = math.rsqrt %705 : vector<16x1xf32>
    %707 = vector.broadcast %706 : vector<16x1xf32> to vector<16x32xf32>
    %708 = arith.mulf %698, %707 : vector<16x32xf32>
    %709 = vector.broadcast %523 : vector<1x32xf32> to vector<16x32xf32>
    %710 = arith.mulf %708, %709 : vector<16x32xf32>
    %711 = vector.broadcast %525 : vector<1x32xf32> to vector<16x32xf32>
    %712 = arith.addf %710, %711 : vector<16x32xf32>
    %713 = vector.shape_cast %712 : vector<16x32xf32> to vector<2x8x32xf32>
    %714 = vector.shape_cast %501 : vector<2x8x32xf32> to vector<16x32xf32>
    %715 = arith.truncf %714 : vector<16x32xf32> to vector<16x32xbf16>
    %cst_332 = arith.constant dense<0.000000e+00> : vector<16x96xf32>
    %716 = tpu.matmul %715, %527, %cst_332 {dimension_numbers = #tpu.dot_dimension_numbers<[1], [0], [0], [1], [0, 0, 1, 1], [], []>} : vector<16x32xbf16>, vector<32x96xbf16>, vector<16x96xf32> -> vector<16x96xf32>
    %717 = vector.broadcast %529 : vector<1x96xf32> to vector<16x96xf32>
    %718 = arith.addf %716, %717 : vector<16x96xf32>
    %719 = vector.shape_cast %718 : vector<16x96xf32> to vector<2x8x96xf32>
    %720 = vector.extract_strided_slice %719 {offsets = [0, 0, 0], sizes = [2, 8, 32], strides = [1, 1, 1]} : vector<2x8x96xf32> to vector<2x8x32xf32>
    %721 = vector.extract_strided_slice %719 {offsets = [0, 0, 32], sizes = [2, 8, 32], strides = [1, 1, 1]} : vector<2x8x96xf32> to vector<2x8x32xf32>
    %722 = vector.extract_strided_slice %719 {offsets = [0, 0, 64], sizes = [2, 8, 32], strides = [1, 1, 1]} : vector<2x8x96xf32> to vector<2x8x32xf32>
    %723 = tpu.iota {dimensions = array<i32: 0>} : vector<8x8xi32>
    %724 = tpu.iota {dimensions = array<i32: 1>} : vector<8x8xi32>
    %725 = arith.cmpi sle, %724, %723 : vector<8x8xi32>
    %726 = vector.shape_cast %725 : vector<8x8xi1> to vector<1x8x8xi1>
    %727 = vector.extract_strided_slice %720 {offsets = [0, 0, 0], sizes = [2, 8, 8], strides = [1, 1, 1]} : vector<2x8x32xf32> to vector<2x8x8xf32>
    %cst_333 = arith.constant 0.353553385 : f32
    %728 = vector.broadcast %cst_333 : f32 to vector<2x8x8xf32>
    %729 = arith.mulf %727, %728 : vector<2x8x8xf32>
    %730 = arith.truncf %729 : vector<2x8x8xf32> to vector<2x8x8xbf16>
    %731 = vector.extract_strided_slice %721 {offsets = [0, 0, 0], sizes = [2, 8, 8], strides = [1, 1, 1]} : vector<2x8x32xf32> to vector<2x8x8xf32>
    %732 = arith.truncf %731 : vector<2x8x8xf32> to vector<2x8x8xbf16>
    %733 = vector.extract_strided_slice %722 {offsets = [0, 0, 0], sizes = [2, 8, 8], strides = [1, 1, 1]} : vector<2x8x32xf32> to vector<2x8x8xf32>
    %734 = arith.truncf %733 : vector<2x8x8xf32> to vector<2x8x8xbf16>
    "tpu.trace_start"() <{level = 10 : i32, message = "bqd,bkd->bqk"}> : () -> ()
    %cst_334 = arith.constant dense<0.000000e+00> : vector<2x8x8xf32>
    %735 = tpu.matmul %730, %732, %cst_334 {dimension_numbers = #tpu.dot_dimension_numbers<[2], [2], [1], [1], [0, 0, 0, 1, 1, 1], [0], [0]>} : vector<2x8x8xbf16>, vector<2x8x8xbf16>, vector<2x8x8xf32> -> vector<2x8x8xf32>
    %cst_335 = arith.constant -1.000000e+30 : f32
    "tpu.trace_stop"() : () -> ()
    %736 = vector.shape_cast %726 : vector<1x8x8xi1> to vector<1x8x8xi1>
    %737 = vector.broadcast %736 : vector<1x8x8xi1> to vector<2x8x8xi1>
    %738 = vector.broadcast %cst_335 : f32 to vector<2x8x8xf32>
    %739 = arith.select %737, %735, %738 : vector<2x8x8xi1>, vector<2x8x8xf32>
    %cst_336 = arith.constant dense<0xFF800000> : vector<2x8xf32>
    %740 = vector.multi_reduction <maximumf>, %739, %cst_336 [2] : vector<2x8x8xf32> to vector<2x8xf32>
    %741 = vector.shape_cast %740 : vector<2x8xf32> to vector<2x8x1xf32>
    %742 = vector.broadcast %741 : vector<2x8x1xf32> to vector<2x8x8xf32>
    %743 = arith.subf %739, %742 : vector<2x8x8xf32>
    %744 = math.exp %743 : vector<2x8x8xf32>
    %cst_337 = arith.constant dense<0.000000e+00> : vector<2x8xf32>
    %745 = vector.multi_reduction <add>, %744, %cst_337 [2] : vector<2x8x8xf32> to vector<2x8xf32>
    %746 = vector.shape_cast %745 : vector<2x8xf32> to vector<2x8x1xf32>
    %747 = vector.broadcast %746 : vector<2x8x1xf32> to vector<2x8x8xf32>
    %748 = arith.divf %744, %747 : vector<2x8x8xf32>
    %749 = arith.truncf %748 : vector<2x8x8xf32> to vector<2x8x8xbf16>
    "tpu.trace_start"() <{level = 10 : i32, message = "bqk,bkd->bqd"}> : () -> ()
    %cst_338 = arith.constant dense<0.000000e+00> : vector<2x8x8xf32>
    %750 = tpu.matmul %749, %734, %cst_338 {dimension_numbers = #tpu.dot_dimension_numbers<[2], [1], [1], [2], [0, 0, 0, 1, 1, 2], [0], [0]>} : vector<2x8x8xbf16>, vector<2x8x8xbf16>, vector<2x8x8xf32> -> vector<2x8x8xf32>
    "tpu.trace_stop"() : () -> ()
    %751 = vector.extract_strided_slice %720 {offsets = [0, 0, 8], sizes = [2, 8, 8], strides = [1, 1, 1]} : vector<2x8x32xf32> to vector<2x8x8xf32>
    %cst_339 = arith.constant 0.353553385 : f32
    %752 = vector.broadcast %cst_339 : f32 to vector<2x8x8xf32>
    %753 = arith.mulf %751, %752 : vector<2x8x8xf32>
    %754 = arith.truncf %753 : vector<2x8x8xf32> to vector<2x8x8xbf16>
    %755 = vector.extract_strided_slice %721 {offsets = [0, 0, 8], sizes = [2, 8, 8], strides = [1, 1, 1]} : vector<2x8x32xf32> to vector<2x8x8xf32>
    %756 = arith.truncf %755 : vector<2x8x8xf32> to vector<2x8x8xbf16>
    %757 = vector.extract_strided_slice %722 {offsets = [0, 0, 8], sizes = [2, 8, 8], strides = [1, 1, 1]} : vector<2x8x32xf32> to vector<2x8x8xf32>
    %758 = arith.truncf %757 : vector<2x8x8xf32> to vector<2x8x8xbf16>
    "tpu.trace_start"() <{level = 10 : i32, message = "bqd,bkd->bqk"}> : () -> ()
    %cst_340 = arith.constant dense<0.000000e+00> : vector<2x8x8xf32>
    %759 = tpu.matmul %754, %756, %cst_340 {dimension_numbers = #tpu.dot_dimension_numbers<[2], [2], [1], [1], [0, 0, 0, 1, 1, 1], [0], [0]>} : vector<2x8x8xbf16>, vector<2x8x8xbf16>, vector<2x8x8xf32> -> vector<2x8x8xf32>
    %cst_341 = arith.constant -1.000000e+30 : f32
    "tpu.trace_stop"() : () -> ()
    %760 = vector.shape_cast %726 : vector<1x8x8xi1> to vector<1x8x8xi1>
    %761 = vector.broadcast %760 : vector<1x8x8xi1> to vector<2x8x8xi1>
    %762 = vector.broadcast %cst_341 : f32 to vector<2x8x8xf32>
    %763 = arith.select %761, %759, %762 : vector<2x8x8xi1>, vector<2x8x8xf32>
    %cst_342 = arith.constant dense<0xFF800000> : vector<2x8xf32>
    %764 = vector.multi_reduction <maximumf>, %763, %cst_342 [2] : vector<2x8x8xf32> to vector<2x8xf32>
    %765 = vector.shape_cast %764 : vector<2x8xf32> to vector<2x8x1xf32>
    %766 = vector.broadcast %765 : vector<2x8x1xf32> to vector<2x8x8xf32>
    %767 = arith.subf %763, %766 : vector<2x8x8xf32>
    %768 = math.exp %767 : vector<2x8x8xf32>
    %cst_343 = arith.constant dense<0.000000e+00> : vector<2x8xf32>
    %769 = vector.multi_reduction <add>, %768, %cst_343 [2] : vector<2x8x8xf32> to vector<2x8xf32>
    %770 = vector.shape_cast %769 : vector<2x8xf32> to vector<2x8x1xf32>
    %771 = vector.broadcast %770 : vector<2x8x1xf32> to vector<2x8x8xf32>
    %772 = arith.divf %768, %771 : vector<2x8x8xf32>
    %773 = arith.truncf %772 : vector<2x8x8xf32> to vector<2x8x8xbf16>
    "tpu.trace_start"() <{level = 10 : i32, message = "bqk,bkd->bqd"}> : () -> ()
    %cst_344 = arith.constant dense<0.000000e+00> : vector<2x8x8xf32>
    %774 = tpu.matmul %773, %758, %cst_344 {dimension_numbers = #tpu.dot_dimension_numbers<[2], [1], [1], [2], [0, 0, 0, 1, 1, 2], [0], [0]>} : vector<2x8x8xbf16>, vector<2x8x8xbf16>, vector<2x8x8xf32> -> vector<2x8x8xf32>
    "tpu.trace_stop"() : () -> ()
    %775 = vector.extract_strided_slice %720 {offsets = [0, 0, 16], sizes = [2, 8, 8], strides = [1, 1, 1]} : vector<2x8x32xf32> to vector<2x8x8xf32>
    %cst_345 = arith.constant 0.353553385 : f32
    %776 = vector.broadcast %cst_345 : f32 to vector<2x8x8xf32>
    %777 = arith.mulf %775, %776 : vector<2x8x8xf32>
    %778 = arith.truncf %777 : vector<2x8x8xf32> to vector<2x8x8xbf16>
    %779 = vector.extract_strided_slice %721 {offsets = [0, 0, 16], sizes = [2, 8, 8], strides = [1, 1, 1]} : vector<2x8x32xf32> to vector<2x8x8xf32>
    %780 = arith.truncf %779 : vector<2x8x8xf32> to vector<2x8x8xbf16>
    %781 = vector.extract_strided_slice %722 {offsets = [0, 0, 16], sizes = [2, 8, 8], strides = [1, 1, 1]} : vector<2x8x32xf32> to vector<2x8x8xf32>
    %782 = arith.truncf %781 : vector<2x8x8xf32> to vector<2x8x8xbf16>
    "tpu.trace_start"() <{level = 10 : i32, message = "bqd,bkd->bqk"}> : () -> ()
    %cst_346 = arith.constant dense<0.000000e+00> : vector<2x8x8xf32>
    %783 = tpu.matmul %778, %780, %cst_346 {dimension_numbers = #tpu.dot_dimension_numbers<[2], [2], [1], [1], [0, 0, 0, 1, 1, 1], [0], [0]>} : vector<2x8x8xbf16>, vector<2x8x8xbf16>, vector<2x8x8xf32> -> vector<2x8x8xf32>
    %cst_347 = arith.constant -1.000000e+30 : f32
    "tpu.trace_stop"() : () -> ()
    %784 = vector.shape_cast %726 : vector<1x8x8xi1> to vector<1x8x8xi1>
    %785 = vector.broadcast %784 : vector<1x8x8xi1> to vector<2x8x8xi1>
    %786 = vector.broadcast %cst_347 : f32 to vector<2x8x8xf32>
    %787 = arith.select %785, %783, %786 : vector<2x8x8xi1>, vector<2x8x8xf32>
    %cst_348 = arith.constant dense<0xFF800000> : vector<2x8xf32>
    %788 = vector.multi_reduction <maximumf>, %787, %cst_348 [2] : vector<2x8x8xf32> to vector<2x8xf32>
    %789 = vector.shape_cast %788 : vector<2x8xf32> to vector<2x8x1xf32>
    %790 = vector.broadcast %789 : vector<2x8x1xf32> to vector<2x8x8xf32>
    %791 = arith.subf %787, %790 : vector<2x8x8xf32>
    %792 = math.exp %791 : vector<2x8x8xf32>
    %cst_349 = arith.constant dense<0.000000e+00> : vector<2x8xf32>
    %793 = vector.multi_reduction <add>, %792, %cst_349 [2] : vector<2x8x8xf32> to vector<2x8xf32>
    %794 = vector.shape_cast %793 : vector<2x8xf32> to vector<2x8x1xf32>
    %795 = vector.broadcast %794 : vector<2x8x1xf32> to vector<2x8x8xf32>
    %796 = arith.divf %792, %795 : vector<2x8x8xf32>
    %797 = arith.truncf %796 : vector<2x8x8xf32> to vector<2x8x8xbf16>
    "tpu.trace_start"() <{level = 10 : i32, message = "bqk,bkd->bqd"}> : () -> ()
    %cst_350 = arith.constant dense<0.000000e+00> : vector<2x8x8xf32>
    %798 = tpu.matmul %797, %782, %cst_350 {dimension_numbers = #tpu.dot_dimension_numbers<[2], [1], [1], [2], [0, 0, 0, 1, 1, 2], [0], [0]>} : vector<2x8x8xbf16>, vector<2x8x8xbf16>, vector<2x8x8xf32> -> vector<2x8x8xf32>
    "tpu.trace_stop"() : () -> ()
    %799 = vector.extract_strided_slice %720 {offsets = [0, 0, 24], sizes = [2, 8, 8], strides = [1, 1, 1]} : vector<2x8x32xf32> to vector<2x8x8xf32>
    %cst_351 = arith.constant 0.353553385 : f32
    %800 = vector.broadcast %cst_351 : f32 to vector<2x8x8xf32>
    %801 = arith.mulf %799, %800 : vector<2x8x8xf32>
    %802 = arith.truncf %801 : vector<2x8x8xf32> to vector<2x8x8xbf16>
    %803 = vector.extract_strided_slice %721 {offsets = [0, 0, 24], sizes = [2, 8, 8], strides = [1, 1, 1]} : vector<2x8x32xf32> to vector<2x8x8xf32>
    %804 = arith.truncf %803 : vector<2x8x8xf32> to vector<2x8x8xbf16>
    %805 = vector.extract_strided_slice %722 {offsets = [0, 0, 24], sizes = [2, 8, 8], strides = [1, 1, 1]} : vector<2x8x32xf32> to vector<2x8x8xf32>
    %806 = arith.truncf %805 : vector<2x8x8xf32> to vector<2x8x8xbf16>
    "tpu.trace_start"() <{level = 10 : i32, message = "bqd,bkd->bqk"}> : () -> ()
    %cst_352 = arith.constant dense<0.000000e+00> : vector<2x8x8xf32>
    %807 = tpu.matmul %802, %804, %cst_352 {dimension_numbers = #tpu.dot_dimension_numbers<[2], [2], [1], [1], [0, 0, 0, 1, 1, 1], [0], [0]>} : vector<2x8x8xbf16>, vector<2x8x8xbf16>, vector<2x8x8xf32> -> vector<2x8x8xf32>
    %cst_353 = arith.constant -1.000000e+30 : f32
    "tpu.trace_stop"() : () -> ()
    %808 = vector.shape_cast %726 : vector<1x8x8xi1> to vector<1x8x8xi1>
    %809 = vector.broadcast %808 : vector<1x8x8xi1> to vector<2x8x8xi1>
    %810 = vector.broadcast %cst_353 : f32 to vector<2x8x8xf32>
    %811 = arith.select %809, %807, %810 : vector<2x8x8xi1>, vector<2x8x8xf32>
    %cst_354 = arith.constant dense<0xFF800000> : vector<2x8xf32>
    %812 = vector.multi_reduction <maximumf>, %811, %cst_354 [2] : vector<2x8x8xf32> to vector<2x8xf32>
    %813 = vector.shape_cast %812 : vector<2x8xf32> to vector<2x8x1xf32>
    %814 = vector.broadcast %813 : vector<2x8x1xf32> to vector<2x8x8xf32>
    %815 = arith.subf %811, %814 : vector<2x8x8xf32>
    %816 = math.exp %815 : vector<2x8x8xf32>
    %cst_355 = arith.constant dense<0.000000e+00> : vector<2x8xf32>
    %817 = vector.multi_reduction <add>, %816, %cst_355 [2] : vector<2x8x8xf32> to vector<2x8xf32>
    %818 = vector.shape_cast %817 : vector<2x8xf32> to vector<2x8x1xf32>
    %819 = vector.broadcast %818 : vector<2x8x1xf32> to vector<2x8x8xf32>
    %820 = arith.divf %816, %819 : vector<2x8x8xf32>
    %821 = arith.truncf %820 : vector<2x8x8xf32> to vector<2x8x8xbf16>
    "tpu.trace_start"() <{level = 10 : i32, message = "bqk,bkd->bqd"}> : () -> ()
    %cst_356 = arith.constant dense<0.000000e+00> : vector<2x8x8xf32>
    %822 = tpu.matmul %821, %806, %cst_356 {dimension_numbers = #tpu.dot_dimension_numbers<[2], [1], [1], [2], [0, 0, 0, 1, 1, 2], [0], [0]>} : vector<2x8x8xbf16>, vector<2x8x8xbf16>, vector<2x8x8xf32> -> vector<2x8x8xf32>
    "tpu.trace_stop"() : () -> ()
    %823 = tpu.concatenate %750, %774, %798, %822 in 2 : vector<2x8x8xf32>, vector<2x8x8xf32>, vector<2x8x8xf32>, vector<2x8x8xf32> -> vector<2x8x32xf32>
    %824 = vector.shape_cast %823 : vector<2x8x32xf32> to vector<16x32xf32>
    %825 = arith.truncf %824 : vector<16x32xf32> to vector<16x32xbf16>
    %cst_357 = arith.constant dense<0.000000e+00> : vector<16x32xf32>
    %826 = tpu.matmul %825, %531, %cst_357 {dimension_numbers = #tpu.dot_dimension_numbers<[1], [0], [0], [1], [0, 0, 1, 1], [], []>} : vector<16x32xbf16>, vector<32x32xbf16>, vector<16x32xf32> -> vector<16x32xf32>
    %827 = vector.broadcast %533 : vector<1x32xf32> to vector<16x32xf32>
    %828 = arith.addf %826, %827 : vector<16x32xf32>
    %829 = arith.addf %714, %828 : vector<16x32xf32>
    %cst_358 = arith.constant dense<0.000000e+00> : vector<16xf32>
    %830 = vector.multi_reduction <add>, %829, %cst_358 [1] : vector<16x32xf32> to vector<16xf32>
    %831 = vector.shape_cast %830 : vector<16xf32> to vector<16x1xf32>
    %cst_359 = arith.constant 3.200000e+01 : f32
    %832 = vector.broadcast %cst_359 : f32 to vector<16x1xf32>
    %833 = arith.divf %831, %832 : vector<16x1xf32>
    %834 = vector.broadcast %833 : vector<16x1xf32> to vector<16x32xf32>
    %835 = arith.subf %829, %834 : vector<16x32xf32>
    %836 = arith.mulf %835, %835 : vector<16x32xf32>
    %cst_360 = arith.constant dense<0.000000e+00> : vector<16xf32>
    %837 = vector.multi_reduction <add>, %836, %cst_360 [1] : vector<16x32xf32> to vector<16xf32>
    %838 = vector.shape_cast %837 : vector<16xf32> to vector<16x1xf32>
    %cst_361 = arith.constant 3.200000e+01 : f32
    %839 = vector.broadcast %cst_361 : f32 to vector<16x1xf32>
    %840 = arith.divf %838, %839 : vector<16x1xf32>
    %cst_362 = arith.constant 9.99999974E-6 : f32
    %841 = vector.broadcast %cst_362 : f32 to vector<16x1xf32>
    %842 = arith.addf %840, %841 : vector<16x1xf32>
    %843 = math.rsqrt %842 : vector<16x1xf32>
    %844 = vector.broadcast %843 : vector<16x1xf32> to vector<16x32xf32>
    %845 = arith.mulf %835, %844 : vector<16x32xf32>
    %846 = vector.broadcast %535 : vector<1x32xf32> to vector<16x32xf32>
    %847 = arith.mulf %845, %846 : vector<16x32xf32>
    %848 = vector.broadcast %537 : vector<1x32xf32> to vector<16x32xf32>
    %849 = arith.addf %847, %848 : vector<16x32xf32>
    %850 = arith.truncf %849 : vector<16x32xf32> to vector<16x32xbf16>
    %cst_363 = arith.constant dense<0.000000e+00> : vector<16x32xf32>
    %851 = tpu.matmul %850, %539, %cst_363 {dimension_numbers = #tpu.dot_dimension_numbers<[1], [0], [0], [1], [0, 0, 1, 1], [], []>} : vector<16x32xbf16>, vector<32x32xbf16>, vector<16x32xf32> -> vector<16x32xf32>
    %852 = vector.broadcast %541 : vector<1x32xf32> to vector<16x32xf32>
    %853 = arith.addf %851, %852 : vector<16x32xf32>
    %854 = vector.shape_cast %853 : vector<16x32xf32> to vector<2x8x32xf32>
    %855 = vector.shape_cast %713 : vector<2x8x32xf32> to vector<16x32xf32>
    %856 = arith.truncf %855 : vector<16x32xf32> to vector<16x32xbf16>
    %cst_364 = arith.constant dense<0.000000e+00> : vector<16x64xf32>
    %857 = tpu.matmul %856, %543, %cst_364 {dimension_numbers = #tpu.dot_dimension_numbers<[1], [0], [0], [1], [0, 0, 1, 1], [], []>} : vector<16x32xbf16>, vector<32x64xbf16>, vector<16x64xf32> -> vector<16x64xf32>
    %858 = vector.broadcast %545 : vector<1x64xf32> to vector<16x64xf32>
    %859 = arith.addf %857, %858 : vector<16x64xf32>
    %860 = vector.shape_cast %859 : vector<16x64xf32> to vector<2x8x64xf32>
    %861 = vector.extract_strided_slice %860 {offsets = [0, 0, 0], sizes = [2, 8, 32], strides = [1, 1, 1]} : vector<2x8x64xf32> to vector<2x8x32xf32>
    %862 = vector.extract_strided_slice %860 {offsets = [0, 0, 32], sizes = [2, 8, 32], strides = [1, 1, 1]} : vector<2x8x64xf32> to vector<2x8x32xf32>
    %863 = vector.extract_strided_slice %854 {offsets = [0, 0, 0], sizes = [2, 8, 8], strides = [1, 1, 1]} : vector<2x8x32xf32> to vector<2x8x8xf32>
    %cst_365 = arith.constant 0.353553385 : f32
    %864 = vector.broadcast %cst_365 : f32 to vector<2x8x8xf32>
    %865 = arith.mulf %863, %864 : vector<2x8x8xf32>
    %866 = arith.truncf %865 : vector<2x8x8xf32> to vector<2x8x8xbf16>
    %867 = vector.extract_strided_slice %861 {offsets = [0, 0, 0], sizes = [2, 8, 8], strides = [1, 1, 1]} : vector<2x8x32xf32> to vector<2x8x8xf32>
    %868 = arith.truncf %867 : vector<2x8x8xf32> to vector<2x8x8xbf16>
    %869 = vector.extract_strided_slice %862 {offsets = [0, 0, 0], sizes = [2, 8, 8], strides = [1, 1, 1]} : vector<2x8x32xf32> to vector<2x8x8xf32>
    %870 = arith.truncf %869 : vector<2x8x8xf32> to vector<2x8x8xbf16>
    "tpu.trace_start"() <{level = 10 : i32, message = "bqd,bkd->bqk"}> : () -> ()
    %cst_366 = arith.constant dense<0.000000e+00> : vector<2x8x8xf32>
    %871 = tpu.matmul %866, %868, %cst_366 {dimension_numbers = #tpu.dot_dimension_numbers<[2], [2], [1], [1], [0, 0, 0, 1, 1, 1], [0], [0]>} : vector<2x8x8xbf16>, vector<2x8x8xbf16>, vector<2x8x8xf32> -> vector<2x8x8xf32>
    "tpu.trace_stop"() : () -> ()
    %cst_367 = arith.constant dense<0xFF800000> : vector<2x8xf32>
    %872 = vector.multi_reduction <maximumf>, %871, %cst_367 [2] : vector<2x8x8xf32> to vector<2x8xf32>
    %873 = vector.shape_cast %872 : vector<2x8xf32> to vector<2x8x1xf32>
    %874 = vector.broadcast %873 : vector<2x8x1xf32> to vector<2x8x8xf32>
    %875 = arith.subf %871, %874 : vector<2x8x8xf32>
    %876 = math.exp %875 : vector<2x8x8xf32>
    %cst_368 = arith.constant dense<0.000000e+00> : vector<2x8xf32>
    %877 = vector.multi_reduction <add>, %876, %cst_368 [2] : vector<2x8x8xf32> to vector<2x8xf32>
    %878 = vector.shape_cast %877 : vector<2x8xf32> to vector<2x8x1xf32>
    %879 = vector.broadcast %878 : vector<2x8x1xf32> to vector<2x8x8xf32>
    %880 = arith.divf %876, %879 : vector<2x8x8xf32>
    %881 = arith.truncf %880 : vector<2x8x8xf32> to vector<2x8x8xbf16>
    "tpu.trace_start"() <{level = 10 : i32, message = "bqk,bkd->bqd"}> : () -> ()
    %cst_369 = arith.constant dense<0.000000e+00> : vector<2x8x8xf32>
    %882 = tpu.matmul %881, %870, %cst_369 {dimension_numbers = #tpu.dot_dimension_numbers<[2], [1], [1], [2], [0, 0, 0, 1, 1, 2], [0], [0]>} : vector<2x8x8xbf16>, vector<2x8x8xbf16>, vector<2x8x8xf32> -> vector<2x8x8xf32>
    "tpu.trace_stop"() : () -> ()
    %883 = vector.extract_strided_slice %854 {offsets = [0, 0, 8], sizes = [2, 8, 8], strides = [1, 1, 1]} : vector<2x8x32xf32> to vector<2x8x8xf32>
    %cst_370 = arith.constant 0.353553385 : f32
    %884 = vector.broadcast %cst_370 : f32 to vector<2x8x8xf32>
    %885 = arith.mulf %883, %884 : vector<2x8x8xf32>
    %886 = arith.truncf %885 : vector<2x8x8xf32> to vector<2x8x8xbf16>
    %887 = vector.extract_strided_slice %861 {offsets = [0, 0, 8], sizes = [2, 8, 8], strides = [1, 1, 1]} : vector<2x8x32xf32> to vector<2x8x8xf32>
    %888 = arith.truncf %887 : vector<2x8x8xf32> to vector<2x8x8xbf16>
    %889 = vector.extract_strided_slice %862 {offsets = [0, 0, 8], sizes = [2, 8, 8], strides = [1, 1, 1]} : vector<2x8x32xf32> to vector<2x8x8xf32>
    %890 = arith.truncf %889 : vector<2x8x8xf32> to vector<2x8x8xbf16>
    "tpu.trace_start"() <{level = 10 : i32, message = "bqd,bkd->bqk"}> : () -> ()
    %cst_371 = arith.constant dense<0.000000e+00> : vector<2x8x8xf32>
    %891 = tpu.matmul %886, %888, %cst_371 {dimension_numbers = #tpu.dot_dimension_numbers<[2], [2], [1], [1], [0, 0, 0, 1, 1, 1], [0], [0]>} : vector<2x8x8xbf16>, vector<2x8x8xbf16>, vector<2x8x8xf32> -> vector<2x8x8xf32>
    "tpu.trace_stop"() : () -> ()
    %cst_372 = arith.constant dense<0xFF800000> : vector<2x8xf32>
    %892 = vector.multi_reduction <maximumf>, %891, %cst_372 [2] : vector<2x8x8xf32> to vector<2x8xf32>
    %893 = vector.shape_cast %892 : vector<2x8xf32> to vector<2x8x1xf32>
    %894 = vector.broadcast %893 : vector<2x8x1xf32> to vector<2x8x8xf32>
    %895 = arith.subf %891, %894 : vector<2x8x8xf32>
    %896 = math.exp %895 : vector<2x8x8xf32>
    %cst_373 = arith.constant dense<0.000000e+00> : vector<2x8xf32>
    %897 = vector.multi_reduction <add>, %896, %cst_373 [2] : vector<2x8x8xf32> to vector<2x8xf32>
    %898 = vector.shape_cast %897 : vector<2x8xf32> to vector<2x8x1xf32>
    %899 = vector.broadcast %898 : vector<2x8x1xf32> to vector<2x8x8xf32>
    %900 = arith.divf %896, %899 : vector<2x8x8xf32>
    %901 = arith.truncf %900 : vector<2x8x8xf32> to vector<2x8x8xbf16>
    "tpu.trace_start"() <{level = 10 : i32, message = "bqk,bkd->bqd"}> : () -> ()
    %cst_374 = arith.constant dense<0.000000e+00> : vector<2x8x8xf32>
    %902 = tpu.matmul %901, %890, %cst_374 {dimension_numbers = #tpu.dot_dimension_numbers<[2], [1], [1], [2], [0, 0, 0, 1, 1, 2], [0], [0]>} : vector<2x8x8xbf16>, vector<2x8x8xbf16>, vector<2x8x8xf32> -> vector<2x8x8xf32>
    "tpu.trace_stop"() : () -> ()
    %903 = vector.extract_strided_slice %854 {offsets = [0, 0, 16], sizes = [2, 8, 8], strides = [1, 1, 1]} : vector<2x8x32xf32> to vector<2x8x8xf32>
    %cst_375 = arith.constant 0.353553385 : f32
    %904 = vector.broadcast %cst_375 : f32 to vector<2x8x8xf32>
    %905 = arith.mulf %903, %904 : vector<2x8x8xf32>
    %906 = arith.truncf %905 : vector<2x8x8xf32> to vector<2x8x8xbf16>
    %907 = vector.extract_strided_slice %861 {offsets = [0, 0, 16], sizes = [2, 8, 8], strides = [1, 1, 1]} : vector<2x8x32xf32> to vector<2x8x8xf32>
    %908 = arith.truncf %907 : vector<2x8x8xf32> to vector<2x8x8xbf16>
    %909 = vector.extract_strided_slice %862 {offsets = [0, 0, 16], sizes = [2, 8, 8], strides = [1, 1, 1]} : vector<2x8x32xf32> to vector<2x8x8xf32>
    %910 = arith.truncf %909 : vector<2x8x8xf32> to vector<2x8x8xbf16>
    "tpu.trace_start"() <{level = 10 : i32, message = "bqd,bkd->bqk"}> : () -> ()
    %cst_376 = arith.constant dense<0.000000e+00> : vector<2x8x8xf32>
    %911 = tpu.matmul %906, %908, %cst_376 {dimension_numbers = #tpu.dot_dimension_numbers<[2], [2], [1], [1], [0, 0, 0, 1, 1, 1], [0], [0]>} : vector<2x8x8xbf16>, vector<2x8x8xbf16>, vector<2x8x8xf32> -> vector<2x8x8xf32>
    "tpu.trace_stop"() : () -> ()
    %cst_377 = arith.constant dense<0xFF800000> : vector<2x8xf32>
    %912 = vector.multi_reduction <maximumf>, %911, %cst_377 [2] : vector<2x8x8xf32> to vector<2x8xf32>
    %913 = vector.shape_cast %912 : vector<2x8xf32> to vector<2x8x1xf32>
    %914 = vector.broadcast %913 : vector<2x8x1xf32> to vector<2x8x8xf32>
    %915 = arith.subf %911, %914 : vector<2x8x8xf32>
    %916 = math.exp %915 : vector<2x8x8xf32>
    %cst_378 = arith.constant dense<0.000000e+00> : vector<2x8xf32>
    %917 = vector.multi_reduction <add>, %916, %cst_378 [2] : vector<2x8x8xf32> to vector<2x8xf32>
    %918 = vector.shape_cast %917 : vector<2x8xf32> to vector<2x8x1xf32>
    %919 = vector.broadcast %918 : vector<2x8x1xf32> to vector<2x8x8xf32>
    %920 = arith.divf %916, %919 : vector<2x8x8xf32>
    %921 = arith.truncf %920 : vector<2x8x8xf32> to vector<2x8x8xbf16>
    "tpu.trace_start"() <{level = 10 : i32, message = "bqk,bkd->bqd"}> : () -> ()
    %cst_379 = arith.constant dense<0.000000e+00> : vector<2x8x8xf32>
    %922 = tpu.matmul %921, %910, %cst_379 {dimension_numbers = #tpu.dot_dimension_numbers<[2], [1], [1], [2], [0, 0, 0, 1, 1, 2], [0], [0]>} : vector<2x8x8xbf16>, vector<2x8x8xbf16>, vector<2x8x8xf32> -> vector<2x8x8xf32>
    "tpu.trace_stop"() : () -> ()
    %923 = vector.extract_strided_slice %854 {offsets = [0, 0, 24], sizes = [2, 8, 8], strides = [1, 1, 1]} : vector<2x8x32xf32> to vector<2x8x8xf32>
    %cst_380 = arith.constant 0.353553385 : f32
    %924 = vector.broadcast %cst_380 : f32 to vector<2x8x8xf32>
    %925 = arith.mulf %923, %924 : vector<2x8x8xf32>
    %926 = arith.truncf %925 : vector<2x8x8xf32> to vector<2x8x8xbf16>
    %927 = vector.extract_strided_slice %861 {offsets = [0, 0, 24], sizes = [2, 8, 8], strides = [1, 1, 1]} : vector<2x8x32xf32> to vector<2x8x8xf32>
    %928 = arith.truncf %927 : vector<2x8x8xf32> to vector<2x8x8xbf16>
    %929 = vector.extract_strided_slice %862 {offsets = [0, 0, 24], sizes = [2, 8, 8], strides = [1, 1, 1]} : vector<2x8x32xf32> to vector<2x8x8xf32>
    %930 = arith.truncf %929 : vector<2x8x8xf32> to vector<2x8x8xbf16>
    "tpu.trace_start"() <{level = 10 : i32, message = "bqd,bkd->bqk"}> : () -> ()
    %cst_381 = arith.constant dense<0.000000e+00> : vector<2x8x8xf32>
    %931 = tpu.matmul %926, %928, %cst_381 {dimension_numbers = #tpu.dot_dimension_numbers<[2], [2], [1], [1], [0, 0, 0, 1, 1, 1], [0], [0]>} : vector<2x8x8xbf16>, vector<2x8x8xbf16>, vector<2x8x8xf32> -> vector<2x8x8xf32>
    "tpu.trace_stop"() : () -> ()
    %cst_382 = arith.constant dense<0xFF800000> : vector<2x8xf32>
    %932 = vector.multi_reduction <maximumf>, %931, %cst_382 [2] : vector<2x8x8xf32> to vector<2x8xf32>
    %933 = vector.shape_cast %932 : vector<2x8xf32> to vector<2x8x1xf32>
    %934 = vector.broadcast %933 : vector<2x8x1xf32> to vector<2x8x8xf32>
    %935 = arith.subf %931, %934 : vector<2x8x8xf32>
    %936 = math.exp %935 : vector<2x8x8xf32>
    %cst_383 = arith.constant dense<0.000000e+00> : vector<2x8xf32>
    %937 = vector.multi_reduction <add>, %936, %cst_383 [2] : vector<2x8x8xf32> to vector<2x8xf32>
    %938 = vector.shape_cast %937 : vector<2x8xf32> to vector<2x8x1xf32>
    %939 = vector.broadcast %938 : vector<2x8x1xf32> to vector<2x8x8xf32>
    %940 = arith.divf %936, %939 : vector<2x8x8xf32>
    %941 = arith.truncf %940 : vector<2x8x8xf32> to vector<2x8x8xbf16>
    "tpu.trace_start"() <{level = 10 : i32, message = "bqk,bkd->bqd"}> : () -> ()
    %cst_384 = arith.constant dense<0.000000e+00> : vector<2x8x8xf32>
    %942 = tpu.matmul %941, %930, %cst_384 {dimension_numbers = #tpu.dot_dimension_numbers<[2], [1], [1], [2], [0, 0, 0, 1, 1, 2], [0], [0]>} : vector<2x8x8xbf16>, vector<2x8x8xbf16>, vector<2x8x8xf32> -> vector<2x8x8xf32>
    "tpu.trace_stop"() : () -> ()
    %943 = tpu.concatenate %882, %902, %922, %942 in 2 : vector<2x8x8xf32>, vector<2x8x8xf32>, vector<2x8x8xf32>, vector<2x8x8xf32> -> vector<2x8x32xf32>
    %944 = vector.shape_cast %943 : vector<2x8x32xf32> to vector<16x32xf32>
    %945 = arith.truncf %944 : vector<16x32xf32> to vector<16x32xbf16>
    %cst_385 = arith.constant dense<0.000000e+00> : vector<16x32xf32>
    %946 = tpu.matmul %945, %547, %cst_385 {dimension_numbers = #tpu.dot_dimension_numbers<[1], [0], [0], [1], [0, 0, 1, 1], [], []>} : vector<16x32xbf16>, vector<32x32xbf16>, vector<16x32xf32> -> vector<16x32xf32>
    %947 = vector.broadcast %549 : vector<1x32xf32> to vector<16x32xf32>
    %948 = arith.addf %946, %947 : vector<16x32xf32>
    %949 = arith.addf %849, %948 : vector<16x32xf32>
    %cst_386 = arith.constant dense<0.000000e+00> : vector<16xf32>
    %950 = vector.multi_reduction <add>, %949, %cst_386 [1] : vector<16x32xf32> to vector<16xf32>
    %951 = vector.shape_cast %950 : vector<16xf32> to vector<16x1xf32>
    %cst_387 = arith.constant 3.200000e+01 : f32
    %952 = vector.broadcast %cst_387 : f32 to vector<16x1xf32>
    %953 = arith.divf %951, %952 : vector<16x1xf32>
    %954 = vector.broadcast %953 : vector<16x1xf32> to vector<16x32xf32>
    %955 = arith.subf %949, %954 : vector<16x32xf32>
    %956 = arith.mulf %955, %955 : vector<16x32xf32>
    %cst_388 = arith.constant dense<0.000000e+00> : vector<16xf32>
    %957 = vector.multi_reduction <add>, %956, %cst_388 [1] : vector<16x32xf32> to vector<16xf32>
    %958 = vector.shape_cast %957 : vector<16xf32> to vector<16x1xf32>
    %cst_389 = arith.constant 3.200000e+01 : f32
    %959 = vector.broadcast %cst_389 : f32 to vector<16x1xf32>
    %960 = arith.divf %958, %959 : vector<16x1xf32>
    %cst_390 = arith.constant 9.99999974E-6 : f32
    %961 = vector.broadcast %cst_390 : f32 to vector<16x1xf32>
    %962 = arith.addf %960, %961 : vector<16x1xf32>
    %963 = math.rsqrt %962 : vector<16x1xf32>
    %964 = vector.broadcast %963 : vector<16x1xf32> to vector<16x32xf32>
    %965 = arith.mulf %955, %964 : vector<16x32xf32>
    %966 = vector.broadcast %551 : vector<1x32xf32> to vector<16x32xf32>
    %967 = arith.mulf %965, %966 : vector<16x32xf32>
    %968 = vector.broadcast %553 : vector<1x32xf32> to vector<16x32xf32>
    %969 = arith.addf %967, %968 : vector<16x32xf32>
    %970 = arith.truncf %969 : vector<16x32xf32> to vector<16x32xbf16>
    %cst_391 = arith.constant dense<0.000000e+00> : vector<16x64xf32>
    %971 = tpu.matmul %970, %555, %cst_391 {dimension_numbers = #tpu.dot_dimension_numbers<[1], [0], [0], [1], [0, 0, 1, 1], [], []>} : vector<16x32xbf16>, vector<32x64xbf16>, vector<16x64xf32> -> vector<16x64xf32>
    %972 = vector.broadcast %557 : vector<1x64xf32> to vector<16x64xf32>
    %973 = arith.addf %971, %972 : vector<16x64xf32>
    %cst_392 = arith.constant 0.000000e+00 : f32
    %974 = vector.broadcast %cst_392 : f32 to vector<16x64xf32>
    %975 = arith.maximumf %973, %974 : vector<16x64xf32>
    %976 = arith.truncf %975 : vector<16x64xf32> to vector<16x64xbf16>
    %cst_393 = arith.constant dense<0.000000e+00> : vector<16x32xf32>
    %977 = tpu.matmul %976, %559, %cst_393 {dimension_numbers = #tpu.dot_dimension_numbers<[1], [0], [0], [1], [0, 0, 1, 1], [], []>} : vector<16x64xbf16>, vector<64x32xbf16>, vector<16x32xf32> -> vector<16x32xf32>
    %978 = vector.broadcast %561 : vector<1x32xf32> to vector<16x32xf32>
    %979 = arith.addf %977, %978 : vector<16x32xf32>
    %980 = arith.addf %969, %979 : vector<16x32xf32>
    %cst_394 = arith.constant dense<0.000000e+00> : vector<16xf32>
    %981 = vector.multi_reduction <add>, %980, %cst_394 [1] : vector<16x32xf32> to vector<16xf32>
    %982 = vector.shape_cast %981 : vector<16xf32> to vector<16x1xf32>
    %cst_395 = arith.constant 3.200000e+01 : f32
    %983 = vector.broadcast %cst_395 : f32 to vector<16x1xf32>
    %984 = arith.divf %982, %983 : vector<16x1xf32>
    %985 = vector.broadcast %984 : vector<16x1xf32> to vector<16x32xf32>
    %986 = arith.subf %980, %985 : vector<16x32xf32>
    %987 = arith.mulf %986, %986 : vector<16x32xf32>
    %cst_396 = arith.constant dense<0.000000e+00> : vector<16xf32>
    %988 = vector.multi_reduction <add>, %987, %cst_396 [1] : vector<16x32xf32> to vector<16xf32>
    %989 = vector.shape_cast %988 : vector<16xf32> to vector<16x1xf32>
    %cst_397 = arith.constant 3.200000e+01 : f32
    %990 = vector.broadcast %cst_397 : f32 to vector<16x1xf32>
    %991 = arith.divf %989, %990 : vector<16x1xf32>
    %cst_398 = arith.constant 9.99999974E-6 : f32
    %992 = vector.broadcast %cst_398 : f32 to vector<16x1xf32>
    %993 = arith.addf %991, %992 : vector<16x1xf32>
    %994 = math.rsqrt %993 : vector<16x1xf32>
    %995 = vector.broadcast %994 : vector<16x1xf32> to vector<16x32xf32>
    %996 = arith.mulf %986, %995 : vector<16x32xf32>
    %997 = vector.broadcast %563 : vector<1x32xf32> to vector<16x32xf32>
    %998 = arith.mulf %996, %997 : vector<16x32xf32>
    %999 = vector.broadcast %565 : vector<1x32xf32> to vector<16x32xf32>
    %1000 = arith.addf %998, %999 : vector<16x32xf32>
    %1001 = vector.shape_cast %1000 : vector<16x32xf32> to vector<2x8x32xf32>
    %1002 = vector.shape_cast %1001 : vector<2x8x32xf32> to vector<16x32xf32>
    %c0_399 = arith.constant 0 : index
    %c0_400 = arith.constant 0 : index
    %1003 = vector.load %arg34[%c0_399, %c0_400] : memref<32x16xbf16, #tpu.memory_space<vmem>>, vector<32x16xbf16>
    %c0_401 = arith.constant 0 : index
    %c0_402 = arith.constant 0 : index
    %1004 = vector.load %arg35[%c0_401, %c0_402] : memref<1x16xf32, #tpu.memory_space<vmem>>, vector<1x16xf32>
    %1005 = arith.truncf %1002 : vector<16x32xf32> to vector<16x32xbf16>
    %cst_403 = arith.constant dense<0.000000e+00> : vector<16x16xf32>
    %1006 = tpu.matmul %1005, %1003, %cst_403 {dimension_numbers = #tpu.dot_dimension_numbers<[1], [0], [0], [1], [0, 0, 1, 1], [], []>} : vector<16x32xbf16>, vector<32x16xbf16>, vector<16x16xf32> -> vector<16x16xf32>
    %1007 = vector.broadcast %1004 : vector<1x16xf32> to vector<16x16xf32>
    %1008 = arith.addf %1006, %1007 : vector<16x16xf32>
    %1009 = vector.shape_cast %1008 : vector<16x16xf32> to vector<2x8x16xf32>
    %cst_404 = arith.constant dense<0xFF800000> : vector<8x16xf32>
    %1010 = vector.multi_reduction <maximumf>, %1009, %cst_404 [0] : vector<2x8x16xf32> to vector<8x16xf32>
    %1011 = vector.shape_cast %1010 : vector<8x16xf32> to vector<1x8x16xf32>
    %1012 = vector.broadcast %1011 : vector<1x8x16xf32> to vector<2x8x16xf32>
    %1013 = arith.subf %1009, %1012 : vector<2x8x16xf32>
    %1014 = math.exp %1013 : vector<2x8x16xf32>
    %cst_405 = arith.constant dense<0.000000e+00> : vector<8x16xf32>
    %1015 = vector.multi_reduction <add>, %1014, %cst_405 [0] : vector<2x8x16xf32> to vector<8x16xf32>
    %1016 = vector.shape_cast %1015 : vector<8x16xf32> to vector<1x8x16xf32>
    %1017 = vector.broadcast %1016 : vector<1x8x16xf32> to vector<2x8x16xf32>
    %1018 = arith.divf %1014, %1017 : vector<2x8x16xf32>
    %c0_406 = arith.constant 0 : index
    %c0_407 = arith.constant 0 : index
    %c0_408 = arith.constant 0 : index
    %1019 = vector.load %arg36[%c0_406, %c0_407, %c0_408] : memref<2x8x16xf32, #tpu.memory_space<vmem>>, vector<2x8x16xf32>
    tpu.vector_store %arg36[%c0_406, %c0_407, %c0_408], %1018 {strides = array<i32>} : memref<2x8x16xf32, #tpu.memory_space<vmem>>, vector<2x8x16xf32>,
    return
  }
}

</mosaic_0001>

<bundles_post_ra>
// kernel: transformer_forward.1
= control target key start
LH: loop header
LB: loop body
LE: loop exit
PB: predicated region body
PF: predicated region fallthrough
CT: control target
= control target key end

     0   :  { %s6314_s6 = smov 1   ;;  %s6315_s10 = smov 2   ;;  %s7881_s0 = inlined_call_operand.smem [shape: u32[37], index: -1, kind: input, shape index: {}] }
   0x1   :  { %s6375_s5 = sld [smem:[%s7881_s0]]   ;;  %s6316_s14 = smov 3  }
   0x2   :  { %s6380_s9 = sld [smem:[%s7881_s0 + %s6314_s6]]   ;;  %s6317_s18 = smov 4  }
   0x3   :  { %s6385_s13 = sld [smem:[%s7881_s0 + %s6315_s10]]   ;;  %s6318_s22 = smov 5  }
   0x4   :  { %s6390_s17 = sld [smem:[%s7881_s0 + %s6316_s14]]   ;;  %s6319_s26 = smov 6  }
   0x5   :  { %s6395_s21 = sld [smem:[%s7881_s0 + %s6317_s18]]   ;;  %s6320_s30 = smov 7  }
   0x6   :  { %s6400_s25 = sld [smem:[%s7881_s0 + %s6318_s22]]   ;;  %s6321_s4 = smov 8  }
   0x7   :  { %s6405_s29 = sld [smem:[%s7881_s0 + %s6319_s26]]   ;;  %s6322_s10 = smov 9  }
   0x8   :  { %s6410_s3 = sld [smem:[%s7881_s0 + %s6320_s30]]   ;;  %s6323_s15 = smov 10  }
   0x9   :  { %s6415_s8 = sld [smem:[%s7881_s0 + %s6321_s4]]   ;;  %s6324_s20 = smov 11  }
   0xa   :  { %s6420_s14 = sld [smem:[%s7881_s0 + %s6322_s10]]   ;;  %s6325_s26 = smov 12  }
   0xb   :  { %s6425_s19 = sld [smem:[%s7881_s0 + %s6323_s15]]   ;;  %s6326_s1 = smov 13  }
   0xc   :  { %s6430_s24 = sld [smem:[%s7881_s0 + %s6324_s20]]   ;;  %s6327_s7 = smov 14  }
   0xd   :  { %s6435_s30 = sld [smem:[%s7881_s0 + %s6325_s26]]   ;;  %s6328_s15 = smov 15  }
   0xe   :  { %s6440_s6 = sld [smem:[%s7881_s0 + %s6326_s1]]   ;;  %s6329_s22 = smov 16  }
   0xf   :  { %s6445_s12 = sld [smem:[%s7881_s0 + %s6327_s7]]   ;;  %s6330_s28 = smov 17  }
  0x10   :  { %s6450_s20 = sld [smem:[%s7881_s0 + %s6328_s15]]   ;;  %s6331_s7 = smov 18  }
  0x11   :  { %s6455_s27 = sld [smem:[%s7881_s0 + %s6329_s22]]   ;;  %s6332_s15 = smov 19  }
  0x12   :  { %s6460_s4 = sld [smem:[%s7881_s0 + %s6330_s28]]   ;;  %s6333_s22 = smov 20  }
  0x13   :  { %7935 = sst [smem:[#allocation5_spill]] %s6435_s30  ;;  %s6334_s28 = smov 21  }
  0x14   :  { %7936 = sst [smem:[#allocation6_spill]] %s6440_s6 }
  0x15   :  { %s6465_s6 = sld [smem:[%s7881_s0 + %s6331_s7]]   ;;  %s6335_s7 = smov 22  }
  0x16   :  { %s6470_s30 = sld [smem:[%s7881_s0 + %s6332_s15]]   ;;  %s6336_s15 = smov 23  }
  0x17   :  { %7937 = sst [smem:[#allocation7_spill]] %s6455_s27 }
  0x18   :  { %7938 = sst [smem:[#allocation8_spill]] %s6460_s4 }
  0x19   :  { %s6475_s27 = sld [smem:[%s7881_s0 + %s6333_s22]]   ;;  %s6337_s22 = smov 24  }
  0x1a   :  { %s6480_s4 = sld [smem:[%s7881_s0 + %s6334_s28]]   ;;  %s6338_s28 = smov 25  }
  0x1b   :  { %7939 = sst [smem:[#allocation9_spill]] %s6465_s6 }
  0x1c   :  { %7940 = sst [smem:[#allocation10_spill]] %s6470_s30 }
  0x1d   :  { %s6485_s6 = sld [smem:[%s7881_s0 + %s6335_s7]]   ;;  %s6339_s7 = smov 26  }
  0x1e   :  { %s6490_s30 = sld [smem:[%s7881_s0 + %s6336_s15]]   ;;  %s6340_s15 = smov 27  }
  0x1f   :  { %7941 = sst [smem:[#allocation11_spill]] %s6475_s27 }
  0x20   :  { %7942 = sst [smem:[#allocation12_spill]] %s6480_s4 }
  0x21   :  { %s6495_s27 = sld [smem:[%s7881_s0 + %s6337_s22]]   ;;  %s6341_s22 = smov 28  }
  0x22   :  { %s6500_s4 = sld [smem:[%s7881_s0 + %s6338_s28]]   ;;  %s6342_s28 = smov 29  }
  0x23   :  { %7943 = sst [smem:[#allocation13_spill]] %s6485_s6 }
  0x24   :  { %7944 = sst [smem:[#allocation14_spill]] %s6490_s30 }
  0x25   :  { %s6505_s6 = sld [smem:[%s7881_s0 + %s6339_s7]]   ;;  %s6343_s7 = smov 30  }
  0x26   :  { %s6510_s30 = sld [smem:[%s7881_s0 + %s6340_s15]]   ;;  %s6344_s15 = smov 31  }
  0x27   :  { %7945 = sst [smem:[#allocation15_spill]] %s6495_s27 }
  0x28   :  { %7946 = sst [smem:[#allocation16_spill]] %s6500_s4 }
  0x29   :  { %s6515_s27 = sld [smem:[%s7881_s0 + %s6341_s22]]   ;;  %s6345_s22 = smov 32  }
  0x2a   :  { %s6520_s4 = sld [smem:[%s7881_s0 + %s6342_s28]]   ;;  %s6346_s28 = smov 33  }
  0x2b   :  { %7947 = sst [smem:[#allocation17_spill]] %s6505_s6 }
  0x2c   :  { %7948 = sst [smem:[#allocation18_spill]] %s6510_s30 }
  0x2d   :  { %s6525_s6 = sld [smem:[%s7881_s0 + %s6343_s7]]   ;;  %s6347_s7 = smov 34  }
  0x2e   :  { %s6530_s30 = sld [smem:[%s7881_s0 + %s6344_s15]]   ;;  %s6348_s15 = smov 35  }
  0x2f   :  { %7949 = sst [smem:[#allocation19_spill]] %s6515_s27 }
  0x30   :  { %7950 = sst [smem:[#allocation20_spill]] %s6520_s4 }
  0x31   :  { %s6535_s27 = sld [smem:[%s7881_s0 + %s6345_s22]]   ;;  %s6349_s22 = smov 36  }
  0x32   :  { %s6540_s4 = sld [smem:[%s7881_s0 + %s6346_s28]]  }
  0x33   :  { %7951 = sst [smem:[#allocation21_spill]] %s6525_s6 }
  0x34   :  { %7952 = sst [smem:[#allocation22_spill]] %s6530_s30 }
  0x35   :  { %s6545_s6 = sld [smem:[%s7881_s0 + %s6347_s7]]  }
  0x36   :  { %s6550_s30 = sld [smem:[%s7881_s0 + %s6348_s15]]  }
  0x37   :  { %7953 = sst [smem:[#allocation23_spill]] %s6535_s27 }
  0x38   :  { %s6555_s27 = sld [smem:[%s7881_s0 + %s6349_s22]]  }
  0x3b   :  { %7954 = sst [smem:[#allocation24_spill]] %s6545_s6 }
  0x3c   :  { %7955 = sst [smem:[#allocation25_spill]] %s6550_s30 }
  0x3e   :  { %7956 = sst [smem:[#allocation26_spill]] %s6555_s27 }
  0x3f   :  { %v5807_v0 = vld [vmem:[%s6385_s13 + $0x8] sm:$0xff]  ;;  %v5806_v1 = vld [vmem:[%s6385_s13] sm:$0xff]  ;;  %vm245_vm0 = vcmask 261120  }
  0x40   :  { %v6560_v2 = vld [vmem:[%s6375_s5] sm:$0xff]  ;;  %v6563_v3 = vld [vmem:[%s6375_s5 + $0x8] sm:$0xff]  ;;  %255 = vmatpush.bf16.msra.mxu0 %v5807_v0 }
  0x41   :  { %v229_v4 = vpack.c.bf16 %v6563_v3, %v6560_v2 }
  0x44   :  { %256 = vmatpush.bf16.msra.mxu0 %v5806_v1 }
  0x47   :  { %5406 = vmatmul.msk.bf16.vlgmr.msra.gmra.mxu0 %vm245_vm0, %v229_v4 }
  0x48   :  { %78 = vsyncpa [#allocation3], 0  ;;  %v6003_v5 = vld [vmem:[%s6390_s17] ss:$0 sm:$0xff]  ;;  %s7919_s0 = smov 88   ;;  %s7927_s5 = smov 96  }
  0x49   :  { %s7925_s28 = smov 120   ;;  %s7917_s1 = smov 80   ;;  %vm274_vm1 = vcmask 64512   ;;  %vm373_vm2 = vcmask 1043456  }
  0x4a   :  { %s7923_s2 = smov 112   ;;  %s7915_s7 = smov 72  }
  0x4b   :  { %s7921_s10 = smov 104   ;;  %s7905_s11 = smov 56  }
  0x4c   :  { %s7907_s15 = smov 64   ;;  %s7901_s16 = smov 40  }
  0x4d   :  { %s7903_s18 = smov 48   ;;  %s7913_s22 = smov 8  }
  0x4e   :  { %s7911_s23 = smov 16   ;;  %s7909_s26 = smov 24  }
  0x4f   :  { %s7975_s27 = sld [smem:[#allocation16_spill]]  ;;  %s7976_s30 = smov 96  }
  0x50   :  { %s7977_s6 = smov 120  }
  0xc4   :  { %v258_v6 = vpop.f32.mrf.mxu0 }
  0xc5   :  { %v259_v7 = vadd.f32 %v6003_v5, %v258_v6 }
  0xc7   :  { %v263_v8 = vmul.f32 0.35355338, %v259_v7  ;;  %v267_v9 = vpack.c.bf16 %v259_v7, %v259_v7 }
  0xc9   :  { %v265_v10 = vpack.c.bf16 %v263_v8, %v263_v8  ;;  %v270_v11 = vunpack.c.l.b16 %v267_v9 }
  0xcb   :  { %v6569_v12 = vpack.c.b16 %v270_v11, %v270_v11  ;;  %v412_v13 = vunpack.c.l.b16 %v265_v10 }
  0xcc   :  { %v260_v14 = vpop.f32.mrf.mxu0 }
  0xcd   :  { %v261_v15 = vadd.f32 %v6003_v5, %v260_v14  ;;  %416 = vrot.lane.b32.xlu1 %v6569_v12, %s7919_s0  ;;  %272 = vrot.lane.b32.xlu0 %v6569_v12, %s7927_s5  ;;  %v413_v16 = vpack.c.b16 %v412_v13, %v412_v13 }
  0xcf   :  { %v264_v17 = vmul.f32 0.35355338, %v261_v15  ;;  %v268_v18 = vpack.c.bf16 %v261_v15, %v261_v15  ;;  %414 = vrot.lane.b32.xlu2 %v413_v16, %s7925_s28 }
  0xd1   :  { %v266_v19 = vpack.c.bf16 %v264_v17, %v264_v17  ;;  %v295_v20 = vunpack.c.l.b16 %v268_v18 }
  0xd3   :  { %v6576_v21 = vpack.c.b16 %v295_v20, %v295_v20  ;;  %v438_v22 = vunpack.c.l.b16 %v266_v19 }
  0xd5   :  { %442 = vrot.lane.b32.xlu1 %v6576_v21, %s7919_s0  ;;  %297 = vrot.lane.b32.xlu0 %v6576_v21, %s7927_s5  ;;  %v439_v23 = vpack.c.b16 %v438_v22, %v438_v22 }
  0xd7   :  { %440 = vrot.lane.b32.xlu2 %v439_v23, %s7925_s28 }
  0xdd   :  { %580 = vrot.lane.b32.xlu1 %v6576_v21, %s7917_s1  ;;  %557 = vrot.lane.b32.xlu0 %v6569_v12, %s7917_s1 }
  0xdf   :  { %555 = vrot.lane.b32.xlu2 %v413_v16, %s7923_s2 }
  0xe5   :  { %695 = vrot.lane.b32.xlu1 %v6569_v12, %s7915_s7  ;;  %578 = vrot.lane.b32.xlu0 %v439_v23, %s7923_s2 }
  0xe7   :  { %718 = vrot.lane.b32.xlu2 %v6576_v21, %s7915_s7 }
  0xed   :  { %716 = vrot.lane.b32.xlu1 %v439_v23, %s7921_s10  ;;  %693 = vrot.lane.b32.xlu0 %v413_v16, %s7921_s10 }
 0x129   :  { %v415_v24 = vpop.permute.xlu2 %414 }
 0x131   :  { %v441_v29 = vpop.permute.xlu2 %440 }
 0x139   :  { %v556_v34 = vpop.permute.xlu2 %555 }
 0x13f   :  { %v417_v25 = vpop.permute.xlu1 %416  ;;  %v273_v26 = vpop.permute.xlu0 %272 }
 0x140   :  { %v279_v27 = vsel %vm274_vm1, %v273_v26, 0  ;;  %v422_v28 = vsel %vm274_vm1, %v417_v25, 0 }
 0x141   :  { %288 = vmatpush.bf16.xpose.msra.mxu1 %v279_v27  ;;  %431 = vmatpush.bf16.xpose.msrb.mxu0 %v422_v28  ;;  %v719_v39 = vpop.permute.xlu2 %718 }
 0x142   :  { %v724_v41 = vsel %vm274_vm1, %v719_v39, 0 }
 0x147   :  { %v443_v30 = vpop.permute.xlu1 %442  ;;  %v298_v31 = vpop.permute.xlu0 %297 }
 0x148   :  { %5407 = vmatmul.msk.bf16.vlgmr.msra.gmra.mxu1 %vm274_vm1, %v265_v10  ;;  %5411 = vmatmul.msk.bf16.vlgmr.msrb.gmra.mxu0 %vm274_vm1, %v415_v24  ;;  %v303_v32 = vsel %vm274_vm1, %v298_v31, 0  ;;  %v448_v33 = vsel %vm274_vm1, %v443_v30, 0 }
 0x149   :  { %312 = vmatpush.bf16.xpose.msra.mxu2 %v303_v32  ;;  %457 = vmatpush.bf16.xpose.msrb.mxu1 %v448_v33 }
 0x14f   :  { %v581_v35 = vpop.permute.xlu1 %580  ;;  %v558_v36 = vpop.permute.xlu0 %557 }
 0x150   :  { %v586_v37 = vsel %vm274_vm1, %v581_v35, 0  ;;  %v563_v38 = vsel %vm274_vm1, %v558_v36, 0  ;;  %5408 = vmatmul.msk.bf16.vlgmr.msra.gmra.mxu2 %vm274_vm1, %v266_v19 }
 0x151   :  { %572 = vmatpush.bf16.xpose.msra.mxu0 %v563_v38  ;;  %595 = vmatpush.bf16.xpose.msra.mxu1 %v586_v37 }
 0x157   :  { %v696_v40 = vpop.permute.xlu1 %695  ;;  %v579_v43 = vpop.permute.xlu0 %578 }
 0x158   :  { %v701_v42 = vsel %vm274_vm1, %v696_v40, 0  ;;  %5412 = vmatmul.msk.bf16.vlgmr.msrb.gmra.mxu1 %vm274_vm1, %v441_v29  ;;  %5415 = vmatmul.msk.bf16.vlgmr.msra.gmra.mxu0 %vm274_vm1, %v556_v34 }
 0x159   :  { %733 = vmatpush.bf16.xpose.msrb.mxu1 %v724_v41  ;;  %710 = vmatpush.bf16.xpose.msrb.mxu0 %v701_v42 }
 0x15f   :  { %v694_v44 = vpop.permute.xlu0 %693  ;;  %v717_v45 = vpop.permute.xlu1 %716 }
 0x168   :  { %5416 = vmatmul.msk.bf16.vlgmr.msra.gmra.mxu1 %vm274_vm1, %v579_v43  ;;  %5419 = vmatmul.msk.bf16.vlgmr.msrb.gmra.mxu0 %vm274_vm1, %v694_v44 }
 0x178   :  { %5420 = vmatmul.msk.bf16.vlgmr.msrb.gmra.mxu1 %vm274_vm1, %v717_v45 }
 0x1c5   :  { %v290_v46 = vpop.f32.mrf.mxu1  ;;  %v433_v47 = vpop.f32.mrf.mxu0 }
 0x1c6   :  { %v463_v48 = vsel %vm274_vm1, %v433_v47, -inf  ;;  %v318_v49 = vsel %vm274_vm1, %v290_v46, -inf }
 0x1c7   :  { %464 = vmax.xlane.f32.xlu1 %v463_v48  ;;  %319 = vmax.xlane.f32.xlu2 %v318_v49 }
 0x1cd   :  { %v292_v50 = vpop.f32.mrf.mxu1  ;;  %v435_v51 = vpop.f32.mrf.mxu0 }
 0x1d3   :  { %v314_v52 = vpop.f32.mrf.mxu2 }
 0x1d4   :  { %v321_v53 = vsel %vm274_vm1, %v314_v52, -inf }
 0x1d5   :  { %322 = vmax.xlane.f32.xlu0 %v321_v53  ;;  %v459_v54 = vpop.f32.mrf.mxu1  ;;  %v6614_v55 = vpop.f32.mrf.mxu0 }
 0x1d6   :  { %v466_v56 = vsel %vm274_vm1, %v459_v54, -inf  ;;  %v601_v6 = vsel %vm274_vm1, %v6614_v55, -inf }
 0x1d7   :  { %467 = vmax.xlane.f32.xlu2 %v466_v56 }
 0x1db   :  { %v316_v57 = vpop.f32.mrf.mxu2 }
 0x1dd   :  { %v461_v58 = vpop.f32.mrf.mxu1  ;;  %v576_v59 = vpop.f32.mrf.mxu0 }
 0x1e0   :  { %534 = vrot.lane.b32.xlu1 %v6576_v21, %s7905_s11 }
 0x1e5   :  { %v6619_v60 = vpop.f32.mrf.mxu1  ;;  %v6621_v61 = vpop.f32.mrf.mxu0 }
 0x1e6   :  { %v604_v62 = vsel %vm274_vm1, %v6619_v60, -inf  ;;  %v739_v7 = vsel %vm274_vm1, %v6621_v61, -inf }
 0x1e7   :  { %605 = vmax.xlane.f32.xlu0 %v604_v62 }
 0x1ed   :  { %v599_v63 = vpop.f32.mrf.mxu1  ;;  %v714_v0 = vpop.f32.mrf.mxu0 }
 0x1ef   :  { %368 = vrot.lane.b32.xlu2 %v6569_v12, %s7907_s15 }
 0x1f5   :  { %v735_v1 = vpop.f32.mrf.mxu1 }
 0x1f6   :  { %v742_v4 = vsel %vm274_vm1, %v735_v1, -inf }
 0x1f7   :  { %743 = vmax.xlane.f32.xlu0 %v742_v4 }
 0x1fd   :  { %v737_v5 = vpop.f32.mrf.mxu1 }
 0x20b   :  { %390 = vrot.lane.b32.xlu0 %v6576_v21, %s7907_s15 }
 0x218   :  { %602 = vmax.xlane.f32.xlu2 %v601_v6 }
 0x220   :  { %740 = vmax.xlane.f32.xlu2 %v739_v7 }
 0x238   :  { %513 = vrot.lane.b32.xlu2 %v6569_v12, %s7905_s11 }
 0x23a   :  { %v465_v8 = vpop.xlane.xlu1 %464  ;;  %v320_v9 = vpop.xlane.xlu2 %319 }
 0x23b   :  { %v469_v10 = vsub.f32 %v433_v47, %v465_v8  ;;  %v324_v11 = vsub.f32 %v290_v46, %v320_v9 }
 0x23d   :  { %v471_v13 = vmul.f32 1.442695, %v469_v10  ;;  %v326_v14 = vmul.f32 1.442695, %v324_v11 }
 0x23f   :  { %6046 = vpow2.f32 %v471_v13 }
 0x240   :  { %6048 = vpow2.f32 %v326_v14 }
 0x245   :  { %v6636_v15 = vpop.eup %6046 }
 0x246   :  { %v6638_v16 = vpop.eup %6048  ;;  %v475_v17 = vsel %vm274_vm1, %v6636_v15, 0.0 }
 0x247   :  { %v330_v18 = vsel %vm274_vm1, %v6638_v16, 0.0  ;;  %476 = vadd.xlane.f32.xlu0 %v475_v17 }
 0x248   :  { %331 = vadd.xlane.f32.xlu1 %v330_v18  ;;  %v323_v19 = vpop.xlane.xlu0 %322 }
 0x249   :  { %v325_v20 = vsub.f32 %v314_v52, %v323_v19 }
 0x24a   :  { %v468_v22 = vpop.xlane.xlu2 %467 }
 0x24b   :  { %v328_v23 = vmul.f32 1.442695, %v325_v20  ;;  %v470_v24 = vsub.f32 %v459_v54, %v468_v22 }
 0x24d   :  { %6050 = vpow2.f32 %v328_v23  ;;  %v473_v25 = vmul.f32 1.442695, %v470_v24 }
 0x24f   :  { %6052 = vpow2.f32 %v473_v25 }
 0x252   :  { %v369_v26 = vpop.permute.xlu2 %368  ;;  %v535_v56 = vpop.permute.xlu1 %534 }
 0x253   :  { %v6644_v27 = vpop.eup %6050  ;;  %v375_v28 = vsel %vm373_vm2, %v369_v26, 0 }
 0x254   :  { %384 = vmatpush.bf16.msra.mxu3 %v375_v28  ;;  %v333_v29 = vsel %vm274_vm1, %v6644_v27, 0.0 }
 0x255   :  { %334 = vadd.xlane.f32.xlu1 %v333_v29  ;;  %v6649_v30 = vpop.eup %6052 }
 0x256   :  { %v478_v31 = vsel %vm274_vm1, %v6649_v30, 0.0 }
 0x25a   :  { %v606_v32 = vpop.xlane.xlu0 %605 }
 0x25b   :  { %v608_v42 = vsub.f32 %v6619_v60, %v606_v32 }
 0x25d   :  { %479 = vadd.xlane.f32.xlu1 %v478_v31  ;;  %v611_v44 = vmul.f32 1.442695, %v608_v42 }
 0x26a   :  { %v744_v33 = vpop.xlane.xlu0 %743 }
 0x26b   :  { %v746_v34 = vsub.f32 %v735_v1, %v744_v33 }
 0x26d   :  { %v749_v35 = vmul.f32 1.442695, %v746_v34 }
 0x26f   :  { %6054 = vpow2.f32 %v749_v35 }
 0x275   :  { %v6653_v36 = vpop.eup %6054 }
 0x276   :  { %v754_v37 = vsel %vm274_vm1, %v6653_v36, 0.0 }
 0x277   :  { %755 = vadd.xlane.f32.xlu2 %v754_v37 }
 0x27d   :  { %v391_v38 = vpop.permute.xlu0 %390 }
 0x27e   :  { %v396_v39 = vsel %vm373_vm2, %v391_v38, 0 }
 0x27f   :  { %405 = vmatpush.bf16.msrb.mxu3 %v396_v39 }
 0x28b   :  { %v603_v40 = vpop.xlane.xlu2 %602 }
 0x28c   :  { %v607_v41 = vsub.f32 %v6614_v55, %v603_v40 }
 0x28e   :  { %v609_v43 = vmul.f32 1.442695, %v607_v41 }
 0x290   :  { %6056 = vpow2.f32 %v609_v43 }
 0x291   :  { %6058 = vpow2.f32 %v611_v44 }
 0x293   :  { %v741_v45 = vpop.xlane.xlu2 %740 }
 0x294   :  { %v745_v46 = vsub.f32 %v6621_v61, %v741_v45 }
 0x296   :  { %v6661_v47 = vpop.eup %6056  ;;  %v747_v48 = vmul.f32 1.442695, %v745_v46 }
 0x297   :  { %v613_v49 = vsel %vm274_vm1, %v6661_v47, 0.0  ;;  %v6665_v51 = vpop.eup %6058 }
 0x298   :  { %6060 = vpow2.f32 %v747_v48  ;;  %614 = vadd.xlane.f32.xlu1 %v613_v49  ;;  %v616_v54 = vsel %vm274_vm1, %v6665_v51, 0.0 }
 0x29b   :  { %v514_v50 = vpop.permute.xlu2 %513 }
 0x29c   :  { %v519_v52 = vsel %vm373_vm2, %v514_v50, 0 }
 0x29d   :  { %528 = vmatpush.bf16.msrb.mxu2 %v519_v52 }
 0x29e   :  { %v6668_v53 = vpop.eup %6060 }
 0x29f   :  { %v751_v55 = vsel %vm274_vm1, %v6668_v53, 0.0 }
 0x2a0   :  { %617 = vadd.xlane.f32.xlu1 %v616_v54  ;;  %752 = vadd.xlane.f32.xlu0 %v751_v55 }
 0x2b4   :  { %810 = vrot.lane.b32.xlu0 %v6576_v21, %s7901_s16 }
 0x2b9   :  { %651 = vrot.lane.b32.xlu1 %v6569_v12, %s7903_s18 }
 0x2ba   :  { %v477_v57 = vpop.xlane.xlu0 %476 }
 0x2bb   :  { %v332_v58 = vpop.xlane.xlu1 %331  ;;  %6062 = vrcp.f32 %v477_v57  ;;  %v492_v1 = vand.u32 2147483648, %v477_v57  ;;  %v490_v6 = vand.u32 2147483647, %v477_v57  ;;  %vm486_vm5 = vweird.f32 %v477_v57 }
 0x2bc   :  { %6064 = vrcp.f32 %v332_v58  ;;  %v347_v5 = vand.u32 2147483648, %v332_v58  ;;  %v345_v8 = vand.u32 2147483647, %v332_v58  ;;  %vm341_vm7 = vweird.f32 %v332_v58 }
 0x2bd   :  { %v493_v11 = vor.u32 1.1754944e-38, %v492_v1  ;;  %vm491_vm9 = vcmp.eq.f32.partialorder %v490_v6, 8.507059e+37 }
 0x2be   :  { %v348_v13 = vor.u32 1.1754944e-38, %v347_v5  ;;  %vm346_vm10 = vcmp.eq.f32.partialorder %v345_v8, 8.507059e+37 }
 0x2c1   :  { %v6063_v59 = vpop.eup %6062  ;;  %672 = vrot.lane.b32.xlu1 %v6576_v21, %s7903_s18 }
 0x2c2   :  { %v6065_v60 = vpop.eup %6064  ;;  %v482_v61 = vmul.f32 %v6063_v59, %v477_v57  ;;  %vm487_vm3 = vweird.f32 %v6063_v59 }
 0x2c3   :  { %v337_v62 = vmul.f32 %v6065_v60, %v332_v58  ;;  %vm342_vm4 = vweird.f32 %v6065_v60  ;;  %vm488_vm6 = vmor %vm486_vm5, %vm487_vm3 }
 0x2c4   :  { %v483_v63 = vsub.f32 1.0, %v482_v61  ;;  %vm343_vm8 = vmor %vm341_vm7, %vm342_vm4 }
 0x2c5   :  { %v338_v0 = vsub.f32 1.0, %v337_v62 }
 0x2c6   :  { %v484_v4 = vmul.f32 %v6063_v59, %v483_v63 }
 0x2c7   :  { %v339_v7 = vmul.f32 %v6065_v60, %v338_v0 }
 0x2c8   :  { %v335_v9 = vpop.xlane.xlu1 %334  ;;  %v485_v10 = vadd.f32 %v6063_v59, %v484_v4 }
 0x2c9   :  { %6066 = vrcp.f32 %v335_v9  ;;  %789 = vrot.lane.b32.xlu1 %v6569_v12, %s7901_s16  ;;  %v340_v21 = vadd.f32 %v6065_v60, %v339_v7  ;;  %v540_v12 = vsel %vm373_vm2, %v535_v56, 0  ;;  %v362_v31 = vand.u32 2147483648, %v335_v9 }
 0x2ca   :  { %v489_v14 = vsel %vm488_vm6, %v6063_v59, %v485_v10  ;;  %vm356_vm12 = vweird.f32 %v335_v9 }
 0x2cb   :  { %v344_v17 = vsel %vm343_vm8, %v6065_v60, %v340_v21  ;;  %v494_v18 = vsel %vm491_vm9, %v493_v11, %v489_v14  ;;  %v363_v34 = vor.u32 1.1754944e-38, %v362_v31 }
 0x2cc   :  { %v349_v19 = vsel %vm346_vm10, %v348_v13, %v344_v17  ;;  %v495_v20 = vmul.f32 %v6636_v15, %v494_v18  ;;  %v360_v15 = vand.u32 2147483647, %v335_v9 }
 0x2cd   :  { %v350_v22 = vmul.f32 %v6638_v16, %v349_v19 }
 0x2ce   :  { %v511_v23 = vpack.c.bf16 %v495_v20, %v495_v20  ;;  %vm361_vm14 = vcmp.eq.f32.partialorder %v360_v15, 8.507059e+37 }
 0x2cf   :  { %v6067_v24 = vpop.eup %6066  ;;  %v366_v25 = vpack.c.bf16 %v350_v22, %v350_v22 }
 0x2d0   :  { %v352_v26 = vmul.f32 %v6067_v24, %v335_v9  ;;  %v480_v28 = vpop.xlane.xlu1 %479  ;;  %5413 = vmatmul.msk.bf16.vlgmr.msrb.gmra.mxu2 %vm274_vm1, %v511_v23  ;;  %vm357_vm11 = vweird.f32 %v6067_v24 }
 0x2d1   :  { %6068 = vrcp.f32 %v480_v28  ;;  %5409 = vmatmul.msk.bf16.vlgmr.msra.gmra.mxu3 %vm274_vm1, %v366_v25  ;;  %vm358_vm13 = vmor %vm356_vm12, %vm357_vm11  ;;  %v507_v44 = vand.u32 2147483648, %v480_v28  ;;  %vm501_vm3 = vweird.f32 %v480_v28  ;;  %v505_v45 = vand.u32 2147483647, %v480_v28 }
 0x2d2   :  { %v353_v29 = vsub.f32 1.0, %v352_v26  ;;  %549 = vmatpush.bf16.msra.mxu3 %v540_v12 }
 0x2d3   :  { %v508_v48 = vor.u32 1.1754944e-38, %v507_v44  ;;  %vm506_vm5 = vcmp.eq.f32.partialorder %v505_v45, 8.507059e+37 }
 0x2d4   :  { %v354_v32 = vmul.f32 %v6067_v24, %v353_v29 }
 0x2d6   :  { %v355_v16 = vadd.f32 %v6067_v24, %v354_v32 }
 0x2d7   :  { %v6069_v33 = vpop.eup %6068 }
 0x2d8   :  { %v497_v35 = vmul.f32 %v6069_v33, %v480_v28  ;;  %v359_v37 = vsel %vm358_vm13, %v6067_v24, %v355_v16  ;;  %vm502_vm15 = vweird.f32 %v6069_v33 }
 0x2d9   :  { %v364_v38 = vsel %vm361_vm14, %v363_v34, %v359_v37  ;;  %vm503_vm4 = vmor %vm501_vm3, %vm502_vm15 }
 0x2da   :  { %v498_v39 = vsub.f32 1.0, %v497_v35  ;;  %v365_v40 = vmul.f32 %v6644_v27, %v364_v38 }
 0x2dc   :  { %v499_v41 = vmul.f32 %v6069_v33, %v498_v39  ;;  %v367_v42 = vpack.c.bf16 %v365_v40, %v365_v40 }
 0x2de   :  { %v500_v43 = vadd.f32 %v6069_v33, %v499_v41 }
 0x2e0   :  { %v504_v46 = vsel %vm503_vm4, %v6069_v33, %v500_v43 }
 0x2e1   :  { %5410 = vmatmul.msk.bf16.vlgmr.msrb.gmra.mxu3 %vm274_vm1, %v367_v42  ;;  %v509_v49 = vsel %vm506_vm5, %v508_v48, %v504_v46 }
 0x2e2   :  { %v510_v50 = vmul.f32 %v6649_v30, %v509_v49 }
 0x2e4   :  { %v512_v52 = vpack.c.bf16 %v510_v50, %v510_v50 }
 0x2ea   :  { %v6691_v62 = vpop.xlane.xlu2 %755 }
 0x2eb   :  { %v781_v41 = vand.u32 2147483647, %v6691_v62 }
 0x2f1   :  { %5414 = vmatmul.msk.bf16.vlgmr.msra.gmra.mxu3 %vm274_vm1, %v512_v52 }
 0x30b   :  { %v615_v27 = vpop.xlane.xlu1 %614 }
 0x30c   :  { %6070 = vrcp.f32 %v615_v27  ;;  %v630_v1 = vand.u32 2147483648, %v615_v27  ;;  %vm624_vm7 = vweird.f32 %v615_v27  ;;  %v628_v4 = vand.u32 2147483647, %v615_v27 }
 0x30e   :  { %v631_v8 = vor.u32 1.1754944e-38, %v630_v1  ;;  %vm629_vm9 = vcmp.eq.f32.partialorder %v628_v4, 8.507059e+37 }
 0x312   :  { %v6071_v54 = vpop.eup %6070 }
 0x313   :  { %v618_v55 = vpop.xlane.xlu1 %617  ;;  %v620_v56 = vmul.f32 %v6071_v54, %v615_v27  ;;  %v753_v58 = vpop.xlane.xlu0 %752  ;;  %vm625_vm6 = vweird.f32 %v6071_v54 }
 0x314   :  { %6072 = vrcp.f32 %v618_v55  ;;  %vm626_vm8 = vmor %vm624_vm7, %vm625_vm6  ;;  %v645_v13 = vand.u32 2147483648, %v618_v55  ;;  %vm639_vm11 = vweird.f32 %v618_v55  ;;  %v643_v14 = vand.u32 2147483647, %v618_v55 }
 0x315   :  { %v621_v57 = vsub.f32 1.0, %v620_v56  ;;  %6074 = vrcp.f32 %v753_v58  ;;  %v768_v29 = vand.u32 2147483648, %v753_v58  ;;  %vm762_vm15 = vweird.f32 %v753_v58 }
 0x316   :  { %6076 = vrcp.f32 %v6691_v62  ;;  %v646_v24 = vor.u32 1.1754944e-38, %v645_v13  ;;  %vm644_vm13 = vcmp.eq.f32.partialorder %v643_v14, 8.507059e+37  ;;  %vm777_vm6 = vweird.f32 %v6691_v62 }
 0x317   :  { %v622_v60 = vmul.f32 %v6071_v54, %v621_v57  ;;  %v769_v35 = vor.u32 1.1754944e-38, %v768_v29 }
 0x319   :  { %v623_v63 = vadd.f32 %v6071_v54, %v622_v60 }
 0x31a   :  { %v6073_v59 = vpop.eup %6072 }
 0x31b   :  { %v635_v61 = vmul.f32 %v6073_v59, %v618_v55  ;;  %v6075_v0 = vpop.eup %6074  ;;  %v627_v5 = vsel %vm626_vm8, %v6071_v54, %v623_v63  ;;  %vm640_vm10 = vweird.f32 %v6073_v59  ;;  %vm782_vm8 = vcmp.eq.f32.partialorder %v781_v41, 8.507059e+37 }
 0x31c   :  { %v758_v7 = vmul.f32 %v6075_v0, %v753_v58  ;;  %v632_v9 = vsel %vm629_vm9, %v631_v8, %v627_v5  ;;  %v6077_v21 = vpop.eup %6076  ;;  %vm641_vm12 = vmor %vm639_vm11, %vm640_vm10  ;;  %vm763_vm14 = vweird.f32 %v6075_v0  ;;  %v5808_v8 = vld [vmem:[%s6395_s21] sm:$0xff]  ;;  %vm857_vm9 = vcmask 130048  }
 0x31d   :  { %v636_v30 = vsub.f32 1.0, %v635_v61  ;;  %v633_v17 = vmul.f32 %v6661_v47, %v632_v9  ;;  %v773_v19 = vmul.f32 %v6077_v21, %v6691_v62  ;;  %v766_v47 = vand.u32 2147483647, %v753_v58  ;;  %vm764_vm3 = vmor %vm762_vm15, %vm763_vm14  ;;  %v5817_v9 = vld [vmem:[%s6445_s12 + $0x8] sm:$0xff] }
 0x31e   :  { %v759_v11 = vsub.f32 1.0, %v758_v7  ;;  %vm778_vm5 = vweird.f32 %v6077_v21  ;;  %v5809_v7 = vld [vmem:[%s6395_s21 + $0x8] sm:$0xff]  ;;  %vm860_vm10 = vcmask 195584  }
 0x31f   :  { %v637_v6 = vmul.f32 %v6073_v59, %v636_v30  ;;  %v649_v25 = vpack.c.bf16 %v633_v17, %v633_v17  ;;  %v774_v28 = vsub.f32 1.0, %v773_v19  ;;  %vm767_vm4 = vcmp.eq.f32.partialorder %v766_v47, 8.507059e+37  ;;  %vm779_vm7 = vmor %vm777_vm6, %vm778_vm5  ;;  %888 = vmatpush.bf16.msra.mxu0 %v5809_v7 }
 0x320   :  { %v760_v22 = vmul.f32 %v6075_v0, %v759_v11  ;;  %v154_v11 = vld [vmem:[%s6380_s9] sm:$0xff]  ;;  %vm1022_vm6 = vcmask 523264  }
 0x321   :  { %v638_v10 = vadd.f32 %v6073_v59, %v637_v6  ;;  %v775_v16 = vmul.f32 %v6077_v21, %v774_v28 }
 0x322   :  { %v761_v12 = vadd.f32 %v6075_v0, %v760_v22 }
 0x323   :  { %v642_v20 = vsel %vm641_vm12, %v6073_v59, %v638_v10  ;;  %v776_v40 = vadd.f32 %v6077_v21, %v775_v16  ;;  %889 = vmatpush.bf16.msra.mxu0 %v5808_v8  ;;  %v5816_v10 = vld [vmem:[%s6445_s12] sm:$0xff] }
 0x324   :  { %v647_v26 = vsel %vm644_vm13, %v646_v24, %v642_v20  ;;  %v765_v33 = vsel %vm764_vm3, %v6075_v0, %v761_v12 }
 0x325   :  { %v648_v32 = vmul.f32 %v6665_v51, %v647_v26  ;;  %v770_v39 = vsel %vm767_vm4, %v769_v35, %v765_v33  ;;  %v783_v51 = vand.u32 2147483648, %v6691_v62  ;;  %v780_v44 = vsel %vm779_vm7, %v6077_v21, %v776_v40  ;;  %v155_v21 = vld [vmem:[%s6380_s9 + $0x8] sm:$0xff] }
 0x326   :  { %v811_v31 = vpop.permute.xlu0 %810  ;;  %v771_v42 = vmul.f32 %v6668_v53, %v770_v39  ;;  %v1096_v13 = vpack.c.bf16 %v155_v21, %v154_v11 }
 0x327   :  { %v816_v37 = vsel %vm373_vm2, %v811_v31, 0  ;;  %v650_v38 = vpack.c.bf16 %v648_v32, %v648_v32  ;;  %v784_v46 = vor.u32 1.1754944e-38, %v783_v51  ;;  %v6005_v51 = vld [vmem:[%s6450_s20] ss:$0 sm:$0xff] }
 0x328   :  { %v787_v48 = vpack.c.bf16 %v771_v42, %v771_v42 }
 0x329   :  { %v785_v49 = vsel %vm782_vm8, %v784_v46, %v780_v44 }
 0x32a   :  { %v786_v50 = vmul.f32 %v6653_v36, %v785_v49 }
 0x32b   :  { %v652_v18 = vpop.permute.xlu1 %651 }
 0x32c   :  { %v657_v23 = vsel %vm373_vm2, %v652_v18, 0  ;;  %v788_v52 = vpack.c.bf16 %v786_v50, %v786_v50 }
 0x32d   :  { %666 = vmatpush.bf16.msra.mxu2 %v657_v23 }
 0x330   :  { %5417 = vmatmul.msk.bf16.vlgmr.msra.gmra.mxu2 %vm274_vm1, %v649_v25 }
 0x333   :  { %v673_v15 = vpop.permute.xlu1 %672 }
 0x334   :  { %v678_v34 = vsel %vm373_vm2, %v673_v15, 0  ;;  %v6004_v15 = vld [vmem:[%s6400_s25] ss:$0 sm:$0xff] }
 0x335   :  { %687 = vmatpush.bf16.msrb.mxu3 %v678_v34 }
 0x338   :  { %5418 = vmatmul.msk.bf16.vlgmr.msrb.gmra.mxu3 %vm274_vm1, %v650_v38 }
 0x339   :  { %825 = vmatpush.bf16.msra.mxu3 %v816_v37 }
 0x33b   :  { %v790_v43 = vpop.permute.xlu1 %789 }
 0x33c   :  { %v795_v45 = vsel %vm373_vm2, %v790_v43, 0 }
 0x33d   :  { %804 = vmatpush.bf16.msrb.mxu2 %v795_v45  ;;  %1121 = vmatpush.bf16.msrb.mxu3 %v5817_v9 }
 0x340   :  { %5421 = vmatmul.msk.bf16.vlgmr.msrb.gmra.mxu2 %vm274_vm1, %v787_v48 }
 0x341   :  { %1122 = vmatpush.bf16.msrb.mxu3 %v5816_v10 }
 0x348   :  { %5422 = vmatmul.msk.bf16.vlgmr.msra.gmra.mxu3 %vm274_vm1, %v788_v52 }
 0x353   :  { %v530_v27 = vpop.f32.mrf.mxu2 }
 0x354   :  { %v386_v54 = vpop.f32.mrf.mxu3 }
 0x358   :  { %5466 = vmatmul.msk.bf16.vlgmr.msrb.gmra.mxu3 %vm245_vm0, %v1096_v13  ;;  %v5811_v13 = vld [vmem:[%s6415_s8 + $0x8] sm:$0xff] }
 0x359   :  { %984 = vmatpush.bf16.msra.mxu1 %v5811_v13  ;;  %v5813_v13 = vld [vmem:[%s6425_s19 + $0x8] sm:$0xff] }
 0x35b   :  { %v532_v53 = vpop.f32.mrf.mxu2 }
 0x35c   :  { %v388_v55 = vpop.f32.mrf.mxu3  ;;  %v6364_v53 = vmov 32.0  }
 0x35d   :  { %6078 = vrcp.f32 %v6364_v53 }
 0x364   :  { %v407_v56 = vpop.f32.mrf.mxu3 }
 0x36c   :  { %v409_v57 = vpop.f32.mrf.mxu3 }
 0x374   :  { %v551_v58 = vpop.f32.mrf.mxu3 }
 0x375   :  { %v5913_v59 = vpack.i.bf16 %v551_v58, %v530_v27 }
 0x377   :  { %5914 = vrot.lane.b32.xlu2 %v5913_v59, %s7913_s22 }
 0x37c   :  { %v553_v60 = vpop.f32.mrf.mxu3 }
 0x3b3   :  { %v668_v61 = vpop.f32.mrf.mxu2 }
 0x3bb   :  { %v670_v62 = vpop.f32.mrf.mxu2  ;;  %v689_v36 = vpop.f32.mrf.mxu3 }
 0x3bc   :  { %v5918_v63 = vpack.i.bf16 %v689_v36, %v668_v61 }
 0x3be   :  { %5919 = vrot.lane.b32.xlu1 %v5918_v63, %s7911_s23 }
 0x3c3   :  { %v691_v30 = vpop.f32.mrf.mxu3  ;;  %v806_v0 = vpop.f32.mrf.mxu2 }
 0x3cb   :  { %v808_v1 = vpop.f32.mrf.mxu2  ;;  %v827_v4 = vpop.f32.mrf.mxu3 }
 0x3cc   :  { %v5923_v5 = vpack.i.bf16 %v827_v4, %v806_v0 }
 0x3ce   :  { %5924 = vrot.lane.b32.xlu1 %v5923_v5, %s7909_s26 }
 0x3d1   :  { %v5915_v17 = vpop.permute.xlu2 %5914 }
 0x3d2   :  { %v5917_v18 = vunpack.i.h.bf16 %v5915_v17  ;;  %v5916_v19 = vunpack.i.l.bf16 %v5915_v17 }
 0x3d3   :  { %v829_v6 = vpop.f32.mrf.mxu3 }
 0x3d4   :  { %v856_v24 = vsel %vm274_vm1, %v407_v56, %v5917_v18  ;;  %v855_v25 = vsel %vm274_vm1, %v386_v54, %v5916_v19  ;;  %v6079_v56 = vpop.eup %6078 }
 0x3d5   :  { %v905_v58 = vmul.f32 32.0, %v6079_v56  ;;  %vm909_vm11 = vweird.f32 %v6079_v56 }
 0x3d7   :  { %v906_v61 = vsub.f32 1.0, %v905_v58 }
 0x3d9   :  { %v907_v62 = vmul.f32 %v6079_v56, %v906_v61 }
 0x3db   :  { %v1124_v41 = vpop.f32.mrf.mxu3  ;;  %v908_v36 = vadd.f32 %v6079_v56, %v907_v62 }
 0x3dc   :  { %v1125_v42 = vadd.f32 %v6005_v51, %v1124_v41  ;;  %v1129_v41 = vlaneseq }
 0x3dd   :  { %v6750_v63 = vsel %vm909_vm11, %v6079_v56, %v908_v36 }
 0x3de   :  { %v1138_v43 = vpack.c.bf16 %v1125_v42, %v1125_v42  ;;  %v1134_v49 = vmul.f32 0.35355338, %v1125_v42 }
 0x3e0   :  { %v1141_v45 = vunpack.c.l.b16 %v1138_v43  ;;  %v1136_v52 = vpack.c.bf16 %v1134_v49, %v1134_v49  ;;  %v1130_v49 = vshrl.u32 %v1129_v41, 7 }
 0x3e2   :  { %v6733_v48 = vpack.c.b16 %v1141_v45, %v1141_v45  ;;  %v1285_v27 = vunpack.c.l.b16 %v1136_v52 }
 0x3e3   :  { %v1126_v44 = vpop.f32.mrf.mxu3 }
 0x3e4   :  { %v1127_v46 = vadd.f32 %v6005_v51, %v1126_v44  ;;  %v1286_v54 = vpack.c.b16 %v1285_v27, %v1285_v27 }
 0x3e6   :  { %v1135_v55 = vmul.f32 0.35355338, %v1127_v46 }
 0x3e8   :  { %v6746_v57 = vpack.c.bf16 %v1135_v55, %v1135_v55 }
 0x3ea   :  { %v1311_v59 = vunpack.c.l.b16 %v6746_v57 }
 0x3ec   :  { %v1312_v60 = vpack.c.b16 %v1311_v59, %v1311_v59 }
 0x430   :  { %v5920_v14 = vpop.permute.xlu1 %5919 }
 0x431   :  { %v5922_v20 = vunpack.i.h.bf16 %v5920_v14  ;;  %v5921_v22 = vunpack.i.l.bf16 %v5920_v14  ;;  %v5810_v14 = vld [vmem:[%s6415_s8] sm:$0xff] }
 0x432   :  { %985 = vmatpush.bf16.msra.mxu1 %v5810_v14  ;;  %v5812_v14 = vld [vmem:[%s6425_s19] sm:$0xff] }
 0x433   :  { %v859_v12 = vsel %vm857_vm9, %v856_v24, %v5922_v20  ;;  %v858_v29 = vsel %vm857_vm9, %v855_v25, %v5921_v22 }
 0x440   :  { %v5925_v23 = vpop.permute.xlu1 %5924 }
 0x441   :  { %v5927_v26 = vunpack.i.h.bf16 %v5925_v23  ;;  %v5926_v28 = vunpack.i.l.bf16 %v5925_v23 }
 0x443   :  { %v862_v47 = vsel %vm860_vm10, %v859_v12, %v5927_v26  ;;  %v861_v31 = vsel %vm860_vm10, %v858_v29, %v5926_v28 }
 0x444   :  { %v863_v32 = vpack.c.bf16 %v862_v47, %v861_v31 }
 0x446   :  { %5431 = vmatmul.msk.bf16.vlgmr.msra.gmra.mxu0 %vm245_vm0, %v863_v32 }
 0x4c3   :  { %v891_v16 = vpop.f32.mrf.mxu0 }
 0x4c4   :  { %v892_v33 = vadd.f32 %v6004_v15, %v891_v16 }
 0x4c6   :  { %v896_v34 = vadd.f32 %v892_v33, %v6560_v2  ;;  %v1139_v2 = vpack.c.bf16 %v1127_v46, %v1127_v46  ;;  %v6007_v46 = vld [vmem:[%s6410_s3] ss:$0 sm:$0xff] }
 0x4c8   :  { %v898_v35 = vsel %vm245_vm0, %v896_v34, 0.0  ;;  %v1165_v50 = vunpack.c.l.b16 %v1139_v2 }
 0x4c9   :  { %899 = vadd.xlane.f32.xlu1 %v898_v35 }
 0x4cb   :  { %v893_v37 = vpop.f32.mrf.mxu0 }
 0x4cc   :  { %v894_v38 = vadd.f32 %v6004_v15, %v893_v37 }
 0x4ce   :  { %v897_v39 = vadd.f32 %v894_v38, %v6563_v3  ;;  %v6737_v3 = vpack.c.b16 %v1165_v50, %v1165_v50  ;;  %v1132_v50 = vand.u32 127, %v1129_v41 }
 0x4d0   :  { %v901_v40 = vsel %vm245_vm0, %v897_v39, 0.0  ;;  %vm6782_vm5 = vcmp.le.s32.totalorder %v1132_v50, %v1130_v49 }
 0x4d1   :  { %902 = vadd.xlane.f32.xlu0 %v901_v40 }
 0x4e5   :  { %1143 = vrot.lane.b32.xlu0 %v6733_v48, %s7927_s5 }
 0x4ed   :  { %1315 = vrot.lane.b32.xlu0 %v6737_v3, %s7919_s0 }
 0x4f5   :  { %1287 = vrot.lane.b32.xlu0 %v1286_v54, %s7925_s28 }
 0x4fd   :  { %1455 = vrot.lane.b32.xlu0 %v6737_v3, %s7917_s1 }
 0x505   :  { %1572 = vrot.lane.b32.xlu0 %v6733_v48, %s7915_s7 }
 0x50d   :  { %1593 = vrot.lane.b32.xlu0 %v1312_v60, %s7921_s10 }
 0x53c   :  { %v900_v30 = vpop.xlane.xlu1 %899 }
 0x53d   :  { %v911_v0 = vmul.f32 %v6750_v63, %v900_v30 }
 0x53f   :  { %v913_v1 = vsub.f32 %v896_v34, %v911_v0 }
 0x541   :  { %v915_v4 = vmul.f32 %v913_v1, %v913_v1 }
 0x543   :  { %v917_v5 = vsel %vm245_vm0, %v915_v4, 0.0 }
 0x544   :  { %v903_v6 = vpop.xlane.xlu0 %902  ;;  %918 = vadd.xlane.f32.xlu2 %v917_v5 }
 0x545   :  { %v912_v7 = vmul.f32 %v6750_v63, %v903_v6 }
 0x547   :  { %v914_v8 = vsub.f32 %v897_v39, %v912_v7  ;;  %v6006_v39 = vld [vmem:[%s6405_s29] ss:$0 sm:$0xff] }
 0x549   :  { %v916_v9 = vmul.f32 %v914_v8, %v914_v8 }
 0x54b   :  { %v920_v10 = vsel %vm245_vm0, %v916_v9, 0.0 }
 0x54c   :  { %921 = vadd.xlane.f32.xlu1 %v920_v10 }
 0x557   :  { %v1144_v11 = vpop.permute.xlu0 %1143 }
 0x558   :  { %v1149_v21 = vsel %vm274_vm1, %v1144_v11, 0  ;;  %v5815_v11 = vld [vmem:[%s6425_s19 + $0x18] sm:$0xff] }
 0x559   :  { %1158 = vmatpush.bf16.xpose.msrb.mxu0 %v1149_v21  ;;  %1030 = vmatpush.bf16.msra.mxu2 %v5815_v11  ;;  %v5814_v21 = vld [vmem:[%s6425_s19 + $0x10] sm:$0xff] }
 0x55c   :  { %1167 = vrot.lane.b32.xlu2 %v6737_v3, %s7927_s5 }
 0x55d   :  { %1031 = vmatpush.bf16.msra.mxu2 %v5814_v21 }
 0x55f   :  { %v1316_v26 = vpop.permute.xlu0 %1315 }
 0x560   :  { %5467 = vmatmul.msk.bf16.vlgmr.msrb.gmra.mxu0 %vm274_vm1, %v1136_v52  ;;  %v1321_v59 = vsel %vm274_vm1, %v1316_v26, 0 }
 0x561   :  { %1032 = vmatpush.bf16.msra.mxu2 %v5813_v13 }
 0x564   :  { %1313 = vrot.lane.b32.xlu2 %v1312_v60, %s7925_s28 }
 0x565   :  { %1289 = vrot.lane.b32.xlu1 %v6733_v48, %s7919_s0  ;;  %1033 = vmatpush.bf16.msra.mxu2 %v5812_v14 }
 0x567   :  { %v1288_v33 = vpop.permute.xlu0 %1287 }
 0x56c   :  { %1430 = vrot.lane.b32.xlu2 %v1286_v54, %s7923_s2 }
 0x56d   :  { %1432 = vrot.lane.b32.xlu1 %v6733_v48, %s7917_s1  ;;  %s7968_s1 = sld [smem:[#allocation12_spill]] }
 0x56f   :  { %v1456_v43 = vpop.permute.xlu0 %1455 }
 0x570   :  { %v1461_v5 = vsel %vm274_vm1, %v1456_v43, 0 }
 0x574   :  { %1595 = vrot.lane.b32.xlu2 %v6737_v3, %s7915_s7  ;;  %s7967_s7 = sld [smem:[#allocation14_spill]] }
 0x575   :  { %1453 = vrot.lane.b32.xlu1 %v1312_v60, %s7923_s2 }
 0x577   :  { %v1573_v36 = vpop.permute.xlu0 %1572 }
 0x578   :  { %v1578_v0 = vsel %vm274_vm1, %v1573_v36, 0 }
 0x57d   :  { %1570 = vrot.lane.b32.xlu1 %v1286_v54, %s7921_s10 }
 0x5b7   :  { %v919_v17 = vpop.xlane.xlu2 %918 }
 0x5b8   :  { %v923_v18 = vmul.f32 %v919_v17, %v6750_v63 }
 0x5ba   :  { %v925_v19 = vadd.f32 1e-05, %v923_v18 }
 0x5bc   :  { %6080 = vrsqrt.f32 %v925_v19  ;;  %vm933_vm13 = vweird.f32 %v925_v19 }
 0x5bf   :  { %v922_v20 = vpop.xlane.xlu1 %921  ;;  %v1168_v22 = vpop.permute.xlu2 %1167 }
 0x5c0   :  { %v924_v23 = vmul.f32 %v922_v20, %v6750_v63  ;;  %v1173_v24 = vsel %vm274_vm1, %v1168_v22, 0 }
 0x5c1   :  { %1182 = vmatpush.bf16.xpose.msrb.mxu1 %v1173_v24 }
 0x5c2   :  { %v6081_v25 = vpop.eup %6080  ;;  %v926_v28 = vadd.f32 1e-05, %v924_v23  ;;  %v6008_v23 = vld [vmem:[%s6420_s14] ss:$0 sm:$0xff] }
 0x5c3   :  { %v928_v12 = vmul.f32 %v6081_v25, %v925_v19  ;;  %vm934_vm12 = vweird.f32 %v6081_v25 }
 0x5c4   :  { %6082 = vrsqrt.f32 %v926_v28  ;;  %vm935_vm14 = vmor %vm933_vm13, %vm934_vm12  ;;  %vm943_vm3 = vweird.f32 %v926_v28 }
 0x5c5   :  { %v929_v29 = vmul.f32 %v6081_v25, %v928_v12 }
 0x5c7   :  { %v930_v47 = vmul.f32 0.5, %v929_v29 }
 0x5c9   :  { %v931_v31 = vsub.f32 1.5, %v930_v47 }
 0x5ca   :  { %v6083_v32 = vpop.eup %6082 }
 0x5cb   :  { %v932_v15 = vmul.f32 %v6081_v25, %v931_v31  ;;  %v938_v16 = vmul.f32 %v6083_v32, %v926_v28  ;;  %vm944_vm15 = vweird.f32 %v6083_v32 }
 0x5cc   :  { %vm945_vm4 = vmor %vm943_vm3, %vm944_vm15 }
 0x5cd   :  { %v939_v34 = vmul.f32 %v6083_v32, %v938_v16  ;;  %v936_v35 = vsel %vm935_vm14, %v6081_v25, %v932_v15 }
 0x5ce   :  { %v947_v40 = vmul.f32 %v936_v35, %v913_v1  ;;  %v1314_v1 = vpop.permute.xlu2 %1313 }
 0x5cf   :  { %v940_v37 = vmul.f32 0.5, %v939_v34 }
 0x5d0   :  { %v952_v44 = vmul.f32 %v6006_v39, %v947_v40 }
 0x5d1   :  { %v941_v38 = vsub.f32 1.5, %v940_v37 }
 0x5d2   :  { %v6778_v54 = vadd.f32 %v6007_v46, %v952_v44 }
 0x5d3   :  { %v942_v51 = vmul.f32 %v6083_v32, %v941_v38 }
 0x5d5   :  { %v946_v42 = vsel %vm945_vm4, %v6083_v32, %v942_v51 }
 0x5d6   :  { %v948_v45 = vmul.f32 %v946_v42, %v914_v8  ;;  %v1431_v6 = vpop.permute.xlu2 %1430 }
 0x5d7   :  { %v1290_v2 = vpop.permute.xlu1 %1289 }
 0x5d8   :  { %v953_v52 = vmul.f32 %v6006_v39, %v948_v45  ;;  %v1295_v27 = vsel %vm274_vm1, %v1290_v2, 0 }
 0x5d9   :  { %1304 = vmatpush.bf16.xpose.msra.mxu0 %v1295_v27 }
 0x5da   :  { %v6780_v53 = vadd.f32 %v6007_v46, %v953_v52 }
 0x5dc   :  { %v959_v56 = vpack.c.bf16 %v6780_v53, %v6778_v54 }
 0x5dd   :  { %v1160_v58 = vpop.f32.mrf.mxu0 }
 0x5de   :  { %v1190_v60 = vsel %vm6782_vm5, %v1160_v58, -1e+30  ;;  %5440 = vmatmul.msk.bf16.vlgmr.msra.gmra.mxu1 %vm245_vm0, %v959_v56  ;;  %v1596_v8 = vpop.permute.xlu2 %1595 }
 0x5df   :  { %1330 = vmatpush.bf16.xpose.msra.mxu1 %v1321_v59  ;;  %v1433_v61 = vpop.permute.xlu1 %1432  ;;  %v1192_v62 = vsel %vm274_vm1, %v1190_v60, -inf  ;;  %v1601_v9 = vsel %vm274_vm1, %v1596_v8, 0 }
 0x5e0   :  { %v1438_v30 = vsel %vm274_vm1, %v1433_v61, 0  ;;  %5471 = vmatmul.msk.bf16.vlgmr.msra.gmra.mxu0 %vm274_vm1, %v1288_v33  ;;  %1193 = vmax.xlane.f32.xlu2 %v1192_v62 }
 0x5e1   :  { %1447 = vmatpush.bf16.xpose.msrb.mxu0 %v1438_v30 }
 0x5e5   :  { %v1162_v4 = vpop.f32.mrf.mxu0 }
 0x5e7   :  { %v1454_v7 = vpop.permute.xlu1 %1453 }
 0x5e9   :  { %1587 = vmatpush.bf16.xpose.msra.mxu0 %v1578_v0 }
 0x5ee   :  { %5468 = vmatmul.msk.bf16.vlgmr.msrb.gmra.mxu1 %vm274_vm1, %v6746_v57  ;;  %v1594_v57 = vpop.permute.xlu0 %1593 }
 0x5ef   :  { %1470 = vmatpush.bf16.xpose.msrb.mxu1 %v1461_v5  ;;  %v1571_v10 = vpop.permute.xlu1 %1570 }
 0x5f0   :  { %5475 = vmatmul.msk.bf16.vlgmr.msrb.gmra.mxu0 %vm274_vm1, %v1431_v6 }
 0x5fe   :  { %5472 = vmatmul.msk.bf16.vlgmr.msra.gmra.mxu1 %vm274_vm1, %v1314_v1 }
 0x5ff   :  { %1610 = vmatpush.bf16.xpose.msra.mxu1 %v1601_v9 }
 0x600   :  { %5479 = vmatmul.msk.bf16.vlgmr.msra.gmra.mxu0 %vm274_vm1, %v1571_v10 }
 0x60e   :  { %5476 = vmatmul.msk.bf16.vlgmr.msrb.gmra.mxu1 %vm274_vm1, %v1454_v7 }
 0x61e   :  { %5480 = vmatmul.msk.bf16.vlgmr.msra.gmra.mxu1 %vm274_vm1, %v1594_v57 }
 0x653   :  { %v1194_v17 = vpop.xlane.xlu2 %1193 }
 0x654   :  { %v1198_v18 = vsub.f32 %v1190_v60, %v1194_v17 }
 0x656   :  { %v1200_v19 = vmul.f32 1.442695, %v1198_v18 }
 0x658   :  { %6084 = vpow2.f32 %v1200_v19 }
 0x65b   :  { %v987_v20 = vpop.f32.mrf.mxu1 }
 0x65c   :  { %v988_v26 = vadd.f32 %v6008_v23, %v987_v20 }
 0x65d   :  { %v1306_v22 = vpop.f32.mrf.mxu0 }
 0x65e   :  { %v1336_v24 = vsel %vm6782_vm5, %v1306_v22, -1e+30  ;;  %v6813_v12 = vpop.eup %6084  ;;  %v992_v31 = vmax.f32 %v988_v26, 0.0 }
 0x65f   :  { %v1338_v25 = vsel %vm274_vm1, %v1336_v24, -inf  ;;  %v1204_v15 = vsel %vm274_vm1, %v6813_v12, 0.0 }
 0x660   :  { %1339 = vmax.xlane.f32.xlu0 %v1338_v25 }
 0x663   :  { %v989_v28 = vpop.f32.mrf.mxu1 }
 0x664   :  { %v990_v29 = vadd.f32 %v6008_v23, %v989_v28 }
 0x665   :  { %v1308_v47 = vpop.f32.mrf.mxu0 }
 0x666   :  { %v993_v32 = vmax.f32 %v990_v29, 0.0 }
 0x668   :  { %v994_v16 = vpack.c.bf16 %v993_v32, %v992_v31  ;;  %1205 = vadd.xlane.f32.xlu0 %v1204_v15 }
 0x66a   :  { %5457 = vmatmul.msk.bf16.vlgmr.msra.gmra.mxu2 %vm1022_vm6, %v994_v16 }
 0x66b   :  { %v1184_v33 = vpop.f32.mrf.mxu1 }
 0x66c   :  { %v1191_v34 = vsel %vm6782_vm5, %v1184_v33, -1e+30 }
 0x66d   :  { %v1449_v35 = vpop.f32.mrf.mxu0  ;;  %v1195_v37 = vsel %vm274_vm1, %v1191_v34, -inf }
 0x66e   :  { %1196 = vmax.xlane.f32.xlu1 %v1195_v37  ;;  %v1476_v38 = vsel %vm6782_vm5, %v1449_v35, -1e+30 }
 0x66f   :  { %v1478_v51 = vsel %vm274_vm1, %v1476_v38, -inf }
 0x673   :  { %v1186_v39 = vpop.f32.mrf.mxu1 }
 0x675   :  { %v1451_v40 = vpop.f32.mrf.mxu0 }
 0x676   :  { %1479 = vmax.xlane.f32.xlu1 %v1478_v51 }
 0x67b   :  { %v1332_v41 = vpop.f32.mrf.mxu1 }
 0x67c   :  { %v6832_v46 = vsel %vm6782_vm5, %v1332_v41, -1e+30 }
 0x67d   :  { %v1589_v42 = vpop.f32.mrf.mxu0  ;;  %v1341_v49 = vsel %vm274_vm1, %v6832_v46, -inf }
 0x67e   :  { %v6826_v43 = vsel %vm6782_vm5, %v1589_v42, -1e+30 }
 0x67f   :  { %v1618_v44 = vsel %vm274_vm1, %v6826_v43, -inf }
 0x680   :  { %1619 = vmax.xlane.f32.xlu2 %v1618_v44 }
 0x683   :  { %v1334_v45 = vpop.f32.mrf.mxu1 }
 0x685   :  { %v1591_v2 = vpop.f32.mrf.mxu0 }
 0x688   :  { %1342 = vmax.xlane.f32.xlu2 %v1341_v49 }
 0x68b   :  { %v1472_v50 = vpop.f32.mrf.mxu1 }
 0x68c   :  { %v6838_v52 = vsel %vm6782_vm5, %v1472_v50, -1e+30 }
 0x68d   :  { %v1481_v27 = vsel %vm274_vm1, %v6838_v52, -inf }
 0x68e   :  { %1482 = vmax.xlane.f32.xlu0 %v1481_v27 }
 0x693   :  { %v1474_v56 = vpop.f32.mrf.mxu1 }
 0x69b   :  { %v1612_v58 = vpop.f32.mrf.mxu1 }
 0x69c   :  { %v6850_v5 = vsel %vm6782_vm5, %v1612_v58, -1e+30 }
 0x69d   :  { %v1621_v7 = vsel %vm274_vm1, %v6850_v5, -inf }
 0x6a0   :  { %1242 = vrot.lane.b32.xlu2 %v6733_v48, %s7907_s15 }
 0x6a3   :  { %v1614_v59 = vpop.f32.mrf.mxu1 }
 0x6d3   :  { %v1340_v60 = vpop.xlane.xlu0 %1339 }
 0x6d4   :  { %v1344_v61 = vsub.f32 %v1336_v24, %v1340_v60 }
 0x6d6   :  { %v1346_v62 = vmul.f32 1.442695, %v1344_v61 }
 0x6d8   :  { %6086 = vpow2.f32 %v1346_v62 }
 0x6db   :  { %v1206_v0 = vpop.xlane.xlu0 %1205 }
 0x6dc   :  { %6088 = vrcp.f32 %v1206_v0  ;;  %v1221_v23 = vand.u32 2147483648, %v1206_v0  ;;  %vm1215_vm8 = vweird.f32 %v1206_v0  ;;  %v1219_v24 = vand.u32 2147483647, %v1206_v0 }
 0x6de   :  { %v6844_v36 = vpop.eup %6086  ;;  %v1222_v28 = vor.u32 1.1754944e-38, %v1221_v23  ;;  %vm1220_vm12 = vcmp.eq.f32.partialorder %v1219_v24, 8.507059e+37 }
 0x6df   :  { %v1350_v30 = vsel %vm274_vm1, %v6844_v36, 0.0 }
 0x6e0   :  { %1351 = vadd.xlane.f32.xlu1 %v1350_v30 }
 0x6e1   :  { %v1197_v1 = vpop.xlane.xlu1 %1196 }
 0x6e2   :  { %v1199_v4 = vsub.f32 %v1191_v34, %v1197_v1  ;;  %v6089_v8 = vpop.eup %6088 }
 0x6e3   :  { %v1211_v11 = vmul.f32 %v6089_v8, %v1206_v0  ;;  %vm1216_vm7 = vweird.f32 %v6089_v8 }
 0x6e4   :  { %v1202_v6 = vmul.f32 1.442695, %v1199_v4  ;;  %vm1217_vm11 = vmor %vm1215_vm8, %vm1216_vm7 }
 0x6e5   :  { %v1212_v14 = vsub.f32 1.0, %v1211_v11 }
 0x6e6   :  { %6090 = vpow2.f32 %v1202_v6 }
 0x6e7   :  { %v1213_v19 = vmul.f32 %v6089_v8, %v1212_v14 }
 0x6e8   :  { %1622 = vmax.xlane.f32.xlu1 %v1621_v7 }
 0x6e9   :  { %v1480_v9 = vpop.xlane.xlu1 %1479  ;;  %v1214_v22 = vadd.f32 %v6089_v8, %v1213_v19 }
 0x6ea   :  { %v1484_v10 = vsub.f32 %v1476_v38, %v1480_v9 }
 0x6eb   :  { %v1218_v26 = vsel %vm1217_vm11, %v6089_v8, %v1214_v22 }
 0x6ec   :  { %v6854_v57 = vpop.eup %6090  ;;  %v1486_v21 = vmul.f32 1.442695, %v1484_v10  ;;  %v1223_v29 = vsel %vm1220_vm12, %v1222_v28, %v1218_v26 }
 0x6ed   :  { %v1207_v13 = vsel %vm274_vm1, %v6854_v57, 0.0  ;;  %v1224_v47 = vmul.f32 %v6813_v12, %v1223_v29  ;;  %v6903_v23 = vpop.f32.mrf.mxu2 }
 0x6ee   :  { %6092 = vpow2.f32 %v1486_v21  ;;  %1208 = vadd.xlane.f32.xlu2 %v1207_v13 }
 0x6ef   :  { %v1240_v15 = vpack.c.bf16 %v1224_v47, %v1224_v47 }
 0x6f3   :  { %v1620_v17 = vpop.xlane.xlu2 %1619 }
 0x6f4   :  { %v6858_v18 = vpop.eup %6092  ;;  %v1624_v16 = vsub.f32 %v6826_v43, %v1620_v17 }
 0x6f5   :  { %v1490_v20 = vsel %vm274_vm1, %v6858_v18, 0.0  ;;  %v6908_v28 = vpop.f32.mrf.mxu2 }
 0x6f6   :  { %1491 = vadd.xlane.f32.xlu0 %v1490_v20  ;;  %v1626_v33 = vmul.f32 1.442695, %v1624_v16 }
 0x6f8   :  { %6094 = vpow2.f32 %v1626_v33 }
 0x6fb   :  { %v1343_v25 = vpop.xlane.xlu2 %1342 }
 0x6fc   :  { %v1345_v34 = vsub.f32 %v6832_v46, %v1343_v25 }
 0x6fe   :  { %v1348_v12 = vmul.f32 1.442695, %v1345_v34  ;;  %v6873_v35 = vpop.eup %6094 }
 0x6ff   :  { %v1630_v39 = vsel %vm274_vm1, %v6873_v35, 0.0 }
 0x700   :  { %6096 = vpow2.f32 %v1348_v12 }
 0x701   :  { %1263 = vrot.lane.b32.xlu1 %v6737_v3, %s7907_s15  ;;  %v1483_v37 = vpop.xlane.xlu0 %1482  ;;  %s7963_s15 = sld [smem:[#allocation6_spill]] }
 0x702   :  { %v1485_v38 = vsub.f32 %v6838_v52, %v1483_v37 }
 0x703   :  { %v1243_v31 = vpop.permute.xlu2 %1242 }
 0x704   :  { %v1248_v32 = vsel %vm373_vm2, %v1243_v31, 0  ;;  %v1488_v40 = vmul.f32 1.442695, %v1485_v38 }
 0x705   :  { %1257 = vmatpush.bf16.msrb.mxu2 %v1248_v32 }
 0x706   :  { %1409 = vrot.lane.b32.xlu2 %v6737_v3, %s7905_s11  ;;  %v6878_v51 = vpop.eup %6096  ;;  %6098 = vpow2.f32 %v1488_v40 }
 0x707   :  { %v1353_v41 = vsel %vm274_vm1, %v6878_v51, 0.0 }
 0x708   :  { %5469 = vmatmul.msk.bf16.vlgmr.msrb.gmra.mxu2 %vm274_vm1, %v1240_v15 }
 0x70a   :  { %1388 = vrot.lane.b32.xlu0 %v6733_v48, %s7905_s11  ;;  %s7961_s11 = sld [smem:[#allocation13_spill]] }
 0x70c   :  { %v6882_v42 = vpop.eup %6098 }
 0x70d   :  { %v1493_v43 = vsel %vm274_vm1, %v6882_v42, 0.0 }
 0x72b   :  { %1631 = vadd.xlane.f32.xlu1 %v1630_v39 }
 0x734   :  { %1354 = vadd.xlane.f32.xlu0 %v1353_v41 }
 0x73c   :  { %1494 = vadd.xlane.f32.xlu0 %v1493_v43 }
 0x750   :  { %1528 = vrot.lane.b32.xlu0 %v6733_v48, %s7903_s18 }
 0x753   :  { %v1352_v44 = vpop.xlane.xlu1 %1351 }
 0x754   :  { %6100 = vrcp.f32 %v1352_v44  ;;  %v1367_v7 = vand.u32 2147483648, %v1352_v44  ;;  %vm1361_vm7 = vweird.f32 %v1352_v44  ;;  %v1365_v9 = vand.u32 2147483647, %v1352_v44 }
 0x756   :  { %v1368_v20 = vor.u32 1.1754944e-38, %v1367_v7  ;;  %vm1366_vm11 = vcmp.eq.f32.partialorder %v1365_v9, 8.507059e+37 }
 0x758   :  { %1549 = vrot.lane.b32.xlu0 %v6737_v3, %s7903_s18  ;;  %s7960_s18 = sld [smem:[#allocation8_spill]] }
 0x75a   :  { %v6101_v50 = vpop.eup %6100 }
 0x75b   :  { %v1623_v45 = vpop.xlane.xlu1 %1622  ;;  %v1357_v52 = vmul.f32 %v6101_v50, %v1352_v44  ;;  %vm1362_vm3 = vweird.f32 %v6101_v50 }
 0x75c   :  { %v1625_v46 = vsub.f32 %v6850_v5, %v1623_v45  ;;  %vm1363_vm8 = vmor %vm1361_vm7, %vm1362_vm3 }
 0x75d   :  { %v1358_v59 = vsub.f32 1.0, %v1357_v52 }
 0x75e   :  { %v1628_v2 = vmul.f32 1.442695, %v1625_v46 }
 0x75f   :  { %v1359_v30 = vmul.f32 %v6101_v50, %v1358_v59 }
 0x760   :  { %6102 = vpow2.f32 %v1628_v2  ;;  %1668 = vrot.lane.b32.xlu0 %v6733_v48, %s7901_s16 }
 0x761   :  { %v1209_v49 = vpop.xlane.xlu2 %1208  ;;  %v1360_v5 = vadd.f32 %v6101_v50, %v1359_v30 }
 0x762   :  { %6104 = vrcp.f32 %v1209_v49  ;;  %v1236_v62 = vand.u32 2147483648, %v1209_v49  ;;  %v1234_v0 = vand.u32 2147483647, %v1209_v49  ;;  %vm1230_vm14 = vweird.f32 %v1209_v49 }
 0x763   :  { %v1364_v14 = vsel %vm1363_vm8, %v6101_v50, %v1360_v5 }
 0x764   :  { %v1237_v4 = vor.u32 1.1754944e-38, %v1236_v62  ;;  %vm1235_vm4 = vcmp.eq.f32.partialorder %v1234_v0, 8.507059e+37  ;;  %v1369_v22 = vsel %vm1366_vm11, %v1368_v20, %v1364_v14 }
 0x765   :  { %v1370_v24 = vmul.f32 %v6844_v36, %v1369_v22 }
 0x766   :  { %v6893_v27 = vpop.eup %6102 }
 0x767   :  { %v1633_v56 = vsel %vm274_vm1, %v6893_v27, 0.0  ;;  %v1386_v26 = vpack.c.bf16 %v1370_v24, %v1370_v24 }
 0x768   :  { %v6105_v58 = vpop.eup %6104  ;;  %1689 = vrot.lane.b32.xlu0 %v6737_v3, %s7901_s16  ;;  %1634 = vadd.xlane.f32.xlu2 %v1633_v56  ;;  %s7959_s16 = sld [smem:[#allocation7_spill]] }
 0x769   :  { %v1226_v60 = vmul.f32 %v6105_v58, %v1209_v49  ;;  %vm1231_vm13 = vweird.f32 %v6105_v58  ;;  %v1410_v8 = vpop.permute.xlu2 %1409  ;;  %v1492_v21 = vpop.xlane.xlu0 %1491 }
 0x76a   :  { %vm1232_vm15 = vmor %vm1230_vm14, %vm1231_vm13  ;;  %v1415_v17 = vsel %vm373_vm2, %v1410_v8, 0  ;;  %6106 = vrcp.f32 %v1492_v21  ;;  %v1507_v52 = vand.u32 2147483648, %v1492_v21 }
 0x76b   :  { %v1227_v61 = vsub.f32 1.0, %v1226_v60 }
 0x76c   :  { %v1508_v0 = vor.u32 1.1754944e-38, %v1507_v52 }
 0x76d   :  { %v1228_v48 = vmul.f32 %v6105_v58, %v1227_v61 }
 0x76f   :  { %v1229_v1 = vadd.f32 %v6105_v58, %v1228_v48 }
 0x770   :  { %v6107_v32 = vpop.eup %6106 }
 0x771   :  { %v1233_v6 = vsel %vm1232_vm15, %v6105_v58, %v1229_v1  ;;  %v1497_v15 = vmul.f32 %v6107_v32, %v1492_v21  ;;  %vm1502_vm14 = vweird.f32 %v6107_v32  ;;  %v1505_v58 = vand.u32 2147483647, %v1492_v21 }
 0x772   :  { %v1238_v3 = vsel %vm1235_vm4, %v1237_v4, %v1233_v6  ;;  %vm1501_vm4 = vweird.f32 %v1492_v21 }
 0x773   :  { %v1264_v10 = vpop.permute.xlu1 %1263  ;;  %v1239_v11 = vmul.f32 %v6854_v57, %v1238_v3  ;;  %v1498_v33 = vsub.f32 1.0, %v1497_v15  ;;  %vm1503_vm7 = vmor %vm1501_vm4, %vm1502_vm14  ;;  %vm1506_vm8 = vcmp.eq.f32.partialorder %v1505_v58, 8.507059e+37 }
 0x774   :  { %v1269_v13 = vsel %vm373_vm2, %v1264_v10, 0 }
 0x775   :  { %1278 = vmatpush.bf16.msra.mxu3 %v1269_v13  ;;  %v1241_v19 = vpack.c.bf16 %v1239_v11, %v1239_v11  ;;  %v1499_v39 = vmul.f32 %v6107_v32, %v1498_v33 }
 0x777   :  { %v1500_v46 = vadd.f32 %v6107_v32, %v1499_v39 }
 0x778   :  { %5470 = vmatmul.msk.bf16.vlgmr.msra.gmra.mxu3 %vm274_vm1, %v1241_v19 }
 0x779   :  { %1424 = vmatpush.bf16.msrb.mxu3 %v1415_v17  ;;  %v1504_v61 = vsel %vm1503_vm7, %v6107_v32, %v1500_v46 }
 0x77a   :  { %v1509_v1 = vsel %vm1506_vm8, %v1508_v0, %v1504_v61 }
 0x77b   :  { %v1510_v8 = vmul.f32 %v6858_v18, %v1509_v1 }
 0x77c   :  { %v1389_v57 = vpop.permute.xlu0 %1388 }
 0x77d   :  { %v1394_v25 = vsel %vm373_vm2, %v1389_v57, 0  ;;  %v1526_v21 = vpack.c.bf16 %v1510_v8, %v1510_v8 }
 0x77e   :  { %1403 = vmatpush.bf16.msra.mxu2 %v1394_v25 }
 0x781   :  { %5473 = vmatmul.msk.bf16.vlgmr.msra.gmra.mxu2 %vm274_vm1, %v1386_v26 }
 0x78b   :  { %v6910_v29 = vpop.f32.mrf.mxu2 }
 0x793   :  { %v1261_v47 = vpop.f32.mrf.mxu2 }
 0x79e   :  { %v6912_v36 = vpop.xlane.xlu1 %1631 }
 0x79f   :  { %v1647_v17 = vand.u32 2147483648, %v6912_v36  ;;  %v1645_v18 = vand.u32 2147483647, %v6912_v36 }
 0x7a1   :  { %v1648_v57 = vor.u32 1.1754944e-38, %v1647_v17  ;;  %vm1646_vm7 = vcmp.eq.f32.partialorder %v1645_v18, 8.507059e+37 }
 0x7a7   :  { %v1355_v31 = vpop.xlane.xlu0 %1354 }
 0x7a8   :  { %6108 = vrcp.f32 %v1355_v31  ;;  %v1382_v38 = vand.u32 2147483648, %v1355_v31  ;;  %v1380_v41 = vand.u32 2147483647, %v1355_v31  ;;  %vm1376_vm13 = vweird.f32 %v1355_v31 }
 0x7aa   :  { %v1383_v45 = vor.u32 1.1754944e-38, %v1382_v38  ;;  %vm1381_vm3 = vcmp.eq.f32.partialorder %v1380_v41, 8.507059e+37 }
 0x7ae   :  { %v6109_v16 = vpop.eup %6108 }
 0x7af   :  { %v1372_v34 = vmul.f32 %v6109_v16, %v1355_v31  ;;  %v1495_v12 = vpop.xlane.xlu0 %1494  ;;  %vm1377_vm12 = vweird.f32 %v6109_v16 }
 0x7b0   :  { %6110 = vrcp.f32 %v1495_v12  ;;  %vm1378_vm15 = vmor %vm1376_vm13, %vm1377_vm12  ;;  %v1522_v6 = vand.u32 2147483648, %v1495_v12  ;;  %vm1516_vm12 = vweird.f32 %v1495_v12  ;;  %v1520_v7 = vand.u32 2147483647, %v1495_v12 }
 0x7b1   :  { %v1373_v37 = vsub.f32 1.0, %v1372_v34  ;;  %6112 = vrcp.f32 %v6912_v36 }
 0x7b2   :  { %v1523_v11 = vor.u32 1.1754944e-38, %v1522_v6  ;;  %vm1521_vm14 = vcmp.eq.f32.partialorder %v1520_v7, 8.507059e+37 }
 0x7b3   :  { %v1374_v40 = vmul.f32 %v6109_v16, %v1373_v37 }
 0x7b5   :  { %v1375_v43 = vadd.f32 %v6109_v16, %v1374_v40 }
 0x7b6   :  { %v6111_v44 = vpop.eup %6110 }
 0x7b7   :  { %v1379_v2 = vsel %vm1378_vm15, %v6109_v16, %v1375_v43  ;;  %v1512_v49 = vmul.f32 %v6111_v44, %v1495_v12  ;;  %v6113_v50 = vpop.eup %6112  ;;  %vm1517_vm11 = vweird.f32 %v6111_v44 }
 0x7b8   :  { %v1384_v56 = vsel %vm1381_vm3, %v1383_v45, %v1379_v2  ;;  %v1637_v62 = vmul.f32 %v6113_v50, %v6912_v36  ;;  %vm1518_vm13 = vmor %vm1516_vm12, %vm1517_vm11  ;;  %vm1642_vm15 = vweird.f32 %v6113_v50  ;;  %vm1641_vm3 = vweird.f32 %v6912_v36 }
 0x7b9   :  { %v1513_v59 = vsub.f32 1.0, %v1512_v49  ;;  %v1385_v60 = vmul.f32 %v6878_v51, %v1384_v56  ;;  %vm1643_vm4 = vmor %vm1641_vm3, %vm1642_vm15 }
 0x7ba   :  { %v1638_v4 = vsub.f32 1.0, %v1637_v62 }
 0x7bb   :  { %v1514_v30 = vmul.f32 %v6111_v44, %v1513_v59  ;;  %v1387_v48 = vpack.c.bf16 %v1385_v60, %v1385_v60 }
 0x7bc   :  { %v1639_v3 = vmul.f32 %v6113_v50, %v1638_v4 }
 0x7bd   :  { %5474 = vmatmul.msk.bf16.vlgmr.msrb.gmra.mxu3 %vm274_vm1, %v1387_v48  ;;  %v1515_v5 = vadd.f32 %v6111_v44, %v1514_v30  ;;  %v6009_v48 = vld [vmem:[%s6430_s24] ss:$0 sm:$0xff] }
 0x7be   :  { %v1640_v14 = vadd.f32 %v6113_v50, %v1639_v3  ;;  %v1038_v1 = vadd.f32 %v6009_v48, %v6908_v28  ;;  %v5818_v28 = vld [vmem:[%s7959_s16] sm:$0xff] }
 0x7bf   :  { %v1519_v9 = vsel %vm1518_vm13, %v6111_v44, %v1515_v5 }
 0x7c0   :  { %v1524_v13 = vsel %vm1521_vm14, %v1523_v11, %v1519_v9  ;;  %v1644_v22 = vsel %vm1643_vm4, %v6113_v50, %v1640_v14  ;;  %v1041_v4 = vadd.f32 %v1038_v1, %v6780_v53 }
 0x7c1   :  { %v1525_v19 = vmul.f32 %v6882_v42, %v1524_v13  ;;  %v1649_v26 = vsel %vm1646_vm7, %v1648_v57, %v1644_v22 }
 0x7c2   :  { %v1529_v51 = vpop.permute.xlu0 %1528  ;;  %v1650_v47 = vmul.f32 %v6873_v35, %v1649_v26  ;;  %v1045_v5 = vsel %vm245_vm0, %v1041_v4, 0.0 }
 0x7c3   :  { %v1534_v10 = vsel %vm373_vm2, %v1529_v51, 0  ;;  %v1527_v25 = vpack.c.bf16 %v1525_v19, %v1525_v19  ;;  %v1036_v51 = vadd.f32 %v6009_v48, %v6903_v23  ;;  %v5822_v48 = vld [vmem:[%s7961_s11] sm:$0xff] }
 0x7c4   :  { %1543 = vmatpush.bf16.msrb.mxu2 %v1534_v10  ;;  %v1666_v15 = vpack.c.bf16 %v1650_v47, %v1650_v47  ;;  %v5819_v10 = vld [vmem:[%s7959_s16 + $0x8] sm:$0xff] }
 0x7c5   :  { %v1040_v3 = vadd.f32 %v1036_v51, %v6778_v54  ;;  %1765 = vmatpush.bf16.msrb.mxu0 %v5819_v10 }
 0x7c7   :  { %5477 = vmatmul.msk.bf16.vlgmr.msrb.gmra.mxu2 %vm274_vm1, %v1526_v21  ;;  %v1042_v9 = vsel %vm245_vm0, %v1040_v3, 0.0 }
 0x7c9   :  { %1766 = vmatpush.bf16.msrb.mxu0 %v5818_v28 }
 0x7ca   :  { %v1550_v20 = vpop.permute.xlu0 %1549 }
 0x7cb   :  { %v1555_v24 = vsel %vm373_vm2, %v1550_v20, 0 }
 0x7cc   :  { %1564 = vmatpush.bf16.msra.mxu3 %v1555_v24 }
 0x7cf   :  { %5478 = vmatmul.msk.bf16.vlgmr.msra.gmra.mxu3 %vm274_vm1, %v1527_v25 }
 0x7d2   :  { %v1669_v31 = vpop.permute.xlu0 %1668 }
 0x7d3   :  { %v1674_v32 = vsel %vm373_vm2, %v1669_v31, 0 }
 0x7d4   :  { %1683 = vmatpush.bf16.msra.mxu2 %v1674_v32 }
 0x7d7   :  { %5481 = vmatmul.msk.bf16.vlgmr.msra.gmra.mxu2 %vm274_vm1, %v1666_v15 }
 0x7da   :  { %v1690_v42 = vpop.permute.xlu0 %1689 }
 0x7db   :  { %v1695_v16 = vsel %vm373_vm2, %v1690_v42, 0  ;;  %v1635_v33 = vpop.xlane.xlu2 %1634 }
 0x7dc   :  { %6114 = vrcp.f32 %v1635_v33  ;;  %1704 = vmatpush.bf16.msrb.mxu3 %v1695_v16  ;;  %v1662_v37 = vand.u32 2147483648, %v1635_v33  ;;  %v1660_v35 = vand.u32 2147483647, %v1635_v33  ;;  %vm1656_vm11 = vweird.f32 %v1635_v33 }
 0x7de   :  { %v1663_v40 = vor.u32 1.1754944e-38, %v1662_v37  ;;  %vm1661_vm13 = vcmp.eq.f32.partialorder %v1660_v35, 8.507059e+37 }
 0x7e2   :  { %v6115_v36 = vpop.eup %6114 }
 0x7e3   :  { %v1652_v34 = vmul.f32 %v6115_v36, %v1635_v33  ;;  %vm1657_vm8 = vweird.f32 %v6115_v36 }
 0x7e4   :  { %vm1658_vm12 = vmor %vm1656_vm11, %vm1657_vm8 }
 0x7e5   :  { %v1653_v12 = vsub.f32 1.0, %v1652_v34 }
 0x7e7   :  { %v1654_v38 = vmul.f32 %v6115_v36, %v1653_v12 }
 0x7e9   :  { %v1655_v39 = vadd.f32 %v6115_v36, %v1654_v38 }
 0x7eb   :  { %v1659_v41 = vsel %vm1658_vm12, %v6115_v36, %v1655_v39  ;;  %v6286_v36 = vld [vmem:[%s6380_s9] sm:$0xff] }
 0x7ec   :  { %v1664_v43 = vsel %vm1661_vm13, %v1663_v40, %v1659_v41  ;;  %v6287_v40 = vld [vmem:[%s6380_s9 + $0x8] sm:$0xff]  ;;  %s7962_s9 = sld [smem:[#allocation5_spill]] }
 0x7ed   :  { %v1665_v44 = vmul.f32 %v6893_v27, %v1664_v43 }
 0x7ef   :  { %v1667_v45 = vpack.c.bf16 %v1665_v44, %v1665_v44 }
 0x7f1   :  { %5482 = vmatmul.msk.bf16.vlgmr.msrb.gmra.mxu3 %vm274_vm1, %v1667_v45 }
 0x7fb   :  { %v1280_v46 = vpop.f32.mrf.mxu3 }
 0x803   :  { %v1282_v2 = vpop.f32.mrf.mxu3 }
 0x804   :  { %v1405_v49 = vpop.f32.mrf.mxu2 }
 0x80c   :  { %v1407_v50 = vpop.f32.mrf.mxu2 }
 0x840   :  { %v1426_v52 = vpop.f32.mrf.mxu3 }
 0x841   :  { %v5928_v56 = vpack.i.bf16 %v1426_v52, %v1405_v49 }
 0x843   :  { %5929 = vrot.lane.b32.xlu1 %v5928_v56, %s7913_s22  ;;  %s7966_s22 = sld [smem:[#allocation10_spill]] }
 0x848   :  { %v1428_v58 = vpop.f32.mrf.mxu3 }
 0x84a   :  { %v1545_v59 = vpop.f32.mrf.mxu2 }
 0x852   :  { %v1547_v60 = vpop.f32.mrf.mxu2  ;;  %v1566_v61 = vpop.f32.mrf.mxu3 }
 0x853   :  { %v5933_v62 = vpack.i.bf16 %v1566_v61, %v1545_v59 }
 0x855   :  { %5934 = vrot.lane.b32.xlu2 %v5933_v62, %s7911_s23  ;;  %v5823_v62 = vld [vmem:[%s7961_s11 + $0x8] sm:$0xff]  ;;  %s7965_s23 = sld [smem:[#allocation9_spill]] }
 0x856   :  { %1887 = vmatpush.bf16.msrb.mxu2 %v5823_v62 }
 0x85a   :  { %v1568_v27 = vpop.f32.mrf.mxu3  ;;  %v1685_v30 = vpop.f32.mrf.mxu2  ;;  %1888 = vmatpush.bf16.msrb.mxu2 %v5822_v48 }
 0x862   :  { %v1687_v0 = vpop.f32.mrf.mxu2 }
 0x86d   :  { %1046 = vadd.xlane.f32.xlu1 %v1045_v5 }
 0x874   :  { %v1706_v6 = vpop.f32.mrf.mxu3 }
 0x875   :  { %v5938_v7 = vpack.i.bf16 %v1706_v6, %v1685_v30 }
 0x877   :  { %5939 = vrot.lane.b32.xlu0 %v5938_v7, %s7909_s26  ;;  %s7964_s26 = sld [smem:[#allocation11_spill]] }
 0x87c   :  { %v1708_v8 = vpop.f32.mrf.mxu3 }
 0x8a1   :  { %1043 = vadd.xlane.f32.xlu0 %v1042_v9 }
 0x8af   :  { %v5935_v18 = vpop.permute.xlu2 %5934 }
 0x8b0   :  { %v5937_v22 = vunpack.i.h.bf16 %v5935_v18  ;;  %v5936_v24 = vunpack.i.l.bf16 %v5935_v18 }
 0x8b5   :  { %v5930_v53 = vpop.permute.xlu1 %5929 }
 0x8b6   :  { %v5932_v14 = vunpack.i.h.bf16 %v5930_v53  ;;  %v5931_v17 = vunpack.i.l.bf16 %v5930_v53 }
 0x8b8   :  { %v1735_v19 = vsel %vm274_vm1, %v1280_v46, %v5932_v14  ;;  %v1734_v20 = vsel %vm274_vm1, %v6910_v29, %v5931_v17  ;;  %v6011_v29 = vld [vmem:[%s7960_s18] ss:$0 sm:$0xff] }
 0x8b9   :  { %v1736_v47 = vsel %vm857_vm9, %v1734_v20, %v5936_v24  ;;  %v1737_v31 = vsel %vm857_vm9, %v1735_v19, %v5937_v22  ;;  %v6012_v24 = vld [vmem:[%s7963_s15] ss:$0 sm:$0xff] }
 0x8e0   :  { %v1047_v11 = vpop.xlane.xlu1 %1046 }
 0x8e1   :  { %v1049_v21 = vmul.f32 %v1047_v11, %v6750_v63 }
 0x8e3   :  { %v6946_v13 = vsub.f32 %v1041_v4, %v1049_v21 }
 0x8e5   :  { %v1053_v23 = vmul.f32 %v6946_v13, %v6946_v13 }
 0x8e7   :  { %v1057_v54 = vsel %vm245_vm0, %v1053_v23, 0.0  ;;  %v6010_v23 = vld [vmem:[%s7962_s9] ss:$0 sm:$0xff] }
 0x8e8   :  { %1058 = vadd.xlane.f32.xlu1 %v1057_v54 }
 0x8e9   :  { %v5940_v57 = vpop.permute.xlu0 %5939 }
 0x8ea   :  { %v5942_v25 = vunpack.i.h.bf16 %v5940_v57  ;;  %v5941_v26 = vunpack.i.l.bf16 %v5940_v57 }
 0x8ec   :  { %v1739_v32 = vsel %vm860_vm10, %v1737_v31, %v5942_v25  ;;  %v1738_v15 = vsel %vm860_vm10, %v1736_v47, %v5941_v26  ;;  %v5821_v31 = vld [vmem:[%s7964_s26 + $0x8] sm:$0xff] }
 0x8ed   :  { %v1740_v42 = vpack.c.bf16 %v1739_v32, %v1738_v15  ;;  %1854 = vmatpush.bf16.msrb.mxu1 %v5821_v31  ;;  %v5820_v15 = vld [vmem:[%s7964_s26] sm:$0xff]  ;;  %s7990_s26 = sld [smem:[#allocation22_spill]] }
 0x8ef   :  { %5491 = vmatmul.msk.bf16.vlgmr.msrb.gmra.mxu0 %vm245_vm0, %v1740_v42 }
 0x8f1   :  { %1855 = vmatpush.bf16.msrb.mxu1 %v5820_v15 }
 0x914   :  { %v1044_v37 = vpop.xlane.xlu0 %1043 }
 0x915   :  { %v1048_v35 = vmul.f32 %v1044_v37, %v6750_v63 }
 0x917   :  { %v1050_v43 = vsub.f32 %v1040_v3, %v1048_v35 }
 0x919   :  { %v1052_v45 = vmul.f32 %v1050_v43, %v1050_v43 }
 0x91b   :  { %v1054_v46 = vsel %vm245_vm0, %v1052_v45, 0.0 }
 0x95b   :  { %v1059_v2 = vpop.xlane.xlu1 %1058 }
 0x95c   :  { %v1061_v49 = vmul.f32 %v1059_v2, %v6750_v63 }
 0x95e   :  { %v1063_v50 = vadd.f32 1e-05, %v1061_v49 }
 0x960   :  { %6116 = vrsqrt.f32 %v1063_v50  ;;  %vm1080_vm15 = vweird.f32 %v1063_v50 }
 0x966   :  { %v6117_v27 = vpop.eup %6116 }
 0x967   :  { %v1075_v1 = vmul.f32 %v6117_v27, %v1063_v50  ;;  %vm1081_vm14 = vweird.f32 %v6117_v27 }
 0x968   :  { %vm1082_vm3 = vmor %vm1080_vm15, %vm1081_vm14 }
 0x969   :  { %v1076_v6 = vmul.f32 %v6117_v27, %v1075_v1 }
 0x96b   :  { %v1077_v3 = vmul.f32 0.5, %v1076_v6 }
 0x96c   :  { %v1768_v16 = vpop.f32.mrf.mxu0 }
 0x96d   :  { %v1769_v33 = vadd.f32 %v6011_v29, %v1768_v16  ;;  %v1078_v9 = vsub.f32 1.5, %v1077_v3 }
 0x96f   :  { %v1773_v34 = vadd.f32 %v6286_v36, %v1769_v33  ;;  %v1079_v28 = vmul.f32 %v6117_v27, %v1078_v9 }
 0x971   :  { %v1775_v12 = vsel %vm245_vm0, %v1773_v34, 0.0  ;;  %v1083_v21 = vsel %vm1082_vm3, %v6117_v27, %v1079_v28 }
 0x972   :  { %1776 = vadd.xlane.f32.xlu2 %v1775_v12  ;;  %v1085_v18 = vmul.f32 %v1083_v21, %v6946_v13 }
 0x974   :  { %v1770_v38 = vpop.f32.mrf.mxu0  ;;  %v1090_v20 = vmul.f32 %v6010_v23, %v1085_v18 }
 0x975   :  { %v1771_v39 = vadd.f32 %v6011_v29, %v1770_v38 }
 0x976   :  { %v6987_v26 = vadd.f32 %v6012_v24, %v1090_v20 }
 0x977   :  { %v1774_v41 = vadd.f32 %v6287_v40, %v1771_v39 }
 0x979   :  { %v1778_v44 = vsel %vm245_vm0, %v1774_v41, 0.0 }
 0x97a   :  { %1779 = vadd.xlane.f32.xlu0 %v1778_v44 }
 0x982   :  { %1055 = vadd.xlane.f32.xlu0 %v1054_v46  ;;  %v6013_v46 = vld [vmem:[%s7965_s23] ss:$0 sm:$0xff]  ;;  %s7989_s23 = smov 40  }
 0x9e5   :  { %v1777_v52 = vpop.xlane.xlu2 %1776 }
 0x9e6   :  { %v1781_v56 = vmul.f32 %v1777_v52, %v6750_v63 }
 0x9e8   :  { %v6968_v58 = vsub.f32 %v1773_v34, %v1781_v56 }
 0x9ea   :  { %v1785_v59 = vmul.f32 %v6968_v58, %v6968_v58 }
 0x9ec   :  { %v1787_v60 = vsel %vm245_vm0, %v1785_v59, 0.0  ;;  %v6014_v59 = vld [vmem:[%s7966_s22] ss:$0 sm:$0xff]  ;;  %s7986_s22 = sld [smem:[#allocation20_spill]] }
 0x9ed   :  { %1788 = vadd.xlane.f32.xlu2 %v1787_v60  ;;  %v1780_v61 = vpop.xlane.xlu0 %1779 }
 0x9ee   :  { %v1782_v30 = vmul.f32 %v1780_v61, %v6750_v63 }
 0x9f0   :  { %v6976_v0 = vsub.f32 %v1774_v41, %v1782_v30  ;;  %v6015_v30 = vld [vmem:[%s7967_s7] ss:$0 sm:$0xff]  ;;  %s7983_s7 = sld [smem:[#allocation18_spill]] }
 0x9f2   :  { %v1786_v4 = vmul.f32 %v6976_v0, %v6976_v0 }
 0x9f4   :  { %v1790_v5 = vsel %vm245_vm0, %v1786_v4, 0.0 }
 0x9f5   :  { %1791 = vadd.xlane.f32.xlu0 %v1790_v5  ;;  %v1056_v7 = vpop.xlane.xlu0 %1055 }
 0x9f6   :  { %v1060_v8 = vmul.f32 %v1056_v7, %v6750_v63 }
 0x9f8   :  { %v1062_v51 = vadd.f32 1e-05, %v1060_v8 }
 0x9fa   :  { %6118 = vrsqrt.f32 %v1062_v51  ;;  %vm1070_vm7 = vweird.f32 %v1062_v51 }
 0xa00   :  { %v6119_v10 = vpop.eup %6118 }
 0xa01   :  { %v1065_v53 = vmul.f32 %v6119_v10, %v1062_v51  ;;  %vm1071_vm4 = vweird.f32 %v6119_v10 }
 0xa02   :  { %vm1072_vm8 = vmor %vm1070_vm7, %vm1071_vm4 }
 0xa03   :  { %v1066_v11 = vmul.f32 %v6119_v10, %v1065_v53 }
 0xa05   :  { %v1067_v14 = vmul.f32 0.5, %v1066_v11 }
 0xa07   :  { %v1068_v17 = vsub.f32 1.5, %v1067_v14 }
 0xa09   :  { %v1069_v54 = vmul.f32 %v6119_v10, %v1068_v17 }
 0xa0b   :  { %v1073_v19 = vsel %vm1072_vm8, %v6119_v10, %v1069_v54  ;;  %v6016_v10 = vld [vmem:[%s7968_s1] ss:$0 sm:$0xff]  ;;  %s7981_s1 = smov 88  }
 0xa0c   :  { %v1084_v22 = vmul.f32 %v1073_v19, %v1050_v43 }
 0xa0e   :  { %v1089_v57 = vmul.f32 %v6010_v23, %v1084_v22 }
 0xa10   :  { %v6985_v25 = vadd.f32 %v6012_v24, %v1089_v57 }
 0xa12   :  { %v6991_v47 = vpack.c.bf16 %v6987_v26, %v6985_v25 }
 0xa14   :  { %5509 = vmatmul.msk.bf16.vlgmr.msrb.gmra.mxu2 %vm245_vm0, %v6991_v47 }
 0xa60   :  { %v1789_v13 = vpop.xlane.xlu2 %1788 }
 0xa61   :  { %v1793_v32 = vmul.f32 %v1789_v13, %v6750_v63 }
 0xa63   :  { %v1795_v42 = vadd.f32 1e-05, %v1793_v32 }
 0xa65   :  { %6120 = vrsqrt.f32 %v1795_v42  ;;  %vm1803_vm12 = vweird.f32 %v1795_v42 }
 0xa68   :  { %v1792_v29 = vpop.xlane.xlu0 %1791 }
 0xa69   :  { %v1794_v16 = vmul.f32 %v1792_v29, %v6750_v63 }
 0xa6b   :  { %v6121_v33 = vpop.eup %6120  ;;  %v1796_v36 = vadd.f32 1e-05, %v1794_v16 }
 0xa6c   :  { %v1798_v34 = vmul.f32 %v6121_v33, %v1795_v42  ;;  %vm1804_vm11 = vweird.f32 %v6121_v33 }
 0xa6d   :  { %6122 = vrsqrt.f32 %v1796_v36  ;;  %vm1805_vm13 = vmor %vm1803_vm12, %vm1804_vm11  ;;  %vm1813_vm15 = vweird.f32 %v1796_v36 }
 0xa6e   :  { %v1799_v12 = vmul.f32 %v6121_v33, %v1798_v34 }
 0xa70   :  { %v1800_v37 = vmul.f32 0.5, %v1799_v12 }
 0xa72   :  { %v1801_v38 = vsub.f32 1.5, %v1800_v37 }
 0xa73   :  { %v6123_v35 = vpop.eup %6122 }
 0xa74   :  { %v1802_v39 = vmul.f32 %v6121_v33, %v1801_v38  ;;  %v1808_v40 = vmul.f32 %v6123_v35, %v1796_v36  ;;  %vm1814_vm14 = vweird.f32 %v6123_v35 }
 0xa75   :  { %vm1815_vm3 = vmor %vm1813_vm15, %vm1814_vm14 }
 0xa76   :  { %v1809_v41 = vmul.f32 %v6123_v35, %v1808_v40  ;;  %v1806_v43 = vsel %vm1805_vm13, %v6121_v33, %v1802_v39 }
 0xa77   :  { %v1817_v2 = vmul.f32 %v1806_v43, %v6968_v58 }
 0xa78   :  { %v1810_v44 = vmul.f32 0.5, %v1809_v41 }
 0xa79   :  { %v1822_v52 = vmul.f32 %v6013_v46, %v1817_v2 }
 0xa7a   :  { %v1811_v45 = vsub.f32 1.5, %v1810_v44 }
 0xa7b   :  { %v7003_v61 = vadd.f32 %v6014_v59, %v1822_v52 }
 0xa7c   :  { %v1812_v49 = vmul.f32 %v6123_v35, %v1811_v45 }
 0xa7e   :  { %v1816_v50 = vsel %vm1815_vm3, %v6123_v35, %v1812_v49 }
 0xa7f   :  { %v1818_v56 = vmul.f32 %v1816_v50, %v6976_v0 }
 0xa81   :  { %v1823_v60 = vmul.f32 %v6013_v46, %v1818_v56 }
 0xa83   :  { %v7005_v62 = vadd.f32 %v6014_v59, %v1823_v60 }
 0xa85   :  { %v1829_v27 = vpack.c.bf16 %v7005_v62, %v7003_v61 }
 0xa87   :  { %5500 = vmatmul.msk.bf16.vlgmr.msrb.gmra.mxu1 %vm245_vm0, %v1829_v27 }
 0xa97   :  { %v1890_v58 = vpop.f32.mrf.mxu2 }
 0xa98   :  { %v1891_v48 = vadd.f32 %v6015_v30, %v1890_v58 }
 0xa9a   :  { %v1899_v1 = vpack.c.bf16 %v1891_v48, %v1891_v48 }
 0xa9c   :  { %v1905_v4 = vsel %vm274_vm1, %v1899_v1, 0  ;;  %v1990_v5 = vunpack.c.l.b16 %v1899_v1 }
 0xa9d   :  { %1914 = vmatpush.bf16.xpose.msra.mxu3 %v1905_v4 }
 0xa9e   :  { %v7012_v0 = vpack.c.b16 %v1990_v5, %v1990_v5 }
 0xa9f   :  { %v1892_v6 = vpop.f32.mrf.mxu2 }
 0xaa0   :  { %v1893_v7 = vadd.f32 %v6015_v30, %v1892_v6  ;;  %2042 = vrot.lane.b32.xlu1 %v7012_v0, %s7925_s28 }
 0xaa2   :  { %v1900_v8 = vpack.c.bf16 %v1893_v7, %v1893_v7 }
 0xaa4   :  { %v2014_v51 = vunpack.c.l.b16 %v1900_v8  ;;  %v1924_v3 = vsel %vm274_vm1, %v1900_v8, 0 }
 0xaa5   :  { %1933 = vmatpush.bf16.xpose.msra.mxu0 %v1924_v3 }
 0xaa6   :  { %v7017_v9 = vpack.c.b16 %v2014_v51, %v2014_v51 }
 0xaa8   :  { %2068 = vrot.lane.b32.xlu2 %v7017_v9, %s7925_s28  ;;  %2206 = vrot.lane.b32.xlu1 %v7017_v9, %s7923_s2 }
 0xab0   :  { %2183 = vrot.lane.b32.xlu2 %v7012_v0, %s7923_s2  ;;  %2321 = vrot.lane.b32.xlu1 %v7012_v0, %s7921_s10 }
 0xb02   :  { %v2069_v28 = vpop.permute.xlu2 %2068 }
 0xb03   :  { %v2074_v53 = vsel %vm274_vm1, %v2069_v28, 0 }
 0xb04   :  { %v1857_v11 = vpop.f32.mrf.mxu1  ;;  %2083 = vmatpush.bf16.xpose.msrb.mxu0 %v2074_v53 }
 0xb05   :  { %v1858_v21 = vadd.f32 %v6016_v10, %v1857_v11 }
 0xb07   :  { %v1895_v14 = vmul.f32 0.35355338, %v1858_v21 }
 0xb09   :  { %v1897_v17 = vpack.c.bf16 %v1895_v14, %v1895_v14 }
 0xb0a   :  { %v2184_v22 = vpop.permute.xlu2 %2183 }
 0xb0b   :  { %v2038_v23 = vunpack.c.l.b16 %v1897_v17  ;;  %5510 = vmatmul.msk.bf16.vlgmr.msra.gmra.mxu3 %vm274_vm1, %v1897_v17  ;;  %v2189_v32 = vsel %vm274_vm1, %v2184_v22, 0 }
 0xb0c   :  { %v1859_v18 = vpop.f32.mrf.mxu1 }
 0xb0d   :  { %v1860_v54 = vadd.f32 %v6016_v10, %v1859_v18  ;;  %v2039_v19 = vpack.c.b16 %v2038_v23, %v2038_v23 }
 0xb0f   :  { %v1896_v20 = vmul.f32 0.35355338, %v1860_v54  ;;  %2040 = vrot.lane.b32.xlu0 %v2039_v19, %s7925_s28 }
 0xb11   :  { %v1898_v24 = vpack.c.bf16 %v1896_v20, %v1896_v20 }
 0xb12   :  { %v2043_v57 = vpop.permute.xlu1 %2042 }
 0xb13   :  { %v2048_v13 = vsel %vm274_vm1, %v2043_v57, 0  ;;  %5511 = vmatmul.msk.bf16.vlgmr.msra.gmra.mxu0 %vm274_vm1, %v1898_v24  ;;  %v2064_v31 = vunpack.c.l.b16 %v1898_v24 }
 0xb14   :  { %2057 = vmatpush.bf16.xpose.msrb.mxu3 %v2048_v13 }
 0xb15   :  { %v2065_v15 = vpack.c.b16 %v2064_v31, %v2064_v31 }
 0xb17   :  { %2342 = vrot.lane.b32.xlu1 %v2065_v15, %s7921_s10  ;;  %2204 = vrot.lane.b32.xlu2 %v2065_v15, %s7923_s2 }
 0xb18   :  { %2066 = vrot.lane.b32.xlu0 %v2065_v15, %s7925_s28  ;;  %s7973_s28 = smov 16  }
 0xb1a   :  { %v2207_v42 = vpop.permute.xlu1 %2206 }
 0xb1b   :  { %v2212_v29 = vsel %vm274_vm1, %v2207_v42, 0 }
 0xb1c   :  { %2198 = vmatpush.bf16.xpose.msra.mxu3 %v2189_v32  ;;  %2221 = vmatpush.bf16.xpose.msra.mxu0 %v2212_v29 }
 0xb1f   :  { %2319 = vrot.lane.b32.xlu2 %v2039_v19, %s7921_s10 }
 0xb20   :  { %2181 = vrot.lane.b32.xlu0 %v2039_v19, %s7923_s2  ;;  %s7972_s2 = smov 8  }
 0xb22   :  { %v2322_v16 = vpop.permute.xlu1 %2321 }
 0xb23   :  { %v2327_v36 = vsel %vm274_vm1, %v2322_v16, 0 }
 0xb28   :  { %2344 = vrot.lane.b32.xlu0 %v7017_v9, %s7921_s10  ;;  %s7970_s10 = smov 72  }
 0xb71   :  { %v2205_v41 = vpop.permute.xlu2 %2204 }
 0xb79   :  { %v2320_v46 = vpop.permute.xlu2 %2319 }
 0xb81   :  { %v2041_v33 = vpop.permute.xlu0 %2040 }
 0xb82   :  { %5514 = vmatmul.msk.bf16.vlgmr.msrb.gmra.mxu3 %vm274_vm1, %v2041_v33 }
 0xb83   :  { %2336 = vmatpush.bf16.xpose.msrb.mxu3 %v2327_v36 }
 0xb89   :  { %v2343_v2 = vpop.permute.xlu1 %2342 }
 0xb8a   :  { %v2067_v34 = vpop.permute.xlu0 %2066 }
 0xb8b   :  { %5515 = vmatmul.msk.bf16.vlgmr.msrb.gmra.mxu0 %vm274_vm1, %v2067_v34 }
 0xb8e   :  { %v1916_v12 = vpop.f32.mrf.mxu3 }
 0xb8f   :  { %v1939_v37 = vsel %vm274_vm1, %v1916_v12, -inf }
 0xb90   :  { %v1935_v38 = vpop.f32.mrf.mxu0  ;;  %1940 = vmax.xlane.f32.xlu2 %v1939_v37 }
 0xb91   :  { %v1942_v35 = vsel %vm274_vm1, %v1935_v38, -inf }
 0xb92   :  { %v2182_v39 = vpop.permute.xlu0 %2181  ;;  %1943 = vmax.xlane.f32.xlu0 %v1942_v35 }
 0xb93   :  { %5518 = vmatmul.msk.bf16.vlgmr.msra.gmra.mxu3 %vm274_vm1, %v2182_v39 }
 0xb96   :  { %v1918_v40 = vpop.f32.mrf.mxu3 }
 0xb98   :  { %v1937_v43 = vpop.f32.mrf.mxu0 }
 0xb9a   :  { %v2345_v44 = vpop.permute.xlu0 %2344 }
 0xb9b   :  { %v2350_v45 = vsel %vm274_vm1, %v2345_v44, 0  ;;  %5519 = vmatmul.msk.bf16.vlgmr.msra.gmra.mxu0 %vm274_vm1, %v2205_v41 }
 0xb9c   :  { %2359 = vmatpush.bf16.xpose.msrb.mxu0 %v2350_v45 }
 0xba3   :  { %5522 = vmatmul.msk.bf16.vlgmr.msrb.gmra.mxu3 %vm274_vm1, %v2320_v46 }
 0xbab   :  { %5523 = vmatmul.msk.bf16.vlgmr.msrb.gmra.mxu0 %vm274_vm1, %v2343_v2 }
 0xc03   :  { %v1941_v49 = vpop.xlane.xlu2 %1940 }
 0xc04   :  { %v1945_v50 = vsub.f32 %v1916_v12, %v1941_v49 }
 0xc05   :  { %v1944_v52 = vpop.xlane.xlu0 %1943  ;;  %v2059_v56 = vpop.f32.mrf.mxu3 }
 0xc06   :  { %v1947_v59 = vmul.f32 1.442695, %v1945_v50  ;;  %v1946_v60 = vsub.f32 %v1935_v38, %v1944_v52  ;;  %v2089_v27 = vsel %vm274_vm1, %v2059_v56, -inf }
 0xc07   :  { %2090 = vmax.xlane.f32.xlu2 %v2089_v27 }
 0xc08   :  { %6124 = vpow2.f32 %v1947_v59  ;;  %v1949_v30 = vmul.f32 1.442695, %v1946_v60  ;;  %v2085_v58 = vpop.f32.mrf.mxu0 }
 0xc09   :  { %v2092_v48 = vsel %vm274_vm1, %v2085_v58, -inf }
 0xc0a   :  { %6126 = vpow2.f32 %v1949_v30  ;;  %2093 = vmax.xlane.f32.xlu1 %v2092_v48 }
 0xc0d   :  { %v2061_v1 = vpop.f32.mrf.mxu3 }
 0xc0e   :  { %v7054_v4 = vpop.eup %6124 }
 0xc0f   :  { %v1951_v5 = vsel %vm274_vm1, %v7054_v4, 0.0 }
 0xc10   :  { %v7058_v6 = vpop.eup %6126  ;;  %v2087_v7 = vpop.f32.mrf.mxu0  ;;  %1952 = vadd.xlane.f32.xlu2 %v1951_v5 }
 0xc11   :  { %v1954_v8 = vsel %vm274_vm1, %v7058_v6, 0.0 }
 0xc12   :  { %1955 = vadd.xlane.f32.xlu0 %v1954_v8 }
 0xc16   :  { %v2200_v51 = vpop.f32.mrf.mxu3 }
 0xc17   :  { %v2227_v3 = vsel %vm274_vm1, %v2200_v51, -inf }
 0xc18   :  { %v2223_v10 = vpop.f32.mrf.mxu0  ;;  %2228 = vmax.xlane.f32.xlu1 %v2227_v3 }
 0xc19   :  { %v2230_v28 = vsel %vm274_vm1, %v2223_v10, -inf }
 0xc1a   :  { %2231 = vmax.xlane.f32.xlu0 %v2230_v28 }
 0xc1e   :  { %v2202_v53 = vpop.f32.mrf.mxu3 }
 0xc20   :  { %v2225_v11 = vpop.f32.mrf.mxu0 }
 0xc26   :  { %v7064_v21 = vpop.f32.mrf.mxu3 }
 0xc27   :  { %v2365_v14 = vsel %vm274_vm1, %v7064_v21, -inf }
 0xc28   :  { %v7068_v17 = vpop.f32.mrf.mxu0  ;;  %2366 = vmax.xlane.f32.xlu1 %v2365_v14  ;;  %2160 = vrot.lane.b32.xlu2 %v7017_v9, %s7919_s0 }
 0xc29   :  { %v2368_v54 = vsel %vm274_vm1, %v7068_v17, -inf }
 0xc2e   :  { %v2340_v23 = vpop.f32.mrf.mxu3  ;;  %1992 = vrot.lane.b32.xlu0 %v7012_v0, %s7927_s5 }
 0xc30   :  { %v2363_v18 = vpop.f32.mrf.mxu0 }
 0xc36   :  { %2139 = vrot.lane.b32.xlu0 %v7012_v0, %s7919_s0  ;;  %s7969_s0 = smov 80  }
 0xc41   :  { %2016 = vrot.lane.b32.xlu1 %v7017_v9, %s7927_s5  ;;  %s7974_s5 = smov 24  }
 0xc51   :  { %2369 = vmax.xlane.f32.xlu2 %v2368_v54 }
 0xc7a   :  { %v2091_v19 = vpop.xlane.xlu2 %2090 }
 0xc7b   :  { %v2095_v20 = vsub.f32 %v2059_v56, %v2091_v19 }
 0xc7d   :  { %v2097_v22 = vmul.f32 1.442695, %v2095_v20  ;;  %v2094_v24 = vpop.xlane.xlu1 %2093 }
 0xc7e   :  { %v2096_v57 = vsub.f32 %v2085_v58, %v2094_v24 }
 0xc7f   :  { %6128 = vpow2.f32 %v2097_v22 }
 0xc80   :  { %v2099_v13 = vmul.f32 1.442695, %v2096_v57 }
 0xc82   :  { %6130 = vpow2.f32 %v2099_v13 }
 0xc83   :  { %v1953_v31 = vpop.xlane.xlu2 %1952 }
 0xc84   :  { %6132 = vrcp.f32 %v1953_v31  ;;  %v1968_v45 = vand.u32 2147483648, %v1953_v31  ;;  %vm1962_vm7 = vweird.f32 %v1953_v31  ;;  %v1966_v46 = vand.u32 2147483647, %v1953_v31 }
 0xc85   :  { %v7080_v32 = vpop.eup %6128  ;;  %v1956_v15 = vpop.xlane.xlu0 %1955 }
 0xc86   :  { %v2101_v42 = vsel %vm274_vm1, %v7080_v32, 0.0  ;;  %v1969_v59 = vor.u32 1.1754944e-38, %v1968_v45  ;;  %vm1967_vm11 = vcmp.eq.f32.partialorder %v1966_v46, 8.507059e+37  ;;  %v1983_v3 = vand.u32 2147483648, %v1956_v15 }
 0xc87   :  { %2102 = vadd.xlane.f32.xlu2 %v2101_v42  ;;  %vm1977_vm13 = vweird.f32 %v1956_v15  ;;  %v1981_v28 = vand.u32 2147483647, %v1956_v15 }
 0xc88   :  { %v7084_v29 = vpop.eup %6130  ;;  %v1984_v11 = vor.u32 1.1754944e-38, %v1983_v3 }
 0xc89   :  { %v2104_v16 = vsel %vm274_vm1, %v7084_v29, 0.0  ;;  %vm1982_vm15 = vcmp.eq.f32.partialorder %v1981_v28, 8.507059e+37 }
 0xc8a   :  { %v6133_v33 = vpop.eup %6132  ;;  %2105 = vadd.xlane.f32.xlu0 %v2104_v16 }
 0xc8b   :  { %v1958_v36 = vmul.f32 %v6133_v33, %v1953_v31  ;;  %v2229_v34 = vpop.xlane.xlu1 %2228  ;;  %vm1963_vm4 = vweird.f32 %v6133_v33  ;;  %v2161_v23 = vpop.permute.xlu2 %2160 }
 0xc8c   :  { %v2233_v12 = vsub.f32 %v2200_v51, %v2229_v34  ;;  %vm1964_vm8 = vmor %vm1962_vm7, %vm1963_vm4  ;;  %v2166_v20 = vsel %vm373_vm2, %v2161_v23, 0 }
 0xc8d   :  { %v1959_v37 = vsub.f32 1.0, %v1958_v36  ;;  %v2232_v38 = vpop.xlane.xlu0 %2231 }
 0xc8e   :  { %v2235_v35 = vmul.f32 1.442695, %v2233_v12  ;;  %v2234_v39 = vsub.f32 %v2223_v10, %v2232_v38 }
 0xc8f   :  { %v1960_v41 = vmul.f32 %v6133_v33, %v1959_v37 }
 0xc90   :  { %6134 = vpow2.f32 %v2235_v35  ;;  %v2237_v40 = vmul.f32 1.442695, %v2234_v39 }
 0xc91   :  { %v1961_v43 = vadd.f32 %v6133_v33, %v1960_v41 }
 0xc92   :  { %6136 = vpow2.f32 %v2237_v40 }
 0xc93   :  { %6138 = vrcp.f32 %v1956_v15  ;;  %v1965_v52 = vsel %vm1964_vm8, %v6133_v33, %v1961_v43 }
 0xc94   :  { %v1970_v27 = vsel %vm1967_vm11, %v1969_v59, %v1965_v52 }
 0xc95   :  { %v1971_v30 = vmul.f32 %v7054_v4, %v1970_v27 }
 0xc96   :  { %v7088_v44 = vpop.eup %6134 }
 0xc97   :  { %v2239_v2 = vsel %vm274_vm1, %v7088_v44, 0.0  ;;  %v1987_v5 = vpack.c.bf16 %v1971_v30, %v1971_v30 }
 0xc98   :  { %v7092_v49 = vpop.eup %6136  ;;  %2240 = vadd.xlane.f32.xlu1 %v2239_v2 }
 0xc99   :  { %v6139_v50 = vpop.eup %6138  ;;  %v2242_v56 = vsel %vm274_vm1, %v7092_v49, 0.0 }
 0xc9a   :  { %2243 = vadd.xlane.f32.xlu2 %v2242_v56  ;;  %v1973_v60 = vmul.f32 %v6139_v50, %v1956_v15  ;;  %vm1978_vm12 = vweird.f32 %v6139_v50 }
 0xc9b   :  { %vm1979_vm14 = vmor %vm1977_vm13, %vm1978_vm12  ;;  %v2367_v4 = vpop.xlane.xlu1 %2366 }
 0xc9c   :  { %v1974_v58 = vsub.f32 1.0, %v1973_v60  ;;  %v2371_v31 = vsub.f32 %v7064_v21, %v2367_v4 }
 0xc9e   :  { %v1975_v7 = vmul.f32 %v6139_v50, %v1974_v58 }
 0xca0   :  { %v1993_v48 = vpop.permute.xlu0 %1992  ;;  %v1976_v8 = vadd.f32 %v6139_v50, %v1975_v7 }
 0xca1   :  { %v1998_v1 = vsel %vm373_vm2, %v1993_v48, 0 }
 0xca2   :  { %2007 = vmatpush.bf16.msra.mxu1 %v1998_v1  ;;  %v1980_v53 = vsel %vm1979_vm14, %v6139_v50, %v1976_v8 }
 0xca3   :  { %v1985_v14 = vsel %vm1982_vm15, %v1984_v11, %v1980_v53 }
 0xca4   :  { %v1986_v18 = vmul.f32 %v7058_v6, %v1985_v14  ;;  %v2373_v6 = vmul.f32 1.442695, %v2371_v31 }
 0xca5   :  { %5512 = vmatmul.msk.bf16.vlgmr.msra.gmra.mxu1 %vm274_vm1, %v1987_v5 }
 0xca6   :  { %v1988_v22 = vpack.c.bf16 %v1986_v18, %v1986_v18 }
 0xca8   :  { %v2140_v51 = vpop.permute.xlu0 %2139 }
 0xca9   :  { %v2145_v10 = vsel %vm373_vm2, %v2140_v51, 0 }
 0xcaa   :  { %2154 = vmatpush.bf16.msrb.mxu1 %v2145_v10 }
 0xcb1   :  { %2277 = vrot.lane.b32.xlu1 %v7012_v0, %s7969_s0 }
 0xcb2   :  { %2298 = vrot.lane.b32.xlu2 %v7017_v9, %s7969_s0 }
 0xcb3   :  { %v2017_v54 = vpop.permute.xlu1 %2016 }
 0xcb4   :  { %v2022_v19 = vsel %vm373_vm2, %v2017_v54, 0 }
 0xcb5   :  { %2031 = vmatpush.bf16.msra.mxu2 %v2022_v19 }
 0xcb8   :  { %5513 = vmatmul.msk.bf16.vlgmr.msra.gmra.mxu2 %vm274_vm1, %v1988_v22 }
 0xcb9   :  { %2175 = vmatpush.bf16.msrb.mxu2 %v2166_v20  ;;  %2415 = vrot.lane.b32.xlu1 %v7012_v0, %s7970_s10 }
 0xcc4   :  { %v2370_v24 = vpop.xlane.xlu2 %2369 }
 0xcc5   :  { %v2372_v57 = vsub.f32 %v7068_v17, %v2370_v24 }
 0xcc7   :  { %v2375_v13 = vmul.f32 1.442695, %v2372_v57 }
 0xcc9   :  { %6140 = vpow2.f32 %v2375_v13 }
 0xcca   :  { %6142 = vpow2.f32 %v2373_v6 }
 0xccf   :  { %v7112_v15 = vpop.eup %6140 }
 0xcd0   :  { %v2380_v42 = vsel %vm274_vm1, %v7112_v15, 0.0  ;;  %v7116_v16 = vpop.eup %6142 }
 0xcd1   :  { %2381 = vadd.xlane.f32.xlu0 %v2380_v42  ;;  %v2377_v0 = vsel %vm274_vm1, %v7116_v16, 0.0 }
 0xcdb   :  { %2378 = vadd.xlane.f32.xlu2 %v2377_v0 }
 0xce5   :  { %2436 = vrot.lane.b32.xlu0 %v7017_v9, %s7970_s10 }
 0xcfa   :  { %v2103_v17 = vpop.xlane.xlu2 %2102 }
 0xcfb   :  { %6144 = vrcp.f32 %v2103_v17  ;;  %v2118_v35 = vand.u32 2147483648, %v2103_v17  ;;  %vm2112_vm4 = vweird.f32 %v2103_v17  ;;  %v2116_v40 = vand.u32 2147483647, %v2103_v17 }
 0xcfd   :  { %v2106_v21 = vpop.xlane.xlu0 %2105  ;;  %v2119_v2 = vor.u32 1.1754944e-38, %v2118_v35  ;;  %vm2117_vm12 = vcmp.eq.f32.partialorder %v2116_v40, 8.507059e+37 }
 0xcfe   :  { %6146 = vrcp.f32 %v2106_v21  ;;  %v2133_v45 = vand.u32 2147483648, %v2106_v21  ;;  %v2131_v9 = vand.u32 2147483647, %v2106_v21  ;;  %vm2127_vm11 = vweird.f32 %v2106_v21 }
 0xd00   :  { %v2134_v59 = vor.u32 1.1754944e-38, %v2133_v45  ;;  %vm2132_vm14 = vcmp.eq.f32.partialorder %v2131_v9, 8.507059e+37 }
 0xd01   :  { %v6145_v33 = vpop.eup %6144 }
 0xd02   :  { %v2108_v36 = vmul.f32 %v6145_v33, %v2103_v17  ;;  %vm2113_vm3 = vweird.f32 %v6145_v33 }
 0xd03   :  { %vm2114_vm8 = vmor %vm2112_vm4, %vm2113_vm3 }
 0xd04   :  { %v6147_v34 = vpop.eup %6146  ;;  %v2109_v12 = vsub.f32 1.0, %v2108_v36 }
 0xd05   :  { %v2123_v37 = vmul.f32 %v6147_v34, %v2106_v21  ;;  %vm2128_vm7 = vweird.f32 %v6147_v34 }
 0xd06   :  { %v2110_v38 = vmul.f32 %v6145_v33, %v2109_v12  ;;  %vm2129_vm13 = vmor %vm2127_vm11, %vm2128_vm7 }
 0xd07   :  { %v2124_v39 = vsub.f32 1.0, %v2123_v37 }
 0xd08   :  { %v2111_v41 = vadd.f32 %v6145_v33, %v2110_v38 }
 0xd09   :  { %v2125_v43 = vmul.f32 %v6147_v34, %v2124_v39 }
 0xd0a   :  { %v2115_v46 = vsel %vm2114_vm8, %v6145_v33, %v2111_v41 }
 0xd0b   :  { %v2126_v50 = vadd.f32 %v6147_v34, %v2125_v43  ;;  %v2241_v52 = vpop.xlane.xlu1 %2240  ;;  %v2120_v27 = vsel %vm2117_vm12, %v2119_v2, %v2115_v46 }
 0xd0c   :  { %6148 = vrcp.f32 %v2241_v52  ;;  %v2121_v30 = vmul.f32 %v7080_v32, %v2120_v27  ;;  %v2256_v32 = vand.u32 2147483648, %v2241_v52  ;;  %vm2250_vm4 = vweird.f32 %v2241_v52  ;;  %v5833_v27 = vld [vmem:[%s6385_s13 + $0x18] sm:$0xff] }
 0xd0d   :  { %v2130_v56 = vsel %vm2129_vm13, %v6147_v34, %v2126_v50  ;;  %v2244_v60 = vpop.xlane.xlu2 %2243  ;;  %v2254_v54 = vand.u32 2147483647, %v2241_v52 }
 0xd0e   :  { %6150 = vrcp.f32 %v2244_v60  ;;  %v2135_v58 = vsel %vm2132_vm14, %v2134_v59, %v2130_v56  ;;  %v2137_v1 = vpack.c.bf16 %v2121_v30, %v2121_v30  ;;  %v2269_v18 = vand.u32 2147483647, %v2244_v60 }
 0xd0f   :  { %v2136_v48 = vmul.f32 %v7084_v29, %v2135_v58  ;;  %v2271_v29 = vand.u32 2147483648, %v2244_v60  ;;  %vm2265_vm8 = vweird.f32 %v2244_v60  ;;  %v2257_v24 = vor.u32 1.1754944e-38, %v2256_v32 }
 0xd10   :  { %5516 = vmatmul.msk.bf16.vlgmr.msrb.gmra.mxu1 %vm274_vm1, %v2137_v1  ;;  %vm2270_vm12 = vcmp.eq.f32.partialorder %v2269_v18, 8.507059e+37  ;;  %vm2255_vm13 = vcmp.eq.f32.partialorder %v2254_v54, 8.507059e+37 }
 0xd11   :  { %v2138_v7 = vpack.c.bf16 %v2136_v48, %v2136_v48  ;;  %v2272_v22 = vor.u32 1.1754944e-38, %v2271_v29 }
 0xd12   :  { %v6149_v5 = vpop.eup %6148 }
 0xd13   :  { %v2246_v8 = vmul.f32 %v6149_v5, %v2241_v52  ;;  %5517 = vmatmul.msk.bf16.vlgmr.msrb.gmra.mxu2 %vm274_vm1, %v2138_v7  ;;  %vm2251_vm15 = vweird.f32 %v6149_v5 }
 0xd14   :  { %v6151_v51 = vpop.eup %6150  ;;  %vm2252_vm7 = vmor %vm2250_vm4, %vm2251_vm15 }
 0xd15   :  { %v2247_v3 = vsub.f32 1.0, %v2246_v8  ;;  %v2261_v10 = vmul.f32 %v6151_v51, %v2244_v60  ;;  %v2299_v28 = vpop.permute.xlu2 %2298  ;;  %vm2266_vm3 = vweird.f32 %v6151_v51 }
 0xd16   :  { %v2304_v4 = vsel %vm373_vm2, %v2299_v28, 0  ;;  %vm2267_vm11 = vmor %vm2265_vm8, %vm2266_vm3 }
 0xd17   :  { %v2248_v53 = vmul.f32 %v6149_v5, %v2247_v3  ;;  %v2262_v11 = vsub.f32 1.0, %v2261_v10  ;;  %2313 = vmatpush.bf16.msra.mxu2 %v2304_v4 }
 0xd19   :  { %v2249_v14 = vadd.f32 %v6149_v5, %v2248_v53  ;;  %v2263_v23 = vmul.f32 %v6151_v51, %v2262_v11 }
 0xd1b   :  { %v2264_v19 = vadd.f32 %v6151_v51, %v2263_v23  ;;  %v2253_v20 = vsel %vm2252_vm7, %v6149_v5, %v2249_v14 }
 0xd1c   :  { %v2258_v31 = vsel %vm2255_vm13, %v2257_v24, %v2253_v20 }
 0xd1d   :  { %v2268_v57 = vsel %vm2267_vm11, %v6151_v51, %v2264_v19  ;;  %v2259_v0 = vmul.f32 %v7088_v44, %v2258_v31  ;;  %v5832_v51 = vld [vmem:[%s6385_s13 + $0x10] sm:$0xff]  ;;  %s7971_s13 = sld [smem:[#allocation15_spill]] }
 0xd1e   :  { %v2273_v13 = vsel %vm2270_vm12, %v2272_v22, %v2268_v57 }
 0xd1f   :  { %v2274_v6 = vmul.f32 %v7092_v49, %v2273_v13  ;;  %v2275_v36 = vpack.c.bf16 %v2259_v0, %v2259_v0 }
 0xd21   :  { %v2276_v42 = vpack.c.bf16 %v2274_v6, %v2274_v6 }
 0xd22   :  { %v7129_v17 = vpop.f32.mrf.mxu1 }
 0xd23   :  { %v2278_v21 = vpop.permute.xlu1 %2277  ;;  %5521 = vmatmul.msk.bf16.vlgmr.msra.gmra.mxu2 %vm274_vm1, %v2276_v42  ;;  %v5825_v31 = vld [vmem:[%s7971_s13 + $0x8] sm:$0xff]  ;;  %v5824_v6 = vld [vmem:[%s7971_s13] sm:$0xff]  ;;  %s7980_s13 = sld [smem:[#allocation19_spill]] }
 0xd24   :  { %v2283_v33 = vsel %vm373_vm2, %v2278_v21, 0  ;;  %2512 = vmatpush.bf16.msra.mxu3 %v5825_v31 }
 0xd25   :  { %2292 = vmatpush.bf16.msra.mxu1 %v2283_v33 }
 0xd28   :  { %5520 = vmatmul.msk.bf16.vlgmr.msra.gmra.mxu1 %vm274_vm1, %v2275_v36  ;;  %2513 = vmatpush.bf16.msra.mxu3 %v5824_v6 }
 0xd29   :  { %v5826_v31 = vld [vmem:[%s7980_s13] sm:$0xff] }
 0xd2a   :  { %v2011_v34 = vpop.f32.mrf.mxu1 }
 0xd2b   :  { %v2416_v12 = vpop.permute.xlu1 %2415 }
 0xd2c   :  { %v2421_v37 = vsel %vm373_vm2, %v2416_v12, 0 }
 0xd2d   :  { %2430 = vmatpush.bf16.msrb.mxu1 %v2421_v37 }
 0xd3b   :  { %v7135_v49 = vpop.f32.mrf.mxu2 }
 0xd43   :  { %v2035_v38 = vpop.f32.mrf.mxu2 }
 0xd44   :  { %v2382_v44 = vpop.xlane.xlu0 %2381 }
 0xd45   :  { %6152 = vrcp.f32 %v2382_v44  ;;  %v2409_v43 = vand.u32 2147483648, %v2382_v44  ;;  %v2407_v9 = vand.u32 2147483647, %v2382_v44  ;;  %vm2403_vm15 = vweird.f32 %v2382_v44 }
 0xd47   :  { %v2410_v2 = vor.u32 1.1754944e-38, %v2409_v43  ;;  %vm2408_vm4 = vcmp.eq.f32.partialorder %v2407_v9, 8.507059e+37  ;;  %v6018_v9 = vld [vmem:[%s7975_s27] ss:$0 sm:$0xff]  ;;  %s7979_s27 = smov 104  }
 0xd4b   :  { %v6153_v35 = vpop.eup %6152 }
 0xd4c   :  { %v2399_v39 = vmul.f32 %v6153_v35, %v2382_v44  ;;  %vm2404_vm14 = vweird.f32 %v6153_v35 }
 0xd4d   :  { %vm2405_vm3 = vmor %vm2403_vm15, %vm2404_vm14 }
 0xd4e   :  { %v2400_v40 = vsub.f32 1.0, %v2399_v39  ;;  %v2379_v41 = vpop.xlane.xlu2 %2378 }
 0xd4f   :  { %6154 = vrcp.f32 %v2379_v41  ;;  %v2394_v1 = vand.u32 2147483648, %v2379_v41  ;;  %v2392_v8 = vand.u32 2147483647, %v2379_v41  ;;  %vm2388_vm8 = vweird.f32 %v2379_v41 }
 0xd50   :  { %v2401_v45 = vmul.f32 %v6153_v35, %v2400_v40 }
 0xd51   :  { %vm2393_vm12 = vcmp.eq.f32.partialorder %v2392_v8, 8.507059e+37 }
 0xd52   :  { %v2402_v46 = vadd.f32 %v6153_v35, %v2401_v45 }
 0xd54   :  { %v2406_v50 = vsel %vm2405_vm3, %v6153_v35, %v2402_v46 }
 0xd55   :  { %v6155_v52 = vpop.eup %6154  ;;  %v2411_v56 = vsel %vm2408_vm4, %v2410_v2, %v2406_v50 }
 0xd56   :  { %v2412_v59 = vmul.f32 %v7112_v15, %v2411_v56  ;;  %v2384_v60 = vmul.f32 %v6155_v52, %v2379_v41  ;;  %vm2389_vm7 = vweird.f32 %v6155_v52  ;;  %v2395_v15 = vor.u32 1.1754944e-38, %v2394_v1 }
 0xd57   :  { %v2437_v30 = vpop.permute.xlu0 %2436  ;;  %vm2390_vm11 = vmor %vm2388_vm8, %vm2389_vm7 }
 0xd58   :  { %v2385_v58 = vsub.f32 1.0, %v2384_v60  ;;  %v2442_v48 = vsel %vm373_vm2, %v2437_v30, 0  ;;  %v2414_v5 = vpack.c.bf16 %v2412_v59, %v2412_v59  ;;  %v6017_v60 = vld [vmem:[%s6390_s17 + $0x1] ss:$0 sm:$0xff]  ;;  %s7978_s17 = smov 112  }
 0xd59   :  { %2451 = vmatpush.bf16.msrb.mxu2 %v2442_v48 }
 0xd5a   :  { %v2386_v7 = vmul.f32 %v6155_v52, %v2385_v58 }
 0xd5c   :  { %v2387_v3 = vadd.f32 %v6155_v52, %v2386_v7  ;;  %5525 = vmatmul.msk.bf16.vlgmr.msrb.gmra.mxu2 %vm274_vm1, %v2414_v5 }
 0xd5d   :  { %2838 = vmatpush.bf16.msra.mxu2 %v5833_v27 }
 0xd5e   :  { %v2391_v10 = vsel %vm2390_vm11, %v6155_v52, %v2387_v3 }
 0xd5f   :  { %v2396_v28 = vsel %vm2393_vm12, %v2395_v15, %v2391_v10 }
 0xd60   :  { %v2397_v4 = vmul.f32 %v7116_v16, %v2396_v28 }
 0xd61   :  { %2839 = vmatpush.bf16.msra.mxu2 %v5832_v51 }
 0xd62   :  { %v2413_v53 = vpack.c.bf16 %v2397_v4, %v2397_v4 }
 0xd64   :  { %5524 = vmatmul.msk.bf16.vlgmr.msrb.gmra.mxu1 %vm274_vm1, %v2413_v53 }
 0xd6c   :  { %5642 = vmatmul.msk.bf16.vlgmr.msra.gmra.mxu2 %vm245_vm0, %v6991_v47 }
 0xd8d   :  { %v2156_v11 = vpop.f32.mrf.mxu1 }
 0xd95   :  { %v2158_v29 = vpop.f32.mrf.mxu1 }
 0xd96   :  { %v2177_v32 = vpop.f32.mrf.mxu2 }
 0xd97   :  { %v5943_v14 = vpack.i.bf16 %v2177_v32, %v2156_v11 }
 0xd99   :  { %5944 = vrot.lane.b32.xlu2 %v5943_v14, %s7972_s2 }
 0xd9e   :  { %v2179_v23 = vpop.f32.mrf.mxu2 }
 0xda5   :  { %v2294_v18 = vpop.f32.mrf.mxu1 }
 0xda6   :  { %v2315_v54 = vpop.f32.mrf.mxu2 }
 0xda7   :  { %v5948_v19 = vpack.i.bf16 %v2315_v54, %v2294_v18 }
 0xda9   :  { %5949 = vrot.lane.b32.xlu0 %v5948_v19, %s7973_s28 }
 0xdad   :  { %v2296_v16 = vpop.f32.mrf.mxu1 }
 0xdae   :  { %v2317_v20 = vpop.f32.mrf.mxu2 }
 0xddf   :  { %v2453_v22 = vpop.f32.mrf.mxu2 }
 0xde1   :  { %v2432_v24 = vpop.f32.mrf.mxu1 }
 0xde2   :  { %v5953_v57 = vpack.i.bf16 %v2453_v22, %v2432_v24 }
 0xde4   :  { %5954 = vrot.lane.b32.xlu1 %v5953_v57, %s7974_s5 }
 0xde7   :  { %v2455_v47 = vpop.f32.mrf.mxu2 }
 0xde8   :  { %v5827_v47 = vld [vmem:[%s7980_s13 + $0x8] sm:$0xff]  ;;  %s7982_s13 = sld [smem:[#allocation17_spill]] }
 0xde9   :  { %v2434_v13 = vpop.f32.mrf.mxu1  ;;  %2601 = vmatpush.bf16.msra.mxu0 %v5827_v47 }
 0xded   :  { %2602 = vmatpush.bf16.msra.mxu0 %v5826_v31 }
 0xdef   :  { %v2841_v27 = vpop.f32.mrf.mxu2 }
 0xdf0   :  { %v2842_v30 = vadd.f32 %v6017_v60, %v2841_v27 }
 0xdf2   :  { %v2850_v58 = vpack.c.bf16 %v2842_v30, %v2842_v30  ;;  %v2846_v48 = vmul.f32 0.35355338, %v2842_v30 }
 0xdf3   :  { %v5945_v42 = vpop.permute.xlu2 %5944 }
 0xdf4   :  { %v5947_v21 = vunpack.i.h.bf16 %v5945_v42  ;;  %v5946_v33 = vunpack.i.l.bf16 %v5945_v42  ;;  %v2853_v1 = vunpack.c.l.b16 %v2850_v58  ;;  %v2848_v5 = vpack.c.bf16 %v2846_v48, %v2846_v48 }
 0xdf6   :  { %v2482_v37 = vsel %vm274_vm1, %v7135_v49, %v5947_v21  ;;  %v2481_v38 = vsel %vm274_vm1, %v7129_v17, %v5946_v33  ;;  %v7166_v7 = vpack.c.b16 %v2853_v1, %v2853_v1  ;;  %v6020_v1 = vld [vmem:[%s7983_s7] ss:$0 sm:$0xff]  ;;  %s7984_s7 = sld [smem:[#allocation21_spill]] }
 0xdf7   :  { %v2843_v8 = vpop.f32.mrf.mxu2 }
 0xdf8   :  { %v2844_v51 = vadd.f32 %v6017_v60, %v2843_v8 }
 0xdfa   :  { %v2851_v16 = vpack.c.bf16 %v2844_v51, %v2844_v51 }
 0xdfc   :  { %v2877_v20 = vunpack.c.l.b16 %v2851_v16  ;;  %v5831_v16 = vld [vmem:[%s7984_s7 + $0x18] sm:$0xff] }
 0xdfd   :  { %2646 = vmatpush.bf16.msra.mxu1 %v5831_v16 }
 0xdfe   :  { %v7193_v57 = vpack.c.b16 %v2877_v20, %v2877_v20  ;;  %v5830_v20 = vld [vmem:[%s7984_s7 + $0x10] sm:$0xff] }
 0xe01   :  { %2647 = vmatpush.bf16.msra.mxu1 %v5830_v20 }
 0xe1b   :  { %v5950_v0 = vpop.permute.xlu0 %5949 }
 0xe1c   :  { %v5952_v36 = vunpack.i.h.bf16 %v5950_v0  ;;  %v5951_v34 = vunpack.i.l.bf16 %v5950_v0 }
 0xe1e   :  { %v2484_v39 = vsel %vm857_vm9, %v2482_v37, %v5952_v36  ;;  %v2483_v40 = vsel %vm857_vm9, %v2481_v38, %v5951_v34 }
 0xe56   :  { %v5955_v12 = vpop.permute.xlu1 %5954 }
 0xe57   :  { %v5957_v44 = vunpack.i.h.bf16 %v5955_v12  ;;  %v5956_v35 = vunpack.i.l.bf16 %v5955_v12 }
 0xe59   :  { %v2486_v41 = vsel %vm860_vm10, %v2484_v39, %v5957_v44  ;;  %v2485_v43 = vsel %vm860_vm10, %v2483_v40, %v5956_v35 }
 0xe5a   :  { %v2487_v45 = vpack.c.bf16 %v2486_v41, %v2485_v43 }
 0xe5c   :  { %5534 = vmatmul.msk.bf16.vlgmr.msra.gmra.mxu3 %vm245_vm0, %v2487_v45 }
 0xedf   :  { %v2515_v46 = vpop.f32.mrf.mxu3 }
 0xee0   :  { %v2516_v49 = vadd.f32 %v6018_v9, %v2515_v46 }
 0xee2   :  { %v2520_v2 = vadd.f32 %v2516_v49, %v7003_v61  ;;  %v2993_v61 = vunpack.c.l.b16 %v2848_v5 }
 0xee4   :  { %v2522_v17 = vsel %vm245_vm0, %v2520_v2, 0.0  ;;  %v2994_v3 = vpack.c.b16 %v2993_v61, %v2993_v61 }
 0xee5   :  { %2523 = vadd.xlane.f32.xlu0 %v2522_v17 }
 0xee7   :  { %v2517_v50 = vpop.f32.mrf.mxu3 }
 0xee8   :  { %v2518_v52 = vadd.f32 %v6018_v9, %v2517_v50 }
 0xeea   :  { %v2521_v56 = vadd.f32 %v2518_v52, %v7005_v62  ;;  %v2847_v62 = vmul.f32 0.35355338, %v2844_v51 }
 0xeec   :  { %v2525_v59 = vsel %vm245_vm0, %v2521_v56, 0.0  ;;  %v7171_v15 = vpack.c.bf16 %v2847_v62, %v2847_v62 }
 0xeed   :  { %2526 = vadd.xlane.f32.xlu1 %v2525_v59  ;;  %v6019_v59 = vld [vmem:[%s7982_s13] ss:$0 sm:$0xff]  ;;  %s7985_s13 = smov 64  }
 0xeee   :  { %v3019_v10 = vunpack.c.l.b16 %v7171_v15 }
 0xef0   :  { %v3020_v28 = vpack.c.b16 %v3019_v10, %v3019_v10 }
 0xf06   :  { %2855 = vrot.lane.b32.xlu1 %v7166_v7, %s7976_s30 }
 0xf0e   :  { %2995 = vrot.lane.b32.xlu1 %v2994_v3, %s7977_s6 }
 0xf16   :  { %3138 = vrot.lane.b32.xlu1 %v7166_v7, %s7969_s0 }
 0xf1e   :  { %3159 = vrot.lane.b32.xlu1 %v3020_v28, %s7978_s17 }
 0xf26   :  { %3274 = vrot.lane.b32.xlu1 %v2994_v3, %s7979_s27 }
 0xf58   :  { %v2524_v4 = vpop.xlane.xlu0 %2523 }
 0xf59   :  { %v2528_v53 = vmul.f32 %v2524_v4, %v6750_v63 }
 0xf5b   :  { %v7179_v11 = vsub.f32 %v2520_v2, %v2528_v53 }
 0xf5d   :  { %v2532_v32 = vmul.f32 %v7179_v11, %v7179_v11 }
 0xf5f   :  { %v2534_v29 = vsel %vm245_vm0, %v2532_v32, 0.0 }
 0xf60   :  { %v2527_v14 = vpop.xlane.xlu1 %2526  ;;  %2535 = vadd.xlane.f32.xlu2 %v2534_v29 }
 0xf61   :  { %v2529_v23 = vmul.f32 %v2527_v14, %v6750_v63 }
 0xf63   :  { %v7185_v18 = vsub.f32 %v2521_v56, %v2529_v23 }
 0xf65   :  { %v2533_v54 = vmul.f32 %v7185_v18, %v7185_v18 }
 0xf67   :  { %v2537_v19 = vsel %vm245_vm0, %v2533_v54, 0.0 }
 0xf68   :  { %2538 = vadd.xlane.f32.xlu0 %v2537_v19 }
 0xf78   :  { %v2856_v22 = vpop.permute.xlu1 %2855  ;;  %2997 = vrot.lane.b32.xlu2 %v7166_v7, %s7981_s1 }
 0xf79   :  { %v2861_v24 = vsel %vm274_vm1, %v2856_v22, 0  ;;  %v5829_v22 = vld [vmem:[%s7984_s7 + $0x8] sm:$0xff] }
 0xf7a   :  { %2870 = vmatpush.bf16.xpose.msrb.mxu3 %v2861_v24  ;;  %2648 = vmatpush.bf16.msra.mxu1 %v5829_v22  ;;  %v5828_v24 = vld [vmem:[%s7984_s7] sm:$0xff]  ;;  %s7988_s7 = smov 48  }
 0xf7c   :  { %2879 = vrot.lane.b32.xlu0 %v7193_v57, %s7976_s30 }
 0xf7e   :  { %2649 = vmatpush.bf16.msra.mxu1 %v5828_v24 }
 0xf80   :  { %3161 = vrot.lane.b32.xlu2 %v7193_v57, %s7969_s0  ;;  %v2996_v13 = vpop.permute.xlu1 %2995 }
 0xf81   :  { %5643 = vmatmul.msk.bf16.vlgmr.msrb.gmra.mxu3 %vm274_vm1, %v2848_v5 }
 0xf84   :  { %3023 = vrot.lane.b32.xlu0 %v7193_v57, %s7981_s1 }
 0xf88   :  { %3276 = vrot.lane.b32.xlu2 %v7166_v7, %s7970_s10  ;;  %v3139_v21 = vpop.permute.xlu1 %3138 }
 0xf89   :  { %v3144_v37 = vsel %vm274_vm1, %v3139_v21, 0 }
 0xf8c   :  { %3021 = vrot.lane.b32.xlu0 %v3020_v28, %s7977_s6 }
 0xf90   :  { %3297 = vrot.lane.b32.xlu2 %v3020_v28, %s7979_s27  ;;  %v3160_v14 = vpop.permute.xlu1 %3159 }
 0xf94   :  { %3136 = vrot.lane.b32.xlu0 %v2994_v3, %s7978_s17 }
 0xf9c   :  { %3299 = vrot.lane.b32.xlu0 %v7193_v57, %s7970_s10 }
 0xfd3   :  { %v2536_v6 = vpop.xlane.xlu2 %2535 }
 0xfd4   :  { %v2540_v42 = vmul.f32 %v2536_v6, %v6750_v63 }
 0xfd6   :  { %v2542_v0 = vadd.f32 1e-05, %v2540_v42 }
 0xfd8   :  { %6156 = vrsqrt.f32 %v2542_v0  ;;  %vm2550_vm14 = vweird.f32 %v2542_v0 }
 0xfdb   :  { %v2998_v33 = vpop.permute.xlu2 %2997  ;;  %v2539_v36 = vpop.xlane.xlu0 %2538 }
 0xfdc   :  { %v3003_v34 = vsel %vm274_vm1, %v2998_v33, 0  ;;  %v2541_v12 = vmul.f32 %v2539_v36, %v6750_v63 }
 0xfdd   :  { %3012 = vmatpush.bf16.xpose.msra.mxu3 %v3003_v34 }
 0xfde   :  { %v6157_v38 = vpop.eup %6156  ;;  %v2543_v44 = vadd.f32 1e-05, %v2541_v12 }
 0xfdf   :  { %v2545_v35 = vmul.f32 %v6157_v38, %v2542_v0  ;;  %vm2551_vm13 = vweird.f32 %v6157_v38  ;;  %v6021_v0 = vld [vmem:[%s7986_s22] ss:$0 sm:$0xff]  ;;  %s7987_s22 = smov 56  }
 0xfe0   :  { %6158 = vrsqrt.f32 %v2543_v44  ;;  %vm2552_vm15 = vmor %vm2550_vm14, %vm2551_vm13  ;;  %vm2560_vm4 = vweird.f32 %v2543_v44 }
 0xfe1   :  { %v2546_v39 = vmul.f32 %v6157_v38, %v2545_v35 }
 0xfe3   :  { %v2547_v40 = vmul.f32 0.5, %v2546_v39  ;;  %v3162_v41 = vpop.permute.xlu2 %3161 }
 0xfe4   :  { %5647 = vmatmul.msk.bf16.vlgmr.msra.gmra.mxu3 %vm274_vm1, %v2996_v13  ;;  %v3167_v29 = vsel %vm274_vm1, %v3162_v41, 0 }
 0xfe5   :  { %3153 = vmatpush.bf16.xpose.msrb.mxu3 %v3144_v37  ;;  %v2548_v43 = vsub.f32 1.5, %v2547_v40 }
 0xfe6   :  { %v6159_v45 = vpop.eup %6158 }
 0xfe7   :  { %v2549_v9 = vmul.f32 %v6157_v38, %v2548_v43  ;;  %v2555_v46 = vmul.f32 %v6159_v45, %v2543_v44  ;;  %vm2561_vm3 = vweird.f32 %v6159_v45 }
 0xfe8   :  { %vm2562_vm7 = vmor %vm2560_vm4, %vm2561_vm3 }
 0xfe9   :  { %v2556_v49 = vmul.f32 %v6159_v45, %v2555_v46  ;;  %v2553_v2 = vsel %vm2552_vm15, %v6157_v38, %v2549_v9 }
 0xfea   :  { %v2564_v60 = vmul.f32 %v2553_v2, %v7179_v11 }
 0xfeb   :  { %v2557_v17 = vmul.f32 0.5, %v2556_v49  ;;  %v3277_v50 = vpop.permute.xlu2 %3276 }
 0xfec   :  { %v3282_v52 = vsel %vm274_vm1, %v3277_v50, 0  ;;  %v2569_v5 = vmul.f32 %v6019_v59, %v2564_v60 }
 0xfed   :  { %v2558_v56 = vsub.f32 1.5, %v2557_v17  ;;  %3291 = vmatpush.bf16.xpose.msra.mxu3 %v3282_v52 }
 0xfee   :  { %v2880_v27 = vpop.permute.xlu0 %2879  ;;  %v7222_v51 = vadd.f32 %v6020_v1, %v2569_v5 }
 0xfef   :  { %v2559_v30 = vmul.f32 %v6159_v45, %v2558_v56  ;;  %v2885_v58 = vsel %vm274_vm1, %v2880_v27, 0 }
 0xff0   :  { %2894 = vmatpush.bf16.xpose.msrb.mxu0 %v2885_v58 }
 0xff1   :  { %v2563_v48 = vsel %vm2562_vm7, %v6159_v45, %v2559_v30 }
 0xff2   :  { %v2565_v61 = vmul.f32 %v2563_v48, %v7185_v18  ;;  %v3275_v18 = vpop.permute.xlu1 %3274 }
 0xff4   :  { %v2570_v8 = vmul.f32 %v6019_v59, %v2565_v61 }
 0xff6   :  { %v7224_v3 = vadd.f32 %v6020_v1, %v2570_v8  ;;  %v3024_v62 = vpop.permute.xlu0 %3023 }
 0xff7   :  { %v3029_v28 = vsel %vm274_vm1, %v3024_v62, 0 }
 0xff8   :  { %v2576_v10 = vpack.c.bf16 %v7224_v3, %v7222_v51 }
 0xffa   :  { %5543 = vmatmul.msk.bf16.vlgmr.msra.gmra.mxu0 %vm245_vm0, %v2576_v10 }
 0xffb   :  { %3038 = vmatpush.bf16.xpose.msra.mxu0 %v3029_v28 }
 0xffe   :  { %v3022_v4 = vpop.permute.xlu0 %3021 }
0x1004   :  { %v2872_v53 = vpop.f32.mrf.mxu3 }
0x1005   :  { %v2900_v11 = vsel %vm274_vm1, %v2872_v53, -inf }
0x1006   :  { %2901 = vmax.xlane.f32.xlu1 %v2900_v11  ;;  %v3137_v32 = vpop.permute.xlu0 %3136 }
0x1007   :  { %5651 = vmatmul.msk.bf16.vlgmr.msrb.gmra.mxu3 %vm274_vm1, %v3137_v32 }
0x100a   :  { %5644 = vmatmul.msk.bf16.vlgmr.msrb.gmra.mxu0 %vm274_vm1, %v7171_v15  ;;  %v3298_v15 = vpop.permute.xlu2 %3297 }
0x100b   :  { %3176 = vmatpush.bf16.xpose.msrb.mxu0 %v3167_v29 }
0x100c   :  { %v2874_v23 = vpop.f32.mrf.mxu3 }
0x100e   :  { %v3300_v54 = vpop.permute.xlu0 %3299 }
0x100f   :  { %v3305_v19 = vsel %vm274_vm1, %v3300_v54, 0 }
0x1017   :  { %5655 = vmatmul.msk.bf16.vlgmr.msra.gmra.mxu3 %vm274_vm1, %v3275_v18 }
0x101a   :  { %5648 = vmatmul.msk.bf16.vlgmr.msra.gmra.mxu0 %vm274_vm1, %v3022_v4 }
0x101b   :  { %3314 = vmatpush.bf16.xpose.msra.mxu0 %v3305_v19 }
0x101f   :  { %2950 = vrot.lane.b32.xlu1 %v7166_v7, %s7985_s13 }
0x102a   :  { %5652 = vmatmul.msk.bf16.vlgmr.msrb.gmra.mxu0 %vm274_vm1, %v3160_v14 }
0x103a   :  { %5656 = vmatmul.msk.bf16.vlgmr.msra.gmra.mxu0 %vm274_vm1, %v3298_v15 }
0x1067   :  { %v3014_v47 = vpop.f32.mrf.mxu3 }
0x1068   :  { %v3044_v13 = vsel %vm274_vm1, %v3014_v47, -inf }
0x1069   :  { %3045 = vmax.xlane.f32.xlu0 %v3044_v13 }
0x106f   :  { %v3016_v31 = vpop.f32.mrf.mxu3 }
0x1077   :  { %v2604_v6 = vpop.f32.mrf.mxu0 }
0x1078   :  { %v2605_v36 = vadd.f32 %v6021_v0, %v2604_v6 }
0x1079   :  { %v2902_v42 = vpop.xlane.xlu1 %2901 }
0x107a   :  { %v2906_v21 = vsub.f32 %v2872_v53, %v2902_v42  ;;  %v2609_v37 = vmax.f32 %v2605_v36, 0.0 }
0x107c   :  { %v2908_v33 = vmul.f32 1.442695, %v2906_v21 }
0x107e   :  { %6160 = vpow2.f32 %v2908_v33 }
0x107f   :  { %v2606_v34 = vpop.f32.mrf.mxu0 }
0x1080   :  { %v2607_v12 = vadd.f32 %v6021_v0, %v2606_v34 }
0x1082   :  { %v2610_v38 = vmax.f32 %v2607_v12, 0.0 }
0x1084   :  { %v7248_v44 = vpop.eup %6160  ;;  %v2611_v35 = vpack.c.bf16 %v2610_v38, %v2609_v37 }
0x1085   :  { %v2912_v39 = vsel %vm274_vm1, %v7248_v44, 0.0 }
0x1086   :  { %2913 = vadd.xlane.f32.xlu0 %v2912_v39  ;;  %5560 = vmatmul.msk.bf16.vlgmr.msra.gmra.mxu1 %vm1022_vm6, %v2611_v35 }
0x1087   :  { %v2896_v40 = vpop.f32.mrf.mxu0 }
0x1088   :  { %v2903_v45 = vsel %vm274_vm1, %v2896_v40, -inf }
0x108a   :  { %v3155_v41 = vpop.f32.mrf.mxu3 }
0x108b   :  { %v3182_v43 = vsel %vm274_vm1, %v3155_v41, -inf }
0x108c   :  { %3183 = vmax.xlane.f32.xlu2 %v3182_v43 }
0x108e   :  { %2904 = vmax.xlane.f32.xlu0 %v2903_v45 }
0x108f   :  { %v2898_v9 = vpop.f32.mrf.mxu0 }
0x1091   :  { %v2951_v46 = vpop.permute.xlu1 %2950 }
0x1092   :  { %v2956_v49 = vsel %vm373_vm2, %v2951_v46, 0  ;;  %v3157_v2 = vpop.f32.mrf.mxu3 }
0x1093   :  { %2965 = vmatpush.bf16.msrb.mxu1 %v2956_v49 }
0x1097   :  { %v7256_v17 = vpop.f32.mrf.mxu0 }
0x1098   :  { %v3047_v60 = vsel %vm274_vm1, %v7256_v17, -inf }
0x109a   :  { %v7258_v50 = vpop.f32.mrf.mxu3 }
0x109b   :  { %v3320_v52 = vsel %vm274_vm1, %v7258_v50, -inf }
0x109c   :  { %3321 = vmax.xlane.f32.xlu2 %v3320_v52 }
0x109f   :  { %v3042_v56 = vpop.f32.mrf.mxu0 }
0x10a2   :  { %v3295_v59 = vpop.f32.mrf.mxu3 }
0x10a4   :  { %3048 = vmax.xlane.f32.xlu2 %v3047_v60 }
0x10a7   :  { %v3178_v27 = vpop.f32.mrf.mxu0 }
0x10a8   :  { %v3185_v30 = vsel %vm274_vm1, %v3178_v27, -inf }
0x10a9   :  { %3186 = vmax.xlane.f32.xlu1 %v3185_v30 }
0x10af   :  { %v3180_v58 = vpop.f32.mrf.mxu0 }
0x10b7   :  { %v7265_v48 = vpop.f32.mrf.mxu0 }
0x10b8   :  { %v3323_v35 = vsel %vm274_vm1, %v7265_v48, -inf }
0x10bc   :  { %2971 = vrot.lane.b32.xlu2 %v7193_v57, %s7985_s13 }
0x10bf   :  { %v3318_v1 = vpop.f32.mrf.mxu0 }
0x10dc   :  { %v3046_v5 = vpop.xlane.xlu0 %3045 }
0x10dd   :  { %v3050_v61 = vsub.f32 %v3014_v47, %v3046_v5 }
0x10df   :  { %v3052_v8 = vmul.f32 1.442695, %v3050_v61 }
0x10e1   :  { %6162 = vpow2.f32 %v3052_v8 }
0x10e7   :  { %v7269_v62 = vpop.eup %6162 }
0x10e8   :  { %v3056_v10 = vsel %vm274_vm1, %v7269_v62, 0.0 }
0x10e9   :  { %3057 = vadd.xlane.f32.xlu0 %v3056_v10 }
0x10f9   :  { %v2914_v28 = vpop.xlane.xlu0 %2913 }
0x10fa   :  { %6164 = vrcp.f32 %v2914_v28  ;;  %v2929_v54 = vand.u32 2147483648, %v2914_v28  ;;  %v2927_v16 = vand.u32 2147483647, %v2914_v28  ;;  %vm2923_vm11 = vweird.f32 %v2914_v28 }
0x10fc   :  { %v2930_v22 = vor.u32 1.1754944e-38, %v2929_v54  ;;  %vm2928_vm13 = vcmp.eq.f32.partialorder %v2927_v16, 8.507059e+37 }
0x10fd   :  { %3115 = vrot.lane.b32.xlu0 %v7193_v57, %s7987_s22 }
0x10ff   :  { %v3184_v4 = vpop.xlane.xlu2 %3183 }
0x1100   :  { %v6165_v53 = vpop.eup %6164  ;;  %v3188_v11 = vsub.f32 %v3155_v41, %v3184_v4 }
0x1101   :  { %v2919_v32 = vmul.f32 %v6165_v53, %v2914_v28  ;;  %v2905_v29 = vpop.xlane.xlu0 %2904  ;;  %vm2924_vm8 = vweird.f32 %v6165_v53 }
0x1102   :  { %v3190_v14 = vmul.f32 1.442695, %v3188_v11  ;;  %v2907_v23 = vsub.f32 %v2896_v40, %v2905_v29  ;;  %vm2925_vm12 = vmor %vm2923_vm11, %vm2924_vm8 }
0x1103   :  { %v2920_v18 = vsub.f32 1.0, %v2919_v32  ;;  %v7311_v59 = vpop.f32.mrf.mxu1 }
0x1104   :  { %6166 = vpow2.f32 %v3190_v14  ;;  %v2910_v19 = vmul.f32 1.442695, %v2907_v23 }
0x1105   :  { %v2921_v15 = vmul.f32 %v6165_v53, %v2920_v18 }
0x1106   :  { %6168 = vpow2.f32 %v2910_v19 }
0x1107   :  { %v2922_v20 = vadd.f32 %v6165_v53, %v2921_v15 }
0x1109   :  { %v2926_v24 = vsel %vm2925_vm12, %v6165_v53, %v2922_v20 }
0x110a   :  { %v7275_v47 = vpop.eup %6166  ;;  %v2931_v13 = vsel %vm2928_vm13, %v2930_v22, %v2926_v24 }
0x110b   :  { %v2932_v31 = vmul.f32 %v7248_v44, %v2931_v13  ;;  %v3194_v6 = vsel %vm274_vm1, %v7275_v47, 0.0 }
0x110c   :  { %v7280_v42 = vpop.eup %6168  ;;  %3195 = vadd.xlane.f32.xlu2 %v3194_v6 }
0x110d   :  { %v2948_v0 = vpack.c.bf16 %v2932_v31, %v2932_v31  ;;  %v2915_v21 = vsel %vm274_vm1, %v7280_v42, 0.0 }
0x110e   :  { %2916 = vadd.xlane.f32.xlu1 %v2915_v21 }
0x110f   :  { %v3322_v33 = vpop.xlane.xlu2 %3321  ;;  %5645 = vmatmul.msk.bf16.vlgmr.msrb.gmra.mxu1 %vm274_vm1, %v2948_v0 }
0x1110   :  { %v3326_v46 = vsub.f32 %v7258_v50, %v3322_v33  ;;  %v7313_v50 = vpop.f32.mrf.mxu1 }
0x1117   :  { %v3049_v36 = vpop.xlane.xlu2 %3048 }
0x1118   :  { %v3051_v41 = vsub.f32 %v7256_v17, %v3049_v36 }
0x111a   :  { %v3054_v43 = vmul.f32 1.442695, %v3051_v41 }
0x111c   :  { %v3187_v34 = vpop.xlane.xlu1 %3186 }
0x111d   :  { %v3189_v12 = vsub.f32 %v3178_v27, %v3187_v34 }
0x111f   :  { %v2972_v37 = vpop.permute.xlu2 %2971  ;;  %v3192_v44 = vmul.f32 1.442695, %v3189_v12 }
0x1120   :  { %v2977_v38 = vsel %vm373_vm2, %v2972_v37, 0 }
0x1121   :  { %2986 = vmatpush.bf16.msrb.mxu2 %v2977_v38  ;;  %6170 = vpow2.f32 %v3192_v44 }
0x1122   :  { %6172 = vpow2.f32 %v3054_v43 }
0x1124   :  { %3232 = vrot.lane.b32.xlu2 %v7166_v7, %s7988_s7 }
0x1127   :  { %3324 = vmax.xlane.f32.xlu0 %v3323_v35  ;;  %3094 = vrot.lane.b32.xlu1 %v7166_v7, %s7987_s22  ;;  %v7292_v39 = vpop.eup %6170 }
0x1128   :  { %v3197_v40 = vsel %vm274_vm1, %v7292_v39, 0.0  ;;  %v7301_v45 = vpop.eup %6172 }
0x1129   :  { %v3059_v9 = vsel %vm274_vm1, %v7301_v45, 0.0 }
0x112c   :  { %3370 = vrot.lane.b32.xlu2 %v7166_v7, %s7989_s23  ;;  %v3328_v7 = vmul.f32 1.442695, %v3326_v46 }
0x112e   :  { %6174 = vpow2.f32 %v3328_v7 }
0x112f   :  { %3198 = vadd.xlane.f32.xlu0 %v3197_v40 }
0x1134   :  { %v7306_v2 = vpop.eup %6174 }
0x1135   :  { %v3332_v17 = vsel %vm274_vm1, %v7306_v2, 0.0 }
0x1143   :  { %3253 = vrot.lane.b32.xlu0 %v7193_v57, %s7988_s7 }
0x1151   :  { %3060 = vadd.xlane.f32.xlu1 %v3059_v9 }
0x115c   :  { %v3058_v49 = vpop.xlane.xlu0 %3057 }
0x115d   :  { %6176 = vrcp.f32 %v3058_v49  ;;  %v3073_v14 = vand.u32 2147483648, %v3058_v49  ;;  %vm3067_vm4 = vweird.f32 %v3058_v49  ;;  %v3071_v18 = vand.u32 2147483647, %v3058_v49 }
0x115f   :  { %v3074_v24 = vor.u32 1.1754944e-38, %v3073_v14  ;;  %vm3072_vm12 = vcmp.eq.f32.partialorder %v3071_v18, 8.507059e+37 }
0x1163   :  { %v6177_v60 = vpop.eup %6176 }
0x1164   :  { %v3063_v30 = vmul.f32 %v6177_v60, %v3058_v49  ;;  %vm3068_vm15 = vweird.f32 %v6177_v60 }
0x1165   :  { %vm3069_vm8 = vmor %vm3067_vm4, %vm3068_vm15 }
0x1166   :  { %v3064_v58 = vsub.f32 1.0, %v3063_v30 }
0x1168   :  { %v3065_v8 = vmul.f32 %v6177_v60, %v3064_v58 }
0x116a   :  { %v3066_v32 = vadd.f32 %v6177_v60, %v3065_v8 }
0x116c   :  { %v3070_v16 = vsel %vm3069_vm8, %v6177_v60, %v3066_v32 }
0x116d   :  { %3333 = vadd.xlane.f32.xlu0 %v3332_v17  ;;  %v3075_v6 = vsel %vm3072_vm12, %v3074_v24, %v3070_v16 }
0x116e   :  { %v3076_v33 = vmul.f32 %v7269_v62, %v3075_v6 }
0x116f   :  { %v3116_v52 = vpop.permute.xlu0 %3115 }
0x1170   :  { %v3121_v56 = vsel %vm373_vm2, %v3116_v52, 0 }
0x1171   :  { %3130 = vmatpush.bf16.msra.mxu2 %v3121_v56 }
0x117f   :  { %v3196_v1 = vpop.xlane.xlu2 %3195 }
0x1180   :  { %v3211_v62 = vand.u32 2147483648, %v3196_v1  ;;  %v3209_v9 = vand.u32 2147483647, %v3196_v1 }
0x1181   :  { %v2917_v27 = vpop.xlane.xlu1 %2916 }
0x1182   :  { %6178 = vrcp.f32 %v2917_v27  ;;  %v2944_v28 = vand.u32 2147483648, %v2917_v27  ;;  %v2942_v11 = vand.u32 2147483647, %v2917_v27  ;;  %vm2938_vm3 = vweird.f32 %v2917_v27 }
0x1183   :  { %6180 = vrcp.f32 %v3196_v1  ;;  %v3212_v7 = vor.u32 1.1754944e-38, %v3211_v62 }
0x1184   :  { %v2945_v54 = vor.u32 1.1754944e-38, %v2944_v28  ;;  %vm2943_vm11 = vcmp.eq.f32.partialorder %v2942_v11, 8.507059e+37 }
0x1187   :  { %v3233_v15 = vpop.permute.xlu2 %3232 }
0x1188   :  { %v6179_v5 = vpop.eup %6178  ;;  %v3238_v38 = vsel %vm373_vm2, %v3233_v15, 0 }
0x1189   :  { %v2934_v61 = vmul.f32 %v6179_v5, %v2917_v27  ;;  %vm2939_vm14 = vweird.f32 %v6179_v5  ;;  %v6181_v29 = vpop.eup %6180 }
0x118a   :  { %vm2940_vm7 = vmor %vm2938_vm3, %vm2939_vm14  ;;  %v3201_v20 = vmul.f32 %v6181_v29, %v3196_v1  ;;  %vm3206_vm13 = vweird.f32 %v6181_v29  ;;  %vm3205_vm14 = vweird.f32 %v3196_v1  ;;  %vm3210_vm3 = vcmp.eq.f32.partialorder %v3209_v9, 8.507059e+37 }
0x118b   :  { %v2935_v10 = vsub.f32 1.0, %v2934_v61  ;;  %vm3207_vm15 = vmor %vm3205_vm14, %vm3206_vm13 }
0x118c   :  { %v7315_v4 = vpop.f32.mrf.mxu1  ;;  %v3202_v21 = vsub.f32 1.0, %v3201_v20  ;;  %v7337_v20 = vld [vmem:[%s7990_s26] ss:$0 sm:$0xff] }
0x118d   :  { %v2936_v53 = vmul.f32 %v6179_v5, %v2935_v10 }
0x118e   :  { %v3203_v34 = vmul.f32 %v6181_v29, %v3202_v21 }
0x118f   :  { %v2937_v23 = vadd.f32 %v6179_v5, %v2936_v53  ;;  %v3371_v44 = vpop.permute.xlu2 %3370 }
0x1190   :  { %v3204_v41 = vadd.f32 %v6181_v29, %v3203_v34  ;;  %v3376_v43 = vsel %vm373_vm2, %v3371_v44, 0 }
0x1191   :  { %v2941_v19 = vsel %vm2940_vm7, %v6179_v5, %v2937_v23 }
0x1192   :  { %v2946_v22 = vsel %vm2943_vm11, %v2945_v54, %v2941_v19  ;;  %v3208_v46 = vsel %vm3207_vm15, %v6181_v29, %v3204_v41 }
0x1193   :  { %v2947_v13 = vmul.f32 %v7280_v42, %v2946_v22  ;;  %v3092_v42 = vpack.c.bf16 %v3076_v33, %v3076_v33  ;;  %v3213_v49 = vsel %vm3210_vm3, %v3212_v7, %v3208_v46 }
0x1194   :  { %v2969_v31 = vpop.f32.mrf.mxu1  ;;  %v3214_v52 = vmul.f32 %v7275_v47, %v3213_v49 }
0x1195   :  { %v2949_v0 = vpack.c.bf16 %v2947_v13, %v2947_v13  ;;  %v2652_v31 = vadd.f32 %v7337_v20, %v7311_v59 }
0x1196   :  { %v3230_v56 = vpack.c.bf16 %v3214_v52, %v3214_v52 }
0x1197   :  { %5646 = vmatmul.msk.bf16.vlgmr.msrb.gmra.mxu2 %vm274_vm1, %v2949_v0  ;;  %v2656_v0 = vadd.f32 %v2652_v31, %v7222_v51 }
0x1199   :  { %v3095_v36 = vpop.permute.xlu1 %3094  ;;  %v2658_v34 = vsel %vm245_vm0, %v2656_v0, 0.0 }
0x119a   :  { %v3100_v12 = vsel %vm373_vm2, %v3095_v36, 0  ;;  %v3325_v37 = vpop.xlane.xlu0 %3324 }
0x119b   :  { %v3327_v35 = vsub.f32 %v7265_v48, %v3325_v37  ;;  %3109 = vmatpush.bf16.msra.mxu1 %v3100_v12 }
0x119d   :  { %v3330_v40 = vmul.f32 1.442695, %v3327_v35 }
0x119e   :  { %5649 = vmatmul.msk.bf16.vlgmr.msra.gmra.mxu1 %vm274_vm1, %v3092_v42 }
0x119f   :  { %3247 = vmatpush.bf16.msrb.mxu1 %v3238_v38  ;;  %6182 = vpow2.f32 %v3330_v40 }
0x11a2   :  { %v3199_v60 = vpop.xlane.xlu0 %3198 }
0x11a3   :  { %3385 = vmatpush.bf16.msra.mxu1 %v3376_v43  ;;  %6184 = vrcp.f32 %v3199_v60  ;;  %v3226_v15 = vand.u32 2147483648, %v3199_v60  ;;  %vm3220_vm13 = vweird.f32 %v3199_v60  ;;  %v3224_v16 = vand.u32 2147483647, %v3199_v60 }
0x11a5   :  { %v7325_v48 = vpop.eup %6182  ;;  %v3227_v24 = vor.u32 1.1754944e-38, %v3226_v15  ;;  %vm3225_vm15 = vcmp.eq.f32.partialorder %v3224_v16, 8.507059e+37 }
0x11a6   :  { %v3335_v17 = vsel %vm274_vm1, %v7325_v48, 0.0 }
0x11a7   :  { %3336 = vadd.xlane.f32.xlu1 %v3335_v17 }
0x11a9   :  { %v6185_v1 = vpop.eup %6184 }
0x11aa   :  { %v3216_v8 = vmul.f32 %v6185_v1, %v3199_v60  ;;  %vm3221_vm12 = vweird.f32 %v6185_v1 }
0x11ab   :  { %vm3222_vm14 = vmor %vm3220_vm13, %vm3221_vm12 }
0x11ac   :  { %v3217_v11 = vsub.f32 1.0, %v3216_v8 }
0x11ae   :  { %5653 = vmatmul.msk.bf16.vlgmr.msrb.gmra.mxu1 %vm274_vm1, %v3230_v56  ;;  %v3218_v23 = vmul.f32 %v6185_v1, %v3217_v11 }
0x11b0   :  { %v3219_v19 = vadd.f32 %v6185_v1, %v3218_v23 }
0x11b2   :  { %v3223_v22 = vsel %vm3222_vm14, %v6185_v1, %v3219_v19 }
0x11b3   :  { %v3228_v6 = vsel %vm3225_vm15, %v3227_v24, %v3223_v22 }
0x11b5   :  { %v3254_v27 = vpop.permute.xlu0 %3253 }
0x11b6   :  { %v3259_v30 = vsel %vm373_vm2, %v3254_v27, 0 }
0x11b7   :  { %3268 = vmatpush.bf16.msrb.mxu2 %v3259_v30 }
0x11c0   :  { %3391 = vrot.lane.b32.xlu1 %v7193_v57, %s7989_s23 }
0x11c4   :  { %v3061_v58 = vpop.xlane.xlu1 %3060 }
0x11c5   :  { %6186 = vrcp.f32 %v3061_v58  ;;  %v3088_v47 = vand.u32 2147483648, %v3061_v58  ;;  %v3086_v53 = vand.u32 2147483647, %v3061_v58  ;;  %vm3082_vm7 = vweird.f32 %v3061_v58 }
0x11c7   :  { %v3089_v29 = vor.u32 1.1754944e-38, %v3088_v47  ;;  %vm3087_vm11 = vcmp.eq.f32.partialorder %v3086_v53, 8.507059e+37 }
0x11cb   :  { %v6187_v5 = vpop.eup %6186 }
0x11cc   :  { %v3078_v61 = vmul.f32 %v6187_v5, %v3061_v58  ;;  %vm3083_vm4 = vweird.f32 %v6187_v5 }
0x11cd   :  { %vm3084_vm8 = vmor %vm3082_vm7, %vm3083_vm4 }
0x11ce   :  { %v3079_v10 = vsub.f32 1.0, %v3078_v61 }
0x11d0   :  { %v3080_v28 = vmul.f32 %v6187_v5, %v3079_v10 }
0x11d2   :  { %v3081_v32 = vadd.f32 %v6187_v5, %v3080_v28 }
0x11d4   :  { %v3085_v14 = vsel %vm3084_vm8, %v6187_v5, %v3081_v32 }
0x11d5   :  { %v3090_v57 = vsel %vm3087_vm11, %v3089_v29, %v3085_v14 }
0x11d6   :  { %v3091_v18 = vmul.f32 %v7301_v45, %v3090_v57  ;;  %v3229_v45 = vmul.f32 %v7292_v39, %v3228_v6 }
0x11d8   :  { %v3093_v54 = vpack.c.bf16 %v3091_v18, %v3091_v18  ;;  %v3231_v33 = vpack.c.bf16 %v3229_v45, %v3229_v45  ;;  %v5835_v45 = vld [vmem:[%s6395_s21 + $0x18] sm:$0xff] }
0x11d9   :  { %3467 = vmatpush.bf16.msrb.mxu3 %v5835_v45 }
0x11da   :  { %5650 = vmatmul.msk.bf16.vlgmr.msra.gmra.mxu2 %vm274_vm1, %v3093_v54 }
0x11e0   :  { %v3334_v13 = vpop.xlane.xlu0 %3333 }
0x11e1   :  { %6188 = vrcp.f32 %v3334_v13  ;;  %v3349_v37 = vand.u32 2147483648, %v3334_v13  ;;  %v3347_v44 = vand.u32 2147483647, %v3334_v13  ;;  %vm3343_vm4 = vweird.f32 %v3334_v13 }
0x11e3   :  { %v3350_v35 = vor.u32 1.1754944e-38, %v3349_v37  ;;  %vm3348_vm8 = vcmp.eq.f32.partialorder %v3347_v44, 8.507059e+37 }
0x11e7   :  { %v6189_v21 = vpop.eup %6188 }
0x11e8   :  { %v3339_v36 = vmul.f32 %v6189_v21, %v3334_v13  ;;  %vm3344_vm3 = vweird.f32 %v6189_v21  ;;  %v2654_v13 = vadd.f32 %v7337_v20, %v7313_v50 }
0x11e9   :  { %vm3345_vm7 = vmor %vm3343_vm4, %vm3344_vm3 }
0x11ea   :  { %v3340_v12 = vsub.f32 1.0, %v3339_v36  ;;  %2659 = vadd.xlane.f32.xlu1 %v2658_v34  ;;  %5654 = vmatmul.msk.bf16.vlgmr.msrb.gmra.mxu2 %vm274_vm1, %v3231_v33  ;;  %v2657_v31 = vadd.f32 %v2654_v13, %v7224_v3 }
0x11ec   :  { %v3341_v38 = vmul.f32 %v6189_v21, %v3340_v12  ;;  %v2661_v6 = vsel %vm245_vm0, %v2657_v31, 0.0 }
0x11ee   :  { %v3342_v59 = vadd.f32 %v6189_v21, %v3341_v38 }
0x11f0   :  { %v3346_v39 = vsel %vm3345_vm7, %v6189_v21, %v3342_v59 }
0x11f1   :  { %v3351_v51 = vsel %vm3348_vm8, %v3350_v35, %v3346_v39 }
0x11f2   :  { %v3352_v42 = vmul.f32 %v7306_v2, %v3351_v51 }
0x11f4   :  { %v3368_v40 = vpack.c.bf16 %v3352_v42, %v3352_v42 }
0x11f6   :  { %5657 = vmatmul.msk.bf16.vlgmr.msra.gmra.mxu1 %vm274_vm1, %v3368_v40 }
0x121a   :  { %v2988_v41 = vpop.f32.mrf.mxu2  ;;  %v3337_v43 = vpop.xlane.xlu1 %3336 }
0x121b   :  { %6190 = vrcp.f32 %v3337_v43  ;;  %v3111_v62 = vpop.f32.mrf.mxu1  ;;  %v3364_v60 = vand.u32 2147483648, %v3337_v43  ;;  %vm3358_vm12 = vweird.f32 %v3337_v43  ;;  %v3362_v27 = vand.u32 2147483647, %v3337_v43 }
0x121d   :  { %v3365_v58 = vor.u32 1.1754944e-38, %v3364_v60  ;;  %vm3363_vm14 = vcmp.eq.f32.partialorder %v3362_v27, 8.507059e+37 }
0x1221   :  { %v6191_v9 = vpop.eup %6190 }
0x1222   :  { %v3354_v46 = vmul.f32 %v6191_v9, %v3337_v43  ;;  %v2990_v7 = vpop.f32.mrf.mxu2  ;;  %vm3359_vm11 = vweird.f32 %v6191_v9 }
0x1223   :  { %v3113_v49 = vpop.f32.mrf.mxu1  ;;  %vm3360_vm13 = vmor %vm3358_vm12, %vm3359_vm11 }
0x1224   :  { %v3355_v17 = vsub.f32 1.0, %v3354_v46 }
0x1226   :  { %v3356_v52 = vmul.f32 %v6191_v9, %v3355_v17 }
0x1228   :  { %v3357_v56 = vadd.f32 %v6191_v9, %v3356_v52 }
0x122a   :  { %v3361_v2 = vsel %vm3360_vm13, %v6191_v9, %v3357_v56  ;;  %v6025_v9 = vld [vmem:[%s6400_s25 + $0x1] ss:$0 sm:$0xff]  ;;  %s7992_s25 = sld [smem:[#allocation11_spill]] }
0x122b   :  { %v3249_v30 = vpop.f32.mrf.mxu1  ;;  %v3366_v1 = vsel %vm3363_vm14, %v3365_v58, %v3361_v2 }
0x122c   :  { %v3367_v5 = vmul.f32 %v7325_v48, %v3366_v1 }
0x122e   :  { %v3369_v47 = vpack.c.bf16 %v3367_v5, %v3367_v5  ;;  %v5843_v5 = vld [vmem:[%s6445_s12 + $0x18] sm:$0xff] }
0x1232   :  { %v3392_v61 = vpop.permute.xlu1 %3391 }
0x1233   :  { %v3397_v8 = vsel %vm373_vm2, %v3392_v61, 0  ;;  %v3251_v10 = vpop.f32.mrf.mxu1  ;;  %v5842_v61 = vld [vmem:[%s6445_s12 + $0x10] sm:$0xff]  ;;  %s8001_s12 = sld [smem:[#allocation18_spill]] }
0x1234   :  { %3406 = vmatpush.bf16.msra.mxu2 %v3397_v8 }
0x1237   :  { %5658 = vmatmul.msk.bf16.vlgmr.msra.gmra.mxu2 %vm274_vm1, %v3369_v47 }
0x1238   :  { %3692 = vmatpush.bf16.msrb.mxu2 %v5843_v5 }
0x123c   :  { %3693 = vmatpush.bf16.msrb.mxu2 %v5842_v61 }
0x125d   :  { %v3132_v28 = vpop.f32.mrf.mxu2  ;;  %v2660_v48 = vpop.xlane.xlu1 %2659 }
0x125e   :  { %v5958_v53 = vpack.i.bf16 %v3132_v28, %v3111_v62  ;;  %v2664_v18 = vmul.f32 %v2660_v48, %v6750_v63 }
0x1260   :  { %5959 = vrot.lane.b32.xlu0 %v5958_v53, %s7972_s2  ;;  %v7353_v54 = vsub.f32 %v2656_v0, %v2664_v18  ;;  %v5834_v0 = vld [vmem:[%s6395_s21 + $0x10] sm:$0xff]  ;;  %s7991_s21 = sld [smem:[#allocation23_spill]] }
0x1261   :  { %3468 = vmatpush.bf16.msrb.mxu3 %v5834_v0 }
0x1262   :  { %v2668_v19 = vmul.f32 %v7353_v54, %v7353_v54 }
0x1264   :  { %v2670_v15 = vsel %vm245_vm0, %v2668_v19, 0.0 }
0x1265   :  { %v3134_v11 = vpop.f32.mrf.mxu2 }
0x1266   :  { %v6023_v18 = vld [vmem:[%s7991_s21] ss:$0 sm:$0xff] }
0x126d   :  { %v3270_v32 = vpop.f32.mrf.mxu2 }
0x126e   :  { %v5963_v29 = vpack.i.bf16 %v3270_v32, %v3249_v30 }
0x1270   :  { %5964 = vrot.lane.b32.xlu2 %v5963_v29, %s7973_s28 }
0x1273   :  { %v3387_v14 = vpop.f32.mrf.mxu1 }
0x1275   :  { %v3272_v57 = vpop.f32.mrf.mxu2 }
0x127b   :  { %v3389_v23 = vpop.f32.mrf.mxu1 }
0x128a   :  { %2671 = vadd.xlane.f32.xlu0 %v2670_v15 }
0x12ba   :  { %v3408_v16 = vpop.f32.mrf.mxu2 }
0x12bb   :  { %v5968_v22 = vpack.i.bf16 %v3408_v16, %v3387_v14 }
0x12bd   :  { %5969 = vrot.lane.b32.xlu2 %v5968_v22, %s7974_s5  ;;  %v6024_v22 = vld [vmem:[%s6540_s4] ss:$0 sm:$0xff] }
0x12c2   :  { %v3410_v24 = vpop.f32.mrf.mxu2 }
0x12ca   :  { %v5965_v21 = vpop.permute.xlu2 %5964 }
0x12cb   :  { %v5967_v38 = vunpack.i.h.bf16 %v5965_v21  ;;  %v5966_v50 = vunpack.i.l.bf16 %v5965_v21 }
0x12d2   :  { %v5960_v33 = vpop.permute.xlu0 %5959 }
0x12d3   :  { %v5962_v36 = vunpack.i.h.bf16 %v5960_v33  ;;  %v5961_v34 = vunpack.i.l.bf16 %v5960_v33 }
0x12d5   :  { %v3437_v12 = vsel %vm274_vm1, %v2988_v41, %v5962_v36  ;;  %v3436_v37 = vsel %vm274_vm1, %v7315_v4, %v5961_v34 }
0x12d6   :  { %v3438_v59 = vsel %vm857_vm9, %v3436_v37, %v5966_v50  ;;  %v3439_v35 = vsel %vm857_vm9, %v3437_v12, %v5967_v38 }
0x12e6   :  { %2662 = vadd.xlane.f32.xlu2 %v2661_v6 }
0x12fd   :  { %v2672_v2 = vpop.xlane.xlu0 %2671 }
0x12fe   :  { %v2676_v30 = vmul.f32 %v2672_v2, %v6750_v63  ;;  %v5837_v2 = vld [vmem:[%s6415_s8 + $0x18] sm:$0xff] }
0x12ff   :  { %3556 = vmatpush.bf16.msrb.mxu0 %v5837_v2 }
0x1300   :  { %v2678_v58 = vadd.f32 1e-05, %v2676_v30 }
0x1302   :  { %6192 = vrsqrt.f32 %v2678_v58  ;;  %vm2686_vm3 = vweird.f32 %v2678_v58 }
0x1308   :  { %v6193_v1 = vpop.eup %6192 }
0x1309   :  { %vm2687_vm15 = vweird.f32 %v6193_v1 }
0x130a   :  { %vm2688_vm4 = vmor %vm2686_vm3, %vm2687_vm15 }
0x1317   :  { %v5970_v3 = vpop.permute.xlu2 %5969 }
0x1318   :  { %v5972_v20 = vunpack.i.h.bf16 %v5970_v3  ;;  %v5971_v44 = vunpack.i.l.bf16 %v5970_v3 }
0x131a   :  { %v3440_v39 = vsel %vm860_vm10, %v3438_v59, %v5971_v44  ;;  %v3441_v51 = vsel %vm860_vm10, %v3439_v35, %v5972_v20  ;;  %v6026_v20 = vld [vmem:[%s6450_s20 + $0x1] ss:$0 sm:$0xff]  ;;  %s8002_s20 = sld [smem:[#allocation21_spill]] }
0x131b   :  { %v3442_v42 = vpack.c.bf16 %v3441_v51, %v3440_v39 }
0x131d   :  { %5667 = vmatmul.msk.bf16.vlgmr.msrb.gmra.mxu3 %vm245_vm0, %v3442_v42 }
0x1359   :  { %v2663_v40 = vpop.xlane.xlu2 %2662 }
0x135a   :  { %v2665_v4 = vmul.f32 %v2663_v40, %v6750_v63 }
0x135c   :  { %v2667_v41 = vsub.f32 %v2657_v31, %v2665_v4 }
0x135e   :  { %v2669_v43 = vmul.f32 %v2667_v41, %v2667_v41 }
0x1360   :  { %v2673_v62 = vsel %vm245_vm0, %v2669_v43, 0.0 }
0x1361   :  { %2674 = vadd.xlane.f32.xlu1 %v2673_v62 }
0x13a0   :  { %v3470_v46 = vpop.f32.mrf.mxu3 }
0x13a1   :  { %v3471_v7 = vadd.f32 %v6025_v9, %v3470_v46 }
0x13a3   :  { %v3475_v49 = vadd.f32 %v3471_v7, %v6985_v25  ;;  %v2681_v25 = vmul.f32 %v6193_v1, %v2678_v58  ;;  %v5836_v58 = vld [vmem:[%s6415_s8 + $0x10] sm:$0xff]  ;;  %s7995_s8 = sld [smem:[#allocation14_spill]] }
0x13a4   :  { %3557 = vmatpush.bf16.msrb.mxu0 %v5836_v58 }
0x13a5   :  { %v3477_v17 = vsel %vm245_vm0, %v3475_v49, 0.0  ;;  %v2682_v8 = vmul.f32 %v6193_v1, %v2681_v25 }
0x13a6   :  { %3478 = vadd.xlane.f32.xlu2 %v3477_v17 }
0x13a7   :  { %v2683_v28 = vmul.f32 0.5, %v2682_v8 }
0x13a8   :  { %v3472_v52 = vpop.f32.mrf.mxu3 }
0x13a9   :  { %v3473_v56 = vadd.f32 %v6025_v9, %v3472_v52  ;;  %v2684_v53 = vsub.f32 1.5, %v2683_v28 }
0x13ab   :  { %v3476_v60 = vadd.f32 %v3473_v56, %v6987_v26  ;;  %v2685_v32 = vmul.f32 %v6193_v1, %v2684_v53 }
0x13ad   :  { %v3480_v27 = vsel %vm245_vm0, %v3476_v60, 0.0  ;;  %v2689_v57 = vsel %vm2688_vm4, %v6193_v1, %v2685_v32 }
0x13ae   :  { %3481 = vadd.xlane.f32.xlu0 %v3480_v27  ;;  %v2700_v19 = vmul.f32 %v2689_v57, %v7353_v54 }
0x13b0   :  { %v2705_v24 = vmul.f32 %v6023_v18, %v2700_v19 }
0x13b2   :  { %v7387_v6 = vadd.f32 %v6024_v22, %v2705_v24 }
0x13d4   :  { %v2675_v10 = vpop.xlane.xlu1 %2674 }
0x13d5   :  { %v2677_v47 = vmul.f32 %v2675_v10, %v6750_v63 }
0x13d7   :  { %v2679_v26 = vadd.f32 1e-05, %v2677_v47 }
0x13d9   :  { %6194 = vrsqrt.f32 %v2679_v26  ;;  %vm2696_vm8 = vweird.f32 %v2679_v26 }
0x13df   :  { %v6195_v11 = vpop.eup %6194 }
0x13e0   :  { %v2691_v29 = vmul.f32 %v6195_v11, %v2679_v26  ;;  %vm2697_vm7 = vweird.f32 %v6195_v11 }
0x13e1   :  { %vm2698_vm11 = vmor %vm2696_vm8, %vm2697_vm7 }
0x13e2   :  { %v2692_v14 = vmul.f32 %v6195_v11, %v2691_v29 }
0x13e4   :  { %v2693_v48 = vmul.f32 0.5, %v2692_v14 }
0x13e6   :  { %v2694_v23 = vsub.f32 1.5, %v2693_v48  ;;  %v6027_v48 = vld [vmem:[%s6405_s29 + $0x1] ss:$0 sm:$0xff]  ;;  %s7993_s29 = sld [smem:[#allocation9_spill]] }
0x13e8   :  { %v2695_v15 = vmul.f32 %v6195_v11, %v2694_v23 }
0x13ea   :  { %v2699_v16 = vsel %vm2698_vm11, %v6195_v11, %v2695_v15  ;;  %v6028_v15 = vld [vmem:[%s6410_s3 + $0x1] ss:$0 sm:$0xff]  ;;  %s7994_s3 = sld [smem:[#allocation10_spill]] }
0x13eb   :  { %v2701_v13 = vmul.f32 %v2699_v16, %v2667_v41 }
0x13ed   :  { %v2706_v31 = vmul.f32 %v6023_v18, %v2701_v13 }
0x13ef   :  { %v7389_v45 = vadd.f32 %v6024_v22, %v2706_v31 }
0x13f1   :  { %v3667_v0 = vpack.c.bf16 %v7389_v45, %v7387_v6 }
0x13f3   :  { %5702 = vmatmul.msk.bf16.vlgmr.msrb.gmra.mxu2 %vm245_vm0, %v3667_v0 }
0x1419   :  { %v3479_v21 = vpop.xlane.xlu2 %3478 }
0x141a   :  { %v3483_v54 = vmul.f32 %v3479_v21, %v6750_v63 }
0x141c   :  { %v7395_v33 = vsub.f32 %v3475_v49, %v3483_v54 }
0x141e   :  { %v3487_v36 = vmul.f32 %v7395_v33, %v7395_v33 }
0x1420   :  { %v3489_v34 = vsel %vm245_vm0, %v3487_v36, 0.0 }
0x1421   :  { %v3482_v12 = vpop.xlane.xlu0 %3481  ;;  %3490 = vadd.xlane.f32.xlu1 %v3489_v34 }
0x1422   :  { %v3484_v37 = vmul.f32 %v3482_v12, %v6750_v63 }
0x1424   :  { %v7401_v38 = vsub.f32 %v3476_v60, %v3484_v37 }
0x1426   :  { %v3488_v50 = vmul.f32 %v7401_v38, %v7401_v38 }
0x1428   :  { %v3492_v3 = vsel %vm245_vm0, %v3488_v50, 0.0 }
0x1429   :  { %3493 = vadd.xlane.f32.xlu2 %v3492_v3 }
0x1476   :  { %v3695_v44 = vpop.f32.mrf.mxu2 }
0x1477   :  { %v3696_v59 = vadd.f32 %v6026_v20, %v3695_v44 }
0x1479   :  { %v3704_v35 = vpack.c.bf16 %v3696_v59, %v3696_v59  ;;  %v3700_v43 = vmul.f32 0.35355338, %v3696_v59 }
0x147b   :  { %v3707_v39 = vunpack.c.l.b16 %v3704_v35  ;;  %v7417_v7 = vpack.c.bf16 %v3700_v43, %v3700_v43  ;;  %v5841_v43 = vld [vmem:[%s6425_s19 + $0x38] sm:$0xff] }
0x147c   :  { %3601 = vmatpush.bf16.msrb.mxu1 %v5841_v43 }
0x147d   :  { %v7407_v51 = vpack.c.b16 %v3707_v39, %v3707_v39  ;;  %v3849_v17 = vunpack.c.l.b16 %v7417_v7 }
0x147e   :  { %v3697_v42 = vpop.f32.mrf.mxu2 }
0x147f   :  { %v3698_v40 = vadd.f32 %v6026_v20, %v3697_v42  ;;  %3709 = vrot.lane.b32.xlu0 %v7407_v51, %s7976_s30  ;;  %3853 = vrot.lane.b32.xlu2 %v7407_v51, %s7981_s1  ;;  %v3850_v56 = vpack.c.b16 %v3849_v17, %v3849_v17 }
0x1481   :  { %v3701_v4 = vmul.f32 0.35355338, %v3698_v40  ;;  %v3705_v41 = vpack.c.bf16 %v3698_v40, %v3698_v40 }
0x1483   :  { %v3731_v62 = vunpack.c.l.b16 %v3705_v41  ;;  %v7413_v9 = vpack.c.bf16 %v3701_v4, %v3701_v4 }
0x1485   :  { %v7415_v46 = vpack.c.b16 %v3731_v62, %v3731_v62  ;;  %v3875_v49 = vunpack.c.l.b16 %v7413_v9  ;;  %v5840_v62 = vld [vmem:[%s6425_s19 + $0x30] sm:$0xff] }
0x1486   :  { %3602 = vmatpush.bf16.msrb.mxu1 %v5840_v62 }
0x1487   :  { %3879 = vrot.lane.b32.xlu0 %v7415_v46, %s7981_s1  ;;  %3996 = vrot.lane.b32.xlu2 %v7407_v51, %s7969_s0  ;;  %v3876_v52 = vpack.c.b16 %v3875_v49, %v3875_v49  ;;  %v5838_v49 = vld [vmem:[%s6425_s19 + $0x20] sm:$0xff] }
0x1488   :  { %3733 = vrot.lane.b32.xlu1 %v7415_v46, %s7976_s30 }
0x148f   :  { %3877 = vrot.lane.b32.xlu0 %v3876_v52, %s7977_s6  ;;  %4017 = vrot.lane.b32.xlu2 %v3876_v52, %s7978_s17 }
0x1490   :  { %3851 = vrot.lane.b32.xlu1 %v3850_v56, %s7977_s6 }
0x1494   :  { %v3491_v60 = vpop.xlane.xlu1 %3490 }
0x1495   :  { %v3495_v27 = vmul.f32 %v3491_v60, %v6750_v63  ;;  %v6029_v60 = vld [vmem:[%s6420_s14 + $0x1] ss:$0 sm:$0xff]  ;;  %s7996_s14 = sld [smem:[#allocation12_spill]] }
0x1497   :  { %v3497_v30 = vadd.f32 1e-05, %v3495_v27  ;;  %3994 = vrot.lane.b32.xlu0 %v3850_v56, %s7978_s17  ;;  %4134 = vrot.lane.b32.xlu2 %v3850_v56, %s7979_s27 }
0x1498   :  { %4019 = vrot.lane.b32.xlu1 %v7415_v46, %s7969_s0 }
0x1499   :  { %6196 = vrsqrt.f32 %v3497_v30  ;;  %vm3505_vm13 = vweird.f32 %v3497_v30 }
0x149c   :  { %v3494_v1 = vpop.xlane.xlu2 %3493 }
0x149d   :  { %v3496_v5 = vmul.f32 %v3494_v1, %v6750_v63 }
0x149f   :  { %v6197_v25 = vpop.eup %6196  ;;  %v3498_v61 = vadd.f32 1e-05, %v3496_v5  ;;  %4159 = vrot.lane.b32.xlu0 %v7415_v46, %s7970_s10 }
0x14a0   :  { %v3500_v8 = vmul.f32 %v6197_v25, %v3497_v30  ;;  %4136 = vrot.lane.b32.xlu1 %v7407_v51, %s7970_s10  ;;  %vm3506_vm12 = vweird.f32 %v6197_v25 }
0x14a1   :  { %6198 = vrsqrt.f32 %v3498_v61  ;;  %vm3507_vm14 = vmor %vm3505_vm13, %vm3506_vm12  ;;  %vm3515_vm3 = vweird.f32 %v3498_v61 }
0x14a2   :  { %v3501_v10 = vmul.f32 %v6197_v25, %v3500_v8 }
0x14a4   :  { %v3502_v47 = vmul.f32 0.5, %v3501_v10 }
0x14a6   :  { %v3503_v26 = vsub.f32 1.5, %v3502_v47 }
0x14a7   :  { %v6199_v28 = vpop.eup %6198 }
0x14a8   :  { %v3504_v53 = vmul.f32 %v6197_v25, %v3503_v26  ;;  %v3510_v11 = vmul.f32 %v6199_v28, %v3498_v61  ;;  %4157 = vrot.lane.b32.xlu1 %v3876_v52, %s7979_s27  ;;  %vm3516_vm15 = vweird.f32 %v6199_v28 }
0x14a9   :  { %vm3517_vm4 = vmor %vm3515_vm3, %vm3516_vm15 }
0x14aa   :  { %v3511_v32 = vmul.f32 %v6199_v28, %v3510_v11  ;;  %v3508_v29 = vsel %vm3507_vm14, %v6197_v25, %v3504_v53 }
0x14ab   :  { %v3519_v23 = vmul.f32 %v3508_v29, %v7395_v33 }
0x14ac   :  { %v3512_v14 = vmul.f32 0.5, %v3511_v32 }
0x14ad   :  { %v3524_v16 = vmul.f32 %v6027_v48, %v3519_v23 }
0x14ae   :  { %v3513_v57 = vsub.f32 1.5, %v3512_v14 }
0x14af   :  { %v7447_v13 = vadd.f32 %v6028_v15, %v3524_v16 }
0x14b0   :  { %v3514_v18 = vmul.f32 %v6199_v28, %v3513_v57 }
0x14b2   :  { %v3518_v19 = vsel %vm3517_vm4, %v6199_v28, %v3514_v18 }
0x14b3   :  { %v3520_v22 = vmul.f32 %v3518_v19, %v7401_v38 }
0x14b5   :  { %v3525_v24 = vmul.f32 %v6027_v48, %v3520_v22 }
0x14b7   :  { %v7449_v31 = vadd.f32 %v6028_v15, %v3525_v24 }
0x14b9   :  { %v3531_v0 = vpack.c.bf16 %v7449_v31, %v7447_v13 }
0x14bb   :  { %5676 = vmatmul.msk.bf16.vlgmr.msrb.gmra.mxu0 %vm245_vm0, %v3531_v0 }
0x14d9   :  { %v3854_v21 = vpop.permute.xlu2 %3853 }
0x14da   :  { %v3859_v36 = vsel %vm274_vm1, %v3854_v21, 0 }
0x14e1   :  { %v3997_v34 = vpop.permute.xlu2 %3996 }
0x14e2   :  { %v4002_v37 = vsel %vm274_vm1, %v3997_v34, 0 }
0x14f1   :  { %v3710_v54 = vpop.permute.xlu0 %3709 }
0x14f2   :  { %v3715_v33 = vsel %vm274_vm1, %v3710_v54, 0 }
0x14f3   :  { %3724 = vmatpush.bf16.xpose.msra.mxu3 %v3715_v33 }
0x14f9   :  { %v3880_v12 = vpop.permute.xlu0 %3879 }
0x14fa   :  { %v3885_v38 = vsel %vm274_vm1, %v3880_v12, 0  ;;  %v3734_v50 = vpop.permute.xlu1 %3733  ;;  %5703 = vmatmul.msk.bf16.vlgmr.msra.gmra.mxu3 %vm274_vm1, %v7417_v7  ;;  %v5839_v7 = vld [vmem:[%s6425_s19 + $0x28] sm:$0xff]  ;;  %s7997_s19 = sld [smem:[#allocation15_spill]] }
0x14fb   :  { %3868 = vmatpush.bf16.xpose.msrb.mxu3 %v3859_v36  ;;  %v3739_v3 = vsel %vm274_vm1, %v3734_v50, 0  ;;  %3603 = vmatpush.bf16.msrb.mxu1 %v5839_v7 }
0x14fc   :  { %3748 = vmatpush.bf16.xpose.msra.mxu0 %v3739_v3 }
0x14ff   :  { %3604 = vmatpush.bf16.msrb.mxu1 %v5838_v49 }
0x1501   :  { %v3878_v20 = vpop.permute.xlu0 %3877 }
0x1502   :  { %v3852_v44 = vpop.permute.xlu1 %3851 }
0x1503   :  { %4011 = vmatpush.bf16.xpose.msra.mxu3 %v4002_v37  ;;  %5704 = vmatmul.msk.bf16.vlgmr.msra.gmra.mxu0 %vm274_vm1, %v7413_v9  ;;  %v4018_v9 = vpop.permute.xlu2 %4017 }
0x1504   :  { %3894 = vmatpush.bf16.xpose.msrb.mxu0 %v3885_v38 }
0x1509   :  { %v3995_v59 = vpop.permute.xlu0 %3994 }
0x150a   :  { %v4020_v35 = vpop.permute.xlu1 %4019  ;;  %5707 = vmatmul.msk.bf16.vlgmr.msrb.gmra.mxu3 %vm274_vm1, %v3852_v44 }
0x150b   :  { %v4025_v39 = vsel %vm274_vm1, %v4020_v35, 0  ;;  %v4135_v17 = vpop.permute.xlu2 %4134 }
0x150c   :  { %4034 = vmatpush.bf16.xpose.msra.mxu0 %v4025_v39 }
0x1511   :  { %v4160_v42 = vpop.permute.xlu0 %4159 }
0x1512   :  { %v4165_v40 = vsel %vm274_vm1, %v4160_v42, 0  ;;  %v4137_v4 = vpop.permute.xlu1 %4136 }
0x1513   :  { %v4142_v41 = vsel %vm274_vm1, %v4137_v4, 0  ;;  %5708 = vmatmul.msk.bf16.vlgmr.msrb.gmra.mxu0 %vm274_vm1, %v3878_v20 }
0x1514   :  { %4151 = vmatpush.bf16.xpose.msrb.mxu3 %v4142_v41  ;;  %4174 = vmatpush.bf16.xpose.msrb.mxu0 %v4165_v40 }
0x151a   :  { %5711 = vmatmul.msk.bf16.vlgmr.msra.gmra.mxu3 %vm274_vm1, %v3995_v59  ;;  %v4158_v52 = vpop.permute.xlu1 %4157 }
0x1523   :  { %5712 = vmatmul.msk.bf16.vlgmr.msra.gmra.mxu0 %vm274_vm1, %v4018_v9 }
0x152a   :  { %5715 = vmatmul.msk.bf16.vlgmr.msrb.gmra.mxu3 %vm274_vm1, %v4135_v17 }
0x1533   :  { %5716 = vmatmul.msk.bf16.vlgmr.msrb.gmra.mxu0 %vm274_vm1, %v4158_v52 }
0x1538   :  { %v3559_v56 = vpop.f32.mrf.mxu0 }
0x1539   :  { %v3560_v27 = vadd.f32 %v6029_v60, %v3559_v56 }
0x153b   :  { %v3564_v58 = vmax.f32 %v3560_v27, 0.0 }
0x1540   :  { %v3561_v2 = vpop.f32.mrf.mxu0 }
0x1541   :  { %v3562_v30 = vadd.f32 %v6029_v60, %v3561_v2 }
0x1543   :  { %v3565_v1 = vmax.f32 %v3562_v30, 0.0 }
0x1545   :  { %v3566_v5 = vpack.c.bf16 %v3565_v1, %v3564_v58 }
0x1547   :  { %5693 = vmatmul.msk.bf16.vlgmr.msrb.gmra.mxu1 %vm1022_vm6, %v3566_v5 }
0x157d   :  { %v3726_v25 = vpop.f32.mrf.mxu3 }
0x157e   :  { %v3754_v61 = vsel %vm6782_vm5, %v3726_v25, -1e+30 }
0x157f   :  { %v3756_v8 = vsel %vm274_vm1, %v3754_v61, -inf }
0x1580   :  { %v3750_v10 = vpop.f32.mrf.mxu0  ;;  %3757 = vmax.xlane.f32.xlu2 %v3756_v8 }
0x1581   :  { %v3755_v39 = vsel %vm6782_vm5, %v3750_v10, -1e+30 }
0x1582   :  { %v3759_v4 = vsel %vm274_vm1, %v3755_v39, -inf }
0x1585   :  { %v3728_v47 = vpop.f32.mrf.mxu3 }
0x1588   :  { %v3752_v26 = vpop.f32.mrf.mxu0 }
0x158d   :  { %v3870_v28 = vpop.f32.mrf.mxu3 }
0x158e   :  { %v3900_v53 = vsel %vm6782_vm5, %v3870_v28, -1e+30 }
0x158f   :  { %v3902_v11 = vsel %vm274_vm1, %v3900_v53, -inf }
0x1590   :  { %v3896_v32 = vpop.f32.mrf.mxu0  ;;  %3903 = vmax.xlane.f32.xlu0 %v3902_v11 }
0x1591   :  { %v7494_v21 = vsel %vm6782_vm5, %v3896_v32, -1e+30 }
0x1592   :  { %v3905_v33 = vsel %vm274_vm1, %v7494_v21, -inf }
0x1595   :  { %v3872_v29 = vpop.f32.mrf.mxu3 }
0x1598   :  { %v3898_v14 = vpop.f32.mrf.mxu0  ;;  %3806 = vrot.lane.b32.xlu2 %v7407_v51, %s7985_s13 }
0x159d   :  { %v4013_v57 = vpop.f32.mrf.mxu3 }
0x159e   :  { %v4040_v48 = vsel %vm6782_vm5, %v4013_v57, -1e+30 }
0x159f   :  { %v4042_v23 = vsel %vm274_vm1, %v4040_v48, -inf }
0x15a0   :  { %v4036_v18 = vpop.f32.mrf.mxu0  ;;  %4043 = vmax.xlane.f32.xlu1 %v4042_v23 }
0x15a1   :  { %v7500_v34 = vsel %vm6782_vm5, %v4036_v18, -1e+30 }
0x15a2   :  { %v4045_v12 = vsel %vm274_vm1, %v7500_v34, -inf }
0x15a5   :  { %v4015_v19 = vpop.f32.mrf.mxu3 }
0x15a8   :  { %v4038_v15 = vpop.f32.mrf.mxu0 }
0x15ad   :  { %v4153_v16 = vpop.f32.mrf.mxu3 }
0x15ae   :  { %v4180_v22 = vsel %vm6782_vm5, %v4153_v16, -1e+30 }
0x15af   :  { %v4182_v24 = vsel %vm274_vm1, %v4180_v22, -inf }
0x15b0   :  { %v4176_v0 = vpop.f32.mrf.mxu0  ;;  %4183 = vmax.xlane.f32.xlu1 %v4182_v24 }
0x15b1   :  { %v4181_v2 = vsel %vm6782_vm5, %v4176_v0, -1e+30 }
0x15b2   :  { %v4185_v30 = vsel %vm274_vm1, %v4181_v2, -inf }
0x15b5   :  { %v4155_v54 = vpop.f32.mrf.mxu3 }
0x15b8   :  { %v4178_v36 = vpop.f32.mrf.mxu0  ;;  %3906 = vmax.xlane.f32.xlu1 %v3905_v33 }
0x15c1   :  { %4046 = vmax.xlane.f32.xlu2 %v4045_v12 }
0x15d1   :  { %3827 = vrot.lane.b32.xlu1 %v7415_v46, %s7985_s13 }
0x15f3   :  { %v3758_v37 = vpop.xlane.xlu2 %3757 }
0x15f4   :  { %v3762_v38 = vsub.f32 %v3754_v61, %v3758_v37 }
0x15f6   :  { %v3764_v50 = vmul.f32 1.442695, %v3762_v38 }
0x15f8   :  { %6200 = vpow2.f32 %v3764_v50 }
0x15fb   :  { %v3807_v3 = vpop.permute.xlu2 %3806 }
0x15fc   :  { %v3812_v20 = vsel %vm373_vm2, %v3807_v3, 0 }
0x15fd   :  { %3821 = vmatpush.bf16.msra.mxu1 %v3812_v20 }
0x15fe   :  { %v6201_v44 = vpop.eup %6200 }
0x15ff   :  { %v3768_v59 = vsel %vm274_vm1, %v6201_v44, 0.0 }
0x1600   :  { %3769 = vadd.xlane.f32.xlu0 %v3768_v59  ;;  %v3606_v59 = vpop.f32.mrf.mxu1 }
0x1603   :  { %v3904_v35 = vpop.xlane.xlu0 %3903 }
0x1604   :  { %v3908_v42 = vsub.f32 %v3900_v53, %v3904_v35 }
0x1606   :  { %v3910_v40 = vmul.f32 1.442695, %v3908_v42 }
0x1608   :  { %6202 = vpow2.f32 %v3910_v40  ;;  %3760 = vmax.xlane.f32.xlu0 %v3759_v4 }
0x160e   :  { %v7511_v41 = vpop.eup %6202 }
0x160f   :  { %v3914_v43 = vsel %vm274_vm1, %v7511_v41, 0.0 }
0x1610   :  { %3915 = vadd.xlane.f32.xlu0 %v3914_v43 }
0x1613   :  { %v4044_v62 = vpop.xlane.xlu1 %4043 }
0x1614   :  { %v4048_v9 = vsub.f32 %v4040_v48, %v4044_v62 }
0x1616   :  { %v4050_v7 = vmul.f32 1.442695, %v4048_v9 }
0x1618   :  { %6204 = vpow2.f32 %v4050_v7 }
0x161e   :  { %v7515_v49 = vpop.eup %6204 }
0x161f   :  { %v4054_v17 = vsel %vm274_vm1, %v7515_v49, 0.0 }
0x1620   :  { %4055 = vadd.xlane.f32.xlu1 %v4054_v17 }
0x1623   :  { %v4184_v52 = vpop.xlane.xlu1 %4183 }
0x1624   :  { %3973 = vrot.lane.b32.xlu0 %v7415_v46, %s7987_s22  ;;  %v4188_v5 = vsub.f32 %v4180_v22, %v4184_v52  ;;  %v7573_v52 = vpop.f32.mrf.mxu1 }
0x1626   :  { %v4190_v47 = vmul.f32 1.442695, %v4188_v5 }
0x162b   :  { %v3907_v56 = vpop.xlane.xlu1 %3906 }
0x162c   :  { %v3909_v26 = vsub.f32 %v7494_v21, %v3907_v56 }
0x162e   :  { %v3912_v14 = vmul.f32 1.442695, %v3909_v26 }
0x1634   :  { %v4047_v53 = vpop.xlane.xlu2 %4046 }
0x1635   :  { %v4049_v57 = vsub.f32 %v7500_v34, %v4047_v53 }
0x1637   :  { %v4052_v16 = vmul.f32 1.442695, %v4049_v57 }
0x1639   :  { %4092 = vrot.lane.b32.xlu1 %v7407_v51, %s7988_s7 }
0x1643   :  { %v3828_v60 = vpop.permute.xlu1 %3827 }
0x1644   :  { %v3833_v27 = vsel %vm373_vm2, %v3828_v60, 0 }
0x1645   :  { %3842 = vmatpush.bf16.msra.mxu2 %v3833_v27 }
0x164e   :  { %4186 = vmax.xlane.f32.xlu0 %v4185_v30 }
0x1662   :  { %4113 = vrot.lane.b32.xlu0 %v7415_v46, %s7988_s7 }
0x1673   :  { %v3770_v58 = vpop.xlane.xlu0 %3769 }
0x1674   :  { %6206 = vrcp.f32 %v3770_v58  ;;  %v3785_v28 = vand.u32 2147483648, %v3770_v58  ;;  %v3783_v32 = vand.u32 2147483647, %v3770_v58  ;;  %vm3779_vm7 = vweird.f32 %v3770_v58 }
0x1676   :  { %v3786_v48 = vor.u32 1.1754944e-38, %v3785_v28  ;;  %vm3784_vm11 = vcmp.eq.f32.partialorder %v3783_v32, 8.507059e+37 }
0x167a   :  { %v6207_v1 = vpop.eup %6206 }
0x167b   :  { %v3775_v25 = vmul.f32 %v6207_v1, %v3770_v58  ;;  %v3761_v61 = vpop.xlane.xlu0 %3760  ;;  %vm3780_vm5 = vweird.f32 %v6207_v1 }
0x167c   :  { %v3763_v8 = vsub.f32 %v3755_v39, %v3761_v61  ;;  %vm3781_vm8 = vmor %vm3779_vm7, %vm3780_vm5 }
0x167d   :  { %v3776_v10 = vsub.f32 1.0, %v3775_v25 }
0x167e   :  { %v3766_v55 = vmul.f32 1.442695, %v3763_v8 }
0x167f   :  { %v3777_v11 = vmul.f32 %v6207_v1, %v3776_v10 }
0x1680   :  { %6208 = vpow2.f32 %v3766_v55 }
0x1681   :  { %v3778_v29 = vadd.f32 %v6207_v1, %v3777_v11  ;;  %6210 = vpow2.f32 %v4190_v47 }
0x1682   :  { %6212 = vpow2.f32 %v3912_v14 }
0x1683   :  { %v3782_v23 = vsel %vm3781_vm8, %v6207_v1, %v3778_v29  ;;  %6214 = vpow2.f32 %v4052_v16  ;;  %v3916_v33 = vpop.xlane.xlu0 %3915 }
0x1684   :  { %v3787_v18 = vsel %vm3784_vm11, %v3786_v48, %v3782_v23  ;;  %v3931_v27 = vand.u32 2147483648, %v3916_v33  ;;  %vm3925_vm13 = vweird.f32 %v3916_v33  ;;  %v3929_v30 = vand.u32 2147483647, %v3916_v33 }
0x1685   :  { %v3788_v19 = vmul.f32 %v6201_v44, %v3787_v18  ;;  %v7554_v44 = vld [vmem:[%s6430_s24 + $0x1] ss:$0 sm:$0xff]  ;;  %s7998_s24 = sld [smem:[#allocation16_spill]] }
0x1686   :  { %v7531_v15 = vpop.eup %6208  ;;  %v3607_v35 = vadd.f32 %v7554_v44, %v3606_v59  ;;  %v3932_v61 = vor.u32 1.1754944e-38, %v3931_v27  ;;  %vm3930_vm15 = vcmp.eq.f32.partialorder %v3929_v30, 8.507059e+37 }
0x1687   :  { %v3804_v22 = vpack.c.bf16 %v3788_v19, %v3788_v19  ;;  %v3771_v24 = vsel %vm274_vm1, %v7531_v15, 0.0  ;;  %v7535_v0 = vpop.eup %6210 }
0x1688   :  { %3772 = vadd.xlane.f32.xlu2 %v3771_v24  ;;  %v4194_v21 = vsel %vm274_vm1, %v7535_v0, 0.0  ;;  %v7540_v54 = vpop.eup %6212  ;;  %v7560_v42 = vadd.f32 %v3607_v35, %v7447_v13 }
0x1689   :  { %5705 = vmatmul.msk.bf16.vlgmr.msra.gmra.mxu1 %vm274_vm1, %v3804_v22  ;;  %v3917_v36 = vsel %vm274_vm1, %v7540_v54, 0.0  ;;  %v7544_v34 = vpop.eup %6214 }
0x168a   :  { %v4057_v12 = vsel %vm274_vm1, %v7544_v34, 0.0 }
0x168c   :  { %4195 = vadd.xlane.f32.xlu0 %v4194_v21 }
0x1690   :  { %3918 = vadd.xlane.f32.xlu2 %v3917_v36 }
0x1693   :  { %v7570_v7 = vpop.xlane.xlu1 %4055 }
0x1694   :  { %4058 = vadd.xlane.f32.xlu0 %v4057_v12 }
0x1696   :  { %v3974_v37 = vpop.permute.xlu0 %3973 }
0x1697   :  { %v3979_v38 = vsel %vm373_vm2, %v3974_v37, 0 }
0x1698   :  { %3988 = vmatpush.bf16.msrb.mxu2 %v3979_v38 }
0x16a8   :  { %3952 = vrot.lane.b32.xlu2 %v7407_v51, %s7987_s22  ;;  %4232 = vrot.lane.b32.xlu0 %v7407_v51, %s7989_s23  ;;  %v3613_v51 = vsel %vm245_vm0, %v7560_v42, 0.0 }
0x16ab   :  { %v4093_v57 = vpop.permute.xlu1 %4092 }
0x16ac   :  { %v4098_v21 = vsel %vm373_vm2, %v4093_v57, 0 }
0x16c1   :  { %v4187_v50 = vpop.xlane.xlu0 %4186 }
0x16c2   :  { %v4189_v3 = vsub.f32 %v4181_v2, %v4187_v50 }
0x16c4   :  { %v4192_v20 = vmul.f32 1.442695, %v4189_v3 }
0x16c6   :  { %6216 = vpow2.f32 %v4192_v20  ;;  %v4071_v20 = vand.u32 2147483648, %v7570_v7 }
0x16c7   :  { %6218 = vrcp.f32 %v3916_v33 }
0x16c8   :  { %6220 = vrcp.f32 %v7570_v7 }
0x16cc   :  { %v7557_v39 = vpop.eup %6216 }
0x16cd   :  { %v4197_v40 = vsel %vm274_vm1, %v7557_v39, 0.0  ;;  %v6219_v4 = vpop.eup %6218 }
0x16ce   :  { %v3921_v43 = vmul.f32 %v6219_v4, %v3916_v33  ;;  %vm3926_vm12 = vweird.f32 %v6219_v4 }
0x16cf   :  { %vm3927_vm14 = vmor %vm3925_vm13, %vm3926_vm12  ;;  %vm4065_vm12 = vweird.f32 %v7570_v7 }
0x16d0   :  { %v3922_v9 = vsub.f32 1.0, %v3921_v43 }
0x16d1   :  { %4198 = vadd.xlane.f32.xlu2 %v4197_v40  ;;  %v4069_v40 = vand.u32 2147483647, %v7570_v7 }
0x16d2   :  { %3614 = vadd.xlane.f32.xlu0 %v3613_v51  ;;  %v3923_v17 = vmul.f32 %v6219_v4, %v3922_v9  ;;  %v4072_v9 = vor.u32 1.1754944e-38, %v4071_v20 }
0x16d4   :  { %v7568_v62 = vpop.permute.xlu0 %4113  ;;  %v3924_v60 = vadd.f32 %v6219_v4, %v3923_v17 }
0x16d5   :  { %v4119_v59 = vsel %vm373_vm2, %v7568_v62, 0 }
0x16d6   :  { %v3928_v5 = vsel %vm3927_vm14, %v6219_v4, %v3924_v60 }
0x16d7   :  { %v3933_v26 = vsel %vm3930_vm15, %v3932_v61, %v3928_v5 }
0x16d8   :  { %v3934_v14 = vmul.f32 %v7511_v41, %v3933_v26 }
0x16da   :  { %v3950_v36 = vpack.c.bf16 %v3934_v14, %v3934_v14 }
0x16e9   :  { %4253 = vrot.lane.b32.xlu2 %v7415_v46, %s7989_s23  ;;  %v7577_v46 = vpop.eup %6220 }
0x16ea   :  { %v4061_v25 = vmul.f32 %v7577_v46, %v7570_v7  ;;  %vm4066_vm8 = vweird.f32 %v7577_v46 }
0x16eb   :  { %vm4067_vm13 = vmor %vm4065_vm12, %vm4066_vm8 }
0x16ec   :  { %v4062_v53 = vsub.f32 1.0, %v4061_v25 }
0x16ee   :  { %v4063_v16 = vmul.f32 %v7577_v46, %v4062_v53 }
0x16f0   :  { %v4064_v50 = vadd.f32 %v7577_v46, %v4063_v16 }
0x16f2   :  { %v4068_v43 = vsel %vm4067_vm13, %v7577_v46, %v4064_v50 }
0x16fb   :  { %v3773_v13 = vpop.xlane.xlu2 %3772 }
0x16fc   :  { %6222 = vrcp.f32 %v3773_v13  ;;  %v3800_v10 = vand.u32 2147483648, %v3773_v13  ;;  %v3798_v55 = vand.u32 2147483647, %v3773_v13  ;;  %vm3794_vm4 = vweird.f32 %v3773_v13 }
0x16fe   :  { %v3801_v48 = vor.u32 1.1754944e-38, %v3800_v10  ;;  %vm3799_vm7 = vcmp.eq.f32.partialorder %v3798_v55, 8.507059e+37 }
0x16ff   :  { %v7575_v56 = vpop.xlane.xlu0 %4195 }
0x1700   :  { %vm4205_vm8 = vweird.f32 %v7575_v56 }
0x1702   :  { %v6223_v2 = vpop.eup %6222 }
0x1703   :  { %v3790_v58 = vmul.f32 %v6223_v2, %v3773_v13  ;;  %v7579_v1 = vpop.xlane.xlu2 %3918  ;;  %vm3795_vm3 = vweird.f32 %v6223_v2 }
0x1704   :  { %6224 = vrcp.f32 %v7579_v1  ;;  %vm3796_vm5 = vmor %vm3794_vm4, %vm3795_vm3  ;;  %v3946_v51 = vand.u32 2147483648, %v7579_v1  ;;  %vm3940_vm14 = vweird.f32 %v7579_v1  ;;  %v3944_v4 = vand.u32 2147483647, %v7579_v1 }
0x1705   :  { %v3791_v8 = vsub.f32 1.0, %v3790_v58  ;;  %6226 = vrcp.f32 %v7575_v56  ;;  %vm4070_vm3 = vcmp.eq.f32.partialorder %v4069_v40, 8.507059e+37 }
0x1706   :  { %v7584_v47 = vpop.f32.mrf.mxu1  ;;  %v3947_v60 = vor.u32 1.1754944e-38, %v3946_v51  ;;  %v4073_v7 = vsel %vm4070_vm3, %v4072_v9, %v4068_v43  ;;  %vm3945_vm4 = vcmp.eq.f32.partialorder %v3944_v4, 8.507059e+37 }
0x1707   :  { %v3792_v28 = vmul.f32 %v6223_v2, %v3791_v8  ;;  %v7586_v32 = vpop.xlane.xlu0 %4058  ;;  %v4074_v58 = vmul.f32 %v7515_v49, %v4073_v7  ;;  %v4209_v49 = vand.u32 2147483647, %v7575_v56 }
0x1708   :  { %6228 = vrcp.f32 %v7586_v32  ;;  %vm4080_vm12 = vweird.f32 %v7586_v32  ;;  %v4084_v53 = vand.u32 2147483647, %v7586_v32 }
0x1709   :  { %v3793_v11 = vadd.f32 %v6223_v2, %v3792_v28  ;;  %v4090_v8 = vpack.c.bf16 %v4074_v58, %v4074_v58  ;;  %v4211_v28 = vand.u32 2147483648, %v7575_v56 }
0x170a   :  { %v6225_v29 = vpop.eup %6224 }
0x170b   :  { %v3797_v23 = vsel %vm3796_vm5, %v6223_v2, %v3793_v11  ;;  %v3936_v18 = vmul.f32 %v6225_v29, %v7579_v1  ;;  %v3953_v19 = vpop.permute.xlu2 %3952  ;;  %v6227_v3 = vpop.eup %6226  ;;  %vm3941_vm11 = vweird.f32 %v6225_v29 }
0x170c   :  { %v3802_v22 = vsel %vm3799_vm7, %v3801_v48, %v3797_v23  ;;  %v3958_v24 = vsel %vm373_vm2, %v3953_v19, 0  ;;  %v4201_v62 = vmul.f32 %v6227_v3, %v7575_v56  ;;  %vm3942_vm15 = vmor %vm3940_vm14, %vm3941_vm11  ;;  %vm4206_vm5 = vweird.f32 %v6227_v3 }
0x170d   :  { %v3803_v41 = vmul.f32 %v7531_v15, %v3802_v22  ;;  %v3937_v33 = vsub.f32 1.0, %v3936_v18  ;;  %3967 = vmatpush.bf16.msrb.mxu1 %v3958_v24  ;;  %vm4207_vm11 = vmor %vm4205_vm8, %vm4206_vm5  ;;  %vm4210_vm14 = vcmp.eq.f32.partialorder %v4209_v49, 8.507059e+37 }
0x170e   :  { %v3825_v12 = vpop.f32.mrf.mxu1  ;;  %v6229_v35 = vpop.eup %6228  ;;  %v4202_v27 = vsub.f32 1.0, %v4201_v62 }
0x170f   :  { %v3805_v37 = vpack.c.bf16 %v3803_v41, %v3803_v41  ;;  %v3938_v38 = vmul.f32 %v6225_v29, %v3937_v33  ;;  %v4076_v17 = vmul.f32 %v6229_v35, %v7586_v32  ;;  %vm4081_vm7 = vweird.f32 %v6229_v35 }
0x1710   :  { %5709 = vmatmul.msk.bf16.vlgmr.msrb.gmra.mxu1 %vm274_vm1, %v3950_v36  ;;  %v4203_v25 = vmul.f32 %v6227_v3, %v4202_v27  ;;  %vm4082_vm13 = vmor %vm4080_vm12, %vm4081_vm7 }
0x1711   :  { %4107 = vmatpush.bf16.msra.mxu1 %v4098_v21  ;;  %v3939_v15 = vadd.f32 %v6225_v29, %v3938_v38  ;;  %5706 = vmatmul.msk.bf16.vlgmr.msra.gmra.mxu2 %vm274_vm1, %v3805_v37  ;;  %v4077_v30 = vsub.f32 1.0, %v4076_v17 }
0x1712   :  { %4128 = vmatpush.bf16.msra.mxu2 %v4119_v59  ;;  %v4204_v26 = vadd.f32 %v6227_v3, %v4203_v25 }
0x1713   :  { %v3943_v13 = vsel %vm3942_vm15, %v6225_v29, %v3939_v15  ;;  %v4078_v61 = vmul.f32 %v6229_v35, %v4077_v30  ;;  %v4212_v29 = vor.u32 1.1754944e-38, %v4211_v28  ;;  %vm4085_vm15 = vcmp.eq.f32.partialorder %v4084_v53, 8.507059e+37 }
0x1714   :  { %v3948_v2 = vsel %vm3945_vm4, %v3947_v60, %v3943_v13  ;;  %v4208_v11 = vsel %vm4207_vm11, %v6227_v3, %v4204_v26  ;;  %v5844_v26 = vld [vmem:[%s7959_s16 + $0x10] sm:$0xff] }
0x1715   :  { %v3949_v1 = vmul.f32 %v7540_v54, %v3948_v2  ;;  %v4079_v55 = vadd.f32 %v6229_v35, %v4078_v61  ;;  %v4086_v54 = vand.u32 2147483648, %v7586_v32  ;;  %v4213_v48 = vsel %vm4210_vm14, %v4212_v29, %v4208_v11 }
0x1716   :  { %v4214_v18 = vmul.f32 %v7535_v0, %v4213_v48 }
0x1717   :  { %v3951_v10 = vpack.c.bf16 %v3949_v1, %v3949_v1  ;;  %v4083_v14 = vsel %vm4082_vm13, %v6229_v35, %v4079_v55  ;;  %v4087_v57 = vor.u32 1.1754944e-38, %v4086_v54 }
0x1718   :  { %v4230_v19 = vpack.c.bf16 %v4214_v18, %v4214_v18 }
0x1719   :  { %v4088_v23 = vsel %vm4085_vm15, %v4087_v57, %v4083_v14 }
0x171a   :  { %v4233_v5 = vpop.permute.xlu0 %4232  ;;  %v4089_v56 = vmul.f32 %v7544_v34, %v4088_v23 }
0x171b   :  { %v4238_v46 = vsel %vm373_vm2, %v4233_v5, 0  ;;  %v3609_v5 = vadd.f32 %v7554_v44, %v7573_v52 }
0x171c   :  { %4247 = vmatpush.bf16.msrb.mxu1 %v4238_v46  ;;  %v4091_v16 = vpack.c.bf16 %v4089_v56, %v4089_v56 }
0x171d   :  { %v3612_v1 = vadd.f32 %v3609_v5, %v7449_v31 }
0x171f   :  { %v3616_v61 = vsel %vm245_vm0, %v3612_v1, 0.0 }
0x1720   :  { %5713 = vmatmul.msk.bf16.vlgmr.msra.gmra.mxu1 %vm274_vm1, %v4090_v8 }
0x1721   :  { %5710 = vmatmul.msk.bf16.vlgmr.msrb.gmra.mxu2 %vm274_vm1, %v3951_v10  ;;  %v5845_v10 = vld [vmem:[%s7959_s16 + $0x18] sm:$0xff] }
0x1722   :  { %4329 = vmatpush.bf16.msra.mxu3 %v5845_v10  ;;  %v6031_v10 = vld [vmem:[%s7962_s9 + $0x1] ss:$0 sm:$0xff] }
0x1726   :  { %4330 = vmatpush.bf16.msra.mxu3 %v5844_v26 }
0x1730   :  { %5717 = vmatmul.msk.bf16.vlgmr.msrb.gmra.mxu1 %vm274_vm1, %v4230_v19  ;;  %v6033_v19 = vld [vmem:[%s7960_s18 + $0x1] ss:$0 sm:$0xff] }
0x1731   :  { %5714 = vmatmul.msk.bf16.vlgmr.msra.gmra.mxu2 %vm274_vm1, %v4091_v16 }
0x1744   :  { %v4199_v32 = vpop.xlane.xlu2 %4198 }
0x1745   :  { %6230 = vrcp.f32 %v4199_v32  ;;  %v3615_v22 = vpop.xlane.xlu0 %3614  ;;  %v4226_v38 = vand.u32 2147483648, %v4199_v32  ;;  %v4224_v3 = vand.u32 2147483647, %v4199_v32  ;;  %vm4220_vm4 = vweird.f32 %v4199_v32 }
0x1746   :  { %v3619_v24 = vmul.f32 %v3615_v22, %v6750_v63 }
0x1747   :  { %vm4225_vm7 = vcmp.eq.f32.partialorder %v4224_v3, 8.507059e+37 }
0x1748   :  { %v7628_v21 = vsub.f32 %v7560_v42, %v3619_v24  ;;  %v4227_v42 = vor.u32 1.1754944e-38, %v4226_v38 }
0x174a   :  { %v3623_v41 = vmul.f32 %v7628_v21, %v7628_v21 }
0x174b   :  { %v6231_v0 = vpop.eup %6230 }
0x174c   :  { %v4216_v33 = vmul.f32 %v6231_v0, %v4199_v32  ;;  %v4254_v34 = vpop.permute.xlu2 %4253  ;;  %v3625_v36 = vsel %vm245_vm0, %v3623_v41, 0.0  ;;  %vm4221_vm3 = vweird.f32 %v6231_v0 }
0x174d   :  { %v4259_v12 = vsel %vm373_vm2, %v4254_v34, 0  ;;  %3626 = vadd.xlane.f32.xlu0 %v3625_v36  ;;  %vm4222_vm5 = vmor %vm4220_vm4, %vm4221_vm3 }
0x174e   :  { %v4217_v37 = vsub.f32 1.0, %v4216_v33  ;;  %4268 = vmatpush.bf16.msrb.mxu2 %v4259_v12 }
0x1750   :  { %v4218_v50 = vmul.f32 %v6231_v0, %v4217_v37 }
0x1752   :  { %v4219_v20 = vadd.f32 %v6231_v0, %v4218_v50 }
0x1754   :  { %v4223_v59 = vsel %vm4222_vm5, %v6231_v0, %v4219_v20 }
0x1755   :  { %v4228_v15 = vsel %vm4225_vm7, %v4227_v42, %v4223_v59 }
0x1756   :  { %v4229_v35 = vmul.f32 %v7557_v39, %v4228_v15  ;;  %v5849_v15 = vld [vmem:[%s7961_s11 + $0x18] sm:$0xff] }
0x1757   :  { %4451 = vmatpush.bf16.msra.mxu1 %v5849_v15 }
0x1758   :  { %v4231_v40 = vpack.c.bf16 %v4229_v35, %v4229_v35 }
0x175a   :  { %5718 = vmatmul.msk.bf16.vlgmr.msrb.gmra.mxu2 %vm274_vm1, %v4231_v40 }
0x178d   :  { %v3969_v51 = vpop.f32.mrf.mxu1 }
0x1794   :  { %v3844_v4 = vpop.f32.mrf.mxu2 }
0x1795   :  { %v3971_v43 = vpop.f32.mrf.mxu1 }
0x179c   :  { %v3846_v62 = vpop.f32.mrf.mxu2 }
0x179d   :  { %v4109_v9 = vpop.f32.mrf.mxu1 }
0x17a4   :  { %v3990_v13 = vpop.f32.mrf.mxu2 }
0x17a5   :  { %v5973_v17 = vpack.i.bf16 %v3990_v13, %v3969_v51  ;;  %v4111_v60 = vpop.f32.mrf.mxu1  ;;  %v5848_v51 = vld [vmem:[%s7961_s11 + $0x10] sm:$0xff] }
0x17a6   :  { %4452 = vmatpush.bf16.msra.mxu1 %v5848_v51  ;;  %v6036_v51 = vld [vmem:[%s7995_s8 + $0x1] ss:$0 sm:$0xff] }
0x17a7   :  { %5974 = vrot.lane.b32.xlu1 %v5973_v17, %s7972_s2 }
0x17ac   :  { %v3992_v7 = vpop.f32.mrf.mxu2 }
0x17ad   :  { %v4249_v27 = vpop.f32.mrf.mxu1 }
0x17b4   :  { %v4130_v2 = vpop.f32.mrf.mxu2 }
0x17b5   :  { %v5978_v30 = vpack.i.bf16 %v4130_v2, %v4109_v9  ;;  %v4251_v39 = vpop.f32.mrf.mxu1 }
0x17b7   :  { %5979 = vrot.lane.b32.xlu2 %v5978_v30, %s7973_s28 }
0x17bc   :  { %v4132_v58 = vpop.f32.mrf.mxu2 }
0x17c0   :  { %v3627_v50 = vpop.xlane.xlu0 %3626 }
0x17dd   :  { %v4270_v46 = vpop.f32.mrf.mxu2 }
0x17de   :  { %v5983_v25 = vpack.i.bf16 %v4270_v46, %v4249_v27 }
0x17e0   :  { %3617 = vadd.xlane.f32.xlu2 %v3616_v61  ;;  %5984 = vrot.lane.b32.xlu1 %v5983_v25, %s7974_s5 }
0x17e5   :  { %v4272_v8 = vpop.f32.mrf.mxu2 }
0x1811   :  { %v5980_v54 = vpop.permute.xlu2 %5979 }
0x1812   :  { %v5982_v52 = vunpack.i.h.bf16 %v5980_v54  ;;  %v5981_v53 = vunpack.i.l.bf16 %v5980_v54 }
0x1819   :  { %v5975_v28 = vpop.permute.xlu1 %5974 }
0x181a   :  { %v5977_v55 = vunpack.i.h.bf16 %v5975_v28  ;;  %v5976_v49 = vunpack.i.l.bf16 %v5975_v28 }
0x181c   :  { %v4299_v44 = vsel %vm274_vm1, %v3844_v4, %v5977_v55  ;;  %v4298_v31 = vsel %vm274_vm1, %v7584_v47, %v5976_v49  ;;  %v6032_v49 = vld [vmem:[%s7963_s15 + $0x1] ss:$0 sm:$0xff] }
0x181d   :  { %v4300_v57 = vsel %vm857_vm9, %v4298_v31, %v5981_v53  ;;  %v4301_v48 = vsel %vm857_vm9, %v4299_v44, %v5982_v52 }
0x1852   :  { %v5985_v11 = vpop.permute.xlu1 %5984 }
0x1853   :  { %v5987_v29 = vunpack.i.h.bf16 %v5985_v11  ;;  %v5986_v14 = vunpack.i.l.bf16 %v5985_v11  ;;  %v3618_v16 = vpop.xlane.xlu2 %3617 }
0x1854   :  { %v3620_v47 = vmul.f32 %v3618_v16, %v6750_v63 }
0x1855   :  { %v4302_v23 = vsel %vm860_vm10, %v4300_v57, %v5986_v14  ;;  %v4303_v18 = vsel %vm860_vm10, %v4301_v48, %v5987_v29  ;;  %v5847_v57 = vld [vmem:[%s7992_s25 + $0x18] sm:$0xff] }
0x1856   :  { %v4304_v56 = vpack.c.bf16 %v4303_v18, %v4302_v23  ;;  %v3622_v41 = vsub.f32 %v3612_v1, %v3620_v47  ;;  %4418 = vmatpush.bf16.msra.mxu0 %v5847_v57 }
0x1858   :  { %5727 = vmatmul.msk.bf16.vlgmr.msra.gmra.mxu3 %vm245_vm0, %v4304_v56  ;;  %v3624_v36 = vmul.f32 %v3622_v41, %v3622_v41 }
0x185a   :  { %v3628_v38 = vsel %vm245_vm0, %v3624_v36, 0.0 }
0x18db   :  { %v4332_v32 = vpop.f32.mrf.mxu3 }
0x18dc   :  { %v4333_v22 = vadd.f32 %v6033_v19, %v4332_v32 }
0x18de   :  { %v4337_v24 = vadd.f32 %v4333_v22, %v7387_v6  ;;  %v3631_v6 = vmul.f32 %v3627_v50, %v6750_v63 }
0x18e0   :  { %v4339_v0 = vsel %vm245_vm0, %v4337_v24, 0.0  ;;  %v3633_v3 = vadd.f32 1e-05, %v3631_v6 }
0x18e1   :  { %4340 = vadd.xlane.f32.xlu1 %v4339_v0 }
0x18e2   :  { %6232 = vrsqrt.f32 %v3633_v3  ;;  %vm3641_vm11 = vweird.f32 %v3633_v3 }
0x18e3   :  { %v4334_v33 = vpop.f32.mrf.mxu3 }
0x18e4   :  { %v4335_v34 = vadd.f32 %v6033_v19, %v4334_v33 }
0x18e6   :  { %v4338_v12 = vadd.f32 %v4335_v34, %v7389_v45 }
0x18e8   :  { %v4342_v37 = vsel %vm245_vm0, %v4338_v12, 0.0  ;;  %v6233_v42 = vpop.eup %6232 }
0x18e9   :  { %4343 = vadd.xlane.f32.xlu2 %v4342_v37  ;;  %3629 = vadd.xlane.f32.xlu1 %v3628_v38  ;;  %v3636_v45 = vmul.f32 %v6233_v42, %v3633_v3  ;;  %vm3642_vm8 = vweird.f32 %v6233_v42  ;;  %v6034_v37 = vld [vmem:[%s7993_s29 + $0x1] ss:$0 sm:$0xff] }
0x18ea   :  { %vm3643_vm12 = vmor %vm3641_vm11, %vm3642_vm8  ;;  %v6035_v3 = vld [vmem:[%s7994_s3 + $0x1] ss:$0 sm:$0xff] }
0x18eb   :  { %v3637_v43 = vmul.f32 %v6233_v42, %v3636_v45 }
0x18ed   :  { %v3638_v27 = vmul.f32 0.5, %v3637_v43 }
0x18ef   :  { %v3639_v39 = vsub.f32 1.5, %v3638_v27 }
0x18f1   :  { %v3640_v5 = vmul.f32 %v6233_v42, %v3639_v39 }
0x18f3   :  { %v3644_v25 = vsel %vm3643_vm12, %v6233_v42, %v3640_v5  ;;  %v6037_v5 = vld [vmem:[%s7996_s14 + $0x1] ss:$0 sm:$0xff] }
0x18f4   :  { %v3655_v26 = vmul.f32 %v3644_v25, %v7628_v21  ;;  %v5846_v21 = vld [vmem:[%s7992_s25 + $0x10] sm:$0xff] }
0x18f5   :  { %4419 = vmatpush.bf16.msra.mxu0 %v5846_v21 }
0x18f6   :  { %v3660_v54 = vmul.f32 %v6031_v10, %v3655_v26 }
0x18f8   :  { %v3665_v52 = vadd.f32 %v6032_v49, %v3660_v54 }
0x1954   :  { %v4341_v20 = vpop.xlane.xlu1 %4340 }
0x1955   :  { %v4345_v59 = vmul.f32 %v4341_v20, %v6750_v63 }
0x1957   :  { %v7663_v35 = vsub.f32 %v4337_v24, %v4345_v59 }
0x1959   :  { %v4349_v40 = vmul.f32 %v7663_v35, %v7663_v35 }
0x195b   :  { %v4351_v4 = vsel %vm245_vm0, %v4349_v40, 0.0 }
0x195c   :  { %v4344_v62 = vpop.xlane.xlu2 %4343  ;;  %4352 = vadd.xlane.f32.xlu2 %v4351_v4  ;;  %v3630_v9 = vpop.xlane.xlu1 %3629 }
0x195d   :  { %v4346_v13 = vmul.f32 %v4344_v62, %v6750_v63  ;;  %v3632_v17 = vmul.f32 %v3630_v9, %v6750_v63 }
0x195f   :  { %v7671_v60 = vsub.f32 %v4338_v12, %v4346_v13  ;;  %v3634_v7 = vadd.f32 1e-05, %v3632_v17 }
0x1961   :  { %6234 = vrsqrt.f32 %v3634_v7  ;;  %v4350_v2 = vmul.f32 %v7671_v60, %v7671_v60  ;;  %vm3651_vm14 = vweird.f32 %v3634_v7 }
0x1963   :  { %v4354_v30 = vsel %vm245_vm0, %v4350_v2, 0.0 }
0x1964   :  { %4355 = vadd.xlane.f32.xlu0 %v4354_v30 }
0x1967   :  { %v6235_v58 = vpop.eup %6234 }
0x1968   :  { %v3646_v1 = vmul.f32 %v6235_v58, %v3634_v7  ;;  %vm3652_vm13 = vweird.f32 %v6235_v58 }
0x1969   :  { %vm3653_vm15 = vmor %vm3651_vm14, %vm3652_vm13 }
0x196a   :  { %v3647_v46 = vmul.f32 %v6235_v58, %v3646_v1 }
0x196c   :  { %v3648_v61 = vmul.f32 0.5, %v3647_v46 }
0x196e   :  { %v3649_v8 = vsub.f32 1.5, %v3648_v61 }
0x1970   :  { %v3650_v28 = vmul.f32 %v6235_v58, %v3649_v8 }
0x1972   :  { %v3654_v55 = vsel %vm3653_vm15, %v6235_v58, %v3650_v28 }
0x1973   :  { %v3656_v44 = vmul.f32 %v3654_v55, %v3622_v41 }
0x1975   :  { %v3661_v31 = vmul.f32 %v6031_v10, %v3656_v44 }
0x1977   :  { %v3666_v53 = vadd.f32 %v6032_v49, %v3661_v31 }
0x1979   :  { %v4426_v11 = vpack.c.bf16 %v3666_v53, %v3665_v52 }
0x197b   :  { %5745 = vmatmul.msk.bf16.vlgmr.msra.gmra.mxu1 %vm245_vm0, %v4426_v11 }
0x19cf   :  { %v4353_v29 = vpop.xlane.xlu2 %4352 }
0x19d0   :  { %v4357_v14 = vmul.f32 %v4353_v29, %v6750_v63 }
0x19d2   :  { %v4359_v48 = vadd.f32 1e-05, %v4357_v14 }
0x19d4   :  { %6236 = vrsqrt.f32 %v4359_v48  ;;  %vm4367_vm4 = vweird.f32 %v4359_v48 }
0x19d7   :  { %v4356_v23 = vpop.xlane.xlu0 %4355 }
0x19d8   :  { %v4358_v18 = vmul.f32 %v4356_v23, %v6750_v63 }
0x19da   :  { %v6237_v56 = vpop.eup %6236  ;;  %v4360_v19 = vadd.f32 1e-05, %v4358_v18 }
0x19db   :  { %v4362_v16 = vmul.f32 %v6237_v56, %v4359_v48  ;;  %vm4368_vm3 = vweird.f32 %v6237_v56 }
0x19dc   :  { %6238 = vrsqrt.f32 %v4360_v19  ;;  %vm4369_vm5 = vmor %vm4367_vm4, %vm4368_vm3  ;;  %vm4377_vm8 = vweird.f32 %v4360_v19 }
0x19dd   :  { %v4363_v32 = vmul.f32 %v6237_v56, %v4362_v16 }
0x19df   :  { %v4364_v47 = vmul.f32 0.5, %v4363_v32 }
0x19e1   :  { %v4365_v22 = vsub.f32 1.5, %v4364_v47 }
0x19e2   :  { %v6239_v24 = vpop.eup %6238 }
0x19e3   :  { %v4366_v41 = vmul.f32 %v6237_v56, %v4365_v22  ;;  %v4372_v0 = vmul.f32 %v6239_v24, %v4360_v19  ;;  %vm4378_vm7 = vweird.f32 %v6239_v24 }
0x19e4   :  { %vm4379_vm11 = vmor %vm4377_vm8, %vm4378_vm7 }
0x19e5   :  { %v4373_v33 = vmul.f32 %v6239_v24, %v4372_v0  ;;  %v4370_v34 = vsel %vm4369_vm5, %v6237_v56, %v4366_v41 }
0x19e6   :  { %v4381_v38 = vmul.f32 %v4370_v34, %v7663_v35 }
0x19e7   :  { %v4374_v36 = vmul.f32 0.5, %v4373_v33 }
0x19e8   :  { %v4386_v20 = vmul.f32 %v6034_v37, %v4381_v38 }
0x19e9   :  { %v4375_v12 = vsub.f32 1.5, %v4374_v36 }
0x19ea   :  { %v7688_v15 = vadd.f32 %v6035_v3, %v4386_v20 }
0x19eb   :  { %v4376_v50 = vmul.f32 %v6239_v24, %v4375_v12 }
0x19ed   :  { %v4380_v6 = vsel %vm4379_vm11, %v6239_v24, %v4376_v50 }
0x19ee   :  { %v4382_v42 = vmul.f32 %v4380_v6, %v7671_v60 }
0x19f0   :  { %v4387_v59 = vmul.f32 %v6034_v37, %v4382_v42 }
0x19f2   :  { %v7690_v45 = vadd.f32 %v6035_v3, %v4387_v59 }
0x19f4   :  { %v4393_v40 = vpack.c.bf16 %v7690_v45, %v7688_v15 }
0x19f6   :  { %5736 = vmatmul.msk.bf16.vlgmr.msra.gmra.mxu0 %vm245_vm0, %v4393_v40 }
0x19f8   :  { %v4454_v35 = vpop.f32.mrf.mxu1 }
0x19f9   :  { %v4455_v4 = vadd.f32 %v6036_v51, %v4454_v35 }
0x19fb   :  { %v4463_v43 = vpack.c.bf16 %v4455_v4, %v4455_v4 }
0x19fd   :  { %v4469_v62 = vsel %vm274_vm1, %v4463_v43, 0  ;;  %v4554_v9 = vunpack.c.l.b16 %v4463_v43 }
0x19fe   :  { %4478 = vmatpush.bf16.xpose.msra.mxu2 %v4469_v62 }
0x19ff   :  { %v7697_v13 = vpack.c.b16 %v4554_v9, %v4554_v9 }
0x1a00   :  { %v4456_v17 = vpop.f32.mrf.mxu1 }
0x1a01   :  { %v4457_v60 = vadd.f32 %v6036_v51, %v4456_v17  ;;  %4606 = vrot.lane.b32.xlu1 %v7697_v13, %s7977_s6 }
0x1a03   :  { %v4464_v7 = vpack.c.bf16 %v4457_v60, %v4457_v60 }
0x1a05   :  { %v4488_v27 = vsel %vm274_vm1, %v4464_v7, 0  ;;  %v4578_v2 = vunpack.c.l.b16 %v4464_v7 }
0x1a06   :  { %4497 = vmatpush.bf16.xpose.msrb.mxu3 %v4488_v27 }
0x1a07   :  { %v7702_v30 = vpack.c.b16 %v4578_v2, %v4578_v2 }
0x1a09   :  { %4632 = vrot.lane.b32.xlu2 %v7702_v30, %s7977_s6 }
0x1a11   :  { %4770 = vrot.lane.b32.xlu2 %v7702_v30, %s7978_s17 }
0x1a19   :  { %4885 = vrot.lane.b32.xlu2 %v7697_v13, %s7979_s27 }
0x1a63   :  { %v4633_v39 = vpop.permute.xlu2 %4632 }
0x1a64   :  { %v4638_v58 = vsel %vm274_vm1, %v4633_v39, 0 }
0x1a65   :  { %4647 = vmatpush.bf16.xpose.msra.mxu3 %v4638_v58 }
0x1a6b   :  { %v4771_v44 = vpop.permute.xlu2 %4770 }
0x1a6c   :  { %v4776_v52 = vsel %vm274_vm1, %v4771_v44, 0 }
0x1a73   :  { %v4421_v1 = vpop.f32.mrf.mxu0  ;;  %v4607_v25 = vpop.permute.xlu1 %4606 }
0x1a74   :  { %v4422_v46 = vadd.f32 %v6037_v5, %v4421_v1  ;;  %v4612_v61 = vsel %vm274_vm1, %v4607_v25, 0  ;;  %v4886_v14 = vpop.permute.xlu2 %4885 }
0x1a75   :  { %4621 = vmatpush.bf16.xpose.msrb.mxu2 %v4612_v61  ;;  %v4891_v23 = vsel %vm274_vm1, %v4886_v14, 0 }
0x1a76   :  { %v4459_v8 = vmul.f32 0.35355338, %v4422_v46 }
0x1a78   :  { %v4461_v10 = vpack.c.bf16 %v4459_v8, %v4459_v8 }
0x1a7a   :  { %v4602_v26 = vunpack.c.l.b16 %v4461_v10  ;;  %5746 = vmatmul.msk.bf16.vlgmr.msra.gmra.mxu2 %vm274_vm1, %v4461_v10 }
0x1a7b   :  { %v4423_v28 = vpop.f32.mrf.mxu0 }
0x1a7c   :  { %v4603_v55 = vpack.c.b16 %v4602_v26, %v4602_v26  ;;  %v4424_v49 = vadd.f32 %v6037_v5, %v4423_v28 }
0x1a7e   :  { %v4460_v54 = vmul.f32 0.35355338, %v4424_v49  ;;  %4604 = vrot.lane.b32.xlu0 %v4603_v55, %s7977_s6 }
0x1a80   :  { %v4462_v31 = vpack.c.bf16 %v4460_v54, %v4460_v54 }
0x1a82   :  { %v4628_v53 = vunpack.c.l.b16 %v4462_v31  ;;  %5747 = vmatmul.msk.bf16.vlgmr.msrb.gmra.mxu3 %vm274_vm1, %v4462_v31 }
0x1a83   :  { %4785 = vmatpush.bf16.xpose.msrb.mxu3 %v4776_v52 }
0x1a84   :  { %v4629_v11 = vpack.c.b16 %v4628_v53, %v4628_v53 }
0x1a86   :  { %4906 = vrot.lane.b32.xlu2 %v4629_v11, %s7979_s27  ;;  %4747 = vrot.lane.b32.xlu0 %v7697_v13, %s7978_s17 }
0x1a87   :  { %4630 = vrot.lane.b32.xlu1 %v4629_v11, %s7977_s6  ;;  %s8000_s6 = sld [smem:[#allocation17_spill]] }
0x1a8e   :  { %4768 = vrot.lane.b32.xlu0 %v4629_v11, %s7978_s17 }
0x1a8f   :  { %4745 = vrot.lane.b32.xlu1 %v4603_v55, %s7978_s17 }
0x1a96   :  { %4883 = vrot.lane.b32.xlu0 %v4603_v55, %s7979_s27 }
0x1a97   :  { %4908 = vrot.lane.b32.xlu1 %v7702_v30, %s7979_s27  ;;  %s8003_s27 = sld [smem:[#allocation20_spill]] }
0x1ae0   :  { %v4907_v34 = vpop.permute.xlu2 %4906 }
0x1af0   :  { %v4605_v29 = vpop.permute.xlu0 %4604 }
0x1af1   :  { %5750 = vmatmul.msk.bf16.vlgmr.msrb.gmra.mxu2 %vm274_vm1, %v4605_v29 }
0x1af8   :  { %v4748_v57 = vpop.permute.xlu0 %4747 }
0x1af9   :  { %v4753_v48 = vsel %vm274_vm1, %v4748_v57, 0  ;;  %v4631_v21 = vpop.permute.xlu1 %4630 }
0x1afa   :  { %5751 = vmatmul.msk.bf16.vlgmr.msra.gmra.mxu3 %vm274_vm1, %v4631_v21  ;;  %4762 = vmatpush.bf16.xpose.msra.mxu2 %v4753_v48 }
0x1afd   :  { %v4480_v18 = vpop.f32.mrf.mxu2 }
0x1afe   :  { %v4503_v56 = vsel %vm274_vm1, %v4480_v18, -inf }
0x1aff   :  { %4504 = vmax.xlane.f32.xlu1 %v4503_v56 }
0x1b00   :  { %v4769_v22 = vpop.permute.xlu0 %4768 }
0x1b01   :  { %v4746_v19 = vpop.permute.xlu1 %4745 }
0x1b02   :  { %4900 = vmatpush.bf16.xpose.msrb.mxu2 %v4891_v23 }
0x1b03   :  { %5754 = vmatmul.msk.bf16.vlgmr.msra.gmra.mxu2 %vm274_vm1, %v4746_v19 }
0x1b05   :  { %v4482_v16 = vpop.f32.mrf.mxu2  ;;  %v4499_v32 = vpop.f32.mrf.mxu3 }
0x1b06   :  { %v4506_v47 = vsel %vm274_vm1, %v4499_v32, -inf }
0x1b07   :  { %4507 = vmax.xlane.f32.xlu0 %v4506_v47 }
0x1b08   :  { %v4884_v33 = vpop.permute.xlu0 %4883 }
0x1b09   :  { %v4909_v24 = vpop.permute.xlu1 %4908 }
0x1b0a   :  { %v4914_v41 = vsel %vm274_vm1, %v4909_v24, 0  ;;  %5755 = vmatmul.msk.bf16.vlgmr.msrb.gmra.mxu3 %vm274_vm1, %v4769_v22 }
0x1b0b   :  { %4923 = vmatpush.bf16.xpose.msra.mxu3 %v4914_v41 }
0x1b0d   :  { %v4501_v0 = vpop.f32.mrf.mxu3 }
0x1b13   :  { %5758 = vmatmul.msk.bf16.vlgmr.msrb.gmra.mxu2 %vm274_vm1, %v4884_v33 }
0x1b1a   :  { %5759 = vmatmul.msk.bf16.vlgmr.msra.gmra.mxu3 %vm274_vm1, %v4907_v34 }
0x1b72   :  { %v4505_v36 = vpop.xlane.xlu1 %4504 }
0x1b73   :  { %v4509_v12 = vsub.f32 %v4480_v18, %v4505_v36 }
0x1b74   :  { %v4623_v37 = vpop.f32.mrf.mxu2 }
0x1b75   :  { %v4511_v38 = vmul.f32 1.442695, %v4509_v12  ;;  %v4653_v50 = vsel %vm274_vm1, %v4623_v37, -inf }
0x1b76   :  { %4654 = vmax.xlane.f32.xlu2 %v4653_v50 }
0x1b77   :  { %6240 = vpow2.f32 %v4511_v38 }
0x1b7a   :  { %v4508_v6 = vpop.xlane.xlu0 %4507 }
0x1b7b   :  { %v4510_v3 = vsub.f32 %v4499_v32, %v4508_v6 }
0x1b7c   :  { %v4625_v20 = vpop.f32.mrf.mxu2 }
0x1b7d   :  { %v7738_v42 = vpop.eup %6240  ;;  %v4513_v59 = vmul.f32 1.442695, %v4510_v3  ;;  %v4649_v40 = vpop.f32.mrf.mxu3 }
0x1b7e   :  { %v4656_v51 = vsel %vm274_vm1, %v4649_v40, -inf  ;;  %v4515_v35 = vsel %vm274_vm1, %v7738_v42, 0.0 }
0x1b7f   :  { %6242 = vpow2.f32 %v4513_v59  ;;  %4657 = vmax.xlane.f32.xlu1 %v4656_v51  ;;  %4516 = vadd.xlane.f32.xlu2 %v4515_v35 }
0x1b85   :  { %v7743_v4 = vpop.eup %6242  ;;  %v4651_v43 = vpop.f32.mrf.mxu3 }
0x1b86   :  { %v4764_v62 = vpop.f32.mrf.mxu2  ;;  %v4518_v17 = vsel %vm274_vm1, %v7743_v4, 0.0 }
0x1b87   :  { %v4791_v9 = vsel %vm274_vm1, %v4764_v62, -inf  ;;  %4519 = vadd.xlane.f32.xlu1 %v4518_v17 }
0x1b88   :  { %4792 = vmax.xlane.f32.xlu0 %v4791_v9 }
0x1b8d   :  { %v4787_v7 = vpop.f32.mrf.mxu3 }
0x1b8e   :  { %v4766_v60 = vpop.f32.mrf.mxu2  ;;  %v4794_v27 = vsel %vm274_vm1, %v4787_v7, -inf }
0x1b8f   :  { %4795 = vmax.xlane.f32.xlu2 %v4794_v27 }
0x1b95   :  { %v4789_v2 = vpop.f32.mrf.mxu3 }
0x1b96   :  { %v4902_v39 = vpop.f32.mrf.mxu2 }
0x1b97   :  { %v4929_v58 = vsel %vm274_vm1, %v4902_v39, -inf }
0x1b98   :  { %4930 = vmax.xlane.f32.xlu1 %v4929_v58 }
0x1b9c   :  { %4580 = vrot.lane.b32.xlu0 %v7702_v30, %s7976_s30 }
0x1b9d   :  { %v7752_v1 = vpop.f32.mrf.mxu3 }
0x1b9e   :  { %v4904_v5 = vpop.f32.mrf.mxu2  ;;  %v4932_v25 = vsel %vm274_vm1, %v7752_v1, -inf }
0x1ba5   :  { %v4927_v46 = vpop.f32.mrf.mxu3 }
0x1ba7   :  { %4703 = vrot.lane.b32.xlu2 %v7697_v13, %s7981_s1 }
0x1bb1   :  { %4556 = vrot.lane.b32.xlu1 %v7697_v13, %s7976_s30  ;;  %s7999_s30 = sld [smem:[#allocation19_spill]] }
0x1bc6   :  { %4933 = vmax.xlane.f32.xlu0 %v4932_v25 }
0x1be9   :  { %v4655_v61 = vpop.xlane.xlu2 %4654 }
0x1bea   :  { %v4659_v8 = vsub.f32 %v4623_v37, %v4655_v61 }
0x1bec   :  { %v4661_v10 = vmul.f32 1.442695, %v4659_v8 }
0x1bee   :  { %6244 = vpow2.f32 %v4661_v10 }
0x1bf2   :  { %v4658_v26 = vpop.xlane.xlu1 %4657  ;;  %v4517_v44 = vpop.xlane.xlu2 %4516 }
0x1bf3   :  { %v4660_v28 = vsub.f32 %v4649_v40, %v4658_v26  ;;  %v4532_v9 = vand.u32 2147483648, %v4517_v44  ;;  %vm4526_vm4 = vweird.f32 %v4517_v44  ;;  %v4530_v17 = vand.u32 2147483647, %v4517_v44 }
0x1bf4   :  { %v7760_v55 = vpop.eup %6244 }
0x1bf5   :  { %v4663_v49 = vmul.f32 1.442695, %v4660_v28  ;;  %v4665_v54 = vsel %vm274_vm1, %v7760_v55, 0.0  ;;  %vm4531_vm7 = vcmp.eq.f32.partialorder %v4530_v17, 8.507059e+37 }
0x1bf6   :  { %4666 = vadd.xlane.f32.xlu0 %v4665_v54 }
0x1bf7   :  { %6246 = vpow2.f32 %v4663_v49 }
0x1bfa   :  { %v4520_v52 = vpop.xlane.xlu1 %4519 }
0x1bfb   :  { %v4793_v31 = vpop.xlane.xlu0 %4792  ;;  %6248 = vrcp.f32 %v4520_v52  ;;  %v4547_v19 = vand.u32 2147483648, %v4520_v52  ;;  %v4545_v47 = vand.u32 2147483647, %v4520_v52  ;;  %vm4541_vm13 = vweird.f32 %v4520_v52 }
0x1bfc   :  { %v4797_v53 = vsub.f32 %v4764_v62, %v4793_v31 }
0x1bfd   :  { %v7764_v11 = vpop.eup %6246  ;;  %v4548_v0 = vor.u32 1.1754944e-38, %v4547_v19  ;;  %vm4546_vm15 = vcmp.eq.f32.partialorder %v4545_v47, 8.507059e+37 }
0x1bfe   :  { %v4799_v29 = vmul.f32 1.442695, %v4797_v53  ;;  %v4668_v14 = vsel %vm274_vm1, %v7764_v11, 0.0 }
0x1bff   :  { %4669 = vadd.xlane.f32.xlu2 %v4668_v14 }
0x1c00   :  { %6250 = vpow2.f32 %v4799_v29 }
0x1c01   :  { %v6249_v57 = vpop.eup %6248  ;;  %6252 = vrcp.f32 %v4517_v44 }
0x1c02   :  { %v4537_v48 = vmul.f32 %v6249_v57, %v4520_v52  ;;  %v4796_v21 = vpop.xlane.xlu2 %4795  ;;  %vm4542_vm12 = vweird.f32 %v6249_v57 }
0x1c03   :  { %v4798_v23 = vsub.f32 %v4787_v7, %v4796_v21  ;;  %vm4543_vm14 = vmor %vm4541_vm13, %vm4542_vm12  ;;  %v4533_v7 = vor.u32 1.1754944e-38, %v4532_v9 }
0x1c04   :  { %v4538_v18 = vsub.f32 1.0, %v4537_v48 }
0x1c05   :  { %v4801_v16 = vmul.f32 1.442695, %v4798_v23 }
0x1c06   :  { %v7768_v56 = vpop.eup %6250  ;;  %v4539_v32 = vmul.f32 %v6249_v57, %v4538_v18 }
0x1c07   :  { %v4803_v22 = vsel %vm274_vm1, %v7768_v56, 0.0  ;;  %6254 = vpow2.f32 %v4801_v16  ;;  %v6253_v24 = vpop.eup %6252 }
0x1c08   :  { %4804 = vadd.xlane.f32.xlu2 %v4803_v22  ;;  %v4540_v41 = vadd.f32 %v6249_v57, %v4539_v32  ;;  %v4522_v36 = vmul.f32 %v6253_v24, %v4517_v44  ;;  %vm4527_vm3 = vweird.f32 %v6253_v24 }
0x1c09   :  { %vm4528_vm5 = vmor %vm4526_vm4, %vm4527_vm3 }
0x1c0a   :  { %v4544_v33 = vsel %vm4543_vm14, %v6249_v57, %v4540_v41  ;;  %4724 = vrot.lane.b32.xlu0 %v7702_v30, %s7981_s1  ;;  %v4523_v51 = vsub.f32 1.0, %v4522_v36 }
0x1c0b   :  { %v4931_v34 = vpop.xlane.xlu1 %4930  ;;  %v4549_v12 = vsel %vm4546_vm15, %v4548_v0, %v4544_v33 }
0x1c0c   :  { %v4935_v37 = vsub.f32 %v4902_v39, %v4931_v34  ;;  %v4550_v38 = vmul.f32 %v7743_v4, %v4549_v12  ;;  %v4524_v35 = vmul.f32 %v6253_v24, %v4523_v51  ;;  %v4704_v39 = vpop.permute.xlu2 %4703 }
0x1c0d   :  { %v7775_v50 = vpop.eup %6254  ;;  %v4709_v46 = vsel %vm373_vm2, %v4704_v39, 0 }
0x1c0e   :  { %v4937_v6 = vmul.f32 1.442695, %v4935_v37  ;;  %v4581_v3 = vpop.permute.xlu0 %4580  ;;  %v4552_v20 = vpack.c.bf16 %v4550_v38, %v4550_v38  ;;  %v4806_v40 = vsel %vm274_vm1, %v7775_v50, 0.0  ;;  %v4525_v62 = vadd.f32 %v6253_v24, %v4524_v35 }
0x1c0f   :  { %v4586_v59 = vsel %vm373_vm2, %v4581_v3, 0 }
0x1c10   :  { %6256 = vpow2.f32 %v4937_v6  ;;  %4807 = vadd.xlane.f32.xlu2 %v4806_v40  ;;  %4595 = vmatpush.bf16.msrb.mxu1 %v4586_v59  ;;  %v4529_v60 = vsel %vm4528_vm5, %v6253_v24, %v4525_v62 }
0x1c11   :  { %v4534_v27 = vsel %vm4531_vm7, %v4533_v7, %v4529_v60 }
0x1c12   :  { %v4535_v2 = vmul.f32 %v7738_v42, %v4534_v27 }
0x1c13   :  { %5749 = vmatmul.msk.bf16.vlgmr.msrb.gmra.mxu1 %vm274_vm1, %v4552_v20 }
0x1c14   :  { %v4551_v25 = vpack.c.bf16 %v4535_v2, %v4535_v2 }
0x1c16   :  { %v7781_v43 = vpop.eup %6256 }
0x1c17   :  { %v4941_v4 = vsel %vm274_vm1, %v7781_v43, 0.0 }
0x1c18   :  { %4942 = vadd.xlane.f32.xlu1 %v4941_v4 }
0x1c23   :  { %v4557_v58 = vpop.permute.xlu1 %4556 }
0x1c24   :  { %v4562_v5 = vsel %vm373_vm2, %v4557_v58, 0 }
0x1c25   :  { %4571 = vmatpush.bf16.msrb.mxu0 %v4562_v5 }
0x1c28   :  { %4841 = vrot.lane.b32.xlu2 %v7697_v13, %s7969_s0  ;;  %5748 = vmatmul.msk.bf16.vlgmr.msrb.gmra.mxu0 %vm274_vm1, %v4551_v25 }
0x1c29   :  { %4718 = vmatpush.bf16.msra.mxu0 %v4709_v46 }
0x1c30   :  { %4862 = vrot.lane.b32.xlu2 %v7702_v30, %s7969_s0  ;;  %s8004_s0 = sld [smem:[#allocation24_spill]] }
0x1c31   :  { %5000 = vrot.lane.b32.xlu1 %v7702_v30, %s7970_s10 }
0x1c38   :  { %4979 = vrot.lane.b32.xlu2 %v7697_v13, %s7970_s10 }
0x1c39   :  { %v4934_v42 = vpop.xlane.xlu0 %4933 }
0x1c3a   :  { %v4936_v61 = vsub.f32 %v7752_v1, %v4934_v42 }
0x1c3c   :  { %v4939_v8 = vmul.f32 1.442695, %v4936_v61 }
0x1c3e   :  { %6258 = vpow2.f32 %v4939_v8 }
0x1c44   :  { %v7798_v10 = vpop.eup %6258 }
0x1c45   :  { %v4944_v26 = vsel %vm274_vm1, %v7798_v10, 0.0 }
0x1c46   :  { %4945 = vadd.xlane.f32.xlu0 %v4944_v26 }
0x1c69   :  { %v4667_v28 = vpop.xlane.xlu0 %4666 }
0x1c6a   :  { %6260 = vrcp.f32 %v4667_v28  ;;  %v4682_v31 = vand.u32 2147483648, %v4667_v28  ;;  %v4680_v52 = vand.u32 2147483647, %v4667_v28  ;;  %vm4676_vm11 = vweird.f32 %v4667_v28 }
0x1c6c   :  { %v4683_v53 = vor.u32 1.1754944e-38, %v4682_v31  ;;  %vm4681_vm13 = vcmp.eq.f32.partialorder %v4680_v52, 8.507059e+37 }
0x1c70   :  { %v6261_v49 = vpop.eup %6260 }
0x1c71   :  { %v4672_v54 = vmul.f32 %v6261_v49, %v4667_v28  ;;  %vm4677_vm8 = vweird.f32 %v6261_v49 }
0x1c72   :  { %v4670_v44 = vpop.xlane.xlu2 %4669  ;;  %vm4678_vm12 = vmor %vm4676_vm11, %vm4677_vm8 }
0x1c73   :  { %v4673_v30 = vsub.f32 1.0, %v4672_v54  ;;  %6262 = vrcp.f32 %v4670_v44  ;;  %v4697_v32 = vand.u32 2147483648, %v4670_v44  ;;  %v4695_v24 = vand.u32 2147483647, %v4670_v44 }
0x1c74   :  { %vm4691_vm15 = vweird.f32 %v4670_v44 }
0x1c75   :  { %v4674_v13 = vmul.f32 %v6261_v49, %v4673_v30  ;;  %v4698_v33 = vor.u32 1.1754944e-38, %v4697_v32  ;;  %vm4696_vm4 = vcmp.eq.f32.partialorder %v4695_v24, 8.507059e+37 }
0x1c77   :  { %v4675_v1 = vadd.f32 %v6261_v49, %v4674_v13 }
0x1c79   :  { %v6263_v29 = vpop.eup %6262  ;;  %v4679_v14 = vsel %vm4678_vm12, %v6261_v49, %v4675_v1 }
0x1c7a   :  { %v4684_v57 = vsel %vm4681_vm13, %v4683_v53, %v4679_v14  ;;  %v4687_v48 = vmul.f32 %v6263_v29, %v4670_v44  ;;  %vm4692_vm14 = vweird.f32 %v6263_v29 }
0x1c7b   :  { %v4805_v21 = vpop.xlane.xlu2 %4804  ;;  %v4685_v23 = vmul.f32 %v7760_v55, %v4684_v57  ;;  %vm4693_vm3 = vmor %vm4691_vm15, %vm4692_vm14 }
0x1c7c   :  { %6264 = vrcp.f32 %v4805_v21  ;;  %v4688_v18 = vsub.f32 1.0, %v4687_v48  ;;  %v4725_v19 = vpop.permute.xlu0 %4724  ;;  %v4820_v6 = vand.u32 2147483648, %v4805_v21  ;;  %v4818_v59 = vand.u32 2147483647, %v4805_v21 }
0x1c7d   :  { %v4701_v16 = vpack.c.bf16 %v4685_v23, %v4685_v23  ;;  %v4730_v47 = vsel %vm373_vm2, %v4725_v19, 0  ;;  %vm4814_vm7 = vweird.f32 %v4805_v21 }
0x1c7e   :  { %v4689_v22 = vmul.f32 %v6263_v29, %v4688_v18  ;;  %4739 = vmatpush.bf16.msra.mxu1 %v4730_v47  ;;  %v4821_v35 = vor.u32 1.1754944e-38, %v4820_v6  ;;  %vm4819_vm11 = vcmp.eq.f32.partialorder %v4818_v59, 8.507059e+37 }
0x1c7f   :  { %5752 = vmatmul.msk.bf16.vlgmr.msra.gmra.mxu0 %vm274_vm1, %v4701_v16 }
0x1c80   :  { %v4690_v41 = vadd.f32 %v6263_v29, %v4689_v22 }
0x1c82   :  { %v6265_v0 = vpop.eup %6264  ;;  %v4694_v34 = vsel %vm4693_vm3, %v6263_v29, %v4690_v41 }
0x1c83   :  { %v4810_v55 = vmul.f32 %v6265_v0, %v4805_v21  ;;  %v4808_v36 = vpop.xlane.xlu2 %4807  ;;  %v4699_v12 = vsel %vm4696_vm4, %v4698_v33, %v4694_v34  ;;  %vm4815_vm5 = vweird.f32 %v6265_v0 }
0x1c84   :  { %6266 = vrcp.f32 %v4808_v36  ;;  %v4700_v37 = vmul.f32 %v7764_v11, %v4699_v12  ;;  %vm4816_vm8 = vmor %vm4814_vm7, %vm4815_vm5  ;;  %v4835_v2 = vand.u32 2147483648, %v4808_v36  ;;  %v4833_v5 = vand.u32 2147483647, %v4808_v36 }
0x1c85   :  { %v4811_v38 = vsub.f32 1.0, %v4810_v55  ;;  %vm4829_vm13 = vweird.f32 %v4808_v36 }
0x1c86   :  { %v4702_v3 = vpack.c.bf16 %v4700_v37, %v4700_v37  ;;  %v4836_v61 = vor.u32 1.1754944e-38, %v4835_v2  ;;  %vm4834_vm15 = vcmp.eq.f32.partialorder %v4833_v5, 8.507059e+37  ;;  %v5850_v2 = vld [vmem:[%s7997_s19 + $0x10] sm:$0xff] }
0x1c87   :  { %v4812_v20 = vmul.f32 %v6265_v0, %v4811_v38 }
0x1c88   :  { %5753 = vmatmul.msk.bf16.vlgmr.msra.gmra.mxu1 %vm274_vm1, %v4702_v3 }
0x1c89   :  { %v4813_v40 = vadd.f32 %v6265_v0, %v4812_v20 }
0x1c8a   :  { %v6267_v51 = vpop.eup %6266 }
0x1c8b   :  { %v4817_v4 = vsel %vm4816_vm8, %v6265_v0, %v4813_v40  ;;  %v4825_v62 = vmul.f32 %v6267_v51, %v4808_v36  ;;  %v4842_v9 = vpop.permute.xlu2 %4841  ;;  %v4943_v17 = vpop.xlane.xlu1 %4942  ;;  %vm4830_vm12 = vweird.f32 %v6267_v51 }
0x1c8c   :  { %v4822_v60 = vsel %vm4819_vm11, %v4821_v35, %v4817_v4  ;;  %v4847_v11 = vsel %vm373_vm2, %v4842_v9, 0  ;;  %6268 = vrcp.f32 %v4943_v17  ;;  %vm4831_vm14 = vmor %vm4829_vm13, %vm4830_vm12  ;;  %v4958_v30 = vand.u32 2147483648, %v4943_v17 }
0x1c8d   :  { %v4823_v7 = vmul.f32 %v7768_v56, %v4822_v60  ;;  %v4826_v27 = vsub.f32 1.0, %v4825_v62  ;;  %4856 = vmatpush.bf16.msrb.mxu0 %v4847_v11  ;;  %v4956_v52 = vand.u32 2147483647, %v4943_v17  ;;  %vm4952_vm4 = vweird.f32 %v4943_v17 }
0x1c8e   :  { %v4959_v29 = vor.u32 1.1754944e-38, %v4958_v30 }
0x1c8f   :  { %v4839_v39 = vpack.c.bf16 %v4823_v7, %v4823_v7  ;;  %v4827_v58 = vmul.f32 %v6267_v51, %v4826_v27  ;;  %vm4957_vm7 = vcmp.eq.f32.partialorder %v4956_v52, 8.507059e+37  ;;  %v5851_v27 = vld [vmem:[%s7997_s19 + $0x18] sm:$0xff]  ;;  %v6038_v52 = vld [vmem:[%s7998_s24 + $0x1] ss:$0 sm:$0xff] }
0x1c90   :  { %v7809_v46 = vpop.f32.mrf.mxu1  ;;  %5076 = vmatpush.bf16.msra.mxu2 %v5851_v27 }
0x1c91   :  { %v4828_v25 = vadd.f32 %v6267_v51, %v4827_v58  ;;  %5756 = vmatmul.msk.bf16.vlgmr.msrb.gmra.mxu0 %vm274_vm1, %v4839_v39 }
0x1c92   :  { %v6269_v42 = vpop.eup %6268 }
0x1c93   :  { %v4832_v8 = vsel %vm4831_vm14, %v6267_v51, %v4828_v25  ;;  %v4948_v26 = vmul.f32 %v6269_v42, %v4943_v17  ;;  %v4863_v56 = vpop.permute.xlu2 %4862  ;;  %vm4953_vm3 = vweird.f32 %v6269_v42 }
0x1c94   :  { %v4837_v28 = vsel %vm4834_vm15, %v4836_v61, %v4832_v8  ;;  %v4868_v49 = vsel %vm373_vm2, %v4863_v56, 0  ;;  %vm4954_vm5 = vmor %vm4952_vm4, %vm4953_vm3  ;;  %5077 = vmatpush.bf16.msra.mxu2 %v5850_v2 }
0x1c95   :  { %v4838_v54 = vmul.f32 %v7775_v50, %v4837_v28  ;;  %v4949_v44 = vsub.f32 1.0, %v4948_v26  ;;  %4877 = vmatpush.bf16.msrb.mxu1 %v4868_v49 }
0x1c97   :  { %v4840_v31 = vpack.c.bf16 %v4838_v54, %v4838_v54  ;;  %v4950_v13 = vmul.f32 %v6269_v42, %v4949_v44 }
0x1c98   :  { %v4599_v1 = vpop.f32.mrf.mxu1 }
0x1c99   :  { %v4951_v53 = vadd.f32 %v6269_v42, %v4950_v13  ;;  %5757 = vmatmul.msk.bf16.vlgmr.msrb.gmra.mxu1 %vm274_vm1, %v4840_v31 }
0x1c9b   :  { %v4955_v14 = vsel %vm4954_vm5, %v6269_v42, %v4951_v53  ;;  %v4980_v57 = vpop.permute.xlu2 %4979 }
0x1c9c   :  { %v4960_v48 = vsel %vm4957_vm7, %v4959_v29, %v4955_v14  ;;  %v4985_v50 = vsel %vm373_vm2, %v4980_v57, 0 }
0x1c9d   :  { %v4961_v21 = vmul.f32 %v7781_v43, %v4960_v48  ;;  %4994 = vmatpush.bf16.msra.mxu0 %v4985_v50 }
0x1c9f   :  { %v4977_v23 = vpack.c.bf16 %v4961_v21, %v4961_v21 }
0x1ca1   :  { %5760 = vmatmul.msk.bf16.vlgmr.msra.gmra.mxu0 %vm274_vm1, %v4977_v23 }
0x1ca3   :  { %v5001_v18 = vpop.permute.xlu1 %5000 }
0x1ca4   :  { %v5006_v19 = vsel %vm373_vm2, %v5001_v18, 0 }
0x1ca5   :  { %v4573_v16 = vpop.f32.mrf.mxu0  ;;  %5015 = vmatpush.bf16.msra.mxu1 %v5006_v19 }
0x1cad   :  { %v4575_v32 = vpop.f32.mrf.mxu0 }
0x1cb9   :  { %v4946_v47 = vpop.xlane.xlu0 %4945 }
0x1cba   :  { %6270 = vrcp.f32 %v4946_v47  ;;  %v4973_v0 = vand.u32 2147483648, %v4946_v47  ;;  %v4971_v34 = vand.u32 2147483647, %v4946_v47  ;;  %vm4967_vm11 = vweird.f32 %v4946_v47 }
0x1cbc   :  { %v4974_v55 = vor.u32 1.1754944e-38, %v4973_v0  ;;  %vm4972_vm13 = vcmp.eq.f32.partialorder %v4971_v34, 8.507059e+37  ;;  %v5852_v34 = vld [vmem:[%s7999_s30 + $0x10] sm:$0xff] }
0x1cc0   :  { %v6271_v22 = vpop.eup %6270 }
0x1cc1   :  { %v4963_v24 = vmul.f32 %v6271_v22, %v4946_v47  ;;  %vm4968_vm8 = vweird.f32 %v6271_v22 }
0x1cc2   :  { %vm4969_vm12 = vmor %vm4967_vm11, %vm4968_vm8 }
0x1cc3   :  { %v4964_v41 = vsub.f32 1.0, %v4963_v24 }
0x1cc5   :  { %v4965_v33 = vmul.f32 %v6271_v22, %v4964_v41  ;;  %v5853_v41 = vld [vmem:[%s7999_s30 + $0x18] sm:$0xff] }
0x1cc6   :  { %5165 = vmatpush.bf16.msrb.mxu3 %v5853_v41 }
0x1cc7   :  { %v4966_v43 = vadd.f32 %v6271_v22, %v4965_v33 }
0x1cc9   :  { %v4970_v36 = vsel %vm4969_vm12, %v6271_v22, %v4966_v43 }
0x1cca   :  { %v4975_v12 = vsel %vm4972_vm13, %v4974_v55, %v4970_v36  ;;  %5166 = vmatpush.bf16.msrb.mxu3 %v5852_v34 }
0x1ccb   :  { %v4976_v37 = vmul.f32 %v7798_v10, %v4975_v12 }
0x1ccd   :  { %v4978_v38 = vpack.c.bf16 %v4976_v37, %v4976_v37 }
0x1ccf   :  { %5761 = vmatmul.msk.bf16.vlgmr.msra.gmra.mxu1 %vm274_vm1, %v4978_v38 }
0x1cfc   :  { %v4720_v6 = vpop.f32.mrf.mxu0 }
0x1d04   :  { %v4722_v3 = vpop.f32.mrf.mxu0 }
0x1d05   :  { %v4741_v20 = vpop.f32.mrf.mxu1 }
0x1d06   :  { %v5988_v59 = vpack.i.bf16 %v4741_v20, %v4720_v6 }
0x1d08   :  { %5989 = vrot.lane.b32.xlu2 %v5988_v59, %s7972_s2 }
0x1d0d   :  { %v4743_v40 = vpop.f32.mrf.mxu1 }
0x1d0e   :  { %v4858_v51 = vpop.f32.mrf.mxu0 }
0x1d16   :  { %v4860_v35 = vpop.f32.mrf.mxu0  ;;  %v4879_v4 = vpop.f32.mrf.mxu1 }
0x1d17   :  { %v5993_v62 = vpack.i.bf16 %v4879_v4, %v4858_v51 }
0x1d19   :  { %5994 = vrot.lane.b32.xlu0 %v5993_v62, %s7973_s28  ;;  %s6365_s28 = smov [#allocation2]  }
0x1d1a   :  { %s5348_s1 = sshll.u32 %s6365_s28, 4  ;;  %s5349_s1 = int_to_ptr.vmem [resolvable:$true] %s5348_s1 }
0x1d1e   :  { %v4881_v9 = vpop.f32.mrf.mxu1  ;;  %v4996_v10 = vpop.f32.mrf.mxu0 }
0x1d1f   :  { %v6039_v9 = vld [vmem:[%s8000_s6 + $0x1] ss:$0 sm:$0xff] }
0x1d26   :  { %v4998_v17 = vpop.f32.mrf.mxu0 }
0x1d4c   :  { %v5017_v60 = vpop.f32.mrf.mxu1 }
0x1d4d   :  { %v5998_v11 = vpack.i.bf16 %v5017_v60, %v4996_v10 }
0x1d4f   :  { %5999 = vrot.lane.b32.xlu2 %v5998_v11, %s7974_s5  ;;  %v6040_v11 = vld [vmem:[%s8001_s12 + $0x1] ss:$0 sm:$0xff]  ;;  %s8005_s5 = sld [smem:[#allocation25_spill]] }
0x1d54   :  { %v5019_v7 = vpop.f32.mrf.mxu1 }
0x1d62   :  { %v5990_v39 = vpop.permute.xlu2 %5989 }
0x1d63   :  { %v5992_v5 = vunpack.i.h.bf16 %v5990_v39  ;;  %v5991_v25 = vunpack.i.l.bf16 %v5990_v39 }
0x1d65   :  { %v5046_v26 = vsel %vm274_vm1, %v7809_v46, %v5992_v5  ;;  %v5045_v56 = vsel %vm274_vm1, %v4573_v16, %v5991_v25  ;;  %v5857_v25 = vld [vmem:[%s8002_s20 + $0x38] sm:$0xff] }
0x1d66   :  { %5210 = vmatpush.bf16.msrb.mxu0 %v5857_v25 }
0x1d8b   :  { %v5995_v58 = vpop.permute.xlu0 %5994 }
0x1d8c   :  { %v5997_v42 = vunpack.i.h.bf16 %v5995_v58  ;;  %v5996_v61 = vunpack.i.l.bf16 %v5995_v58 }
0x1d8e   :  { %v5048_v54 = vsel %vm857_vm9, %v5046_v26, %v5997_v42  ;;  %v5047_v44 = vsel %vm857_vm9, %v5045_v56, %v5996_v61  ;;  %v5856_v42 = vld [vmem:[%s8002_s20 + $0x30] sm:$0xff]  ;;  %v5855_v61 = vld [vmem:[%s8002_s20 + $0x28] sm:$0xff]  ;;  %v6041_v56 = vld [vmem:[%s8003_s27 + $0x1] ss:$0 sm:$0xff] }
0x1d8f   :  { %5211 = vmatpush.bf16.msrb.mxu0 %v5856_v42 }
0x1d93   :  { %5212 = vmatpush.bf16.msrb.mxu0 %v5855_v61 }
0x1da9   :  { %v6000_v8 = vpop.permute.xlu2 %5999 }
0x1daa   :  { %v6002_v28 = vunpack.i.h.bf16 %v6000_v8  ;;  %v6001_v49 = vunpack.i.l.bf16 %v6000_v8  ;;  %v5854_v8 = vld [vmem:[%s8002_s20 + $0x20] sm:$0xff] }
0x1dab   :  { %5213 = vmatpush.bf16.msrb.mxu0 %v5854_v8 }
0x1dac   :  { %v5050_v30 = vsel %vm860_vm10, %v5048_v54, %v6002_v28  ;;  %v5049_v31 = vsel %vm860_vm10, %v5047_v44, %v6001_v49 }
0x1dad   :  { %v5051_v13 = vpack.c.bf16 %v5050_v30, %v5049_v31 }
0x1daf   :  { %5770 = vmatmul.msk.bf16.vlgmr.msra.gmra.mxu2 %vm245_vm0, %v5051_v13  ;;  %v6042_v13 = vld [vmem:[%s7990_s26 + $0x1] ss:$0 sm:$0xff] }
0x1e32   :  { %v5079_v1 = vpop.f32.mrf.mxu2 }
0x1e33   :  { %v5080_v53 = vadd.f32 %v6038_v52, %v5079_v1 }
0x1e35   :  { %v5084_v46 = vadd.f32 %v5080_v53, %v7688_v15 }
0x1e37   :  { %v5086_v29 = vsel %vm245_vm0, %v5084_v46, 0.0 }
0x1e38   :  { %5087 = vadd.xlane.f32.xlu2 %v5086_v29 }
0x1e3a   :  { %v5081_v14 = vpop.f32.mrf.mxu2 }
0x1e3b   :  { %v5082_v57 = vadd.f32 %v6038_v52, %v5081_v14 }
0x1e3d   :  { %v5085_v48 = vadd.f32 %v5082_v57, %v7690_v45 }
0x1e3f   :  { %v5089_v50 = vsel %vm245_vm0, %v5085_v48, 0.0 }
0x1e40   :  { %5090 = vadd.xlane.f32.xlu0 %v5089_v50 }
0x1eab   :  { %v5088_v21 = vpop.xlane.xlu2 %5087 }
0x1eac   :  { %v5092_v23 = vmul.f32 %v5088_v21, %v6750_v63 }
0x1eae   :  { %v5094_v18 = vsub.f32 %v5084_v46, %v5092_v23 }
0x1eb0   :  { %v5096_v19 = vmul.f32 %v5094_v18, %v5094_v18 }
0x1eb2   :  { %v5098_v16 = vsel %vm245_vm0, %v5096_v19, 0.0 }
0x1eb3   :  { %v5091_v15 = vpop.xlane.xlu0 %5090  ;;  %5099 = vadd.xlane.f32.xlu1 %v5098_v16 }
0x1eb4   :  { %v5093_v32 = vmul.f32 %v5091_v15, %v6750_v63 }
0x1eb6   :  { %v5095_v47 = vsub.f32 %v5085_v48, %v5093_v32 }
0x1eb8   :  { %v5097_v22 = vmul.f32 %v5095_v47, %v5095_v47 }
0x1eba   :  { %v5101_v45 = vsel %vm245_vm0, %v5097_v22, 0.0 }
0x1ebb   :  { %5102 = vadd.xlane.f32.xlu2 %v5101_v45 }
0x1f26   :  { %v5100_v24 = vpop.xlane.xlu1 %5099 }
0x1f27   :  { %v5104_v0 = vmul.f32 %v5100_v24, %v6750_v63  ;;  %v5859_v24 = vld [vmem:[%s8004_s0 + $0x8] sm:$0xff] }
0x1f28   :  { %5306 = vmatpush.bf16.msrb.mxu1 %v5859_v24 }
0x1f29   :  { %v5106_v33 = vadd.f32 1e-05, %v5104_v0 }
0x1f2b   :  { %6272 = vrsqrt.f32 %v5106_v33  ;;  %vm5114_vm2 = vweird.f32 %v5106_v33 }
0x1f2e   :  { %v5103_v43 = vpop.xlane.xlu2 %5102 }
0x1f2f   :  { %v5105_v55 = vmul.f32 %v5103_v43, %v6750_v63 }
0x1f31   :  { %v6273_v36 = vpop.eup %6272  ;;  %v5107_v12 = vadd.f32 1e-05, %v5105_v55 }
0x1f32   :  { %v5109_v37 = vmul.f32 %v6273_v36, %v5106_v33  ;;  %vm5115_vm1 = vweird.f32 %v6273_v36  ;;  %v5858_v33 = vld [vmem:[%s8004_s0] sm:$0xff] }
0x1f33   :  { %6274 = vrsqrt.f32 %v5107_v12  ;;  %vm5116_vm10 = vmor %vm5114_vm2, %vm5115_vm1  ;;  %vm5124_vm15 = vweird.f32 %v5107_v12  ;;  %5307 = vmatpush.bf16.msrb.mxu1 %v5858_v33 }
0x1f34   :  { %v5110_v38 = vmul.f32 %v6273_v36, %v5109_v37 }
0x1f36   :  { %v5111_v6 = vmul.f32 0.5, %v5110_v38 }
0x1f38   :  { %v5112_v3 = vsub.f32 1.5, %v5111_v6 }
0x1f39   :  { %v6275_v20 = vpop.eup %6274 }
0x1f3a   :  { %v5113_v59 = vmul.f32 %v6273_v36, %v5112_v3  ;;  %v5119_v40 = vmul.f32 %v6275_v20, %v5107_v12  ;;  %vm5125_vm14 = vweird.f32 %v6275_v20 }
0x1f3b   :  { %vm5126_vm3 = vmor %vm5124_vm15, %vm5125_vm14 }
0x1f3c   :  { %v5120_v51 = vmul.f32 %v6275_v20, %v5119_v40  ;;  %v5117_v35 = vsel %vm5116_vm10, %v6273_v36, %v5113_v59 }
0x1f3d   :  { %v5128_v10 = vmul.f32 %v5117_v35, %v5094_v18 }
0x1f3e   :  { %v5121_v4 = vmul.f32 0.5, %v5120_v51 }
0x1f3f   :  { %v5133_v7 = vmul.f32 %v6039_v9, %v5128_v10 }
0x1f40   :  { %v5122_v62 = vsub.f32 1.5, %v5121_v4 }
0x1f41   :  { %v5138_v39 = vadd.f32 %v6040_v11, %v5133_v7 }
0x1f42   :  { %v5123_v17 = vmul.f32 %v6275_v20, %v5122_v62 }
0x1f44   :  { %v5127_v60 = vsel %vm5126_vm3, %v6275_v20, %v5123_v17  ;;  %v6044_v17 = vld [vmem:[%s6540_s4 + $0x1] ss:$0 sm:$0xff]  ;;  %s8006_s4 = sld [smem:[#allocation26_spill]] }
0x1f45   :  { %v5129_v27 = vmul.f32 %v5127_v60, %v5095_v47 }
0x1f47   :  { %v5134_v2 = vmul.f32 %v6039_v9, %v5129_v27 }
0x1f49   :  { %v5139_v58 = vadd.f32 %v6040_v11, %v5134_v2 }
0x1f4a   :  { %s5350_s7 = sshll.u32 %s8006_s4, 4  ;;  %s6304_s15 = scalar_lea.hbm %s8006_s4, 16  ;;  %s5351_s7 = int_to_ptr.hbm [resolvable:$true] %s5350_s7 }
0x1f4b   :  { %v5140_v5 = vpack.c.bf16 %v5139_v58, %v5138_v39  ;;  %s6300_s10 = sshra.s32 %s5351_s7, 4  ;;  %s6301_s10 = int_to_ptr.hbm [resolvable:$true] %s6300_s10 }
0x1f4c   :  { %s6302_s11 = scalar_lea.hbm %s6301_s10, 16  ;;  %p6305_p1 = scmp.lt.s32.totalorder %s6301_s10, %s8006_s4 }
0x1f4d   :  { %5779 = vmatmul.msk.bf16.vlgmr.msrb.gmra.mxu3 %vm245_vm0, %v5140_v5  ;;  %v6045_v5 = vld [vmem:[%s8005_s5] ss:$0 sm:$0xff]  ;;  %p6303_p0 = scmp.ne.s32.totalorder %s6301_s10, %s6302_s11  ;;  %p6306_p2 = scmp.lt.s32.totalorder %s6304_s15, %s6302_s11 }
0x1f4f   :  { %p6307_p3 = por %p6306_p2, %p6305_p1 }
0x1f51   :  { %p6308_p4 = pnand %p6307_p3, %p6303_p0 }
0x1fd0   :  { %v5168_v26 = vpop.f32.mrf.mxu3 }
0x1fd1   :  { %v5169_v28 = vadd.f32 %v6041_v56, %v5168_v26 }
0x1fd3   :  { %v5173_v44 = vmax.f32 %v5169_v28, 0.0 }
0x1fd8   :  { %v5170_v49 = vpop.f32.mrf.mxu3 }
0x1fd9   :  { %v5171_v54 = vadd.f32 %v6041_v56, %v5170_v49 }
0x1fdb   :  { %v5174_v30 = vmax.f32 %v5171_v54, 0.0 }
0x1fdd   :  { %v5175_v31 = vpack.c.bf16 %v5174_v30, %v5173_v44 }
0x1fdf   :  { %5796 = vmatmul.msk.bf16.vlgmr.msrb.gmra.mxu0 %vm1022_vm6, %v5175_v31 }
0x205c   :  { %v5215_v52 = vpop.f32.mrf.mxu0 }
0x205d   :  { %v5216_v1 = vadd.f32 %v6042_v13, %v5215_v52 }
0x205f   :  { %v5220_v53 = vadd.f32 %v5216_v1, %v5138_v39 }
0x2061   :  { %v5222_v46 = vsel %vm245_vm0, %v5220_v53, 0.0 }
0x2062   :  { %5223 = vadd.xlane.f32.xlu2 %v5222_v46 }
0x2064   :  { %v5217_v29 = vpop.f32.mrf.mxu0 }
0x2065   :  { %v5218_v14 = vadd.f32 %v6042_v13, %v5217_v29 }
0x2067   :  { %v5221_v57 = vadd.f32 %v5218_v14, %v5139_v58 }
0x2069   :  { %v5225_v48 = vsel %vm245_vm0, %v5221_v57, 0.0 }
0x206a   :  { %5226 = vadd.xlane.f32.xlu0 %v5225_v48 }
0x20d5   :  { %v5224_v50 = vpop.xlane.xlu2 %5223 }
0x20d6   :  { %v5228_v21 = vmul.f32 %v5224_v50, %v6750_v63 }
0x20d8   :  { %v5230_v23 = vsub.f32 %v5220_v53, %v5228_v21 }
0x20da   :  { %v5232_v18 = vmul.f32 %v5230_v23, %v5230_v23 }
0x20dc   :  { %v5234_v19 = vsel %vm245_vm0, %v5232_v18, 0.0 }
0x20dd   :  { %v5227_v16 = vpop.xlane.xlu0 %5226  ;;  %5235 = vadd.xlane.f32.xlu1 %v5234_v19 }
0x20de   :  { %v5229_v15 = vmul.f32 %v5227_v16, %v6750_v63 }
0x20e0   :  { %v5231_v32 = vsub.f32 %v5221_v57, %v5229_v15 }
0x20e2   :  { %v5233_v47 = vmul.f32 %v5231_v32, %v5231_v32 }
0x20e4   :  { %v5237_v22 = vsel %vm245_vm0, %v5233_v47, 0.0 }
0x20e5   :  { %5238 = vadd.xlane.f32.xlu2 %v5237_v22 }
0x2150   :  { %v5236_v45 = vpop.xlane.xlu1 %5235 }
0x2151   :  { %v5240_v41 = vmul.f32 %v5236_v45, %v6750_v63 }
0x2153   :  { %v5242_v0 = vadd.f32 1e-05, %v5240_v41 }
0x2155   :  { %6276 = vrsqrt.f32 %v5242_v0  ;;  %vm5250_vm4 = vweird.f32 %v5242_v0 }
0x2158   :  { %v5239_v34 = vpop.xlane.xlu2 %5238 }
0x2159   :  { %v5241_v43 = vmul.f32 %v5239_v34, %v6750_v63  ;;  %v6043_v63 = vld [vmem:[%s7991_s21 + $0x1] ss:$0 sm:$0xff] }
0x215b   :  { %v6277_v55 = vpop.eup %6276  ;;  %v5243_v36 = vadd.f32 1e-05, %v5241_v43 }
0x215c   :  { %v5245_v12 = vmul.f32 %v6277_v55, %v5242_v0  ;;  %vm5251_vm6 = vweird.f32 %v6277_v55 }
0x215d   :  { %6278 = vrsqrt.f32 %v5243_v36  ;;  %vm5252_vm5 = vmor %vm5250_vm4, %vm5251_vm6  ;;  %vm5260_vm8 = vweird.f32 %v5243_v36 }
0x215e   :  { %v5246_v37 = vmul.f32 %v6277_v55, %v5245_v12 }
0x2160   :  { %v5247_v38 = vmul.f32 0.5, %v5246_v37 }
0x2162   :  { %v5248_v6 = vsub.f32 1.5, %v5247_v38 }
0x2163   :  { %v6279_v3 = vpop.eup %6278 }
0x2164   :  { %v5249_v20 = vmul.f32 %v6277_v55, %v5248_v6  ;;  %v5255_v59 = vmul.f32 %v6279_v3, %v5243_v36  ;;  %vm5261_vm7 = vweird.f32 %v6279_v3 }
0x2165   :  { %vm5262_vm11 = vmor %vm5260_vm8, %vm5261_vm7 }
0x2166   :  { %v5256_v40 = vmul.f32 %v6279_v3, %v5255_v59  ;;  %v5253_v51 = vsel %vm5252_vm5, %v6277_v55, %v5249_v20 }
0x2167   :  { %v5264_v62 = vmul.f32 %v5253_v51, %v5230_v23 }
0x2168   :  { %v5257_v35 = vmul.f32 0.5, %v5256_v40 }
0x2169   :  { %v5269_v60 = vmul.f32 %v6043_v63, %v5264_v62 }
0x216a   :  { %v5258_v4 = vsub.f32 1.5, %v5257_v35 }
0x216b   :  { %v5274_v27 = vadd.f32 %v6044_v17, %v5269_v60 }
0x216c   :  { %v5259_v9 = vmul.f32 %v6279_v3, %v5258_v4 }
0x216e   :  { %v5263_v10 = vsel %vm5262_vm11, %v6279_v3, %v5259_v9 }
0x216f   :  { %v5265_v11 = vmul.f32 %v5263_v10, %v5231_v32 }
0x2171   :  { %v5270_v7 = vmul.f32 %v6043_v63, %v5265_v11 }
0x2173   :  { %v5275_v2 = vadd.f32 %v6044_v17, %v5270_v7 }
0x2175   :  { %v5281_v39 = vpack.c.bf16 %v5275_v2, %v5274_v27 }
0x2177   :  { %5805 = vmatmul.msk.bf16.vlgmr.msrb.gmra.mxu1 %vm245_vm0, %v5281_v39 }
0x21f4   :  { %v5309_v58 = vpop.f32.mrf.mxu1 }
0x21f5   :  { %v5310_v25 = vadd.f32 %v6045_v5, %v5309_v58 }
0x21f7   :  { %v5314_v8 = vsel %vm857_vm9, %v5310_v25, -inf }
0x21fc   :  { %v5311_v42 = vpop.f32.mrf.mxu1 }
0x21fd   :  { %v5312_v61 = vadd.f32 %v6045_v5, %v5311_v42 }
0x21ff   :  { %v5315_v26 = vsel %vm857_vm9, %v5312_v61, -inf }
0x2200   :  { %v5316_v56 = vmax.f32 %v5314_v8, %v5315_v26 }
0x2202   :  { %v5317_v28 = vsub.f32 %v5310_v25, %v5316_v56  ;;  %v5318_v49 = vsub.f32 %v5312_v61, %v5316_v56 }
0x2204   :  { %v5319_v54 = vmul.f32 1.442695, %v5317_v28  ;;  %v5321_v44 = vmul.f32 1.442695, %v5318_v49 }
0x2206   :  { %6280 = vpow2.f32 %v5319_v54 }
0x2207   :  { %6282 = vpow2.f32 %v5321_v44 }
0x220c   :  { %v6281_v30 = vpop.eup %6280 }
0x220d   :  { %v6283_v31 = vpop.eup %6282  ;;  %v5323_v13 = vsel %vm857_vm9, %v6281_v30, 0.0 }
0x220e   :  { %v5324_v52 = vsel %vm857_vm9, %v6283_v31, 0.0 }
0x220f   :  { %v5325_v1 = vadd.f32 %v5324_v52, %v5323_v13 }
0x2211   :  { %6284 = vrcp.f32 %v5325_v1  ;;  %v5337_v14 = vand.u32 2147483648, %v5325_v1  ;;  %v5335_v48 = vand.u32 2147483647, %v5325_v1  ;;  %vm5331_vm12 = vweird.f32 %v5325_v1 }
0x2213   :  { %v5338_v21 = vor.u32 1.1754944e-38, %v5337_v14  ;;  %vm5336_vm1 = vcmp.eq.f32.partialorder %v5335_v48, 8.507059e+37 }
0x2217   :  { %v6285_v53 = vpop.eup %6284 }
0x2218   :  { %v5327_v46 = vmul.f32 %v6285_v53, %v5325_v1  ;;  %vm5332_vm0 = vweird.f32 %v6285_v53 }
0x2219   :  { %vm5333_vm13 = vmor %vm5331_vm12, %vm5332_vm0 }
0x221a   :  { %v5328_v29 = vsub.f32 1.0, %v5327_v46 }
0x221c   :  { %v5329_v57 = vmul.f32 %v6285_v53, %v5328_v29 }
0x221e   :  { %v5330_v50 = vadd.f32 %v6285_v53, %v5329_v57 }
0x2220   :  { %v5334_v23 = vsel %vm5333_vm13, %v6285_v53, %v5330_v50 }
0x2221   :  { %v5339_v18 = vsel %vm5336_vm1, %v5338_v21, %v5334_v23 }
0x2222   :  { %v5340_v19 = vmul.f32 %v6281_v30, %v5339_v18  ;;  %v5341_v16 = vmul.f32 %v6283_v31, %v5339_v18 }
0x2224   :  { %5342 = vst.msk [vmem:[#allocation2] sm:$0xff] %vm857_vm9, %v5340_v19 }
0x2225   :  { %5343 = vst.msk [vmem:[#allocation2 + $0x8] sm:$0xff] %vm857_vm9, %v5341_v16 }
0x2226   :  { %6311 = shalt.err (!%p6308_p4)
}
0x2227   :  { %s6366_s16 = smov 128  }
0x2228   :  { %5356 = dma.vmem_to_hbm [thread:$0]  %s5349_s1, 256, %s5351_s7, [#allocation3], %s6366_s16, %s6366_s16, %s7972_s2  }
0x2229   :  { %6312 = dma.done.wait [#allocation3], 256  }
0x222a   :  { %6313 = vsyncadd [#allocation3], 4294967040 }
0x222b   :  { %5361 = vsyncpa [#allocation3], 1 }

</bundles_post_ra>
